<compile_context>
chip_gen: v5e
topology: v5e:2x2
jax: 0.10.0
libtpu: 0.0.40
codegen_flags: <defaults>
</compile_context>

<pallas_src>
import functools

import jax
import jax.numpy as jnp
from jax import lax
from jax.experimental import pallas as pl
from jax.experimental.pallas import tpu as pltpu

LANE = 128


def _round_up(x, m):
    return ((x + m - 1) // m) * m


# ----------------------------------------------------------------------------
# Kernel 1: batched input projection  G = X @ W_ih^T + b  (one big matmul,
# hoisted off the serial recurrence path).
# ----------------------------------------------------------------------------
def _proj_kernel(x_ref, w_ref, b_ref, out_ref):
    out_ref[...] = (
        jnp.dot(x_ref[...], w_ref[...], preferred_element_type=jnp.float32)
        + b_ref[...])


def proj_pallas(x2d, w_t, b):
    """x2d: (M, E) bf16, w_t: (E, 4Hp) bf16, b: (1, 4Hp) f32 -> (M, 4Hp) f32."""
    M = x2d.shape[0]
    G4 = w_t.shape[1]
    return pl.pallas_call(
        _proj_kernel,
        out_shape=jax.ShapeDtypeStruct((M, G4), jnp.float32),
    )(x2d, w_t, b)


# ----------------------------------------------------------------------------
# Kernel 2: LSTM recurrence.  Single grid step; the time loop lives inside the
# kernel.  Each gate occupies a full 128-lane tile (Hp is a multiple of 128).
# ----------------------------------------------------------------------------
def _lstm_rec_kernel(gx_ref, whh_ref, h0_ref, c0_ref, out_ref, hN_ref, cN_ref):
    T = gx_ref.shape[0]
    Hp = h0_ref.shape[-1]

    def step(t, carry):
        h_prev, c_prev = carry                              # f32 (B, Hp)
        rec = jnp.dot(h_prev.astype(jnp.bfloat16), whh_ref[...],
                      preferred_element_type=jnp.float32)   # (B, 4Hp)
        gates = gx_ref[t] + rec                             # f32, lane-aligned
        i_g = jax.nn.sigmoid(gates[:, 0 * Hp:1 * Hp])
        f_g = jax.nn.sigmoid(gates[:, 1 * Hp:2 * Hp])
        g_g = jnp.tanh(gates[:, 2 * Hp:3 * Hp])
        o_g = jax.nn.sigmoid(gates[:, 3 * Hp:4 * Hp])
        c_new = f_g * c_prev + i_g * g_g
        h_new = o_g * jnp.tanh(c_new)
        out_ref[t] = h_new                                  # lane-dense store
        return (h_new, c_new)

    h_T, c_T = lax.fori_loop(0, T, step, (h0_ref[...], c0_ref[...]),
                             unroll=True)
    hN_ref[...] = h_T                                       # written once
    cN_ref[...] = c_T


def lstm_rec_pallas(gx_tbg, w_hh_t, h0, c0):
    """gx_tbg: (T, B, 4Hp) f32 (already x@W_ih^T + b), w_hh_t: (Hp, 4Hp) bf16,
    h0/c0: (B, Hp) f32.  Returns (out (T,B,Hp) f32, h_T, c_T)."""
    T, B, _ = gx_tbg.shape
    Hp = h0.shape[-1]
    return pl.pallas_call(
        _lstm_rec_kernel,
        out_shape=(jax.ShapeDtypeStruct((T, B, Hp), jnp.float32),
                   jax.ShapeDtypeStruct((B, Hp), jnp.float32),
                   jax.ShapeDtypeStruct((B, Hp), jnp.float32)),
    )(gx_tbg, w_hh_t, h0, c0)


# ----------------------------------------------------------------------------
# Kernel 3: classifier + per-row NLL (CrossEntropy), tiled over N rows.
# ----------------------------------------------------------------------------
def _ce_kernel(x_ref, w_ref, b_ref, y_ref, nll_ref, *, n_valid, tile_n):
    i = pl.program_id(0)
    logits = (jnp.dot(x_ref[...], w_ref[...], preferred_element_type=jnp.float32)
              + b_ref[...])                                  # (TN, V)
    TN, V = logits.shape
    m = jnp.max(logits, axis=-1, keepdims=True)
    lse = jnp.log(jnp.sum(jnp.exp(logits - m), axis=-1, keepdims=True)) + m
    col = lax.broadcasted_iota(jnp.int32, (TN, V), 1)
    picked = jnp.sum(jnp.where(col == y_ref[...], logits, 0.0),
                     axis=-1, keepdims=True)                 # (TN, 1)
    row = lax.broadcasted_iota(jnp.int32, (TN, 1), 0) + i * tile_n
    nll_ref[...] = jnp.where(row < n_valid, lse - picked, 0.0)


def ce_pallas(x_flat, w_cls_t, b_cls, y_flat, *, tile_n=128):
    """x_flat: (N, Hp) f32, w_cls_t: (Hp, V) f32, b_cls: (1, V) f32,
    y_flat: (N, 1) i32.  Returns per-row NLL (N_pad, 1); padded rows are 0."""
    N, Hp = x_flat.shape
    V = w_cls_t.shape[1]
    tn = min(tile_n, _round_up(N, 8))
    n_pad = _round_up(N, tn)
    if n_pad != N:
        x_flat = jnp.pad(x_flat, ((0, n_pad - N), (0, 0)))
        y_flat = jnp.pad(y_flat, ((0, n_pad - N), (0, 0)))
    num_tiles = n_pad // tn
    # TODO(synk): for very large vocab V the logits tile should also be split
    # along V with an online logsumexp accumulator to fit v7x's 64 MiB VMEM.
    kern = functools.partial(_ce_kernel, n_valid=N, tile_n=tn)
    return pl.pallas_call(
        kern,
        out_shape=jax.ShapeDtypeStruct((n_pad, 1), jnp.float32),
        grid_spec=pltpu.PrefetchScalarGridSpec(
            num_scalar_prefetch=0,
            grid=(num_tiles,),
            in_specs=[
                pl.BlockSpec((tn, Hp), lambda i: (i, 0)),
                pl.BlockSpec((Hp, V), lambda i: (0, 0)),
                pl.BlockSpec((1, V), lambda i: (0, 0)),
                pl.BlockSpec((tn, 1), lambda i: (i, 0)),
            ],
            out_specs=pl.BlockSpec((tn, 1), lambda i: (i, 0)),
        ),
        compiler_params=pltpu.CompilerParams(
            dimension_semantics=("parallel",)),
    )(x_flat, w_cls_t, b_cls, y_flat)


# ----------------------------------------------------------------------------
# Parameter preparation: pad each gate block (and the hidden axis) to the
# 128-lane tile and cast LSTM MXU weight operands to bf16.  Padding with zeros
# is exact: padded gate pre-activations are 0 -> g=tanh(0)=0 -> padded c,h
# stay 0 and never perturb the valid lanes.
# ----------------------------------------------------------------------------
def _pad_gate_cols(w, H, Hp):
    parts = []
    for k in range(4):
        blk = w[..., k * H:(k + 1) * H]
        pad = [(0, 0)] * (w.ndim - 1) + [(0, Hp - H)]
        parts.append(jnp.pad(blk, pad))
    return jnp.concatenate(parts, axis=-1)


def prepare_params(raw):
    H = raw["enc_whh_t"].shape[0]
    Hp = _round_up(H, LANE)
    p = {
        "enc_emb": raw["enc_emb"],
        "dec_emb": raw["dec_emb"],
        "enc_wih_t": _pad_gate_cols(raw["enc_wih_t"], H, Hp).astype(jnp.bfloat16),
        "dec_wih_t": _pad_gate_cols(raw["dec_wih_t"], H, Hp).astype(jnp.bfloat16),
        "enc_whh_t": jnp.pad(_pad_gate_cols(raw["enc_whh_t"], H, Hp),
                             ((0, Hp - H), (0, 0))).astype(jnp.bfloat16),
        "dec_whh_t": jnp.pad(_pad_gate_cols(raw["dec_whh_t"], H, Hp),
                             ((0, Hp - H), (0, 0))).astype(jnp.bfloat16),
        "enc_b": _pad_gate_cols(raw["enc_b"], H, Hp),
        "dec_b": _pad_gate_cols(raw["dec_b"], H, Hp),
        "cls_w_t": jnp.pad(raw["cls_w_t"], ((0, Hp - H), (0, 0))),
        "cls_b": raw["cls_b"],
    }
    return p


# ----------------------------------------------------------------------------
# Seq2Seq forward (embedding lookups / reshapes / transposes are XLA glue).
# ----------------------------------------------------------------------------
@jax.jit
def seq2seq_forward(params, en_index, ch_index):
    decoder_input = ch_index[:, :-1]
    label = ch_index[:, 1:]
    B = en_index.shape[0]
    Hp = params["enc_whh_t"].shape[0]
    G4 = params["enc_whh_t"].shape[1]

    # --- encoder ---
    # TODO(synk): embedding gather stays in XLA (tiny table, no clean Pallas win).
    en_emb = jnp.take(params["enc_emb"], en_index, axis=0)          # (B, Te, E)
    Te, E = en_emb.shape[1], en_emb.shape[2]
    gx = proj_pallas(en_emb.reshape(B * Te, E).astype(jnp.bfloat16),
                     params["enc_wih_t"], params["enc_b"])           # (B*Te, 4Hp)
    gx = jnp.transpose(gx.reshape(B, Te, G4), (1, 0, 2))             # (Te, B, 4Hp)
    h0 = jnp.zeros((B, Hp), jnp.float32)
    c0 = jnp.zeros((B, Hp), jnp.float32)
    _, h_enc, c_enc = lstm_rec_pallas(gx, params["enc_whh_t"], h0, c0)

    # --- decoder ---
    de_emb = jnp.take(params["dec_emb"], decoder_input, axis=0)      # (B, Td, E)
    Td, Ed = de_emb.shape[1], de_emb.shape[2]
    gx_d = proj_pallas(de_emb.reshape(B * Td, Ed).astype(jnp.bfloat16),
                       params["dec_wih_t"], params["dec_b"])
    gx_d = jnp.transpose(gx_d.reshape(B, Td, G4), (1, 0, 2))         # (Td, B, 4Hp)
    dec_out_tbh, _, _ = lstm_rec_pallas(gx_d, params["dec_whh_t"], h_enc, c_enc)

    # --- classifier + cross-entropy ---
    dec_out = jnp.transpose(dec_out_tbh, (1, 0, 2))                  # (B, Td, Hp)
    N = B * Td
    x_flat = dec_out.reshape(N, Hp)
    y_flat = label.reshape(N, 1).astype(jnp.int32)
    nll = ce_pallas(x_flat, params["cls_w_t"], params["cls_b"], y_flat)
    return jnp.sum(nll) / jnp.float32(N)


# ----------------------------------------------------------------------------
# Pure-JAX reference (f32, unpadded params) for a sanity check.
# ----------------------------------------------------------------------------
def _ref_lstm(x_bte, wih_t, whh_t, b, h0, c0):
    H = h0.shape[-1]

    def step(carry, x_t):
        h, c = carry
        g = x_t @ wih_t + h @ whh_t + b[0]
        i = jax.nn.sigmoid(g[:, :H]); f = jax.nn.sigmoid(g[:, H:2 * H])
        gg = jnp.tanh(g[:, 2 * H:3 * H]); o = jax.nn.sigmoid(g[:, 3 * H:])
        c = f * c + i * gg
        h = o * jnp.tanh(c)
        return (h, c), h

    (hT, cT), outs = jax.lax.scan(step, (h0, c0), jnp.transpose(x_bte, (1, 0, 2)))
    return jnp.transpose(outs, (1, 0, 2)), hT, cT


def _ref_forward(params, en_index, ch_index):
    dec_in = ch_index[:, :-1]
    label = ch_index[:, 1:]
    B = en_index.shape[0]
    H = params["enc_whh_t"].shape[0]
    en_emb = jnp.take(params["enc_emb"], en_index, axis=0)
    _, h, c = _ref_lstm(en_emb, params["enc_wih_t"], params["enc_whh_t"],
                        params["enc_b"], jnp.zeros((B, H)), jnp.zeros((B, H)))
    de_emb = jnp.take(params["dec_emb"], dec_in, axis=0)
    dec_out, _, _ = _ref_lstm(de_emb, params["dec_wih_t"], params["dec_whh_t"],
                              params["dec_b"], h, c)
    logits = dec_out.reshape(-1, H) @ params["cls_w_t"] + params["cls_b"][0]
    logp = jax.nn.log_softmax(logits, axis=-1)
    nll = -jnp.take_along_axis(logp, label.reshape(-1, 1), axis=-1)
    return jnp.mean(nll)


# ----------------------------------------------------------------------------
def init_params(key, enc_emb_n, enc_hid, en_vocab, dec_emb_n, dec_hid, ch_vocab):
    ks = jax.random.split(key, 12)
    s = 0.1
    return {
        "enc_emb":   s * jax.random.normal(ks[0], (en_vocab, enc_emb_n), jnp.float32),
        "enc_wih_t": s * jax.random.normal(ks[1], (enc_emb_n, 4 * enc_hid), jnp.float32),
        "enc_whh_t": s * jax.random.normal(ks[2], (enc_hid, 4 * enc_hid), jnp.float32),
        "enc_b":     s * jax.random.normal(ks[3], (1, 4 * enc_hid), jnp.float32),
        "dec_emb":   s * jax.random.normal(ks[4], (ch_vocab, dec_emb_n), jnp.float32),
        "dec_wih_t": s * jax.random.normal(ks[5], (dec_emb_n, 4 * dec_hid), jnp.float32),
        "dec_whh_t": s * jax.random.normal(ks[6], (dec_hid, 4 * dec_hid), jnp.float32),
        "dec_b":     s * jax.random.normal(ks[7], (1, 4 * dec_hid), jnp.float32),
        "cls_w_t":   s * jax.random.normal(ks[8], (dec_hid, ch_vocab), jnp.float32),
        "cls_b":     s * jax.random.normal(ks[9], (1, ch_vocab), jnp.float32),
    }


if __name__ == "__main__":
    # Small shapes consistent with the module
    B = 2
    T_EN, T_CH = 8, 8
    ENC_EMB = DEC_EMB = 32
    ENC_HID = DEC_HID = 32          # must match: encoder hidden seeds decoder
    EN_VOCAB, CH_VOCAB = 50, 40

    key = jax.random.PRNGKey(0)
    kp, ke, kc = jax.random.split(key, 3)
    raw_params = init_params(kp, ENC_EMB, ENC_HID, EN_VOCAB,
                             DEC_EMB, DEC_HID, CH_VOCAB)
    params = prepare_params(raw_params)

    en_index = jax.random.randint(ke, (B, T_EN), 0, EN_VOCAB, dtype=jnp.int32)
    ch_index = jax.random.randint(kc, (B, T_CH), 0, CH_VOCAB, dtype=jnp.int32)

    loss = seq2seq_forward(params, en_index, ch_index)
    jax.block_until_ready(loss)

    ref = _ref_forward(raw_params, en_index, ch_index)
    assert jnp.isfinite(loss), "loss is not finite"
    assert jnp.allclose(loss, ref, rtol=5e-2, atol=5e-2), (loss, ref)

    print("KERNEL_OK")
</pallas_src>

<mosaic_0001>
module attributes {stable_mosaic.version = 11 : i64} {
  func.func @_proj_kernel(%arg0: memref<14x32xbf16, #tpu.memory_space<vmem>>, %arg1: memref<32x512xbf16, #tpu.memory_space<vmem>>, %arg2: memref<1x512xf32, #tpu.memory_space<vmem>>, %arg3: memref<14x512xf32, #tpu.memory_space<vmem>>) attributes {dimension_semantics = [], scalar_prefetch = 0 : i64, scratch_operands = 0 : i64, tpu.core_type = #tpu.core_type<tc>} {
    %c0 = arith.constant 0 : index
    %c0_0 = arith.constant 0 : index
    %0 = vector.load %arg0[%c0, %c0_0] : memref<14x32xbf16, #tpu.memory_space<vmem>>, vector<14x32xbf16>
    %c0_1 = arith.constant 0 : index
    %c0_2 = arith.constant 0 : index
    %1 = vector.load %arg1[%c0_1, %c0_2] : memref<32x512xbf16, #tpu.memory_space<vmem>>, vector<32x512xbf16>
    %cst = arith.constant dense<0.000000e+00> : vector<14x512xf32>
    %2 = tpu.matmul %0, %1, %cst {dimension_numbers = #tpu.dot_dimension_numbers<[1], [0], [0], [1], [0, 0, 1, 1], [], []>} : vector<14x32xbf16>, vector<32x512xbf16>, vector<14x512xf32> -> vector<14x512xf32>
    %c0_3 = arith.constant 0 : index
    %c0_4 = arith.constant 0 : index
    %3 = vector.load %arg2[%c0_3, %c0_4] : memref<1x512xf32, #tpu.memory_space<vmem>>, vector<1x512xf32>
    %4 = vector.broadcast %3 : vector<1x512xf32> to vector<14x512xf32>
    %5 = arith.addf %2, %4 : vector<14x512xf32>
    %c0_5 = arith.constant 0 : index
    %c0_6 = arith.constant 0 : index
    %6 = vector.load %arg3[%c0_5, %c0_6] : memref<14x512xf32, #tpu.memory_space<vmem>>, vector<14x512xf32>
    tpu.vector_store %arg3[%c0_5, %c0_6], %5 {strides = array<i32>} : memref<14x512xf32, #tpu.memory_space<vmem>>, vector<14x512xf32>,
    return
  }
}

module attributes {stable_mosaic.version = 11 : i64} {
  func.func @_proj_kernel(%arg0: memref<16x32xbf16, #tpu.memory_space<vmem>>, %arg1: memref<32x512xbf16, #tpu.memory_space<vmem>>, %arg2: memref<1x512xf32, #tpu.memory_space<vmem>>, %arg3: memref<16x512xf32, #tpu.memory_space<vmem>>) attributes {dimension_semantics = [], scalar_prefetch = 0 : i64, scratch_operands = 0 : i64, tpu.core_type = #tpu.core_type<tc>} {
    %c0 = arith.constant 0 : index
    %c0_0 = arith.constant 0 : index
    %0 = vector.load %arg0[%c0, %c0_0] : memref<16x32xbf16, #tpu.memory_space<vmem>>, vector<16x32xbf16>
    %c0_1 = arith.constant 0 : index
    %c0_2 = arith.constant 0 : index
    %1 = vector.load %arg1[%c0_1, %c0_2] : memref<32x512xbf16, #tpu.memory_space<vmem>>, vector<32x512xbf16>
    %cst = arith.constant dense<0.000000e+00> : vector<16x512xf32>
    %2 = tpu.matmul %0, %1, %cst {dimension_numbers = #tpu.dot_dimension_numbers<[1], [0], [0], [1], [0, 0, 1, 1], [], []>} : vector<16x32xbf16>, vector<32x512xbf16>, vector<16x512xf32> -> vector<16x512xf32>
    %c0_3 = arith.constant 0 : index
    %c0_4 = arith.constant 0 : index
    %3 = vector.load %arg2[%c0_3, %c0_4] : memref<1x512xf32, #tpu.memory_space<vmem>>, vector<1x512xf32>
    %4 = vector.broadcast %3 : vector<1x512xf32> to vector<16x512xf32>
    %5 = arith.addf %2, %4 : vector<16x512xf32>
    %c0_5 = arith.constant 0 : index
    %c0_6 = arith.constant 0 : index
    %6 = vector.load %arg3[%c0_5, %c0_6] : memref<16x512xf32, #tpu.memory_space<vmem>>, vector<16x512xf32>
    tpu.vector_store %arg3[%c0_5, %c0_6], %5 {strides = array<i32>} : memref<16x512xf32, #tpu.memory_space<vmem>>, vector<16x512xf32>,
    return
  }
}

module attributes {stable_mosaic.version = 11 : i64} {
  func.func @_lstm_rec_kernel(%arg0: memref<8x2x512xf32, #tpu.memory_space<vmem>>, %arg1: memref<128x512xbf16, #tpu.memory_space<vmem>>, %arg2: memref<2x128xf32, #tpu.memory_space<vmem>>, %arg3: memref<2x128xf32, #tpu.memory_space<vmem>>, %arg4: memref<8x2x128xf32, #tpu.memory_space<vmem>>, %arg5: memref<2x128xf32, #tpu.memory_space<vmem>>, %arg6: memref<2x128xf32, #tpu.memory_space<vmem>>) attributes {dimension_semantics = [], scalar_prefetch = 0 : i64, scratch_operands = 0 : i64, tpu.core_type = #tpu.core_type<tc>} {
    %c0 = arith.constant 0 : index
    %c0_0 = arith.constant 0 : index
    %0 = vector.load %arg2[%c0, %c0_0] : memref<2x128xf32, #tpu.memory_space<vmem>>, vector<2x128xf32>
    %c0_1 = arith.constant 0 : index
    %c0_2 = arith.constant 0 : index
    %1 = vector.load %arg3[%c0_1, %c0_2] : memref<2x128xf32, #tpu.memory_space<vmem>>, vector<2x128xf32>
    %c0_i32 = arith.constant 0 : i32
    %2 = arith.truncf %0 : vector<2x128xf32> to vector<2x128xbf16>
    %c0_3 = arith.constant 0 : index
    %c0_4 = arith.constant 0 : index
    %3 = vector.load %arg1[%c0_3, %c0_4] : memref<128x512xbf16, #tpu.memory_space<vmem>>, vector<128x512xbf16>
    %cst = arith.constant dense<0.000000e+00> : vector<2x512xf32>
    %4 = tpu.matmul %2, %3, %cst {dimension_numbers = #tpu.dot_dimension_numbers<[1], [0], [0], [1], [0, 0, 1, 1], [], []>} : vector<2x128xbf16>, vector<128x512xbf16>, vector<2x512xf32> -> vector<2x512xf32>
    %5 = arith.index_cast %c0_i32 : i32 to index
    %c0_5 = arith.constant 0 : index
    %c0_6 = arith.constant 0 : index
    %6 = vector.load %arg0[%5, %c0_5, %c0_6] : memref<8x2x512xf32, #tpu.memory_space<vmem>>, vector<1x2x512xf32>
    %7 = vector.shape_cast %6 : vector<1x2x512xf32> to vector<2x512xf32>
    %8 = arith.addf %7, %4 : vector<2x512xf32>
    %9 = vector.extract_strided_slice %8 {offsets = [0, 0], sizes = [2, 128], strides = [1, 1]} : vector<2x512xf32> to vector<2x128xf32>
    %10 = arith.negf %9 : vector<2x128xf32>
    %11 = math.exp %10 : vector<2x128xf32>
    %cst_7 = arith.constant 1.000000e+00 : f32
    %12 = vector.broadcast %cst_7 : f32 to vector<2x128xf32>
    %13 = arith.addf %12, %11 : vector<2x128xf32>
    %14 = arith.divf %12, %13 : vector<2x128xf32>
    %15 = vector.extract_strided_slice %8 {offsets = [0, 128], sizes = [2, 128], strides = [1, 1]} : vector<2x512xf32> to vector<2x128xf32>
    %16 = arith.negf %15 : vector<2x128xf32>
    %17 = math.exp %16 : vector<2x128xf32>
    %cst_8 = arith.constant 1.000000e+00 : f32
    %18 = vector.broadcast %cst_8 : f32 to vector<2x128xf32>
    %19 = arith.addf %18, %17 : vector<2x128xf32>
    %20 = arith.divf %18, %19 : vector<2x128xf32>
    %21 = vector.extract_strided_slice %8 {offsets = [0, 256], sizes = [2, 128], strides = [1, 1]} : vector<2x512xf32> to vector<2x128xf32>
    %22 = math.tanh %21 : vector<2x128xf32>
    %23 = vector.extract_strided_slice %8 {offsets = [0, 384], sizes = [2, 128], strides = [1, 1]} : vector<2x512xf32> to vector<2x128xf32>
    %24 = arith.negf %23 : vector<2x128xf32>
    %25 = math.exp %24 : vector<2x128xf32>
    %cst_9 = arith.constant 1.000000e+00 : f32
    %26 = vector.broadcast %cst_9 : f32 to vector<2x128xf32>
    %27 = arith.addf %26, %25 : vector<2x128xf32>
    %28 = arith.divf %26, %27 : vector<2x128xf32>
    %29 = arith.mulf %20, %1 : vector<2x128xf32>
    %30 = arith.mulf %14, %22 : vector<2x128xf32>
    %31 = arith.addf %29, %30 : vector<2x128xf32>
    %32 = math.tanh %31 : vector<2x128xf32>
    %33 = arith.mulf %28, %32 : vector<2x128xf32>
    %34 = arith.index_cast %c0_i32 : i32 to index
    %c0_10 = arith.constant 0 : index
    %c0_11 = arith.constant 0 : index
    %35 = vector.load %arg4[%34, %c0_10, %c0_11] : memref<8x2x128xf32, #tpu.memory_space<vmem>>, vector<1x2x128xf32>
    %36 = vector.shape_cast %35 : vector<1x2x128xf32> to vector<2x128xf32>
    %37 = vector.shape_cast %33 : vector<2x128xf32> to vector<1x2x128xf32>
    tpu.vector_store %arg4[%34, %c0_10, %c0_11], %37 {strides = array<i32>} : memref<8x2x128xf32, #tpu.memory_space<vmem>>, vector<1x2x128xf32>,
    %c1_i32 = arith.constant 1 : i32
    %38 = arith.truncf %33 : vector<2x128xf32> to vector<2x128xbf16>
    %c0_12 = arith.constant 0 : index
    %c0_13 = arith.constant 0 : index
    %39 = vector.load %arg1[%c0_12, %c0_13] : memref<128x512xbf16, #tpu.memory_space<vmem>>, vector<128x512xbf16>
    %cst_14 = arith.constant dense<0.000000e+00> : vector<2x512xf32>
    %40 = tpu.matmul %38, %39, %cst_14 {dimension_numbers = #tpu.dot_dimension_numbers<[1], [0], [0], [1], [0, 0, 1, 1], [], []>} : vector<2x128xbf16>, vector<128x512xbf16>, vector<2x512xf32> -> vector<2x512xf32>
    %41 = arith.index_cast %c1_i32 : i32 to index
    %c0_15 = arith.constant 0 : index
    %c0_16 = arith.constant 0 : index
    %42 = vector.load %arg0[%41, %c0_15, %c0_16] : memref<8x2x512xf32, #tpu.memory_space<vmem>>, vector<1x2x512xf32>
    %43 = vector.shape_cast %42 : vector<1x2x512xf32> to vector<2x512xf32>
    %44 = arith.addf %43, %40 : vector<2x512xf32>
    %45 = vector.extract_strided_slice %44 {offsets = [0, 0], sizes = [2, 128], strides = [1, 1]} : vector<2x512xf32> to vector<2x128xf32>
    %46 = arith.negf %45 : vector<2x128xf32>
    %47 = math.exp %46 : vector<2x128xf32>
    %cst_17 = arith.constant 1.000000e+00 : f32
    %48 = vector.broadcast %cst_17 : f32 to vector<2x128xf32>
    %49 = arith.addf %48, %47 : vector<2x128xf32>
    %50 = arith.divf %48, %49 : vector<2x128xf32>
    %51 = vector.extract_strided_slice %44 {offsets = [0, 128], sizes = [2, 128], strides = [1, 1]} : vector<2x512xf32> to vector<2x128xf32>
    %52 = arith.negf %51 : vector<2x128xf32>
    %53 = math.exp %52 : vector<2x128xf32>
    %cst_18 = arith.constant 1.000000e+00 : f32
    %54 = vector.broadcast %cst_18 : f32 to vector<2x128xf32>
    %55 = arith.addf %54, %53 : vector<2x128xf32>
    %56 = arith.divf %54, %55 : vector<2x128xf32>
    %57 = vector.extract_strided_slice %44 {offsets = [0, 256], sizes = [2, 128], strides = [1, 1]} : vector<2x512xf32> to vector<2x128xf32>
    %58 = math.tanh %57 : vector<2x128xf32>
    %59 = vector.extract_strided_slice %44 {offsets = [0, 384], sizes = [2, 128], strides = [1, 1]} : vector<2x512xf32> to vector<2x128xf32>
    %60 = arith.negf %59 : vector<2x128xf32>
    %61 = math.exp %60 : vector<2x128xf32>
    %cst_19 = arith.constant 1.000000e+00 : f32
    %62 = vector.broadcast %cst_19 : f32 to vector<2x128xf32>
    %63 = arith.addf %62, %61 : vector<2x128xf32>
    %64 = arith.divf %62, %63 : vector<2x128xf32>
    %65 = arith.mulf %56, %31 : vector<2x128xf32>
    %66 = arith.mulf %50, %58 : vector<2x128xf32>
    %67 = arith.addf %65, %66 : vector<2x128xf32>
    %68 = math.tanh %67 : vector<2x128xf32>
    %69 = arith.mulf %64, %68 : vector<2x128xf32>
    %70 = arith.index_cast %c1_i32 : i32 to index
    %c0_20 = arith.constant 0 : index
    %c0_21 = arith.constant 0 : index
    %71 = vector.load %arg4[%70, %c0_20, %c0_21] : memref<8x2x128xf32, #tpu.memory_space<vmem>>, vector<1x2x128xf32>
    %72 = vector.shape_cast %71 : vector<1x2x128xf32> to vector<2x128xf32>
    %73 = vector.shape_cast %69 : vector<2x128xf32> to vector<1x2x128xf32>
    tpu.vector_store %arg4[%70, %c0_20, %c0_21], %73 {strides = array<i32>} : memref<8x2x128xf32, #tpu.memory_space<vmem>>, vector<1x2x128xf32>,
    %c2_i32 = arith.constant 2 : i32
    %74 = arith.truncf %69 : vector<2x128xf32> to vector<2x128xbf16>
    %c0_22 = arith.constant 0 : index
    %c0_23 = arith.constant 0 : index
    %75 = vector.load %arg1[%c0_22, %c0_23] : memref<128x512xbf16, #tpu.memory_space<vmem>>, vector<128x512xbf16>
    %cst_24 = arith.constant dense<0.000000e+00> : vector<2x512xf32>
    %76 = tpu.matmul %74, %75, %cst_24 {dimension_numbers = #tpu.dot_dimension_numbers<[1], [0], [0], [1], [0, 0, 1, 1], [], []>} : vector<2x128xbf16>, vector<128x512xbf16>, vector<2x512xf32> -> vector<2x512xf32>
    %77 = arith.index_cast %c2_i32 : i32 to index
    %c0_25 = arith.constant 0 : index
    %c0_26 = arith.constant 0 : index
    %78 = vector.load %arg0[%77, %c0_25, %c0_26] : memref<8x2x512xf32, #tpu.memory_space<vmem>>, vector<1x2x512xf32>
    %79 = vector.shape_cast %78 : vector<1x2x512xf32> to vector<2x512xf32>
    %80 = arith.addf %79, %76 : vector<2x512xf32>
    %81 = vector.extract_strided_slice %80 {offsets = [0, 0], sizes = [2, 128], strides = [1, 1]} : vector<2x512xf32> to vector<2x128xf32>
    %82 = arith.negf %81 : vector<2x128xf32>
    %83 = math.exp %82 : vector<2x128xf32>
    %cst_27 = arith.constant 1.000000e+00 : f32
    %84 = vector.broadcast %cst_27 : f32 to vector<2x128xf32>
    %85 = arith.addf %84, %83 : vector<2x128xf32>
    %86 = arith.divf %84, %85 : vector<2x128xf32>
    %87 = vector.extract_strided_slice %80 {offsets = [0, 128], sizes = [2, 128], strides = [1, 1]} : vector<2x512xf32> to vector<2x128xf32>
    %88 = arith.negf %87 : vector<2x128xf32>
    %89 = math.exp %88 : vector<2x128xf32>
    %cst_28 = arith.constant 1.000000e+00 : f32
    %90 = vector.broadcast %cst_28 : f32 to vector<2x128xf32>
    %91 = arith.addf %90, %89 : vector<2x128xf32>
    %92 = arith.divf %90, %91 : vector<2x128xf32>
    %93 = vector.extract_strided_slice %80 {offsets = [0, 256], sizes = [2, 128], strides = [1, 1]} : vector<2x512xf32> to vector<2x128xf32>
    %94 = math.tanh %93 : vector<2x128xf32>
    %95 = vector.extract_strided_slice %80 {offsets = [0, 384], sizes = [2, 128], strides = [1, 1]} : vector<2x512xf32> to vector<2x128xf32>
    %96 = arith.negf %95 : vector<2x128xf32>
    %97 = math.exp %96 : vector<2x128xf32>
    %cst_29 = arith.constant 1.000000e+00 : f32
    %98 = vector.broadcast %cst_29 : f32 to vector<2x128xf32>
    %99 = arith.addf %98, %97 : vector<2x128xf32>
    %100 = arith.divf %98, %99 : vector<2x128xf32>
    %101 = arith.mulf %92, %67 : vector<2x128xf32>
    %102 = arith.mulf %86, %94 : vector<2x128xf32>
    %103 = arith.addf %101, %102 : vector<2x128xf32>
    %104 = math.tanh %103 : vector<2x128xf32>
    %105 = arith.mulf %100, %104 : vector<2x128xf32>
    %106 = arith.index_cast %c2_i32 : i32 to index
    %c0_30 = arith.constant 0 : index
    %c0_31 = arith.constant 0 : index
    %107 = vector.load %arg4[%106, %c0_30, %c0_31] : memref<8x2x128xf32, #tpu.memory_space<vmem>>, vector<1x2x128xf32>
    %108 = vector.shape_cast %107 : vector<1x2x128xf32> to vector<2x128xf32>
    %109 = vector.shape_cast %105 : vector<2x128xf32> to vector<1x2x128xf32>
    tpu.vector_store %arg4[%106, %c0_30, %c0_31], %109 {strides = array<i32>} : memref<8x2x128xf32, #tpu.memory_space<vmem>>, vector<1x2x128xf32>,
    %c3_i32 = arith.constant 3 : i32
    %110 = arith.truncf %105 : vector<2x128xf32> to vector<2x128xbf16>
    %c0_32 = arith.constant 0 : index
    %c0_33 = arith.constant 0 : index
    %111 = vector.load %arg1[%c0_32, %c0_33] : memref<128x512xbf16, #tpu.memory_space<vmem>>, vector<128x512xbf16>
    %cst_34 = arith.constant dense<0.000000e+00> : vector<2x512xf32>
    %112 = tpu.matmul %110, %111, %cst_34 {dimension_numbers = #tpu.dot_dimension_numbers<[1], [0], [0], [1], [0, 0, 1, 1], [], []>} : vector<2x128xbf16>, vector<128x512xbf16>, vector<2x512xf32> -> vector<2x512xf32>
    %113 = arith.index_cast %c3_i32 : i32 to index
    %c0_35 = arith.constant 0 : index
    %c0_36 = arith.constant 0 : index
    %114 = vector.load %arg0[%113, %c0_35, %c0_36] : memref<8x2x512xf32, #tpu.memory_space<vmem>>, vector<1x2x512xf32>
    %115 = vector.shape_cast %114 : vector<1x2x512xf32> to vector<2x512xf32>
    %116 = arith.addf %115, %112 : vector<2x512xf32>
    %117 = vector.extract_strided_slice %116 {offsets = [0, 0], sizes = [2, 128], strides = [1, 1]} : vector<2x512xf32> to vector<2x128xf32>
    %118 = arith.negf %117 : vector<2x128xf32>
    %119 = math.exp %118 : vector<2x128xf32>
    %cst_37 = arith.constant 1.000000e+00 : f32
    %120 = vector.broadcast %cst_37 : f32 to vector<2x128xf32>
    %121 = arith.addf %120, %119 : vector<2x128xf32>
    %122 = arith.divf %120, %121 : vector<2x128xf32>
    %123 = vector.extract_strided_slice %116 {offsets = [0, 128], sizes = [2, 128], strides = [1, 1]} : vector<2x512xf32> to vector<2x128xf32>
    %124 = arith.negf %123 : vector<2x128xf32>
    %125 = math.exp %124 : vector<2x128xf32>
    %cst_38 = arith.constant 1.000000e+00 : f32
    %126 = vector.broadcast %cst_38 : f32 to vector<2x128xf32>
    %127 = arith.addf %126, %125 : vector<2x128xf32>
    %128 = arith.divf %126, %127 : vector<2x128xf32>
    %129 = vector.extract_strided_slice %116 {offsets = [0, 256], sizes = [2, 128], strides = [1, 1]} : vector<2x512xf32> to vector<2x128xf32>
    %130 = math.tanh %129 : vector<2x128xf32>
    %131 = vector.extract_strided_slice %116 {offsets = [0, 384], sizes = [2, 128], strides = [1, 1]} : vector<2x512xf32> to vector<2x128xf32>
    %132 = arith.negf %131 : vector<2x128xf32>
    %133 = math.exp %132 : vector<2x128xf32>
    %cst_39 = arith.constant 1.000000e+00 : f32
    %134 = vector.broadcast %cst_39 : f32 to vector<2x128xf32>
    %135 = arith.addf %134, %133 : vector<2x128xf32>
    %136 = arith.divf %134, %135 : vector<2x128xf32>
    %137 = arith.mulf %128, %103 : vector<2x128xf32>
    %138 = arith.mulf %122, %130 : vector<2x128xf32>
    %139 = arith.addf %137, %138 : vector<2x128xf32>
    %140 = math.tanh %139 : vector<2x128xf32>
    %141 = arith.mulf %136, %140 : vector<2x128xf32>
    %142 = arith.index_cast %c3_i32 : i32 to index
    %c0_40 = arith.constant 0 : index
    %c0_41 = arith.constant 0 : index
    %143 = vector.load %arg4[%142, %c0_40, %c0_41] : memref<8x2x128xf32, #tpu.memory_space<vmem>>, vector<1x2x128xf32>
    %144 = vector.shape_cast %143 : vector<1x2x128xf32> to vector<2x128xf32>
    %145 = vector.shape_cast %141 : vector<2x128xf32> to vector<1x2x128xf32>
    tpu.vector_store %arg4[%142, %c0_40, %c0_41], %145 {strides = array<i32>} : memref<8x2x128xf32, #tpu.memory_space<vmem>>, vector<1x2x128xf32>,
    %c4_i32 = arith.constant 4 : i32
    %146 = arith.truncf %141 : vector<2x128xf32> to vector<2x128xbf16>
    %c0_42 = arith.constant 0 : index
    %c0_43 = arith.constant 0 : index
    %147 = vector.load %arg1[%c0_42, %c0_43] : memref<128x512xbf16, #tpu.memory_space<vmem>>, vector<128x512xbf16>
    %cst_44 = arith.constant dense<0.000000e+00> : vector<2x512xf32>
    %148 = tpu.matmul %146, %147, %cst_44 {dimension_numbers = #tpu.dot_dimension_numbers<[1], [0], [0], [1], [0, 0, 1, 1], [], []>} : vector<2x128xbf16>, vector<128x512xbf16>, vector<2x512xf32> -> vector<2x512xf32>
    %149 = arith.index_cast %c4_i32 : i32 to index
    %c0_45 = arith.constant 0 : index
    %c0_46 = arith.constant 0 : index
    %150 = vector.load %arg0[%149, %c0_45, %c0_46] : memref<8x2x512xf32, #tpu.memory_space<vmem>>, vector<1x2x512xf32>
    %151 = vector.shape_cast %150 : vector<1x2x512xf32> to vector<2x512xf32>
    %152 = arith.addf %151, %148 : vector<2x512xf32>
    %153 = vector.extract_strided_slice %152 {offsets = [0, 0], sizes = [2, 128], strides = [1, 1]} : vector<2x512xf32> to vector<2x128xf32>
    %154 = arith.negf %153 : vector<2x128xf32>
    %155 = math.exp %154 : vector<2x128xf32>
    %cst_47 = arith.constant 1.000000e+00 : f32
    %156 = vector.broadcast %cst_47 : f32 to vector<2x128xf32>
    %157 = arith.addf %156, %155 : vector<2x128xf32>
    %158 = arith.divf %156, %157 : vector<2x128xf32>
    %159 = vector.extract_strided_slice %152 {offsets = [0, 128], sizes = [2, 128], strides = [1, 1]} : vector<2x512xf32> to vector<2x128xf32>
    %160 = arith.negf %159 : vector<2x128xf32>
    %161 = math.exp %160 : vector<2x128xf32>
    %cst_48 = arith.constant 1.000000e+00 : f32
    %162 = vector.broadcast %cst_48 : f32 to vector<2x128xf32>
    %163 = arith.addf %162, %161 : vector<2x128xf32>
    %164 = arith.divf %162, %163 : vector<2x128xf32>
    %165 = vector.extract_strided_slice %152 {offsets = [0, 256], sizes = [2, 128], strides = [1, 1]} : vector<2x512xf32> to vector<2x128xf32>
    %166 = math.tanh %165 : vector<2x128xf32>
    %167 = vector.extract_strided_slice %152 {offsets = [0, 384], sizes = [2, 128], strides = [1, 1]} : vector<2x512xf32> to vector<2x128xf32>
    %168 = arith.negf %167 : vector<2x128xf32>
    %169 = math.exp %168 : vector<2x128xf32>
    %cst_49 = arith.constant 1.000000e+00 : f32
    %170 = vector.broadcast %cst_49 : f32 to vector<2x128xf32>
    %171 = arith.addf %170, %169 : vector<2x128xf32>
    %172 = arith.divf %170, %171 : vector<2x128xf32>
    %173 = arith.mulf %164, %139 : vector<2x128xf32>
    %174 = arith.mulf %158, %166 : vector<2x128xf32>
    %175 = arith.addf %173, %174 : vector<2x128xf32>
    %176 = math.tanh %175 : vector<2x128xf32>
    %177 = arith.mulf %172, %176 : vector<2x128xf32>
    %178 = arith.index_cast %c4_i32 : i32 to index
    %c0_50 = arith.constant 0 : index
    %c0_51 = arith.constant 0 : index
    %179 = vector.load %arg4[%178, %c0_50, %c0_51] : memref<8x2x128xf32, #tpu.memory_space<vmem>>, vector<1x2x128xf32>
    %180 = vector.shape_cast %179 : vector<1x2x128xf32> to vector<2x128xf32>
    %181 = vector.shape_cast %177 : vector<2x128xf32> to vector<1x2x128xf32>
    tpu.vector_store %arg4[%178, %c0_50, %c0_51], %181 {strides = array<i32>} : memref<8x2x128xf32, #tpu.memory_space<vmem>>, vector<1x2x128xf32>,
    %c5_i32 = arith.constant 5 : i32
    %182 = arith.truncf %177 : vector<2x128xf32> to vector<2x128xbf16>
    %c0_52 = arith.constant 0 : index
    %c0_53 = arith.constant 0 : index
    %183 = vector.load %arg1[%c0_52, %c0_53] : memref<128x512xbf16, #tpu.memory_space<vmem>>, vector<128x512xbf16>
    %cst_54 = arith.constant dense<0.000000e+00> : vector<2x512xf32>
    %184 = tpu.matmul %182, %183, %cst_54 {dimension_numbers = #tpu.dot_dimension_numbers<[1], [0], [0], [1], [0, 0, 1, 1], [], []>} : vector<2x128xbf16>, vector<128x512xbf16>, vector<2x512xf32> -> vector<2x512xf32>
    %185 = arith.index_cast %c5_i32 : i32 to index
    %c0_55 = arith.constant 0 : index
    %c0_56 = arith.constant 0 : index
    %186 = vector.load %arg0[%185, %c0_55, %c0_56] : memref<8x2x512xf32, #tpu.memory_space<vmem>>, vector<1x2x512xf32>
    %187 = vector.shape_cast %186 : vector<1x2x512xf32> to vector<2x512xf32>
    %188 = arith.addf %187, %184 : vector<2x512xf32>
    %189 = vector.extract_strided_slice %188 {offsets = [0, 0], sizes = [2, 128], strides = [1, 1]} : vector<2x512xf32> to vector<2x128xf32>
    %190 = arith.negf %189 : vector<2x128xf32>
    %191 = math.exp %190 : vector<2x128xf32>
    %cst_57 = arith.constant 1.000000e+00 : f32
    %192 = vector.broadcast %cst_57 : f32 to vector<2x128xf32>
    %193 = arith.addf %192, %191 : vector<2x128xf32>
    %194 = arith.divf %192, %193 : vector<2x128xf32>
    %195 = vector.extract_strided_slice %188 {offsets = [0, 128], sizes = [2, 128], strides = [1, 1]} : vector<2x512xf32> to vector<2x128xf32>
    %196 = arith.negf %195 : vector<2x128xf32>
    %197 = math.exp %196 : vector<2x128xf32>
    %cst_58 = arith.constant 1.000000e+00 : f32
    %198 = vector.broadcast %cst_58 : f32 to vector<2x128xf32>
    %199 = arith.addf %198, %197 : vector<2x128xf32>
    %200 = arith.divf %198, %199 : vector<2x128xf32>
    %201 = vector.extract_strided_slice %188 {offsets = [0, 256], sizes = [2, 128], strides = [1, 1]} : vector<2x512xf32> to vector<2x128xf32>
    %202 = math.tanh %201 : vector<2x128xf32>
    %203 = vector.extract_strided_slice %188 {offsets = [0, 384], sizes = [2, 128], strides = [1, 1]} : vector<2x512xf32> to vector<2x128xf32>
    %204 = arith.negf %203 : vector<2x128xf32>
    %205 = math.exp %204 : vector<2x128xf32>
    %cst_59 = arith.constant 1.000000e+00 : f32
    %206 = vector.broadcast %cst_59 : f32 to vector<2x128xf32>
    %207 = arith.addf %206, %205 : vector<2x128xf32>
    %208 = arith.divf %206, %207 : vector<2x128xf32>
    %209 = arith.mulf %200, %175 : vector<2x128xf32>
    %210 = arith.mulf %194, %202 : vector<2x128xf32>
    %211 = arith.addf %209, %210 : vector<2x128xf32>
    %212 = math.tanh %211 : vector<2x128xf32>
    %213 = arith.mulf %208, %212 : vector<2x128xf32>
    %214 = arith.index_cast %c5_i32 : i32 to index
    %c0_60 = arith.constant 0 : index
    %c0_61 = arith.constant 0 : index
    %215 = vector.load %arg4[%214, %c0_60, %c0_61] : memref<8x2x128xf32, #tpu.memory_space<vmem>>, vector<1x2x128xf32>
    %216 = vector.shape_cast %215 : vector<1x2x128xf32> to vector<2x128xf32>
    %217 = vector.shape_cast %213 : vector<2x128xf32> to vector<1x2x128xf32>
    tpu.vector_store %arg4[%214, %c0_60, %c0_61], %217 {strides = array<i32>} : memref<8x2x128xf32, #tpu.memory_space<vmem>>, vector<1x2x128xf32>,
    %c6_i32 = arith.constant 6 : i32
    %218 = arith.truncf %213 : vector<2x128xf32> to vector<2x128xbf16>
    %c0_62 = arith.constant 0 : index
    %c0_63 = arith.constant 0 : index
    %219 = vector.load %arg1[%c0_62, %c0_63] : memref<128x512xbf16, #tpu.memory_space<vmem>>, vector<128x512xbf16>
    %cst_64 = arith.constant dense<0.000000e+00> : vector<2x512xf32>
    %220 = tpu.matmul %218, %219, %cst_64 {dimension_numbers = #tpu.dot_dimension_numbers<[1], [0], [0], [1], [0, 0, 1, 1], [], []>} : vector<2x128xbf16>, vector<128x512xbf16>, vector<2x512xf32> -> vector<2x512xf32>
    %221 = arith.index_cast %c6_i32 : i32 to index
    %c0_65 = arith.constant 0 : index
    %c0_66 = arith.constant 0 : index
    %222 = vector.load %arg0[%221, %c0_65, %c0_66] : memref<8x2x512xf32, #tpu.memory_space<vmem>>, vector<1x2x512xf32>
    %223 = vector.shape_cast %222 : vector<1x2x512xf32> to vector<2x512xf32>
    %224 = arith.addf %223, %220 : vector<2x512xf32>
    %225 = vector.extract_strided_slice %224 {offsets = [0, 0], sizes = [2, 128], strides = [1, 1]} : vector<2x512xf32> to vector<2x128xf32>
    %226 = arith.negf %225 : vector<2x128xf32>
    %227 = math.exp %226 : vector<2x128xf32>
    %cst_67 = arith.constant 1.000000e+00 : f32
    %228 = vector.broadcast %cst_67 : f32 to vector<2x128xf32>
    %229 = arith.addf %228, %227 : vector<2x128xf32>
    %230 = arith.divf %228, %229 : vector<2x128xf32>
    %231 = vector.extract_strided_slice %224 {offsets = [0, 128], sizes = [2, 128], strides = [1, 1]} : vector<2x512xf32> to vector<2x128xf32>
    %232 = arith.negf %231 : vector<2x128xf32>
    %233 = math.exp %232 : vector<2x128xf32>
    %cst_68 = arith.constant 1.000000e+00 : f32
    %234 = vector.broadcast %cst_68 : f32 to vector<2x128xf32>
    %235 = arith.addf %234, %233 : vector<2x128xf32>
    %236 = arith.divf %234, %235 : vector<2x128xf32>
    %237 = vector.extract_strided_slice %224 {offsets = [0, 256], sizes = [2, 128], strides = [1, 1]} : vector<2x512xf32> to vector<2x128xf32>
    %238 = math.tanh %237 : vector<2x128xf32>
    %239 = vector.extract_strided_slice %224 {offsets = [0, 384], sizes = [2, 128], strides = [1, 1]} : vector<2x512xf32> to vector<2x128xf32>
    %240 = arith.negf %239 : vector<2x128xf32>
    %241 = math.exp %240 : vector<2x128xf32>
    %cst_69 = arith.constant 1.000000e+00 : f32
    %242 = vector.broadcast %cst_69 : f32 to vector<2x128xf32>
    %243 = arith.addf %242, %241 : vector<2x128xf32>
    %244 = arith.divf %242, %243 : vector<2x128xf32>
    %245 = arith.mulf %236, %211 : vector<2x128xf32>
    %246 = arith.mulf %230, %238 : vector<2x128xf32>
    %247 = arith.addf %245, %246 : vector<2x128xf32>
    %248 = math.tanh %247 : vector<2x128xf32>
    %249 = arith.mulf %244, %248 : vector<2x128xf32>
    %250 = arith.index_cast %c6_i32 : i32 to index
    %c0_70 = arith.constant 0 : index
    %c0_71 = arith.constant 0 : index
    %251 = vector.load %arg4[%250, %c0_70, %c0_71] : memref<8x2x128xf32, #tpu.memory_space<vmem>>, vector<1x2x128xf32>
    %252 = vector.shape_cast %251 : vector<1x2x128xf32> to vector<2x128xf32>
    %253 = vector.shape_cast %249 : vector<2x128xf32> to vector<1x2x128xf32>
    tpu.vector_store %arg4[%250, %c0_70, %c0_71], %253 {strides = array<i32>} : memref<8x2x128xf32, #tpu.memory_space<vmem>>, vector<1x2x128xf32>,
    %c7_i32 = arith.constant 7 : i32
    %254 = arith.truncf %249 : vector<2x128xf32> to vector<2x128xbf16>
    %c0_72 = arith.constant 0 : index
    %c0_73 = arith.constant 0 : index
    %255 = vector.load %arg1[%c0_72, %c0_73] : memref<128x512xbf16, #tpu.memory_space<vmem>>, vector<128x512xbf16>
    %cst_74 = arith.constant dense<0.000000e+00> : vector<2x512xf32>
    %256 = tpu.matmul %254, %255, %cst_74 {dimension_numbers = #tpu.dot_dimension_numbers<[1], [0], [0], [1], [0, 0, 1, 1], [], []>} : vector<2x128xbf16>, vector<128x512xbf16>, vector<2x512xf32> -> vector<2x512xf32>
    %257 = arith.index_cast %c7_i32 : i32 to index
    %c0_75 = arith.constant 0 : index
    %c0_76 = arith.constant 0 : index
    %258 = vector.load %arg0[%257, %c0_75, %c0_76] : memref<8x2x512xf32, #tpu.memory_space<vmem>>, vector<1x2x512xf32>
    %259 = vector.shape_cast %258 : vector<1x2x512xf32> to vector<2x512xf32>
    %260 = arith.addf %259, %256 : vector<2x512xf32>
    %261 = vector.extract_strided_slice %260 {offsets = [0, 0], sizes = [2, 128], strides = [1, 1]} : vector<2x512xf32> to vector<2x128xf32>
    %262 = arith.negf %261 : vector<2x128xf32>
    %263 = math.exp %262 : vector<2x128xf32>
    %cst_77 = arith.constant 1.000000e+00 : f32
    %264 = vector.broadcast %cst_77 : f32 to vector<2x128xf32>
    %265 = arith.addf %264, %263 : vector<2x128xf32>
    %266 = arith.divf %264, %265 : vector<2x128xf32>
    %267 = vector.extract_strided_slice %260 {offsets = [0, 128], sizes = [2, 128], strides = [1, 1]} : vector<2x512xf32> to vector<2x128xf32>
    %268 = arith.negf %267 : vector<2x128xf32>
    %269 = math.exp %268 : vector<2x128xf32>
    %cst_78 = arith.constant 1.000000e+00 : f32
    %270 = vector.broadcast %cst_78 : f32 to vector<2x128xf32>
    %271 = arith.addf %270, %269 : vector<2x128xf32>
    %272 = arith.divf %270, %271 : vector<2x128xf32>
    %273 = vector.extract_strided_slice %260 {offsets = [0, 256], sizes = [2, 128], strides = [1, 1]} : vector<2x512xf32> to vector<2x128xf32>
    %274 = math.tanh %273 : vector<2x128xf32>
    %275 = vector.extract_strided_slice %260 {offsets = [0, 384], sizes = [2, 128], strides = [1, 1]} : vector<2x512xf32> to vector<2x128xf32>
    %276 = arith.negf %275 : vector<2x128xf32>
    %277 = math.exp %276 : vector<2x128xf32>
    %cst_79 = arith.constant 1.000000e+00 : f32
    %278 = vector.broadcast %cst_79 : f32 to vector<2x128xf32>
    %279 = arith.addf %278, %277 : vector<2x128xf32>
    %280 = arith.divf %278, %279 : vector<2x128xf32>
    %281 = arith.mulf %272, %247 : vector<2x128xf32>
    %282 = arith.mulf %266, %274 : vector<2x128xf32>
    %283 = arith.addf %281, %282 : vector<2x128xf32>
    %284 = math.tanh %283 : vector<2x128xf32>
    %285 = arith.mulf %280, %284 : vector<2x128xf32>
    %286 = arith.index_cast %c7_i32 : i32 to index
    %c0_80 = arith.constant 0 : index
    %c0_81 = arith.constant 0 : index
    %287 = vector.load %arg4[%286, %c0_80, %c0_81] : memref<8x2x128xf32, #tpu.memory_space<vmem>>, vector<1x2x128xf32>
    %288 = vector.shape_cast %287 : vector<1x2x128xf32> to vector<2x128xf32>
    %289 = vector.shape_cast %285 : vector<2x128xf32> to vector<1x2x128xf32>
    tpu.vector_store %arg4[%286, %c0_80, %c0_81], %289 {strides = array<i32>} : memref<8x2x128xf32, #tpu.memory_space<vmem>>, vector<1x2x128xf32>,
    %c8_i32 = arith.constant 8 : i32
    %c0_82 = arith.constant 0 : index
    %c0_83 = arith.constant 0 : index
    %290 = vector.load %arg5[%c0_82, %c0_83] : memref<2x128xf32, #tpu.memory_space<vmem>>, vector<2x128xf32>
    tpu.vector_store %arg5[%c0_82, %c0_83], %285 {strides = array<i32>} : memref<2x128xf32, #tpu.memory_space<vmem>>, vector<2x128xf32>,
    %c0_84 = arith.constant 0 : index
    %c0_85 = arith.constant 0 : index
    %291 = vector.load %arg6[%c0_84, %c0_85] : memref<2x128xf32, #tpu.memory_space<vmem>>, vector<2x128xf32>
    tpu.vector_store %arg6[%c0_84, %c0_85], %283 {strides = array<i32>} : memref<2x128xf32, #tpu.memory_space<vmem>>, vector<2x128xf32>,
    return
  }
}

module attributes {stable_mosaic.version = 11 : i64} {
  func.func @_lstm_rec_kernel(%arg0: memref<7x2x512xf32, #tpu.memory_space<vmem>>, %arg1: memref<128x512xbf16, #tpu.memory_space<vmem>>, %arg2: memref<2x128xf32, #tpu.memory_space<vmem>>, %arg3: memref<2x128xf32, #tpu.memory_space<vmem>>, %arg4: memref<7x2x128xf32, #tpu.memory_space<vmem>>, %arg5: memref<2x128xf32, #tpu.memory_space<vmem>>, %arg6: memref<2x128xf32, #tpu.memory_space<vmem>>) attributes {dimension_semantics = [], scalar_prefetch = 0 : i64, scratch_operands = 0 : i64, tpu.core_type = #tpu.core_type<tc>} {
    %c0 = arith.constant 0 : index
    %c0_0 = arith.constant 0 : index
    %0 = vector.load %arg2[%c0, %c0_0] : memref<2x128xf32, #tpu.memory_space<vmem>>, vector<2x128xf32>
    %c0_1 = arith.constant 0 : index
    %c0_2 = arith.constant 0 : index
    %1 = vector.load %arg3[%c0_1, %c0_2] : memref<2x128xf32, #tpu.memory_space<vmem>>, vector<2x128xf32>
    %c0_i32 = arith.constant 0 : i32
    %2 = arith.truncf %0 : vector<2x128xf32> to vector<2x128xbf16>
    %c0_3 = arith.constant 0 : index
    %c0_4 = arith.constant 0 : index
    %3 = vector.load %arg1[%c0_3, %c0_4] : memref<128x512xbf16, #tpu.memory_space<vmem>>, vector<128x512xbf16>
    %cst = arith.constant dense<0.000000e+00> : vector<2x512xf32>
    %4 = tpu.matmul %2, %3, %cst {dimension_numbers = #tpu.dot_dimension_numbers<[1], [0], [0], [1], [0, 0, 1, 1], [], []>} : vector<2x128xbf16>, vector<128x512xbf16>, vector<2x512xf32> -> vector<2x512xf32>
    %5 = arith.index_cast %c0_i32 : i32 to index
    %c0_5 = arith.constant 0 : index
    %c0_6 = arith.constant 0 : index
    %6 = vector.load %arg0[%5, %c0_5, %c0_6] : memref<7x2x512xf32, #tpu.memory_space<vmem>>, vector<1x2x512xf32>
    %7 = vector.shape_cast %6 : vector<1x2x512xf32> to vector<2x512xf32>
    %8 = arith.addf %7, %4 : vector<2x512xf32>
    %9 = vector.extract_strided_slice %8 {offsets = [0, 0], sizes = [2, 128], strides = [1, 1]} : vector<2x512xf32> to vector<2x128xf32>
    %10 = arith.negf %9 : vector<2x128xf32>
    %11 = math.exp %10 : vector<2x128xf32>
    %cst_7 = arith.constant 1.000000e+00 : f32
    %12 = vector.broadcast %cst_7 : f32 to vector<2x128xf32>
    %13 = arith.addf %12, %11 : vector<2x128xf32>
    %14 = arith.divf %12, %13 : vector<2x128xf32>
    %15 = vector.extract_strided_slice %8 {offsets = [0, 128], sizes = [2, 128], strides = [1, 1]} : vector<2x512xf32> to vector<2x128xf32>
    %16 = arith.negf %15 : vector<2x128xf32>
    %17 = math.exp %16 : vector<2x128xf32>
    %cst_8 = arith.constant 1.000000e+00 : f32
    %18 = vector.broadcast %cst_8 : f32 to vector<2x128xf32>
    %19 = arith.addf %18, %17 : vector<2x128xf32>
    %20 = arith.divf %18, %19 : vector<2x128xf32>
    %21 = vector.extract_strided_slice %8 {offsets = [0, 256], sizes = [2, 128], strides = [1, 1]} : vector<2x512xf32> to vector<2x128xf32>
    %22 = math.tanh %21 : vector<2x128xf32>
    %23 = vector.extract_strided_slice %8 {offsets = [0, 384], sizes = [2, 128], strides = [1, 1]} : vector<2x512xf32> to vector<2x128xf32>
    %24 = arith.negf %23 : vector<2x128xf32>
    %25 = math.exp %24 : vector<2x128xf32>
    %cst_9 = arith.constant 1.000000e+00 : f32
    %26 = vector.broadcast %cst_9 : f32 to vector<2x128xf32>
    %27 = arith.addf %26, %25 : vector<2x128xf32>
    %28 = arith.divf %26, %27 : vector<2x128xf32>
    %29 = arith.mulf %20, %1 : vector<2x128xf32>
    %30 = arith.mulf %14, %22 : vector<2x128xf32>
    %31 = arith.addf %29, %30 : vector<2x128xf32>
    %32 = math.tanh %31 : vector<2x128xf32>
    %33 = arith.mulf %28, %32 : vector<2x128xf32>
    %34 = arith.index_cast %c0_i32 : i32 to index
    %c0_10 = arith.constant 0 : index
    %c0_11 = arith.constant 0 : index
    %35 = vector.load %arg4[%34, %c0_10, %c0_11] : memref<7x2x128xf32, #tpu.memory_space<vmem>>, vector<1x2x128xf32>
    %36 = vector.shape_cast %35 : vector<1x2x128xf32> to vector<2x128xf32>
    %37 = vector.shape_cast %33 : vector<2x128xf32> to vector<1x2x128xf32>
    tpu.vector_store %arg4[%34, %c0_10, %c0_11], %37 {strides = array<i32>} : memref<7x2x128xf32, #tpu.memory_space<vmem>>, vector<1x2x128xf32>,
    %c1_i32 = arith.constant 1 : i32
    %38 = arith.truncf %33 : vector<2x128xf32> to vector<2x128xbf16>
    %c0_12 = arith.constant 0 : index
    %c0_13 = arith.constant 0 : index
    %39 = vector.load %arg1[%c0_12, %c0_13] : memref<128x512xbf16, #tpu.memory_space<vmem>>, vector<128x512xbf16>
    %cst_14 = arith.constant dense<0.000000e+00> : vector<2x512xf32>
    %40 = tpu.matmul %38, %39, %cst_14 {dimension_numbers = #tpu.dot_dimension_numbers<[1], [0], [0], [1], [0, 0, 1, 1], [], []>} : vector<2x128xbf16>, vector<128x512xbf16>, vector<2x512xf32> -> vector<2x512xf32>
    %41 = arith.index_cast %c1_i32 : i32 to index
    %c0_15 = arith.constant 0 : index
    %c0_16 = arith.constant 0 : index
    %42 = vector.load %arg0[%41, %c0_15, %c0_16] : memref<7x2x512xf32, #tpu.memory_space<vmem>>, vector<1x2x512xf32>
    %43 = vector.shape_cast %42 : vector<1x2x512xf32> to vector<2x512xf32>
    %44 = arith.addf %43, %40 : vector<2x512xf32>
    %45 = vector.extract_strided_slice %44 {offsets = [0, 0], sizes = [2, 128], strides = [1, 1]} : vector<2x512xf32> to vector<2x128xf32>
    %46 = arith.negf %45 : vector<2x128xf32>
    %47 = math.exp %46 : vector<2x128xf32>
    %cst_17 = arith.constant 1.000000e+00 : f32
    %48 = vector.broadcast %cst_17 : f32 to vector<2x128xf32>
    %49 = arith.addf %48, %47 : vector<2x128xf32>
    %50 = arith.divf %48, %49 : vector<2x128xf32>
    %51 = vector.extract_strided_slice %44 {offsets = [0, 128], sizes = [2, 128], strides = [1, 1]} : vector<2x512xf32> to vector<2x128xf32>
    %52 = arith.negf %51 : vector<2x128xf32>
    %53 = math.exp %52 : vector<2x128xf32>
    %cst_18 = arith.constant 1.000000e+00 : f32
    %54 = vector.broadcast %cst_18 : f32 to vector<2x128xf32>
    %55 = arith.addf %54, %53 : vector<2x128xf32>
    %56 = arith.divf %54, %55 : vector<2x128xf32>
    %57 = vector.extract_strided_slice %44 {offsets = [0, 256], sizes = [2, 128], strides = [1, 1]} : vector<2x512xf32> to vector<2x128xf32>
    %58 = math.tanh %57 : vector<2x128xf32>
    %59 = vector.extract_strided_slice %44 {offsets = [0, 384], sizes = [2, 128], strides = [1, 1]} : vector<2x512xf32> to vector<2x128xf32>
    %60 = arith.negf %59 : vector<2x128xf32>
    %61 = math.exp %60 : vector<2x128xf32>
    %cst_19 = arith.constant 1.000000e+00 : f32
    %62 = vector.broadcast %cst_19 : f32 to vector<2x128xf32>
    %63 = arith.addf %62, %61 : vector<2x128xf32>
    %64 = arith.divf %62, %63 : vector<2x128xf32>
    %65 = arith.mulf %56, %31 : vector<2x128xf32>
    %66 = arith.mulf %50, %58 : vector<2x128xf32>
    %67 = arith.addf %65, %66 : vector<2x128xf32>
    %68 = math.tanh %67 : vector<2x128xf32>
    %69 = arith.mulf %64, %68 : vector<2x128xf32>
    %70 = arith.index_cast %c1_i32 : i32 to index
    %c0_20 = arith.constant 0 : index
    %c0_21 = arith.constant 0 : index
    %71 = vector.load %arg4[%70, %c0_20, %c0_21] : memref<7x2x128xf32, #tpu.memory_space<vmem>>, vector<1x2x128xf32>
    %72 = vector.shape_cast %71 : vector<1x2x128xf32> to vector<2x128xf32>
    %73 = vector.shape_cast %69 : vector<2x128xf32> to vector<1x2x128xf32>
    tpu.vector_store %arg4[%70, %c0_20, %c0_21], %73 {strides = array<i32>} : memref<7x2x128xf32, #tpu.memory_space<vmem>>, vector<1x2x128xf32>,
    %c2_i32 = arith.constant 2 : i32
    %74 = arith.truncf %69 : vector<2x128xf32> to vector<2x128xbf16>
    %c0_22 = arith.constant 0 : index
    %c0_23 = arith.constant 0 : index
    %75 = vector.load %arg1[%c0_22, %c0_23] : memref<128x512xbf16, #tpu.memory_space<vmem>>, vector<128x512xbf16>
    %cst_24 = arith.constant dense<0.000000e+00> : vector<2x512xf32>
    %76 = tpu.matmul %74, %75, %cst_24 {dimension_numbers = #tpu.dot_dimension_numbers<[1], [0], [0], [1], [0, 0, 1, 1], [], []>} : vector<2x128xbf16>, vector<128x512xbf16>, vector<2x512xf32> -> vector<2x512xf32>
    %77 = arith.index_cast %c2_i32 : i32 to index
    %c0_25 = arith.constant 0 : index
    %c0_26 = arith.constant 0 : index
    %78 = vector.load %arg0[%77, %c0_25, %c0_26] : memref<7x2x512xf32, #tpu.memory_space<vmem>>, vector<1x2x512xf32>
    %79 = vector.shape_cast %78 : vector<1x2x512xf32> to vector<2x512xf32>
    %80 = arith.addf %79, %76 : vector<2x512xf32>
    %81 = vector.extract_strided_slice %80 {offsets = [0, 0], sizes = [2, 128], strides = [1, 1]} : vector<2x512xf32> to vector<2x128xf32>
    %82 = arith.negf %81 : vector<2x128xf32>
    %83 = math.exp %82 : vector<2x128xf32>
    %cst_27 = arith.constant 1.000000e+00 : f32
    %84 = vector.broadcast %cst_27 : f32 to vector<2x128xf32>
    %85 = arith.addf %84, %83 : vector<2x128xf32>
    %86 = arith.divf %84, %85 : vector<2x128xf32>
    %87 = vector.extract_strided_slice %80 {offsets = [0, 128], sizes = [2, 128], strides = [1, 1]} : vector<2x512xf32> to vector<2x128xf32>
    %88 = arith.negf %87 : vector<2x128xf32>
    %89 = math.exp %88 : vector<2x128xf32>
    %cst_28 = arith.constant 1.000000e+00 : f32
    %90 = vector.broadcast %cst_28 : f32 to vector<2x128xf32>
    %91 = arith.addf %90, %89 : vector<2x128xf32>
    %92 = arith.divf %90, %91 : vector<2x128xf32>
    %93 = vector.extract_strided_slice %80 {offsets = [0, 256], sizes = [2, 128], strides = [1, 1]} : vector<2x512xf32> to vector<2x128xf32>
    %94 = math.tanh %93 : vector<2x128xf32>
    %95 = vector.extract_strided_slice %80 {offsets = [0, 384], sizes = [2, 128], strides = [1, 1]} : vector<2x512xf32> to vector<2x128xf32>
    %96 = arith.negf %95 : vector<2x128xf32>
    %97 = math.exp %96 : vector<2x128xf32>
    %cst_29 = arith.constant 1.000000e+00 : f32
    %98 = vector.broadcast %cst_29 : f32 to vector<2x128xf32>
    %99 = arith.addf %98, %97 : vector<2x128xf32>
    %100 = arith.divf %98, %99 : vector<2x128xf32>
    %101 = arith.mulf %92, %67 : vector<2x128xf32>
    %102 = arith.mulf %86, %94 : vector<2x128xf32>
    %103 = arith.addf %101, %102 : vector<2x128xf32>
    %104 = math.tanh %103 : vector<2x128xf32>
    %105 = arith.mulf %100, %104 : vector<2x128xf32>
    %106 = arith.index_cast %c2_i32 : i32 to index
    %c0_30 = arith.constant 0 : index
    %c0_31 = arith.constant 0 : index
    %107 = vector.load %arg4[%106, %c0_30, %c0_31] : memref<7x2x128xf32, #tpu.memory_space<vmem>>, vector<1x2x128xf32>
    %108 = vector.shape_cast %107 : vector<1x2x128xf32> to vector<2x128xf32>
    %109 = vector.shape_cast %105 : vector<2x128xf32> to vector<1x2x128xf32>
    tpu.vector_store %arg4[%106, %c0_30, %c0_31], %109 {strides = array<i32>} : memref<7x2x128xf32, #tpu.memory_space<vmem>>, vector<1x2x128xf32>,
    %c3_i32 = arith.constant 3 : i32
    %110 = arith.truncf %105 : vector<2x128xf32> to vector<2x128xbf16>
    %c0_32 = arith.constant 0 : index
    %c0_33 = arith.constant 0 : index
    %111 = vector.load %arg1[%c0_32, %c0_33] : memref<128x512xbf16, #tpu.memory_space<vmem>>, vector<128x512xbf16>
    %cst_34 = arith.constant dense<0.000000e+00> : vector<2x512xf32>
    %112 = tpu.matmul %110, %111, %cst_34 {dimension_numbers = #tpu.dot_dimension_numbers<[1], [0], [0], [1], [0, 0, 1, 1], [], []>} : vector<2x128xbf16>, vector<128x512xbf16>, vector<2x512xf32> -> vector<2x512xf32>
    %113 = arith.index_cast %c3_i32 : i32 to index
    %c0_35 = arith.constant 0 : index
    %c0_36 = arith.constant 0 : index
    %114 = vector.load %arg0[%113, %c0_35, %c0_36] : memref<7x2x512xf32, #tpu.memory_space<vmem>>, vector<1x2x512xf32>
    %115 = vector.shape_cast %114 : vector<1x2x512xf32> to vector<2x512xf32>
    %116 = arith.addf %115, %112 : vector<2x512xf32>
    %117 = vector.extract_strided_slice %116 {offsets = [0, 0], sizes = [2, 128], strides = [1, 1]} : vector<2x512xf32> to vector<2x128xf32>
    %118 = arith.negf %117 : vector<2x128xf32>
    %119 = math.exp %118 : vector<2x128xf32>
    %cst_37 = arith.constant 1.000000e+00 : f32
    %120 = vector.broadcast %cst_37 : f32 to vector<2x128xf32>
    %121 = arith.addf %120, %119 : vector<2x128xf32>
    %122 = arith.divf %120, %121 : vector<2x128xf32>
    %123 = vector.extract_strided_slice %116 {offsets = [0, 128], sizes = [2, 128], strides = [1, 1]} : vector<2x512xf32> to vector<2x128xf32>
    %124 = arith.negf %123 : vector<2x128xf32>
    %125 = math.exp %124 : vector<2x128xf32>
    %cst_38 = arith.constant 1.000000e+00 : f32
    %126 = vector.broadcast %cst_38 : f32 to vector<2x128xf32>
    %127 = arith.addf %126, %125 : vector<2x128xf32>
    %128 = arith.divf %126, %127 : vector<2x128xf32>
    %129 = vector.extract_strided_slice %116 {offsets = [0, 256], sizes = [2, 128], strides = [1, 1]} : vector<2x512xf32> to vector<2x128xf32>
    %130 = math.tanh %129 : vector<2x128xf32>
    %131 = vector.extract_strided_slice %116 {offsets = [0, 384], sizes = [2, 128], strides = [1, 1]} : vector<2x512xf32> to vector<2x128xf32>
    %132 = arith.negf %131 : vector<2x128xf32>
    %133 = math.exp %132 : vector<2x128xf32>
    %cst_39 = arith.constant 1.000000e+00 : f32
    %134 = vector.broadcast %cst_39 : f32 to vector<2x128xf32>
    %135 = arith.addf %134, %133 : vector<2x128xf32>
    %136 = arith.divf %134, %135 : vector<2x128xf32>
    %137 = arith.mulf %128, %103 : vector<2x128xf32>
    %138 = arith.mulf %122, %130 : vector<2x128xf32>
    %139 = arith.addf %137, %138 : vector<2x128xf32>
    %140 = math.tanh %139 : vector<2x128xf32>
    %141 = arith.mulf %136, %140 : vector<2x128xf32>
    %142 = arith.index_cast %c3_i32 : i32 to index
    %c0_40 = arith.constant 0 : index
    %c0_41 = arith.constant 0 : index
    %143 = vector.load %arg4[%142, %c0_40, %c0_41] : memref<7x2x128xf32, #tpu.memory_space<vmem>>, vector<1x2x128xf32>
    %144 = vector.shape_cast %143 : vector<1x2x128xf32> to vector<2x128xf32>
    %145 = vector.shape_cast %141 : vector<2x128xf32> to vector<1x2x128xf32>
    tpu.vector_store %arg4[%142, %c0_40, %c0_41], %145 {strides = array<i32>} : memref<7x2x128xf32, #tpu.memory_space<vmem>>, vector<1x2x128xf32>,
    %c4_i32 = arith.constant 4 : i32
    %146 = arith.truncf %141 : vector<2x128xf32> to vector<2x128xbf16>
    %c0_42 = arith.constant 0 : index
    %c0_43 = arith.constant 0 : index
    %147 = vector.load %arg1[%c0_42, %c0_43] : memref<128x512xbf16, #tpu.memory_space<vmem>>, vector<128x512xbf16>
    %cst_44 = arith.constant dense<0.000000e+00> : vector<2x512xf32>
    %148 = tpu.matmul %146, %147, %cst_44 {dimension_numbers = #tpu.dot_dimension_numbers<[1], [0], [0], [1], [0, 0, 1, 1], [], []>} : vector<2x128xbf16>, vector<128x512xbf16>, vector<2x512xf32> -> vector<2x512xf32>
    %149 = arith.index_cast %c4_i32 : i32 to index
    %c0_45 = arith.constant 0 : index
    %c0_46 = arith.constant 0 : index
    %150 = vector.load %arg0[%149, %c0_45, %c0_46] : memref<7x2x512xf32, #tpu.memory_space<vmem>>, vector<1x2x512xf32>
    %151 = vector.shape_cast %150 : vector<1x2x512xf32> to vector<2x512xf32>
    %152 = arith.addf %151, %148 : vector<2x512xf32>
    %153 = vector.extract_strided_slice %152 {offsets = [0, 0], sizes = [2, 128], strides = [1, 1]} : vector<2x512xf32> to vector<2x128xf32>
    %154 = arith.negf %153 : vector<2x128xf32>
    %155 = math.exp %154 : vector<2x128xf32>
    %cst_47 = arith.constant 1.000000e+00 : f32
    %156 = vector.broadcast %cst_47 : f32 to vector<2x128xf32>
    %157 = arith.addf %156, %155 : vector<2x128xf32>
    %158 = arith.divf %156, %157 : vector<2x128xf32>
    %159 = vector.extract_strided_slice %152 {offsets = [0, 128], sizes = [2, 128], strides = [1, 1]} : vector<2x512xf32> to vector<2x128xf32>
    %160 = arith.negf %159 : vector<2x128xf32>
    %161 = math.exp %160 : vector<2x128xf32>
    %cst_48 = arith.constant 1.000000e+00 : f32
    %162 = vector.broadcast %cst_48 : f32 to vector<2x128xf32>
    %163 = arith.addf %162, %161 : vector<2x128xf32>
    %164 = arith.divf %162, %163 : vector<2x128xf32>
    %165 = vector.extract_strided_slice %152 {offsets = [0, 256], sizes = [2, 128], strides = [1, 1]} : vector<2x512xf32> to vector<2x128xf32>
    %166 = math.tanh %165 : vector<2x128xf32>
    %167 = vector.extract_strided_slice %152 {offsets = [0, 384], sizes = [2, 128], strides = [1, 1]} : vector<2x512xf32> to vector<2x128xf32>
    %168 = arith.negf %167 : vector<2x128xf32>
    %169 = math.exp %168 : vector<2x128xf32>
    %cst_49 = arith.constant 1.000000e+00 : f32
    %170 = vector.broadcast %cst_49 : f32 to vector<2x128xf32>
    %171 = arith.addf %170, %169 : vector<2x128xf32>
    %172 = arith.divf %170, %171 : vector<2x128xf32>
    %173 = arith.mulf %164, %139 : vector<2x128xf32>
    %174 = arith.mulf %158, %166 : vector<2x128xf32>
    %175 = arith.addf %173, %174 : vector<2x128xf32>
    %176 = math.tanh %175 : vector<2x128xf32>
    %177 = arith.mulf %172, %176 : vector<2x128xf32>
    %178 = arith.index_cast %c4_i32 : i32 to index
    %c0_50 = arith.constant 0 : index
    %c0_51 = arith.constant 0 : index
    %179 = vector.load %arg4[%178, %c0_50, %c0_51] : memref<7x2x128xf32, #tpu.memory_space<vmem>>, vector<1x2x128xf32>
    %180 = vector.shape_cast %179 : vector<1x2x128xf32> to vector<2x128xf32>
    %181 = vector.shape_cast %177 : vector<2x128xf32> to vector<1x2x128xf32>
    tpu.vector_store %arg4[%178, %c0_50, %c0_51], %181 {strides = array<i32>} : memref<7x2x128xf32, #tpu.memory_space<vmem>>, vector<1x2x128xf32>,
    %c5_i32 = arith.constant 5 : i32
    %182 = arith.truncf %177 : vector<2x128xf32> to vector<2x128xbf16>
    %c0_52 = arith.constant 0 : index
    %c0_53 = arith.constant 0 : index
    %183 = vector.load %arg1[%c0_52, %c0_53] : memref<128x512xbf16, #tpu.memory_space<vmem>>, vector<128x512xbf16>
    %cst_54 = arith.constant dense<0.000000e+00> : vector<2x512xf32>
    %184 = tpu.matmul %182, %183, %cst_54 {dimension_numbers = #tpu.dot_dimension_numbers<[1], [0], [0], [1], [0, 0, 1, 1], [], []>} : vector<2x128xbf16>, vector<128x512xbf16>, vector<2x512xf32> -> vector<2x512xf32>
    %185 = arith.index_cast %c5_i32 : i32 to index
    %c0_55 = arith.constant 0 : index
    %c0_56 = arith.constant 0 : index
    %186 = vector.load %arg0[%185, %c0_55, %c0_56] : memref<7x2x512xf32, #tpu.memory_space<vmem>>, vector<1x2x512xf32>
    %187 = vector.shape_cast %186 : vector<1x2x512xf32> to vector<2x512xf32>
    %188 = arith.addf %187, %184 : vector<2x512xf32>
    %189 = vector.extract_strided_slice %188 {offsets = [0, 0], sizes = [2, 128], strides = [1, 1]} : vector<2x512xf32> to vector<2x128xf32>
    %190 = arith.negf %189 : vector<2x128xf32>
    %191 = math.exp %190 : vector<2x128xf32>
    %cst_57 = arith.constant 1.000000e+00 : f32
    %192 = vector.broadcast %cst_57 : f32 to vector<2x128xf32>
    %193 = arith.addf %192, %191 : vector<2x128xf32>
    %194 = arith.divf %192, %193 : vector<2x128xf32>
    %195 = vector.extract_strided_slice %188 {offsets = [0, 128], sizes = [2, 128], strides = [1, 1]} : vector<2x512xf32> to vector<2x128xf32>
    %196 = arith.negf %195 : vector<2x128xf32>
    %197 = math.exp %196 : vector<2x128xf32>
    %cst_58 = arith.constant 1.000000e+00 : f32
    %198 = vector.broadcast %cst_58 : f32 to vector<2x128xf32>
    %199 = arith.addf %198, %197 : vector<2x128xf32>
    %200 = arith.divf %198, %199 : vector<2x128xf32>
    %201 = vector.extract_strided_slice %188 {offsets = [0, 256], sizes = [2, 128], strides = [1, 1]} : vector<2x512xf32> to vector<2x128xf32>
    %202 = math.tanh %201 : vector<2x128xf32>
    %203 = vector.extract_strided_slice %188 {offsets = [0, 384], sizes = [2, 128], strides = [1, 1]} : vector<2x512xf32> to vector<2x128xf32>
    %204 = arith.negf %203 : vector<2x128xf32>
    %205 = math.exp %204 : vector<2x128xf32>
    %cst_59 = arith.constant 1.000000e+00 : f32
    %206 = vector.broadcast %cst_59 : f32 to vector<2x128xf32>
    %207 = arith.addf %206, %205 : vector<2x128xf32>
    %208 = arith.divf %206, %207 : vector<2x128xf32>
    %209 = arith.mulf %200, %175 : vector<2x128xf32>
    %210 = arith.mulf %194, %202 : vector<2x128xf32>
    %211 = arith.addf %209, %210 : vector<2x128xf32>
    %212 = math.tanh %211 : vector<2x128xf32>
    %213 = arith.mulf %208, %212 : vector<2x128xf32>
    %214 = arith.index_cast %c5_i32 : i32 to index
    %c0_60 = arith.constant 0 : index
    %c0_61 = arith.constant 0 : index
    %215 = vector.load %arg4[%214, %c0_60, %c0_61] : memref<7x2x128xf32, #tpu.memory_space<vmem>>, vector<1x2x128xf32>
    %216 = vector.shape_cast %215 : vector<1x2x128xf32> to vector<2x128xf32>
    %217 = vector.shape_cast %213 : vector<2x128xf32> to vector<1x2x128xf32>
    tpu.vector_store %arg4[%214, %c0_60, %c0_61], %217 {strides = array<i32>} : memref<7x2x128xf32, #tpu.memory_space<vmem>>, vector<1x2x128xf32>,
    %c6_i32 = arith.constant 6 : i32
    %218 = arith.truncf %213 : vector<2x128xf32> to vector<2x128xbf16>
    %c0_62 = arith.constant 0 : index
    %c0_63 = arith.constant 0 : index
    %219 = vector.load %arg1[%c0_62, %c0_63] : memref<128x512xbf16, #tpu.memory_space<vmem>>, vector<128x512xbf16>
    %cst_64 = arith.constant dense<0.000000e+00> : vector<2x512xf32>
    %220 = tpu.matmul %218, %219, %cst_64 {dimension_numbers = #tpu.dot_dimension_numbers<[1], [0], [0], [1], [0, 0, 1, 1], [], []>} : vector<2x128xbf16>, vector<128x512xbf16>, vector<2x512xf32> -> vector<2x512xf32>
    %221 = arith.index_cast %c6_i32 : i32 to index
    %c0_65 = arith.constant 0 : index
    %c0_66 = arith.constant 0 : index
    %222 = vector.load %arg0[%221, %c0_65, %c0_66] : memref<7x2x512xf32, #tpu.memory_space<vmem>>, vector<1x2x512xf32>
    %223 = vector.shape_cast %222 : vector<1x2x512xf32> to vector<2x512xf32>
    %224 = arith.addf %223, %220 : vector<2x512xf32>
    %225 = vector.extract_strided_slice %224 {offsets = [0, 0], sizes = [2, 128], strides = [1, 1]} : vector<2x512xf32> to vector<2x128xf32>
    %226 = arith.negf %225 : vector<2x128xf32>
    %227 = math.exp %226 : vector<2x128xf32>
    %cst_67 = arith.constant 1.000000e+00 : f32
    %228 = vector.broadcast %cst_67 : f32 to vector<2x128xf32>
    %229 = arith.addf %228, %227 : vector<2x128xf32>
    %230 = arith.divf %228, %229 : vector<2x128xf32>
    %231 = vector.extract_strided_slice %224 {offsets = [0, 128], sizes = [2, 128], strides = [1, 1]} : vector<2x512xf32> to vector<2x128xf32>
    %232 = arith.negf %231 : vector<2x128xf32>
    %233 = math.exp %232 : vector<2x128xf32>
    %cst_68 = arith.constant 1.000000e+00 : f32
    %234 = vector.broadcast %cst_68 : f32 to vector<2x128xf32>
    %235 = arith.addf %234, %233 : vector<2x128xf32>
    %236 = arith.divf %234, %235 : vector<2x128xf32>
    %237 = vector.extract_strided_slice %224 {offsets = [0, 256], sizes = [2, 128], strides = [1, 1]} : vector<2x512xf32> to vector<2x128xf32>
    %238 = math.tanh %237 : vector<2x128xf32>
    %239 = vector.extract_strided_slice %224 {offsets = [0, 384], sizes = [2, 128], strides = [1, 1]} : vector<2x512xf32> to vector<2x128xf32>
    %240 = arith.negf %239 : vector<2x128xf32>
    %241 = math.exp %240 : vector<2x128xf32>
    %cst_69 = arith.constant 1.000000e+00 : f32
    %242 = vector.broadcast %cst_69 : f32 to vector<2x128xf32>
    %243 = arith.addf %242, %241 : vector<2x128xf32>
    %244 = arith.divf %242, %243 : vector<2x128xf32>
    %245 = arith.mulf %236, %211 : vector<2x128xf32>
    %246 = arith.mulf %230, %238 : vector<2x128xf32>
    %247 = arith.addf %245, %246 : vector<2x128xf32>
    %248 = math.tanh %247 : vector<2x128xf32>
    %249 = arith.mulf %244, %248 : vector<2x128xf32>
    %250 = arith.index_cast %c6_i32 : i32 to index
    %c0_70 = arith.constant 0 : index
    %c0_71 = arith.constant 0 : index
    %251 = vector.load %arg4[%250, %c0_70, %c0_71] : memref<7x2x128xf32, #tpu.memory_space<vmem>>, vector<1x2x128xf32>
    %252 = vector.shape_cast %251 : vector<1x2x128xf32> to vector<2x128xf32>
    %253 = vector.shape_cast %249 : vector<2x128xf32> to vector<1x2x128xf32>
    tpu.vector_store %arg4[%250, %c0_70, %c0_71], %253 {strides = array<i32>} : memref<7x2x128xf32, #tpu.memory_space<vmem>>, vector<1x2x128xf32>,
    %c7_i32 = arith.constant 7 : i32
    %c0_72 = arith.constant 0 : index
    %c0_73 = arith.constant 0 : index
    %254 = vector.load %arg5[%c0_72, %c0_73] : memref<2x128xf32, #tpu.memory_space<vmem>>, vector<2x128xf32>
    tpu.vector_store %arg5[%c0_72, %c0_73], %249 {strides = array<i32>} : memref<2x128xf32, #tpu.memory_space<vmem>>, vector<2x128xf32>,
    %c0_74 = arith.constant 0 : index
    %c0_75 = arith.constant 0 : index
    %255 = vector.load %arg6[%c0_74, %c0_75] : memref<2x128xf32, #tpu.memory_space<vmem>>, vector<2x128xf32>
    tpu.vector_store %arg6[%c0_74, %c0_75], %247 {strides = array<i32>} : memref<2x128xf32, #tpu.memory_space<vmem>>, vector<2x128xf32>,
    return
  }
}

module attributes {stable_mosaic.version = 11 : i64} {
  func.func @_ce_kernel(%arg0: i32, %arg1: memref<16x128xf32, #tpu.memory_space<vmem>>, %arg2: memref<128x40xf32, #tpu.memory_space<vmem>>, %arg3: memref<1x40xf32, #tpu.memory_space<vmem>>, %arg4: memref<16x1xi32, #tpu.memory_space<vmem>>, %arg5: memref<16x1xf32, #tpu.memory_space<vmem>>) attributes {dimension_semantics = [#tpu.dimension_semantics<parallel>], iteration_bounds = array<i64: 1>, scalar_prefetch = 0 : i64, scratch_operands = 0 : i64, tpu.core_type = #tpu.core_type<tc>, window_params = [{transform_indices = @transform_0, window_bounds = array<i64: 16, 128>}, {pipeline_mode = #tpu.pipeline_mode<synchronous>, transform_indices = @transform_1, window_bounds = array<i64: 128, 40>}, {pipeline_mode = #tpu.pipeline_mode<synchronous>, transform_indices = @transform_2, window_bounds = array<i64: 1, 40>}, {transform_indices = @transform_3, window_bounds = array<i64: 16, 1>}, {transform_indices = @transform_4, window_bounds = array<i64: 16, 1>}]} {
    %c0 = arith.constant 0 : index
    %c0_0 = arith.constant 0 : index
    %0 = vector.load %arg1[%c0, %c0_0] : memref<16x128xf32, #tpu.memory_space<vmem>>, vector<16x128xf32>
    %c0_1 = arith.constant 0 : index
    %c0_2 = arith.constant 0 : index
    %1 = vector.load %arg2[%c0_1, %c0_2] : memref<128x40xf32, #tpu.memory_space<vmem>>, vector<128x40xf32>
    %cst = arith.constant dense<0.000000e+00> : vector<16x40xf32>
    %2 = tpu.matmul %0, %1, %cst {dimension_numbers = #tpu.dot_dimension_numbers<[1], [0], [0], [1], [0, 0, 1, 1], [], []>} : vector<16x128xf32>, vector<128x40xf32>, vector<16x40xf32> -> vector<16x40xf32>
    %c0_3 = arith.constant 0 : index
    %c0_4 = arith.constant 0 : index
    %3 = vector.load %arg3[%c0_3, %c0_4] : memref<1x40xf32, #tpu.memory_space<vmem>>, vector<1x40xf32>
    %4 = vector.broadcast %3 : vector<1x40xf32> to vector<16x40xf32>
    %5 = arith.addf %2, %4 : vector<16x40xf32>
    %cst_5 = arith.constant dense<0xFF800000> : vector<16xf32>
    %6 = vector.multi_reduction <maximumf>, %5, %cst_5 [1] : vector<16x40xf32> to vector<16xf32>
    %7 = vector.shape_cast %6 : vector<16xf32> to vector<16x1xf32>
    %8 = vector.broadcast %7 : vector<16x1xf32> to vector<16x40xf32>
    %9 = arith.subf %5, %8 : vector<16x40xf32>
    %10 = math.exp %9 : vector<16x40xf32>
    %cst_6 = arith.constant dense<0.000000e+00> : vector<16xf32>
    %11 = vector.multi_reduction <add>, %10, %cst_6 [1] : vector<16x40xf32> to vector<16xf32>
    %12 = vector.shape_cast %11 : vector<16xf32> to vector<16x1xf32>
    %13 = math.log %12 : vector<16x1xf32>
    %14 = arith.addf %13, %7 : vector<16x1xf32>
    %15 = tpu.iota {dimensions = array<i32: 1>} : vector<16x40xi32>
    %c0_7 = arith.constant 0 : index
    %c0_8 = arith.constant 0 : index
    %16 = vector.load %arg4[%c0_7, %c0_8] : memref<16x1xi32, #tpu.memory_space<vmem>>, vector<16x1xi32>
    %17 = vector.broadcast %16 : vector<16x1xi32> to vector<16x40xi32>
    %18 = arith.cmpi eq, %15, %17 : vector<16x40xi32>
    %cst_9 = arith.constant 0.000000e+00 : f32
    %19 = vector.broadcast %cst_9 : f32 to vector<16x40xf32>
    %20 = arith.select %18, %5, %19 : vector<16x40xi1>, vector<16x40xf32>
    %cst_10 = arith.constant dense<0.000000e+00> : vector<16xf32>
    %21 = vector.multi_reduction <add>, %20, %cst_10 [1] : vector<16x40xf32> to vector<16xf32>
    %22 = vector.shape_cast %21 : vector<16xf32> to vector<16x1xf32>
    %23 = tpu.iota {dimensions = array<i32: 0>} : vector<16x1xi32>
    %c16_i32 = arith.constant 16 : i32
    %24 = arith.muli %arg0, %c16_i32 : i32
    %25 = vector.broadcast %24 : i32 to vector<16x1xi32>
    %26 = arith.addi %23, %25 : vector<16x1xi32>
    %c14_i32 = arith.constant 14 : i32
    %27 = vector.broadcast %c14_i32 : i32 to vector<16x1xi32>
    %28 = arith.cmpi slt, %26, %27 : vector<16x1xi32>
    %29 = arith.subf %14, %22 : vector<16x1xf32>
    %cst_11 = arith.constant 0.000000e+00 : f32
    %30 = vector.broadcast %cst_11 : f32 to vector<16x1xf32>
    %31 = arith.select %28, %29, %30 : vector<16x1xi1>, vector<16x1xf32>
    %c0_12 = arith.constant 0 : index
    %c0_13 = arith.constant 0 : index
    %32 = vector.load %arg5[%c0_12, %c0_13] : memref<16x1xf32, #tpu.memory_space<vmem>>, vector<16x1xf32>
    tpu.vector_store %arg5[%c0_12, %c0_13], %31 {strides = array<i32>} : memref<16x1xf32, #tpu.memory_space<vmem>>, vector<16x1xf32>,
    return
  }
  func.func @transform_0(%arg0: i32) -> (i32, i32) {
    %c0_i32 = arith.constant 0 : i32
    %c0_i32_0 = arith.constant 0 : i32
    return %arg0, %c0_i32 : i32, i32
  }
  func.func @transform_1(%arg0: i32) -> (i32, i32) {
    %c0_i32 = arith.constant 0 : i32
    %c0_i32_0 = arith.constant 0 : i32
    %c0_i32_1 = arith.constant 0 : i32
    return %c0_i32, %c0_i32_0 : i32, i32
  }
  func.func @transform_2(%arg0: i32) -> (i32, i32) {
    %c0_i32 = arith.constant 0 : i32
    %c0_i32_0 = arith.constant 0 : i32
    %c0_i32_1 = arith.constant 0 : i32
    return %c0_i32, %c0_i32_0 : i32, i32
  }
  func.func @transform_3(%arg0: i32) -> (i32, i32) {
    %c0_i32 = arith.constant 0 : i32
    %c0_i32_0 = arith.constant 0 : i32
    return %arg0, %c0_i32 : i32, i32
  }
  func.func @transform_4(%arg0: i32) -> (i32, i32) {
    %c0_i32 = arith.constant 0 : i32
    %c0_i32_0 = arith.constant 0 : i32
    return %arg0, %c0_i32 : i32, i32
  }
}

</mosaic_0001>

<bundles_post_ra>
// kernel: seq2seq_forward.7
= control target key start
LH: loop header
LB: loop body
LE: loop exit
PB: predicated region body
PF: predicated region fallthrough
CT: control target
= control target key end

     0   :  { %vm80_vm0 = vcmask 261120   ;;  %s302_s1 = inlined_call_operand.vmem [shape: bf16[32,512], index: 1, kind: input, shape index: {}]   ;;  %s303_s0 = inlined_call_operand.vmem [shape: bf16[14,32], index: 0, kind: input, shape index: {}]   ;;  %s304_s2 = inlined_call_operand.vmem [shape: f32[1,512], index: 2, kind: input, shape index: {}]   ;;  %s305_s3 = inlined_call_operand.vmem [shape: f32[14,512], index: 3, kind: output, shape index: {}]  }
   0x1   :  { %v174_v0 = vld [vmem:[%s302_s1 + $0x20] sm:$0xf]  ;;  %v199_v1 = vld [vmem:[%s302_s1 + $0x2c] sm:$0xf0]  ;;  %v197_v2 = vld [vmem:[%s302_s1 + $0x24] sm:$0xf] }
   0x2   :  { %v175_v3 = vor.u32 %v199_v1, %v174_v0  ;;  %v176_v4 = vld [vmem:[%s302_s1 + $0x30] sm:$0xf0]  ;;  %v182_v5 = vld [vmem:[%s302_s1 + $0x28] sm:$0xf]  ;;  %v200_v6 = vld [vmem:[%s302_s1 + $0x34] sm:$0xf0] }
   0x3   :  { %v179_v7 = vor.u32 %v197_v2, %v176_v4  ;;  %v183_v8 = vor.u32 %v200_v6, %v182_v5  ;;  %v198_v9 = vld [vmem:[%s302_s1 + $0x2c] sm:$0xf]  ;;  %v184_v10 = vld [vmem:[%s302_s1 + $0x38] sm:$0xf0]  ;;  %v158_v11 = vld [vmem:[%s302_s1] sm:$0xf] }
   0x4   :  { %90 = vmatpush.bf16.msra.mxu0 %v175_v3  ;;  %v187_v12 = vor.u32 %v198_v9, %v184_v10  ;;  %v195_v13 = vld [vmem:[%s302_s1 + $0xc] sm:$0xf0]  ;;  %v193_v14 = vld [vmem:[%s302_s1 + $0x4] sm:$0xf]  ;;  %v160_v15 = vld [vmem:[%s302_s1 + $0x10] sm:$0xf0] }
   0x5   :  { %104 = vmatpush.bf16.msra.mxu1 %v179_v7  ;;  %118 = vmatpush.bf16.msra.mxu2 %v183_v8  ;;  %v159_v16 = vor.u32 %v195_v13, %v158_v11  ;;  %v163_v17 = vor.u32 %v193_v14, %v160_v15  ;;  %v166_v18 = vld [vmem:[%s302_s1 + $0x8] sm:$0xf]  ;;  %v196_v19 = vld [vmem:[%s302_s1 + $0x14] sm:$0xf0]  ;;  %v194_v20 = vld [vmem:[%s302_s1 + $0xc] sm:$0xf] }
   0x6   :  { %132 = vmatpush.bf16.msra.mxu3 %v187_v12  ;;  %v167_v21 = vor.u32 %v196_v19, %v166_v18  ;;  %v168_v22 = vld [vmem:[%s302_s1 + $0x18] sm:$0xf0]  ;;  %v154_v23 = vld [vmem:[%s303_s0] sm:$0xf]  ;;  %v192_v24 = vld [vmem:[%s303_s0] sm:$0x70] }
   0x7   :  { %v171_v25 = vor.u32 %v194_v20, %v168_v22  ;;  %v155_v26 = vor.u32 %v192_v24, %v154_v23  ;;  %v25_v27 = vld [vmem:[%s304_s2] sm:$0xf] }
   0x8   :  { %91 = vmatpush.bf16.msra.mxu0 %v159_v16  ;;  %v27_v28 = vperm.slane %v25_v27, 0  ;;  %v28_v29 = vperm.slane %v25_v27, 1  ;;  %v29_v34 = vperm.slane %v25_v27, 2  ;;  %v30_v35 = vperm.slane %v25_v27, 3 }
   0x9   :  { %105 = vmatpush.bf16.msra.mxu1 %v163_v17  ;;  %119 = vmatpush.bf16.msra.mxu2 %v167_v21 }
   0xa   :  { %133 = vmatpush.bf16.msra.mxu3 %v171_v25 }
   0xb   :  { %188 = vmatmul.msk.bf16.vlgmr.msra.gmra.mxu0 %vm80_vm0, %v155_v26 }
   0xc   :  { %189 = vmatmul.msk.bf16.vlgmr.msra.gmra.mxu1 %vm80_vm0, %v155_v26  ;;  %190 = vmatmul.msk.bf16.vlgmr.msra.gmra.mxu2 %vm80_vm0, %v155_v26 }
   0xd   :  { %191 = vmatmul.msk.bf16.vlgmr.msra.gmra.mxu3 %vm80_vm0, %v155_v26 }
  0x88   :  { %v93_v30 = vpop.f32.mrf.mxu0 }
  0x89   :  { %v94_v31 = vadd.f32 %v93_v30, %v27_v28  ;;  %v107_v32 = vpop.f32.mrf.mxu1 }
  0x8a   :  { %v108_v33 = vadd.f32 %v107_v32, %v28_v29 }
  0x8b   :  { %140 = vst [vmem:[%s305_s3] sm:$0xff] %v94_v31 }
  0x8c   :  { %141 = vst [vmem:[%s305_s3 + $0x8] sm:$0xff] %v108_v33 }
  0x8f   :  { %v121_v36 = vpop.f32.mrf.mxu2 }
  0x90   :  { %v122_v37 = vadd.f32 %v121_v36, %v29_v34  ;;  %v135_v38 = vpop.f32.mrf.mxu3  ;;  %v95_v39 = vpop.f32.mrf.mxu0 }
  0x91   :  { %v136_v40 = vadd.f32 %v135_v38, %v30_v35  ;;  %v96_v41 = vadd.f32 %v95_v39, %v27_v28  ;;  %v109_v42 = vpop.f32.mrf.mxu1 }
  0x92   :  { %142 = vst [vmem:[%s305_s3 + $0x10] sm:$0xff] %v122_v37  ;;  %v110_v43 = vadd.f32 %v109_v42, %v28_v29 }
  0x93   :  { %143 = vst [vmem:[%s305_s3 + $0x18] sm:$0xff] %v136_v40 }
  0x94   :  { %144 = vst [vmem:[%s305_s3 + $0x20] sm:$0x3f] %v96_v41 }
  0x95   :  { %145 = vst [vmem:[%s305_s3 + $0x28] sm:$0x3f] %v110_v43 }
  0x97   :  { %v123_v44 = vpop.f32.mrf.mxu2 }
  0x98   :  { %v124_v45 = vadd.f32 %v123_v44, %v29_v34  ;;  %v137_v46 = vpop.f32.mrf.mxu3 }
  0x99   :  { %v138_v47 = vadd.f32 %v137_v46, %v30_v35 }
  0x9a   :  { %146 = vst [vmem:[%s305_s3 + $0x30] sm:$0x3f] %v124_v45 }
  0x9b   :  { %147 = vst [vmem:[%s305_s3 + $0x38] sm:$0x3f] %v138_v47 }

// kernel: seq2seq_forward.5
= control target key start
LH: loop header
LB: loop body
LE: loop exit
PB: predicated region body
PF: predicated region fallthrough
CT: control target
= control target key end

     0   :  { %vm80_vm0 = vcmask 261120   ;;  %s299_s1 = inlined_call_operand.vmem [shape: bf16[32,512], index: 1, kind: input, shape index: {}]   ;;  %s300_s0 = inlined_call_operand.vmem [shape: bf16[16,32], index: 0, kind: input, shape index: {}]   ;;  %s301_s2 = inlined_call_operand.vmem [shape: f32[1,512], index: 2, kind: input, shape index: {}]   ;;  %s302_s3 = inlined_call_operand.vmem [shape: f32[16,512], index: 3, kind: output, shape index: {}]  }
   0x1   :  { %v174_v0 = vld [vmem:[%s299_s1 + $0x20] sm:$0xf]  ;;  %v199_v1 = vld [vmem:[%s299_s1 + $0x2c] sm:$0xf0]  ;;  %v197_v2 = vld [vmem:[%s299_s1 + $0x24] sm:$0xf] }
   0x2   :  { %v175_v3 = vor.u32 %v199_v1, %v174_v0  ;;  %v176_v4 = vld [vmem:[%s299_s1 + $0x30] sm:$0xf0]  ;;  %v182_v5 = vld [vmem:[%s299_s1 + $0x28] sm:$0xf]  ;;  %v200_v6 = vld [vmem:[%s299_s1 + $0x34] sm:$0xf0] }
   0x3   :  { %v179_v7 = vor.u32 %v197_v2, %v176_v4  ;;  %v183_v8 = vor.u32 %v200_v6, %v182_v5  ;;  %v198_v9 = vld [vmem:[%s299_s1 + $0x2c] sm:$0xf]  ;;  %v184_v10 = vld [vmem:[%s299_s1 + $0x38] sm:$0xf0]  ;;  %v158_v11 = vld [vmem:[%s299_s1] sm:$0xf] }
   0x4   :  { %90 = vmatpush.bf16.msra.mxu0 %v175_v3  ;;  %v187_v12 = vor.u32 %v198_v9, %v184_v10  ;;  %v195_v13 = vld [vmem:[%s299_s1 + $0xc] sm:$0xf0]  ;;  %v193_v14 = vld [vmem:[%s299_s1 + $0x4] sm:$0xf]  ;;  %v160_v15 = vld [vmem:[%s299_s1 + $0x10] sm:$0xf0] }
   0x5   :  { %104 = vmatpush.bf16.msra.mxu1 %v179_v7  ;;  %118 = vmatpush.bf16.msra.mxu2 %v183_v8  ;;  %v159_v16 = vor.u32 %v195_v13, %v158_v11  ;;  %v163_v17 = vor.u32 %v193_v14, %v160_v15  ;;  %v166_v18 = vld [vmem:[%s299_s1 + $0x8] sm:$0xf]  ;;  %v196_v19 = vld [vmem:[%s299_s1 + $0x14] sm:$0xf0]  ;;  %v194_v20 = vld [vmem:[%s299_s1 + $0xc] sm:$0xf] }
   0x6   :  { %132 = vmatpush.bf16.msra.mxu3 %v187_v12  ;;  %v167_v21 = vor.u32 %v196_v19, %v166_v18  ;;  %v168_v22 = vld [vmem:[%s299_s1 + $0x18] sm:$0xf0]  ;;  %v192_v24 = vld [vmem:[%s300_s0] sm:$0xff] }
   0x7   :  { %v171_v23 = vor.u32 %v194_v20, %v168_v22  ;;  %v25_v25 = vld [vmem:[%s301_s2] sm:$0xf] }
   0x8   :  { %91 = vmatpush.bf16.msra.mxu0 %v159_v16  ;;  %v27_v26 = vperm.slane %v25_v25, 0  ;;  %v28_v27 = vperm.slane %v25_v25, 1  ;;  %v29_v32 = vperm.slane %v25_v25, 2  ;;  %v30_v33 = vperm.slane %v25_v25, 3 }
   0x9   :  { %105 = vmatpush.bf16.msra.mxu1 %v163_v17  ;;  %119 = vmatpush.bf16.msra.mxu2 %v167_v21 }
   0xa   :  { %133 = vmatpush.bf16.msra.mxu3 %v171_v23 }
   0xb   :  { %188 = vmatmul.msk.bf16.vlgmr.msra.gmra.mxu0 %vm80_vm0, %v192_v24 }
   0xc   :  { %189 = vmatmul.msk.bf16.vlgmr.msra.gmra.mxu1 %vm80_vm0, %v192_v24  ;;  %190 = vmatmul.msk.bf16.vlgmr.msra.gmra.mxu2 %vm80_vm0, %v192_v24 }
   0xd   :  { %191 = vmatmul.msk.bf16.vlgmr.msra.gmra.mxu3 %vm80_vm0, %v192_v24 }
  0x88   :  { %v93_v28 = vpop.f32.mrf.mxu0 }
  0x89   :  { %v94_v29 = vadd.f32 %v93_v28, %v27_v26  ;;  %v107_v30 = vpop.f32.mrf.mxu1 }
  0x8a   :  { %v108_v31 = vadd.f32 %v107_v30, %v28_v27 }
  0x8b   :  { %140 = vst [vmem:[%s302_s3] sm:$0xff] %v94_v29 }
  0x8c   :  { %141 = vst [vmem:[%s302_s3 + $0x8] sm:$0xff] %v108_v31 }
  0x8f   :  { %v121_v34 = vpop.f32.mrf.mxu2 }
  0x90   :  { %v122_v35 = vadd.f32 %v121_v34, %v29_v32  ;;  %v135_v36 = vpop.f32.mrf.mxu3  ;;  %v95_v37 = vpop.f32.mrf.mxu0 }
  0x91   :  { %v136_v38 = vadd.f32 %v135_v36, %v30_v33  ;;  %v96_v39 = vadd.f32 %v95_v37, %v27_v26  ;;  %v109_v40 = vpop.f32.mrf.mxu1 }
  0x92   :  { %142 = vst [vmem:[%s302_s3 + $0x10] sm:$0xff] %v122_v35  ;;  %v110_v41 = vadd.f32 %v109_v40, %v28_v27 }
  0x93   :  { %143 = vst [vmem:[%s302_s3 + $0x18] sm:$0xff] %v136_v38 }
  0x94   :  { %144 = vst [vmem:[%s302_s3 + $0x20] sm:$0xff] %v96_v39 }
  0x95   :  { %145 = vst [vmem:[%s302_s3 + $0x28] sm:$0xff] %v110_v41 }
  0x97   :  { %v123_v42 = vpop.f32.mrf.mxu2 }
  0x98   :  { %v124_v43 = vadd.f32 %v123_v42, %v29_v32  ;;  %v137_v44 = vpop.f32.mrf.mxu3 }
  0x99   :  { %v138_v45 = vadd.f32 %v137_v44, %v30_v33 }
  0x9a   :  { %146 = vst [vmem:[%s302_s3 + $0x30] sm:$0xff] %v124_v43 }
  0x9b   :  { %147 = vst [vmem:[%s302_s3 + $0x38] sm:$0xff] %v138_v45 }

// kernel: seq2seq_forward.8
= control target key start
LH: loop header
LB: loop body
LE: loop exit
PB: predicated region body
PF: predicated region fallthrough
CT: control target
= control target key end

     0   :  { %12 = vsyncpa [#allocation3], 0  ;;  %s5215_s0 = inlined_call_operand.vmem [shape: f32[7,2,512], index: 0, kind: input, shape index: {}]   ;;  %s5216_s1 = inlined_call_operand.vmem [shape: bf16[128,512], index: 1, kind: input, shape index: {}]   ;;  %s5217_s2 = inlined_call_operand.vmem [shape: f32[2,128], index: 2, kind: input, shape index: {}]   ;;  %s5218_s3 = inlined_call_operand.vmem [shape: f32[2,128], index: 3, kind: input, shape index: {}]   ;;  %s5219_s4 = inlined_call_operand.vmem [shape: f32[7,2,128], index: 4, kind: output, shape index: {0}]   ;;  %s5220_s5 = inlined_call_operand.hbm [shape: f32[2,128], index: 5, kind: output, shape index: {1}]   ;;  %s5221_s6 = inlined_call_operand.hbm [shape: f32[2,128], index: 6, kind: output, shape index: {2}]  }
   0x1   :  { %v2494_v0 = vld [vmem:[%s5216_s1 + $0xe0] sm:$0xf]  ;;  %v3339_v1 = vld [vmem:[%s5216_s1 + $0xec] sm:$0xf0]  ;;  %v3337_v2 = vld [vmem:[%s5216_s1 + $0xe4] sm:$0xf] }
   0x2   :  { %v2495_v3 = vor.u32 %v3339_v1, %v2494_v0  ;;  %v2496_v4 = vld [vmem:[%s5216_s1 + $0xf0] sm:$0xf0]  ;;  %v2502_v5 = vld [vmem:[%s5216_s1 + $0xe8] sm:$0xf]  ;;  %v3340_v6 = vld [vmem:[%s5216_s1 + $0xf4] sm:$0xf0] }
   0x3   :  { %v2499_v7 = vor.u32 %v3337_v2, %v2496_v4  ;;  %v2503_v8 = vor.u32 %v3340_v6, %v2502_v5  ;;  %v3338_v9 = vld [vmem:[%s5216_s1 + $0xec] sm:$0xf]  ;;  %v2504_v10 = vld [vmem:[%s5216_s1 + $0xf8] sm:$0xf0]  ;;  %v2478_v11 = vld [vmem:[%s5216_s1 + $0xc0] sm:$0xf] }
   0x4   :  { %217 = vmatpush.bf16.msra.mxu0 %v2495_v3  ;;  %v2507_v12 = vor.u32 %v3338_v9, %v2504_v10  ;;  %v3335_v13 = vld [vmem:[%s5216_s1 + $0xcc] sm:$0xf0]  ;;  %v3333_v14 = vld [vmem:[%s5216_s1 + $0xc4] sm:$0xf]  ;;  %v2480_v15 = vld [vmem:[%s5216_s1 + $0xd0] sm:$0xf0] }
   0x5   :  { %230 = vmatpush.bf16.msra.mxu1 %v2499_v7  ;;  %243 = vmatpush.bf16.msra.mxu2 %v2503_v8  ;;  %v2479_v16 = vor.u32 %v3335_v13, %v2478_v11  ;;  %v2483_v17 = vor.u32 %v3333_v14, %v2480_v15  ;;  %v2486_v18 = vld [vmem:[%s5216_s1 + $0xc8] sm:$0xf]  ;;  %v3336_v19 = vld [vmem:[%s5216_s1 + $0xd4] sm:$0xf0]  ;;  %v3334_v20 = vld [vmem:[%s5216_s1 + $0xcc] sm:$0xf] }
   0x6   :  { %256 = vmatpush.bf16.msra.mxu3 %v2507_v12  ;;  %v2487_v21 = vor.u32 %v3336_v19, %v2486_v18  ;;  %v2488_v22 = vld [vmem:[%s5216_s1 + $0xd8] sm:$0xf0]  ;;  %v2462_v23 = vld [vmem:[%s5216_s1 + $0xa0] sm:$0xf]  ;;  %v3331_v24 = vld [vmem:[%s5216_s1 + $0xac] sm:$0xf0] }
   0x7   :  { %v2491_v25 = vor.u32 %v3334_v20, %v2488_v22  ;;  %v3329_v26 = vld [vmem:[%s5216_s1 + $0xa4] sm:$0xf]  ;;  %v2464_v27 = vld [vmem:[%s5216_s1 + $0xb0] sm:$0xf0]  ;;  %v2470_v28 = vld [vmem:[%s5216_s1 + $0xa8] sm:$0xf]  ;;  %v2463_v29 = vor.u32 %v3331_v24, %v2462_v23 }
   0x8   :  { %218 = vmatpush.bf16.msra.mxu0 %v2479_v16  ;;  %v3332_v30 = vld [vmem:[%s5216_s1 + $0xb4] sm:$0xf0]  ;;  %v3330_v31 = vld [vmem:[%s5216_s1 + $0xac] sm:$0xf]  ;;  %v2472_v32 = vld [vmem:[%s5216_s1 + $0xb8] sm:$0xf0]  ;;  %v2467_v33 = vor.u32 %v3329_v26, %v2464_v27 }
   0x9   :  { %231 = vmatpush.bf16.msra.mxu1 %v2483_v17  ;;  %244 = vmatpush.bf16.msra.mxu2 %v2487_v21  ;;  %v2471_v34 = vor.u32 %v3332_v30, %v2470_v28  ;;  %v2446_v35 = vld [vmem:[%s5216_s1 + $0x80] sm:$0xf]  ;;  %v3327_v36 = vld [vmem:[%s5216_s1 + $0x8c] sm:$0xf0]  ;;  %v3325_v37 = vld [vmem:[%s5216_s1 + $0x84] sm:$0xf]  ;;  %v2475_v38 = vor.u32 %v3330_v31, %v2472_v32 }
   0xa   :  { %257 = vmatpush.bf16.msra.mxu3 %v2491_v25  ;;  %v2448_v39 = vld [vmem:[%s5216_s1 + $0x90] sm:$0xf0]  ;;  %v2454_v40 = vld [vmem:[%s5216_s1 + $0x88] sm:$0xf]  ;;  %v3328_v41 = vld [vmem:[%s5216_s1 + $0x94] sm:$0xf0]  ;;  %v2447_v44 = vor.u32 %v3327_v36, %v2446_v35 }
   0xb   :  { %v3326_v42 = vld [vmem:[%s5216_s1 + $0x8c] sm:$0xf]  ;;  %v2456_v43 = vld [vmem:[%s5216_s1 + $0x98] sm:$0xf0]  ;;  %v2451_v45 = vor.u32 %v3325_v37, %v2448_v39  ;;  %v2455_v46 = vor.u32 %v3328_v41, %v2454_v40  ;;  %v2430_v47 = vld [vmem:[%s5216_s1 + $0x60] sm:$0xf] }
   0xc   :  { %219 = vmatpush.bf16.msra.mxu0 %v2463_v29  ;;  %v3323_v48 = vld [vmem:[%s5216_s1 + $0x6c] sm:$0xf0]  ;;  %v3321_v49 = vld [vmem:[%s5216_s1 + $0x64] sm:$0xf]  ;;  %v2459_v50 = vor.u32 %v3326_v42, %v2456_v43  ;;  %v2432_v51 = vld [vmem:[%s5216_s1 + $0x70] sm:$0xf0] }
   0xd   :  { %232 = vmatpush.bf16.msra.mxu1 %v2467_v33  ;;  %245 = vmatpush.bf16.msra.mxu2 %v2471_v34  ;;  %v2438_v52 = vld [vmem:[%s5216_s1 + $0x68] sm:$0xf]  ;;  %v3324_v53 = vld [vmem:[%s5216_s1 + $0x74] sm:$0xf0]  ;;  %v3322_v54 = vld [vmem:[%s5216_s1 + $0x6c] sm:$0xf]  ;;  %v2431_v56 = vor.u32 %v3323_v48, %v2430_v47  ;;  %v2435_v57 = vor.u32 %v3321_v49, %v2432_v51 }
   0xe   :  { %258 = vmatpush.bf16.msra.mxu3 %v2475_v38  ;;  %v2440_v55 = vld [vmem:[%s5216_s1 + $0x78] sm:$0xf0]  ;;  %v2439_v58 = vor.u32 %v3324_v53, %v2438_v52  ;;  %v2414_v59 = vld [vmem:[%s5216_s1 + $0x40] sm:$0xf]  ;;  %v3319_v60 = vld [vmem:[%s5216_s1 + $0x4c] sm:$0xf0] }
   0xf   :  { %v3317_v61 = vld [vmem:[%s5216_s1 + $0x44] sm:$0xf]  ;;  %v2443_v62 = vor.u32 %v3322_v54, %v2440_v55  ;;  %v2416_v63 = vld [vmem:[%s5216_s1 + $0x50] sm:$0xf0]  ;;  %v2422_v0 = vld [vmem:[%s5216_s1 + $0x48] sm:$0xf]  ;;  %v2415_v4 = vor.u32 %v3319_v60, %v2414_v59 }
  0x10   :  { %220 = vmatpush.bf16.msra.mxu0 %v2447_v44  ;;  %v3320_v1 = vld [vmem:[%s5216_s1 + $0x54] sm:$0xf0]  ;;  %v3318_v2 = vld [vmem:[%s5216_s1 + $0x4c] sm:$0xf]  ;;  %v2424_v3 = vld [vmem:[%s5216_s1 + $0x58] sm:$0xf0]  ;;  %v2419_v6 = vor.u32 %v3317_v61, %v2416_v63 }
  0x11   :  { %233 = vmatpush.bf16.msra.mxu1 %v2451_v45  ;;  %246 = vmatpush.bf16.msra.mxu2 %v2455_v46  ;;  %v2398_v5 = vld [vmem:[%s5216_s1 + $0x20] sm:$0xf]  ;;  %v2423_v7 = vor.u32 %v3320_v1, %v2422_v0  ;;  %v3315_v8 = vld [vmem:[%s5216_s1 + $0x2c] sm:$0xf0]  ;;  %v3313_v9 = vld [vmem:[%s5216_s1 + $0x24] sm:$0xf]  ;;  %v2427_v11 = vor.u32 %v3318_v2, %v2424_v3 }
  0x12   :  { %259 = vmatpush.bf16.msra.mxu3 %v2459_v50  ;;  %v2400_v10 = vld [vmem:[%s5216_s1 + $0x30] sm:$0xf0]  ;;  %v2406_v12 = vld [vmem:[%s5216_s1 + $0x28] sm:$0xf]  ;;  %v3316_v13 = vld [vmem:[%s5216_s1 + $0x34] sm:$0xf0] }
  0x14   :  { %221 = vmatpush.bf16.msra.mxu0 %v2431_v56 }
  0x15   :  { %234 = vmatpush.bf16.msra.mxu1 %v2435_v57  ;;  %247 = vmatpush.bf16.msra.mxu2 %v2439_v58 }
  0x16   :  { %260 = vmatpush.bf16.msra.mxu3 %v2443_v62 }
  0x17   :  { %13 = vsyncpa [#allocation5], 0  ;;  %v3314_v14 = vld [vmem:[%s5216_s1 + $0x2c] sm:$0xf]  ;;  %v2408_v15 = vld [vmem:[%s5216_s1 + $0x38] sm:$0xf0]  ;;  %v2399_v16 = vor.u32 %v3315_v8, %v2398_v5  ;;  %v2403_v17 = vor.u32 %v3313_v9, %v2400_v10  ;;  %v2407_v18 = vor.u32 %v3316_v13, %v2406_v12 }
  0x18   :  { %222 = vmatpush.bf16.msra.mxu0 %v2415_v4  ;;  %v2382_v19 = vld [vmem:[%s5216_s1] sm:$0xf]  ;;  %v3311_v20 = vld [vmem:[%s5216_s1 + $0xc] sm:$0xf0]  ;;  %v3309_v21 = vld [vmem:[%s5216_s1 + $0x4] sm:$0xf]  ;;  %v2411_v22 = vor.u32 %v3314_v14, %v2408_v15 }
  0x19   :  { %235 = vmatpush.bf16.msra.mxu1 %v2419_v6  ;;  %248 = vmatpush.bf16.msra.mxu2 %v2423_v7  ;;  %v2384_v23 = vld [vmem:[%s5216_s1 + $0x10] sm:$0xf0]  ;;  %v2390_v24 = vld [vmem:[%s5216_s1 + $0x8] sm:$0xf]  ;;  %v3312_v25 = vld [vmem:[%s5216_s1 + $0x14] sm:$0xf0]  ;;  %v2383_v28 = vor.u32 %v3311_v20, %v2382_v19 }
  0x1a   :  { %261 = vmatpush.bf16.msra.mxu3 %v2427_v11  ;;  %v3310_v26 = vld [vmem:[%s5216_s1 + $0xc] sm:$0xf]  ;;  %v2392_v27 = vld [vmem:[%s5216_s1 + $0x18] sm:$0xf0]  ;;  %v22_v29 = vld [vmem:[%s5217_s2] sm:$0x3]  ;;  %v2387_v30 = vor.u32 %v3309_v21, %v2384_v23  ;;  %v2391_v31 = vor.u32 %v3312_v25, %v2390_v24 }
  0x1b   :  { %v2395_v32 = vor.u32 %v3310_v26, %v2392_v27  ;;  %v24_v33 = vpack.c.bf16 %v22_v29, %v22_v29  ;;  %v2625_v34 = vld [vmem:[%s5216_s1 + $0xe0] sm:$0xf]  ;;  %v3371_v35 = vld [vmem:[%s5216_s1 + $0xec] sm:$0xf0]  ;;  %v3369_v36 = vld [vmem:[%s5216_s1 + $0xe4] sm:$0xf] }
  0x1c   :  { %223 = vmatpush.bf16.msra.mxu0 %v2399_v16  ;;  %v2626_v37 = vor.u32 %v3371_v35, %v2625_v34  ;;  %v2627_v38 = vld [vmem:[%s5216_s1 + $0xf0] sm:$0xf0]  ;;  %v2633_v39 = vld [vmem:[%s5216_s1 + $0xe8] sm:$0xf]  ;;  %v3372_v40 = vld [vmem:[%s5216_s1 + $0xf4] sm:$0xf0] }
  0x1d   :  { %236 = vmatpush.bf16.msra.mxu1 %v2403_v17  ;;  %249 = vmatpush.bf16.msra.mxu2 %v2407_v18  ;;  %v2630_v41 = vor.u32 %v3369_v36, %v2627_v38  ;;  %v2634_v42 = vor.u32 %v3372_v40, %v2633_v39  ;;  %v3370_v43 = vld [vmem:[%s5216_s1 + $0xec] sm:$0xf]  ;;  %v2635_v44 = vld [vmem:[%s5216_s1 + $0xf8] sm:$0xf0]  ;;  %v2609_v46 = vld [vmem:[%s5216_s1 + $0xc0] sm:$0xf] }
  0x1e   :  { %262 = vmatpush.bf16.msra.mxu3 %v2411_v22  ;;  %v2638_v45 = vor.u32 %v3370_v43, %v2635_v44  ;;  %v3367_v47 = vld [vmem:[%s5216_s1 + $0xcc] sm:$0xf0]  ;;  %v3365_v48 = vld [vmem:[%s5216_s1 + $0xc4] sm:$0xf]  ;;  %v2611_v51 = vld [vmem:[%s5216_s1 + $0xd0] sm:$0xf0] }
  0x1f   :  { %v2610_v50 = vor.u32 %v3367_v47, %v2609_v46  ;;  %v2617_v52 = vld [vmem:[%s5216_s1 + $0xc8] sm:$0xf]  ;;  %v3368_v53 = vld [vmem:[%s5216_s1 + $0xd4] sm:$0xf0]  ;;  %v2614_v55 = vor.u32 %v3365_v48, %v2611_v51  ;;  %v3366_v57 = vld [vmem:[%s5216_s1 + $0xcc] sm:$0xf] }
  0x20   :  { %224 = vmatpush.bf16.msra.mxu0 %v2383_v28  ;;  %v2618_v56 = vor.u32 %v3368_v53, %v2617_v52  ;;  %v2619_v58 = vld [vmem:[%s5216_s1 + $0xd8] sm:$0xf0]  ;;  %vm277_vm0 = vcmask 1041408   ;;  %v2593_v61 = vld [vmem:[%s5216_s1 + $0xa0] sm:$0xf]  ;;  %vm279_vm1 = vcmask 1045508  }
  0x21   :  { %237 = vmatpush.bf16.msra.mxu1 %v2387_v30  ;;  %250 = vmatpush.bf16.msra.mxu2 %v2391_v31  ;;  %v2622_v60 = vor.u32 %v3366_v57, %v2619_v58  ;;  %v3363_v62 = vld [vmem:[%s5216_s1 + $0xac] sm:$0xf0]  ;;  %v3361_v63 = vld [vmem:[%s5216_s1 + $0xa4] sm:$0xf]  ;;  %v2595_v1 = vld [vmem:[%s5216_s1 + $0xb0] sm:$0xf0] }
  0x22   :  { %263 = vmatpush.bf16.msra.mxu3 %v2395_v32  ;;  %v2594_v0 = vor.u32 %v3363_v62, %v2593_v61  ;;  %v2601_v2 = vld [vmem:[%s5216_s1 + $0xa8] sm:$0xf]  ;;  %v3364_v3 = vld [vmem:[%s5216_s1 + $0xb4] sm:$0xf0]  ;;  %v2598_v4 = vor.u32 %v3361_v63, %v2595_v1  ;;  %v3362_v6 = vld [vmem:[%s5216_s1 + $0xac] sm:$0xf] }
  0x23   :  { %225 = vmatmul.bf16.vlgmr.msra.gmra.mxu0 %v24_v33  ;;  %v2602_v5 = vor.u32 %v3364_v3, %v2601_v2  ;;  %v2603_v7 = vld [vmem:[%s5216_s1 + $0xb8] sm:$0xf0]  ;;  %v2577_v8 = vld [vmem:[%s5216_s1 + $0x80] sm:$0xf]  ;;  %v3359_v10 = vld [vmem:[%s5216_s1 + $0x8c] sm:$0xf0] }
  0x24   :  { %238 = vmatmul.bf16.vlgmr.msra.gmra.mxu1 %v24_v33  ;;  %251 = vmatmul.bf16.vlgmr.msra.gmra.mxu2 %v24_v33  ;;  %v2606_v9 = vor.u32 %v3362_v6, %v2603_v7  ;;  %v3357_v11 = vld [vmem:[%s5216_s1 + $0x84] sm:$0xf]  ;;  %v2579_v12 = vld [vmem:[%s5216_s1 + $0x90] sm:$0xf0]  ;;  %v2578_v14 = vor.u32 %v3359_v10, %v2577_v8  ;;  %v2585_v16 = vld [vmem:[%s5216_s1 + $0x88] sm:$0xf] }
  0x25   :  { %264 = vmatmul.bf16.vlgmr.msra.gmra.mxu3 %v24_v33  ;;  %549 = vmatpush.bf16.msrb.mxu0 %v2626_v37  ;;  %v2582_v15 = vor.u32 %v3357_v11, %v2579_v12  ;;  %v3360_v17 = vld [vmem:[%s5216_s1 + $0x94] sm:$0xf0]  ;;  %v3358_v18 = vld [vmem:[%s5216_s1 + $0x8c] sm:$0xf]  ;;  %v269_v21 = vld [vmem:[%s5215_s0] sm:$0xff]  ;;  %vm281_vm2 = vcmask 1043456  }
  0x26   :  { %562 = vmatpush.bf16.msrb.mxu1 %v2630_v41  ;;  %575 = vmatpush.bf16.msrb.mxu2 %v2634_v42  ;;  %v2586_v23 = vor.u32 %v3360_v17, %v2585_v16  ;;  %v2587_v24 = vld [vmem:[%s5216_s1 + $0x98] sm:$0xf0]  ;;  %v2561_v25 = vld [vmem:[%s5216_s1 + $0x60] sm:$0xf]  ;;  %v3355_v30 = vld [vmem:[%s5216_s1 + $0x6c] sm:$0xf0] }
  0x27   :  { %588 = vmatpush.bf16.msrb.mxu3 %v2638_v45  ;;  %v2590_v29 = vor.u32 %v3358_v18, %v2587_v24  ;;  %v3353_v31 = vld [vmem:[%s5216_s1 + $0x64] sm:$0xf]  ;;  %v2562_v32 = vor.u32 %v3355_v30, %v2561_v25  ;;  %v2563_v33 = vld [vmem:[%s5216_s1 + $0x70] sm:$0xf0]  ;;  %v2569_v34 = vld [vmem:[%s5216_s1 + $0x68] sm:$0xf] }
  0x28   :  { %v3356_v35 = vld [vmem:[%s5216_s1 + $0x74] sm:$0xf0]  ;;  %v2566_v37 = vor.u32 %v3353_v31, %v2563_v33  ;;  %v3354_v39 = vld [vmem:[%s5216_s1 + $0x6c] sm:$0xf]  ;;  %v2571_v40 = vld [vmem:[%s5216_s1 + $0x78] sm:$0xf0] }
  0x29   :  { %550 = vmatpush.bf16.msrb.mxu0 %v2610_v50  ;;  %v2570_v38 = vor.u32 %v3356_v35, %v2569_v34  ;;  %v2545_v41 = vld [vmem:[%s5216_s1 + $0x40] sm:$0xf]  ;;  %v2574_v43 = vor.u32 %v3354_v39, %v2571_v40  ;;  %v3351_v44 = vld [vmem:[%s5216_s1 + $0x4c] sm:$0xf0]  ;;  %v3349_v45 = vld [vmem:[%s5216_s1 + $0x44] sm:$0xf] }
  0x2a   :  { %563 = vmatpush.bf16.msrb.mxu1 %v2614_v55  ;;  %576 = vmatpush.bf16.msrb.mxu2 %v2618_v56  ;;  %v2547_v46 = vld [vmem:[%s5216_s1 + $0x50] sm:$0xf0]  ;;  %v2553_v48 = vld [vmem:[%s5216_s1 + $0x48] sm:$0xf]  ;;  %v3350_v50 = vld [vmem:[%s5216_s1 + $0x4c] sm:$0xf]  ;;  %v2546_v51 = vor.u32 %v3351_v44, %v2545_v41 }
  0x2b   :  { %589 = vmatpush.bf16.msrb.mxu3 %v2622_v60  ;;  %v2550_v52 = vor.u32 %v3349_v45, %v2547_v46  ;;  %v2555_v53 = vld [vmem:[%s5216_s1 + $0x58] sm:$0xf0]  ;;  %v3347_v60 = vld [vmem:[%s5216_s1 + $0x2c] sm:$0xf0]  ;;  %v3345_v63 = vld [vmem:[%s5216_s1 + $0x24] sm:$0xf] }
  0x2c   :  { %v2558_v62 = vor.u32 %v3350_v50, %v2555_v53  ;;  %v2537_v1 = vld [vmem:[%s5216_s1 + $0x28] sm:$0xf]  ;;  %v3346_v6 = vld [vmem:[%s5216_s1 + $0x2c] sm:$0xf]  ;;  %v2539_v7 = vld [vmem:[%s5216_s1 + $0x38] sm:$0xf0] }
  0x2d   :  { %551 = vmatpush.bf16.msrb.mxu0 %v2594_v0  ;;  %v2531_v0 = vld [vmem:[%s5216_s1 + $0x30] sm:$0xf0]  ;;  %v2513_v10 = vld [vmem:[%s5216_s1] sm:$0xf]  ;;  %v3343_v11 = vld [vmem:[%s5216_s1 + $0xc] sm:$0xf0] }
  0x2e   :  { %564 = vmatpush.bf16.msrb.mxu1 %v2598_v4  ;;  %577 = vmatpush.bf16.msrb.mxu2 %v2602_v5  ;;  %v3348_v4 = vld [vmem:[%s5216_s1 + $0x34] sm:$0xf0]  ;;  %v2534_v8 = vor.u32 %v3345_v63, %v2531_v0  ;;  %v3341_v12 = vld [vmem:[%s5216_s1 + $0x4] sm:$0xf]  ;;  %v3342_v17 = vld [vmem:[%s5216_s1 + $0xc] sm:$0xf] }
  0x2f   :  { %590 = vmatpush.bf16.msrb.mxu3 %v2606_v9  ;;  %v2538_v9 = vor.u32 %v3348_v4, %v2537_v1  ;;  %v3344_v16 = vld [vmem:[%s5216_s1 + $0x14] sm:$0xf0]  ;;  %v2523_v18 = vld [vmem:[%s5216_s1 + $0x18] sm:$0xf0]  ;;  %v2758_v4 = vld [vmem:[%s5216_s1 + $0xe0] sm:$0xf] }
  0x30   :  { %v2526_v24 = vor.u32 %v3342_v17, %v2523_v18  ;;  %v3399_v17 = vld [vmem:[%s5216_s1 + $0xcc] sm:$0xf0]  ;;  %v3397_v18 = vld [vmem:[%s5216_s1 + $0xc4] sm:$0xf]  ;;  %s2364_s28 = sshll.u32 %s5221_s6, 4  ;;  %s3700_s29 = smov [#allocation2]   ;;  %s2365_s28 = int_to_ptr.hbm [resolvable:$true] %s2364_s28 }
  0x31   :  { %552 = vmatpush.bf16.msrb.mxu0 %v2578_v14  ;;  %v2515_v14 = vld [vmem:[%s5216_s1 + $0x10] sm:$0xf0]  ;;  %s2351_s6 = sshll.u32 %s3700_s29, 4  ;;  %s2353_s8 = sshll.u32 %s5220_s5, 4  ;;  %s2352_s6 = int_to_ptr.vmem [resolvable:$true] %s2351_s6  ;;  %s2354_s8 = int_to_ptr.hbm [resolvable:$true] %s2353_s8 }
  0x32   :  { %565 = vmatpush.bf16.msrb.mxu1 %v2582_v15  ;;  %578 = vmatpush.bf16.msrb.mxu2 %v2586_v23  ;;  %v2521_v15 = vld [vmem:[%s5216_s1 + $0x8] sm:$0xf] }
  0x33   :  { %591 = vmatpush.bf16.msrb.mxu3 %v2590_v29 }
  0x35   :  { %553 = vmatpush.bf16.msrb.mxu0 %v2562_v32 }
  0x36   :  { %566 = vmatpush.bf16.msrb.mxu1 %v2566_v37  ;;  %579 = vmatpush.bf16.msrb.mxu2 %v2570_v38 }
  0x37   :  { %592 = vmatpush.bf16.msrb.mxu3 %v2574_v43 }
  0x39   :  { %554 = vmatpush.bf16.msrb.mxu0 %v2546_v51 }
  0x3a   :  { %567 = vmatpush.bf16.msrb.mxu1 %v2550_v52 }
  0x3b   :  { %593 = vmatpush.bf16.msrb.mxu3 %v2558_v62 }
  0x3e   :  { %568 = vmatpush.bf16.msrb.mxu1 %v2534_v8  ;;  %v2760_v8 = vld [vmem:[%s5216_s1 + $0xf0] sm:$0xf0] }
  0xa0   :  { %v226_v49 = vpop.f32.mrf.mxu0 }
  0xa1   :  { %v239_v54 = vpop.f32.mrf.mxu1 }
  0xa2   :  { %v274_v59 = vrot.slane %v239_v54, 6  ;;  %v2529_v54 = vld [vmem:[%s5216_s1 + $0x20] sm:$0xf] }
  0xa3   :  { %v2530_v5 = vor.u32 %v3347_v60, %v2529_v54 }
  0xa4   :  { %v278_v26 = vsel %vm277_vm0, %v226_v49, %v274_v59  ;;  %v3352_v49 = vld [vmem:[%s5216_s1 + $0x54] sm:$0xf0] }
  0xa5   :  { %v2554_v59 = vor.u32 %v3352_v49, %v2553_v48  ;;  %555 = vmatpush.bf16.msrb.mxu0 %v2530_v5  ;;  %v23_v49 = vld [vmem:[%s5218_s3] sm:$0x3]  ;;  %v3403_v5 = vld [vmem:[%s5216_s1 + $0xec] sm:$0xf0] }
  0xa7   :  { %v252_v13 = vpop.f32.mrf.mxu2  ;;  %580 = vmatpush.bf16.msrb.mxu2 %v2554_v59 }
  0xa8   :  { %v275_v19 = vrot.slane %v252_v13, 4  ;;  %v265_v20 = vpop.f32.mrf.mxu3  ;;  %v228_v22 = vpop.f32.mrf.mxu0  ;;  %v2542_v13 = vor.u32 %v3346_v6, %v2539_v7  ;;  %v3401_v6 = vld [vmem:[%s5216_s1 + $0xe4] sm:$0xf]  ;;  %v2759_v7 = vor.u32 %v3403_v5, %v2758_v4  ;;  %v2702_v5 = vld [vmem:[%s5216_s1 + $0x68] sm:$0xf] }
  0xa9   :  { %v276_v27 = vrot.slane %v265_v20, 2  ;;  %v241_v28 = vpop.f32.mrf.mxu1  ;;  %v2522_v22 = vor.u32 %v3344_v16, %v2521_v15  ;;  %v2742_v16 = vld [vmem:[%s5216_s1 + $0xc0] sm:$0xf] }
  0xaa   :  { %594 = vmatpush.bf16.msrb.mxu3 %v2542_v13  ;;  %v3402_v13 = vld [vmem:[%s5216_s1 + $0xec] sm:$0xf] }
  0xab   :  { %v280_v36 = vsel %vm279_vm1, %v275_v19, %v276_v27  ;;  %v2514_v19 = vor.u32 %v3343_v11, %v2513_v10  ;;  %581 = vmatpush.bf16.msrb.mxu2 %v2538_v9  ;;  %v2766_v9 = vld [vmem:[%s5216_s1 + $0xe8] sm:$0xf]  ;;  %v3404_v10 = vld [vmem:[%s5216_s1 + $0xf4] sm:$0xf0]  ;;  %v2763_v11 = vor.u32 %v3401_v6, %v2760_v8 }
  0xac   :  { %v282_v42 = vsel %vm281_vm2, %v278_v26, %v280_v36  ;;  %v3388_v6 = vld [vmem:[%s5216_s1 + $0x74] sm:$0xf0] }
  0xad   :  { %v4069_v47 = vadd.f32 %v282_v42, %v269_v21  ;;  %v2518_v21 = vor.u32 %v3341_v12, %v2515_v14  ;;  %556 = vmatpush.bf16.msrb.mxu0 %v2514_v19  ;;  %v2767_v12 = vor.u32 %v3404_v10, %v2766_v9  ;;  %v2768_v14 = vld [vmem:[%s5216_s1 + $0xf8] sm:$0xf0]  ;;  %v2743_v19 = vor.u32 %v3399_v17, %v2742_v16  ;;  %v3381_v16 = vld [vmem:[%s5216_s1 + $0x44] sm:$0xf]  ;;  %v2680_v17 = vld [vmem:[%s5216_s1 + $0x50] sm:$0xf0] }
  0xae   :  { %595 = vmatpush.bf16.msrb.mxu3 %v2526_v24  ;;  %v2771_v15 = vor.u32 %v3402_v13, %v2768_v14  ;;  %v2703_v10 = vor.u32 %v3388_v6, %v2702_v5  ;;  %v3383_v13 = vld [vmem:[%s5216_s1 + $0x4c] sm:$0xf0] }
  0xaf   :  { %v2508_v55 = vmul.f32 -1.442695, %v4069_v47  ;;  %v305_v56 = vrot.slane %v4069_v47, 2  ;;  %v329_v57 = vrot.slane %v4069_v47, 6  ;;  %v254_v58 = vpop.f32.mrf.mxu2  ;;  %569 = vmatpush.bf16.msrb.mxu1 %v2518_v21  ;;  %582 = vmatpush.bf16.msrb.mxu2 %v2522_v22  ;;  %v326_v32 = vrot.slane %v4069_v47, 4 }
  0xb0   :  { %v267_v61 = vpop.f32.mrf.mxu3  ;;  %v2750_v21 = vld [vmem:[%s5216_s1 + $0xc8] sm:$0xf]  ;;  %v3400_v22 = vld [vmem:[%s5216_s1 + $0xd4] sm:$0xf0] }
  0xb1   :  { %3535 = vpow2.f32 %v2508_v55  ;;  %v2509_v2 = vmul.f32 -1.442695, %v305_v56  ;;  %v2510_v3 = vmul.f32 -1.442695, %v329_v57  ;;  %880 = vmatpush.bf16.msra.mxu0 %v2759_v7  ;;  %v3386_v7 = vld [vmem:[%s5216_s1 + $0x6c] sm:$0xf] }
  0xb2   :  { %919 = vmatpush.bf16.msra.mxu3 %v2771_v15 }
  0xb3   :  { %3537 = vpow2.f32 %v2509_v2  ;;  %893 = vmatpush.bf16.msra.mxu1 %v2763_v11  ;;  %906 = vmatpush.bf16.msra.mxu2 %v2767_v12  ;;  %v2704_v11 = vld [vmem:[%s5216_s1 + $0x78] sm:$0xf0]  ;;  %v2678_v12 = vld [vmem:[%s5216_s1 + $0x40] sm:$0xf] }
  0xb4   :  { %3539 = vpow2.f32 %v2510_v3  ;;  %v2707_v15 = vor.u32 %v3386_v7, %v2704_v11 }
  0xb5   :  { %881 = vmatpush.bf16.msra.mxu0 %v2743_v19 }
  0xb7   :  { %v3536_v20 = vpop.eup %3535 }
  0xb8   :  { %v288_v23 = vadd.f32 1.0, %v3536_v20  ;;  %v2744_v20 = vld [vmem:[%s5216_s1 + $0xd0] sm:$0xf0] }
  0xb9   :  { %v3538_v25 = vpop.eup %3537 }
  0xba   :  { %v3540_v26 = vpop.eup %3539  ;;  %3541 = vrcp.f32 %v288_v23  ;;  %v310_v27 = vadd.f32 1.0, %v3538_v25  ;;  %v300_v36 = vand.u32 2147483648, %v288_v23  ;;  %v298_v40 = vand.u32 2147483647, %v288_v23 }
  0xbb   :  { %v334_v28 = vadd.f32 1.0, %v3540_v26  ;;  %vm294_vm4 = vweird.f32 %v288_v23  ;;  %v2747_v25 = vor.u32 %v3397_v18, %v2744_v20  ;;  %v2751_v26 = vor.u32 %v3400_v22, %v2750_v21  ;;  %v2686_v18 = vld [vmem:[%s5216_s1 + $0x48] sm:$0xf]  ;;  %v3384_v20 = vld [vmem:[%s5216_s1 + $0x54] sm:$0xf0] }
  0xbc   :  { %3543 = vrcp.f32 %v310_v27  ;;  %v322_v41 = vand.u32 2147483648, %v310_v27  ;;  %v320_v44 = vand.u32 2147483647, %v310_v27  ;;  %v301_v45 = vor.u32 1.1754944e-38, %v300_v36  ;;  %v2734_v36 = vld [vmem:[%s5216_s1 + $0xa8] sm:$0xf] }
  0xbd   :  { %3545 = vrcp.f32 %v334_v28  ;;  %vm299_vm7 = vcmp.eq.f32.partialorder %v298_v40, 8.507059e+37  ;;  %vm316_vm8 = vweird.f32 %v310_v27  ;;  %v346_v60 = vand.u32 2147483648, %v334_v28  ;;  %894 = vmatpush.bf16.msra.mxu1 %v2747_v25  ;;  %907 = vmatpush.bf16.msra.mxu2 %v2751_v26  ;;  %v3394_v40 = vld [vmem:[%s5216_s1 + $0xac] sm:$0xf]  ;;  %v2688_v22 = vld [vmem:[%s5216_s1 + $0x58] sm:$0xf0] }
  0xbe   :  { %3547 = vtanh.f32 %v326_v32  ;;  %v323_v51 = vor.u32 1.1754944e-38, %v322_v41  ;;  %vm321_vm10 = vcmp.eq.f32.partialorder %v320_v44, 8.507059e+37  ;;  %vm340_vm12 = vweird.f32 %v334_v28  ;;  %v3395_v32 = vld [vmem:[%s5216_s1 + $0xac] sm:$0xf0]  ;;  %v2736_v41 = vld [vmem:[%s5216_s1 + $0xb8] sm:$0xf0] }
  0xbf   :  { %v344_v61 = vand.u32 2147483647, %v334_v28  ;;  %v347_v63 = vor.u32 1.1754944e-38, %v346_v60  ;;  %v3391_v44 = vld [vmem:[%s5216_s1 + $0x8c] sm:$0xf0] }
  0xc0   :  { %v3542_v29 = vpop.eup %3541  ;;  %v3382_v21 = vld [vmem:[%s5216_s1 + $0x4c] sm:$0xf]  ;;  %v2662_v25 = vld [vmem:[%s5216_s1 + $0x20] sm:$0xf]  ;;  %v3379_v26 = vld [vmem:[%s5216_s1 + $0x2c] sm:$0xf0] }
  0xc1   :  { %v290_v30 = vmul.f32 %v3542_v29, %v288_v23  ;;  %vm295_vm3 = vweird.f32 %v3542_v29  ;;  %vm345_vm14 = vcmp.eq.f32.partialorder %v344_v61, 8.507059e+37 }
  0xc2   :  { %v3544_v31 = vpop.eup %3543  ;;  %vm296_vm6 = vmor %vm294_vm4, %vm295_vm3 }
  0xc3   :  { %v3546_v33 = vpop.eup %3545  ;;  %v291_v34 = vsub.f32 1.0, %v290_v30  ;;  %v312_v35 = vmul.f32 %v3544_v31, %v310_v27  ;;  %vm317_vm5 = vweird.f32 %v3544_v31  ;;  %v3398_v27 = vld [vmem:[%s5216_s1 + $0xcc] sm:$0xf] }
  0xc4   :  { %v336_v37 = vmul.f32 %v3546_v33, %v334_v28  ;;  %vm318_vm9 = vmor %vm316_vm8, %vm317_vm5  ;;  %v3548_v53 = vpop.eup %3547  ;;  %vm341_vm11 = vweird.f32 %v3546_v33  ;;  %v2752_v28 = vld [vmem:[%s5216_s1 + $0xd8] sm:$0xf0] }
  0xc5   :  { %v313_v38 = vsub.f32 1.0, %v312_v35  ;;  %v292_v39 = vmul.f32 %v3542_v29, %v291_v34  ;;  %vm342_vm13 = vmor %vm340_vm12, %vm341_vm11  ;;  %v2755_v30 = vor.u32 %v3398_v27, %v2752_v28  ;;  %v2728_v35 = vld [vmem:[%s5216_s1 + $0xb0] sm:$0xf0] }
  0xc6   :  { %v337_v46 = vsub.f32 1.0, %v336_v37  ;;  %v3396_v37 = vld [vmem:[%s5216_s1 + $0xb4] sm:$0xf0] }
  0xc7   :  { %v293_v42 = vadd.f32 %v3542_v29, %v292_v39  ;;  %v314_v43 = vmul.f32 %v3544_v31, %v313_v38  ;;  %920 = vmatpush.bf16.msra.mxu3 %v2755_v30  ;;  %v2735_v39 = vor.u32 %v3396_v37, %v2734_v36  ;;  %v2687_v30 = vor.u32 %v3384_v20, %v2686_v18  ;;  %v2670_v36 = vld [vmem:[%s5216_s1 + $0x28] sm:$0xf]  ;;  %v3380_v37 = vld [vmem:[%s5216_s1 + $0x34] sm:$0xf0] }
  0xc8   :  { %v338_v55 = vmul.f32 %v3546_v33, %v337_v46  ;;  %v2712_v46 = vld [vmem:[%s5216_s1 + $0x90] sm:$0xf0] }
  0xc9   :  { %v297_v47 = vsel %vm296_vm6, %v3542_v29, %v293_v42  ;;  %v315_v48 = vadd.f32 %v3544_v31, %v314_v43  ;;  %v2710_v42 = vld [vmem:[%s5216_s1 + $0x80] sm:$0xf]  ;;  %v2739_v43 = vor.u32 %v3394_v40, %v2736_v41  ;;  %908 = vmatpush.bf16.msra.mxu2 %v2735_v39  ;;  %v3378_v40 = vld [vmem:[%s5216_s1 + $0x2c] sm:$0xf]  ;;  %v2663_v41 = vor.u32 %v3379_v26, %v2662_v25 }
  0xca   :  { %v302_v50 = vsel %vm299_vm7, %v301_v45, %v297_v47  ;;  %v339_v59 = vadd.f32 %v3546_v33, %v338_v55  ;;  %v3389_v45 = vld [vmem:[%s5216_s1 + $0x84] sm:$0xf]  ;;  %v2711_v47 = vor.u32 %v3391_v44, %v2710_v42  ;;  %v2672_v42 = vld [vmem:[%s5216_s1 + $0x38] sm:$0xf0]  ;;  %v2671_v44 = vor.u32 %v3380_v37, %v2670_v36 }
  0xcb   :  { %v319_v52 = vsel %vm318_vm9, %v3544_v31, %v315_v48  ;;  %v351_v57 = vmul.f32 %v3548_v53, %v302_v50  ;;  %v2726_v31 = vld [vmem:[%s5216_s1 + $0xa0] sm:$0xf]  ;;  %v2715_v48 = vor.u32 %v3389_v45, %v2712_v46  ;;  %v3392_v50 = vld [vmem:[%s5216_s1 + $0x94] sm:$0xf0]  ;;  %921 = vmatpush.bf16.msra.mxu3 %v2739_v43  ;;  %v3375_v46 = vld [vmem:[%s5216_s1 + $0xc] sm:$0xf0] }
  0xcc   :  { %v324_v54 = vsel %vm321_vm10, %v323_v51, %v319_v52  ;;  %v343_v62 = vsel %vm342_vm13, %v3546_v33, %v339_v59  ;;  %v3393_v33 = vld [vmem:[%s5216_s1 + $0xa4] sm:$0xf]  ;;  %v2727_v34 = vor.u32 %v3395_v32, %v2726_v31  ;;  %v3390_v51 = vld [vmem:[%s5216_s1 + $0x8c] sm:$0xf]  ;;  %v3387_v59 = vld [vmem:[%s5216_s1 + $0x6c] sm:$0xf0] }
  0xcd   :  { %v350_v56 = vmul.f32 %v324_v54, %v23_v49  ;;  %v348_v1 = vsel %vm345_vm14, %v347_v63, %v343_v62  ;;  %v2731_v38 = vor.u32 %v3393_v33, %v2728_v35  ;;  %v2718_v49 = vld [vmem:[%s5216_s1 + $0x88] sm:$0xf]  ;;  %v3377_v31 = vld [vmem:[%s5216_s1 + $0x24] sm:$0xf]  ;;  %v2664_v35 = vld [vmem:[%s5216_s1 + $0x30] sm:$0xf0] }
  0xce   :  { %882 = vmatpush.bf16.msra.mxu0 %v2727_v34  ;;  %v2639_v54 = vld [vmem:[%s5215_s0 + $0x8] sm:$0xff]  ;;  %v2719_v55 = vor.u32 %v3392_v50, %v2718_v49  ;;  %v2691_v34 = vor.u32 %v3382_v21, %v2688_v22  ;;  %v2667_v43 = vor.u32 %v3377_v31, %v2664_v35  ;;  %v2646_v45 = vld [vmem:[%s5216_s1] sm:$0xf]  ;;  %v2648_v49 = vld [vmem:[%s5216_s1 + $0x10] sm:$0xf0] }
  0xcf   :  { %v4138_v58 = vadd.f32 %v351_v57, %v350_v56  ;;  %895 = vmatpush.bf16.msra.mxu1 %v2731_v38  ;;  %v2720_v56 = vld [vmem:[%s5216_s1 + $0x98] sm:$0xf0]  ;;  %v2694_v57 = vld [vmem:[%s5216_s1 + $0x60] sm:$0xf]  ;;  %v2654_v50 = vld [vmem:[%s5216_s1 + $0x8] sm:$0xf] }
  0xd0   :  { %v2695_v4 = vor.u32 %v3387_v59, %v2694_v57  ;;  %909 = vmatpush.bf16.msra.mxu2 %v2719_v55 }
  0xd1   :  { %3549 = vtanh.f32 %v4138_v58 }
  0xd2   :  { %883 = vmatpush.bf16.msra.mxu0 %v2711_v47  ;;  %v3373_v47 = vld [vmem:[%s5216_s1 + $0x4] sm:$0xf] }
  0xd3   :  { %896 = vmatpush.bf16.msra.mxu1 %v2715_v48  ;;  %v2675_v48 = vor.u32 %v3378_v40, %v2672_v42  ;;  %v3433_v40 = vld [vmem:[%s5216_s1 + $0xe4] sm:$0xf]  ;;  %v2893_v42 = vld [vmem:[%s5216_s1 + $0xf0] sm:$0xf0] }
  0xd4   :  { %910 = vmatpush.bf16.msra.mxu2 %v2703_v10 }
  0xd6   :  { %884 = vmatpush.bf16.msra.mxu0 %v2695_v4 }
  0xd7   :  { %v3550_v0 = vpop.eup %3549 }
  0xd8   :  { %v354_v2 = vmul.f32 %v3550_v0, %v348_v1  ;;  %v2723_v0 = vor.u32 %v3390_v51, %v2720_v56  ;;  %v3385_v1 = vld [vmem:[%s5216_s1 + $0x64] sm:$0xf]  ;;  %911 = vmatpush.bf16.msra.mxu2 %v2687_v30  ;;  %v3376_v51 = vld [vmem:[%s5216_s1 + $0x14] sm:$0xf0]  ;;  %v2651_v56 = vor.u32 %v3373_v47, %v2648_v49  ;;  %v3434_v47 = vld [vmem:[%s5216_s1 + $0xec] sm:$0xf] }
  0xd9   :  { %v2655_v57 = vor.u32 %v3376_v51, %v2654_v50  ;;  %v2875_v50 = vld [vmem:[%s5216_s1 + $0xc0] sm:$0xf]  ;;  %v3431_v51 = vld [vmem:[%s5216_s1 + $0xcc] sm:$0xf0] }
  0xda   :  { %355 = vst [vmem:[%s5219_s4] sm:$0x3] %v354_v2  ;;  %v356_v3 = vpack.c.bf16 %v354_v2, %v354_v2  ;;  %v2696_v2 = vld [vmem:[%s5216_s1 + $0x70] sm:$0xf0]  ;;  %922 = vmatpush.bf16.msra.mxu3 %v2723_v0 }
  0xdb   :  { %v2699_v9 = vor.u32 %v3385_v1, %v2696_v2 }
  0xdc   :  { %557 = vmatmul.bf16.vlgmr.msrb.gmra.mxu0 %v356_v3  ;;  %570 = vmatmul.bf16.vlgmr.msrb.gmra.mxu1 %v356_v3 }
  0xdd   :  { %583 = vmatmul.bf16.vlgmr.msrb.gmra.mxu2 %v356_v3  ;;  %596 = vmatmul.bf16.vlgmr.msrb.gmra.mxu3 %v356_v3 }
  0xde   :  { %897 = vmatpush.bf16.msra.mxu1 %v2699_v9  ;;  %923 = vmatpush.bf16.msra.mxu3 %v2707_v15 }
  0xdf   :  { %912 = vmatpush.bf16.msra.mxu2 %v2671_v44  ;;  %v3436_v44 = vld [vmem:[%s5216_s1 + $0xf4] sm:$0xf0] }
  0xe2   :  { %924 = vmatpush.bf16.msra.mxu3 %v2691_v34 }
  0xe3   :  { %913 = vmatpush.bf16.msra.mxu2 %v2655_v57 }
  0xe6   :  { %925 = vmatpush.bf16.msra.mxu3 %v2675_v48  ;;  %v2901_v48 = vld [vmem:[%s5216_s1 + $0xf8] sm:$0xf0] }
  0xe7   :  { %v2904_v49 = vor.u32 %v3434_v47, %v2901_v48  ;;  %v3415_v47 = vld [vmem:[%s5216_s1 + $0x4c] sm:$0xf0] }
 0x159   :  { %v558_v23 = vpop.f32.mrf.mxu0  ;;  %v571_v24 = vpop.f32.mrf.mxu1 }
 0x15a   :  { %v607_v29 = vrot.slane %v571_v24, 6  ;;  %v2683_v24 = vor.u32 %v3381_v16, %v2680_v17 }
 0x15c   :  { %v610_v3 = vsel %vm277_vm0, %v558_v23, %v607_v29  ;;  %v2679_v23 = vor.u32 %v3383_v13, %v2678_v12  ;;  %898 = vmatpush.bf16.msra.mxu1 %v2683_v24 }
 0x15e   :  { %885 = vmatpush.bf16.msra.mxu0 %v2679_v23 }
 0x160   :  { %v584_v52 = vpop.f32.mrf.mxu2  ;;  %v597_v53 = vpop.f32.mrf.mxu3  ;;  %899 = vmatpush.bf16.msra.mxu1 %v2667_v43  ;;  %v2899_v43 = vld [vmem:[%s5216_s1 + $0xe8] sm:$0xf] }
 0x161   :  { %v608_v60 = vrot.slane %v584_v52, 4  ;;  %v609_v61 = vrot.slane %v597_v53, 2  ;;  %v560_v62 = vpop.f32.mrf.mxu0  ;;  %v573_v63 = vpop.f32.mrf.mxu1  ;;  %v3374_v52 = vld [vmem:[%s5216_s1 + $0xc] sm:$0xf]  ;;  %v2656_v53 = vld [vmem:[%s5216_s1 + $0x18] sm:$0xf0] }
 0x162   :  { %886 = vmatpush.bf16.msra.mxu0 %v2663_v41 }
 0x163   :  { %v611_v8 = vsel %vm279_vm1, %v608_v60, %v609_v61  ;;  %v2659_v60 = vor.u32 %v3374_v52, %v2656_v53  ;;  %v3429_v52 = vld [vmem:[%s5216_s1 + $0xc4] sm:$0xf]  ;;  %v2876_v53 = vor.u32 %v3431_v51, %v2875_v50  ;;  %v2813_v51 = vld [vmem:[%s5216_s1 + $0x50] sm:$0xf0] }
 0x164   :  { %v612_v14 = vsel %vm281_vm2, %v610_v3, %v611_v8  ;;  %900 = vmatpush.bf16.msra.mxu1 %v2651_v56  ;;  %v3432_v56 = vld [vmem:[%s5216_s1 + $0xd4] sm:$0xf0]  ;;  %v3413_v50 = vld [vmem:[%s5216_s1 + $0x44] sm:$0xf] }
 0x165   :  { %v4285_v19 = vadd.f32 %v2639_v54, %v612_v14  ;;  %v2647_v54 = vor.u32 %v3375_v46, %v2646_v45  ;;  %926 = vmatpush.bf16.msra.mxu3 %v2659_v60  ;;  %v2896_v45 = vor.u32 %v3433_v40, %v2893_v42  ;;  %v2900_v46 = vor.u32 %v3436_v44, %v2899_v43  ;;  %v3420_v40 = vld [vmem:[%s5216_s1 + $0x74] sm:$0xf0] }
 0x167   :  { %v2640_v27 = vmul.f32 -1.442695, %v4285_v19  ;;  %v635_v28 = vrot.slane %v4285_v19, 2  ;;  %v659_v29 = vrot.slane %v4285_v19, 6  ;;  %887 = vmatpush.bf16.msra.mxu0 %v2647_v54  ;;  %v656_v4 = vrot.slane %v4285_v19, 4  ;;  %1237 = vmatpush.bf16.msrb.mxu2 %v2900_v46 }
 0x168   :  { %v586_v32 = vpop.f32.mrf.mxu2  ;;  %v599_v33 = vpop.f32.mrf.mxu3  ;;  %1224 = vmatpush.bf16.msrb.mxu1 %v2896_v45  ;;  %v2877_v54 = vld [vmem:[%s5216_s1 + $0xd0] sm:$0xf0]  ;;  %v2837_v45 = vld [vmem:[%s5216_s1 + $0x78] sm:$0xf0]  ;;  %v2811_v46 = vld [vmem:[%s5216_s1 + $0x40] sm:$0xf] }
 0x169   :  { %3551 = vpow2.f32 %v2640_v27  ;;  %v2641_v38 = vmul.f32 -1.442695, %v635_v28  ;;  %v2642_v39 = vmul.f32 -1.442695, %v659_v29  ;;  %1250 = vmatpush.bf16.msrb.mxu3 %v2904_v49  ;;  %v2880_v60 = vor.u32 %v3429_v52, %v2877_v54  ;;  %v2819_v52 = vld [vmem:[%s5216_s1 + $0x48] sm:$0xf] }
 0x16a   :  { %v3416_v54 = vld [vmem:[%s5216_s1 + $0x54] sm:$0xf0] }
 0x16b   :  { %3553 = vpow2.f32 %v2641_v38  ;;  %v2891_v38 = vld [vmem:[%s5216_s1 + $0xe0] sm:$0xf] }
 0x16c   :  { %3555 = vpow2.f32 %v2642_v39  ;;  %v3435_v39 = vld [vmem:[%s5216_s1 + $0xec] sm:$0xf0]  ;;  %1225 = vmatpush.bf16.msrb.mxu1 %v2880_v60  ;;  %v2795_v60 = vld [vmem:[%s5216_s1 + $0x20] sm:$0xf] }
 0x16d   :  { %v2892_v41 = vor.u32 %v3435_v39, %v2891_v38  ;;  %v2835_v39 = vld [vmem:[%s5216_s1 + $0x68] sm:$0xf] }
 0x16e   :  { %v2836_v44 = vor.u32 %v3420_v40, %v2835_v39 }
 0x16f   :  { %v3552_v55 = vpop.eup %3551  ;;  %1211 = vmatpush.bf16.msrb.mxu0 %v2892_v41  ;;  %v3418_v41 = vld [vmem:[%s5216_s1 + $0x6c] sm:$0xf] }
 0x170   :  { %v618_v59 = vadd.f32 1.0, %v3552_v55  ;;  %v2883_v55 = vld [vmem:[%s5216_s1 + $0xc8] sm:$0xf]  ;;  %v2840_v49 = vor.u32 %v3418_v41, %v2837_v45 }
 0x171   :  { %v3554_v61 = vpop.eup %3553 }
 0x172   :  { %v3556_v62 = vpop.eup %3555  ;;  %3557 = vrcp.f32 %v618_v59  ;;  %v640_v63 = vadd.f32 1.0, %v3554_v61  ;;  %v630_v8 = vand.u32 2147483648, %v618_v59  ;;  %v628_v12 = vand.u32 2147483647, %v618_v59 }
 0x173   :  { %v664_v0 = vadd.f32 1.0, %v3556_v62  ;;  %vm624_vm3 = vweird.f32 %v618_v59  ;;  %v2884_v61 = vor.u32 %v3432_v56, %v2883_v55  ;;  %v3430_v62 = vld [vmem:[%s5216_s1 + $0xcc] sm:$0xf]  ;;  %1212 = vmatpush.bf16.msrb.mxu0 %v2876_v53  ;;  %v2821_v56 = vld [vmem:[%s5216_s1 + $0x58] sm:$0xf0] }
 0x174   :  { %3559 = vrcp.f32 %v640_v63  ;;  %v652_v13 = vand.u32 2147483648, %v640_v63  ;;  %v650_v16 = vand.u32 2147483647, %v640_v63  ;;  %v631_v17 = vor.u32 1.1754944e-38, %v630_v8  ;;  %v3428_v8 = vld [vmem:[%s5216_s1 + $0xb4] sm:$0xf0] }
 0x175   :  { %3561 = vrcp.f32 %v664_v0  ;;  %vm629_vm6 = vcmp.eq.f32.partialorder %v628_v12, 8.507059e+37  ;;  %vm646_vm7 = vweird.f32 %v640_v63  ;;  %v676_v31 = vand.u32 2147483648, %v664_v0  ;;  %1238 = vmatpush.bf16.msrb.mxu2 %v2884_v61  ;;  %v2869_v12 = vld [vmem:[%s5216_s1 + $0xb8] sm:$0xf0]  ;;  %v3414_v55 = vld [vmem:[%s5216_s1 + $0x4c] sm:$0xf] }
 0x176   :  { %3563 = vtanh.f32 %v656_v4  ;;  %v653_v22 = vor.u32 1.1754944e-38, %v652_v13  ;;  %vm651_vm9 = vcmp.eq.f32.partialorder %v650_v16, 8.507059e+37  ;;  %vm670_vm11 = vweird.f32 %v664_v0  ;;  %v3425_v4 = vld [vmem:[%s5216_s1 + $0xa4] sm:$0xf]  ;;  %v2843_v13 = vld [vmem:[%s5216_s1 + $0x80] sm:$0xf] }
 0x177   :  { %v674_v32 = vand.u32 2147483647, %v664_v0  ;;  %v677_v34 = vor.u32 1.1754944e-38, %v676_v31  ;;  %v3421_v16 = vld [vmem:[%s5216_s1 + $0x84] sm:$0xf] }
 0x178   :  { %v3558_v1 = vpop.eup %3557  ;;  %v3411_v61 = vld [vmem:[%s5216_s1 + $0x2c] sm:$0xf0] }
 0x179   :  { %v620_v2 = vmul.f32 %v3558_v1, %v618_v59  ;;  %vm625_vm15 = vweird.f32 %v3558_v1  ;;  %vm675_vm13 = vcmp.eq.f32.partialorder %v674_v32, 8.507059e+37 }
 0x17a   :  { %v3560_v3 = vpop.eup %3559  ;;  %vm626_vm5 = vmor %vm624_vm3, %vm625_vm15 }
 0x17b   :  { %v3562_v5 = vpop.eup %3561  ;;  %v621_v6 = vsub.f32 1.0, %v620_v2  ;;  %v642_v7 = vmul.f32 %v3560_v3, %v640_v63  ;;  %vm647_vm4 = vweird.f32 %v3560_v3  ;;  %v2885_v63 = vld [vmem:[%s5216_s1 + $0xd8] sm:$0xf0]  ;;  %v2859_v2 = vld [vmem:[%s5216_s1 + $0xa0] sm:$0xf] }
 0x17c   :  { %v666_v9 = vmul.f32 %v3562_v5, %v664_v0  ;;  %vm648_vm8 = vmor %vm646_vm7, %vm647_vm4  ;;  %v3564_v24 = vpop.eup %3563  ;;  %vm671_vm10 = vweird.f32 %v3562_v5 }
 0x17d   :  { %v643_v10 = vsub.f32 1.0, %v642_v7  ;;  %v622_v11 = vmul.f32 %v3558_v1, %v621_v6  ;;  %vm672_vm12 = vmor %vm670_vm11, %vm671_vm10  ;;  %v2861_v6 = vld [vmem:[%s5216_s1 + $0xb0] sm:$0xf0]  ;;  %v2867_v7 = vld [vmem:[%s5216_s1 + $0xa8] sm:$0xf] }
 0x17e   :  { %v667_v18 = vsub.f32 1.0, %v666_v9  ;;  %v2864_v9 = vor.u32 %v3425_v4, %v2861_v6  ;;  %v2797_v6 = vld [vmem:[%s5216_s1 + $0x30] sm:$0xf0] }
 0x17f   :  { %v623_v14 = vadd.f32 %v3558_v1, %v622_v11  ;;  %v644_v15 = vmul.f32 %v3560_v3, %v643_v10  ;;  %v2868_v10 = vor.u32 %v3428_v8, %v2867_v7  ;;  %v3426_v11 = vld [vmem:[%s5216_s1 + $0xac] sm:$0xf]  ;;  %v2803_v7 = vld [vmem:[%s5216_s1 + $0x28] sm:$0xf]  ;;  %v3412_v8 = vld [vmem:[%s5216_s1 + $0x34] sm:$0xf0] }
 0x180   :  { %v668_v26 = vmul.f32 %v3562_v5, %v667_v18  ;;  %1226 = vmatpush.bf16.msrb.mxu1 %v2864_v9 }
 0x181   :  { %v627_v19 = vsel %vm626_vm5, %v3558_v1, %v623_v14  ;;  %v645_v20 = vadd.f32 %v3560_v3, %v644_v15  ;;  %v2888_v1 = vor.u32 %v3430_v62, %v2885_v63  ;;  %v2872_v14 = vor.u32 %v3426_v11, %v2869_v12  ;;  %v3423_v15 = vld [vmem:[%s5216_s1 + $0x8c] sm:$0xf0]  ;;  %1239 = vmatpush.bf16.msrb.mxu2 %v2868_v10  ;;  %v3410_v11 = vld [vmem:[%s5216_s1 + $0x2c] sm:$0xf] }
 0x182   :  { %v632_v21 = vsel %vm629_vm6, %v631_v17, %v627_v19  ;;  %v669_v30 = vadd.f32 %v3562_v5, %v668_v26  ;;  %v2845_v17 = vld [vmem:[%s5216_s1 + $0x90] sm:$0xf0]  ;;  %v2844_v18 = vor.u32 %v3423_v15, %v2843_v13  ;;  %v2796_v12 = vor.u32 %v3411_v61, %v2795_v60  ;;  %v2805_v13 = vld [vmem:[%s5216_s1 + $0x38] sm:$0xf0] }
 0x183   :  { %v649_v23 = vsel %vm648_vm8, %v3560_v3, %v645_v20  ;;  %v681_v28 = vmul.f32 %v3564_v24, %v632_v21  ;;  %v3427_v3 = vld [vmem:[%s5216_s1 + $0xac] sm:$0xf0]  ;;  %1251 = vmatpush.bf16.msrb.mxu3 %v2888_v1  ;;  %v2848_v19 = vor.u32 %v3421_v16, %v2845_v17  ;;  %v2851_v20 = vld [vmem:[%s5216_s1 + $0x88] sm:$0xf]  ;;  %v3424_v21 = vld [vmem:[%s5216_s1 + $0x94] sm:$0xf0]  ;;  %v2820_v1 = vor.u32 %v3416_v54, %v2819_v52 }
 0x184   :  { %v654_v25 = vsel %vm651_vm9, %v653_v22, %v649_v23  ;;  %v673_v33 = vsel %vm672_vm12, %v3562_v5, %v669_v30  ;;  %v2860_v5 = vor.u32 %v3427_v3, %v2859_v2  ;;  %v3422_v22 = vld [vmem:[%s5216_s1 + $0x8c] sm:$0xf]  ;;  %v2852_v26 = vor.u32 %v3424_v21, %v2851_v20  ;;  %v3419_v30 = vld [vmem:[%s5216_s1 + $0x6c] sm:$0xf0]  ;;  %v3409_v2 = vld [vmem:[%s5216_s1 + $0x24] sm:$0xf] }
 0x185   :  { %v680_v27 = vmul.f32 %v654_v25, %v4138_v58  ;;  %v678_v36 = vsel %vm675_vm13, %v677_v34, %v673_v33  ;;  %v2772_v25 = vld [vmem:[%s5215_s0 + $0x10] sm:$0xff]  ;;  %1227 = vmatpush.bf16.msrb.mxu1 %v2848_v19  ;;  %v2804_v15 = vor.u32 %v3412_v8, %v2803_v7  ;;  %v2779_v16 = vld [vmem:[%s5216_s1] sm:$0xf]  ;;  %v2808_v19 = vor.u32 %v3410_v11, %v2805_v13  ;;  %v2787_v21 = vld [vmem:[%s5216_s1 + $0x8] sm:$0xf] }
 0x186   :  { %1213 = vmatpush.bf16.msrb.mxu0 %v2860_v5  ;;  %1240 = vmatpush.bf16.msrb.mxu2 %v2852_v26  ;;  %v2824_v5 = vor.u32 %v3414_v55, %v2821_v56  ;;  %v3407_v17 = vld [vmem:[%s5216_s1 + $0xc] sm:$0xf0]  ;;  %v2781_v20 = vld [vmem:[%s5216_s1 + $0x10] sm:$0xf0]  ;;  %v3465_v11 = vld [vmem:[%s5216_s1 + $0xe4] sm:$0xf] }
 0x187   :  { %v4349_v29 = vadd.f32 %v681_v28, %v680_v27  ;;  %1252 = vmatpush.bf16.msrb.mxu3 %v2872_v14  ;;  %v2853_v27 = vld [vmem:[%s5216_s1 + $0x98] sm:$0xf0]  ;;  %v2827_v28 = vld [vmem:[%s5216_s1 + $0x60] sm:$0xf]  ;;  %v2800_v14 = vor.u32 %v3409_v2, %v2797_v6  ;;  %v3026_v13 = vld [vmem:[%s5216_s1 + $0xf0] sm:$0xf0] }
 0x188   :  { %v2828_v38 = vor.u32 %v3419_v30, %v2827_v28 }
 0x189   :  { %3565 = vtanh.f32 %v4349_v29 }
 0x18a   :  { %1214 = vmatpush.bf16.msrb.mxu0 %v2844_v18  ;;  %1241 = vmatpush.bf16.msrb.mxu2 %v2836_v44  ;;  %v3405_v18 = vld [vmem:[%s5216_s1 + $0x4] sm:$0xf] }
 0x18e   :  { %1215 = vmatpush.bf16.msrb.mxu0 %v2828_v38  ;;  %1242 = vmatpush.bf16.msrb.mxu2 %v2820_v1 }
 0x18f   :  { %v3566_v35 = vpop.eup %3565 }
 0x190   :  { %v684_v37 = vmul.f32 %v3566_v35, %v678_v36  ;;  %v2856_v35 = vor.u32 %v3422_v22, %v2853_v27  ;;  %v3417_v36 = vld [vmem:[%s5216_s1 + $0x64] sm:$0xf]  ;;  %v3408_v22 = vld [vmem:[%s5216_s1 + $0x14] sm:$0xf0]  ;;  %v2784_v27 = vor.u32 %v3405_v18, %v2781_v20  ;;  %v3466_v18 = vld [vmem:[%s5216_s1 + $0xec] sm:$0xf] }
 0x191   :  { %v2788_v28 = vor.u32 %v3408_v22, %v2787_v21  ;;  %v3008_v21 = vld [vmem:[%s5216_s1 + $0xc0] sm:$0xf]  ;;  %v3463_v22 = vld [vmem:[%s5216_s1 + $0xcc] sm:$0xf0] }
 0x192   :  { %2643 = vst [vmem:[%s5219_s4 + $0x2] sm:$0x3] %v684_v37  ;;  %v687_v58 = vpack.c.bf16 %v684_v37, %v684_v37  ;;  %v2829_v37 = vld [vmem:[%s5216_s1 + $0x70] sm:$0xf0]  ;;  %1253 = vmatpush.bf16.msrb.mxu3 %v2856_v35  ;;  %1243 = vmatpush.bf16.msrb.mxu2 %v2804_v15  ;;  %v3468_v15 = vld [vmem:[%s5216_s1 + $0xf4] sm:$0xf0] }
 0x193   :  { %v2832_v43 = vor.u32 %v3417_v36, %v2829_v37 }
 0x194   :  { %888 = vmatmul.bf16.vlgmr.msra.gmra.mxu0 %v687_v58  ;;  %901 = vmatmul.bf16.vlgmr.msra.gmra.mxu1 %v687_v58 }
 0x195   :  { %914 = vmatmul.bf16.vlgmr.msra.gmra.mxu2 %v687_v58  ;;  %927 = vmatmul.bf16.vlgmr.msra.gmra.mxu3 %v687_v58 }
 0x196   :  { %1228 = vmatpush.bf16.msrb.mxu1 %v2832_v43  ;;  %1254 = vmatpush.bf16.msrb.mxu3 %v2840_v49 }
 0x197   :  { %1244 = vmatpush.bf16.msrb.mxu2 %v2788_v28 }
 0x19a   :  { %1255 = vmatpush.bf16.msrb.mxu3 %v2824_v5 }
 0x19e   :  { %1256 = vmatpush.bf16.msrb.mxu3 %v2808_v19  ;;  %v3034_v19 = vld [vmem:[%s5216_s1 + $0xf8] sm:$0xf0] }
 0x19f   :  { %v3037_v20 = vor.u32 %v3466_v18, %v3034_v19  ;;  %v3447_v18 = vld [vmem:[%s5216_s1 + $0x4c] sm:$0xf0] }
 0x211   :  { %v889_v57 = vpop.f32.mrf.mxu0  ;;  %v902_v59 = vpop.f32.mrf.mxu1 }
 0x212   :  { %v938_v0 = vrot.slane %v902_v59, 6  ;;  %v2816_v59 = vor.u32 %v3413_v50, %v2813_v51 }
 0x214   :  { %v941_v58 = vsel %vm277_vm0, %v889_v57, %v938_v0  ;;  %v2812_v57 = vor.u32 %v3415_v47, %v2811_v46  ;;  %1229 = vmatpush.bf16.msrb.mxu1 %v2816_v59 }
 0x216   :  { %1216 = vmatpush.bf16.msrb.mxu0 %v2812_v57 }
 0x218   :  { %v915_v23 = vpop.f32.mrf.mxu2  ;;  %v928_v24 = vpop.f32.mrf.mxu3  ;;  %1230 = vmatpush.bf16.msrb.mxu1 %v2800_v14  ;;  %v3032_v14 = vld [vmem:[%s5216_s1 + $0xe8] sm:$0xf] }
 0x219   :  { %v939_v31 = vrot.slane %v915_v23, 4  ;;  %v940_v32 = vrot.slane %v928_v24, 2  ;;  %v891_v33 = vpop.f32.mrf.mxu0  ;;  %v904_v34 = vpop.f32.mrf.mxu1  ;;  %v3406_v23 = vld [vmem:[%s5216_s1 + $0xc] sm:$0xf]  ;;  %v2789_v24 = vld [vmem:[%s5216_s1 + $0x18] sm:$0xf0] }
 0x21a   :  { %1217 = vmatpush.bf16.msrb.mxu0 %v2796_v12 }
 0x21b   :  { %v942_v42 = vsel %vm279_vm1, %v939_v31, %v940_v32  ;;  %v2792_v31 = vor.u32 %v3406_v23, %v2789_v24  ;;  %v3461_v23 = vld [vmem:[%s5216_s1 + $0xc4] sm:$0xf]  ;;  %v3009_v24 = vor.u32 %v3463_v22, %v3008_v21  ;;  %v2946_v22 = vld [vmem:[%s5216_s1 + $0x50] sm:$0xf0] }
 0x21c   :  { %v943_v48 = vsel %vm281_vm2, %v941_v58, %v942_v42  ;;  %1231 = vmatpush.bf16.msrb.mxu1 %v2784_v27  ;;  %v3464_v27 = vld [vmem:[%s5216_s1 + $0xd4] sm:$0xf0]  ;;  %v3445_v21 = vld [vmem:[%s5216_s1 + $0x44] sm:$0xf] }
 0x21d   :  { %v4496_v53 = vadd.f32 %v2772_v25, %v943_v48  ;;  %v2780_v25 = vor.u32 %v3407_v17, %v2779_v16  ;;  %1257 = vmatpush.bf16.msrb.mxu3 %v2792_v31  ;;  %v3029_v16 = vor.u32 %v3465_v11, %v3026_v13  ;;  %v3033_v17 = vor.u32 %v3468_v15, %v3032_v14  ;;  %v3452_v11 = vld [vmem:[%s5216_s1 + $0x74] sm:$0xf0] }
 0x21f   :  { %v2773_v62 = vmul.f32 -1.442695, %v4496_v53  ;;  %v966_v63 = vrot.slane %v4496_v53, 2  ;;  %v990_v0 = vrot.slane %v4496_v53, 6  ;;  %1218 = vmatpush.bf16.msrb.mxu0 %v2780_v25  ;;  %v987_v38 = vrot.slane %v4496_v53, 4  ;;  %1568 = vmatpush.bf16.msra.mxu2 %v3033_v17 }
 0x220   :  { %v917_v3 = vpop.f32.mrf.mxu2  ;;  %v930_v4 = vpop.f32.mrf.mxu3  ;;  %1555 = vmatpush.bf16.msra.mxu1 %v3029_v16  ;;  %v3010_v25 = vld [vmem:[%s5216_s1 + $0xd0] sm:$0xf0]  ;;  %v2970_v16 = vld [vmem:[%s5216_s1 + $0x78] sm:$0xf0]  ;;  %v2944_v17 = vld [vmem:[%s5216_s1 + $0x40] sm:$0xf] }
 0x221   :  { %3567 = vpow2.f32 %v2773_v62  ;;  %v2774_v9 = vmul.f32 -1.442695, %v966_v63  ;;  %v2775_v10 = vmul.f32 -1.442695, %v990_v0  ;;  %1581 = vmatpush.bf16.msra.mxu3 %v3037_v20  ;;  %v3013_v31 = vor.u32 %v3461_v23, %v3010_v25  ;;  %v2952_v23 = vld [vmem:[%s5216_s1 + $0x48] sm:$0xf] }
 0x222   :  { %v3448_v25 = vld [vmem:[%s5216_s1 + $0x54] sm:$0xf0] }
 0x223   :  { %3569 = vpow2.f32 %v2774_v9  ;;  %v3024_v9 = vld [vmem:[%s5216_s1 + $0xe0] sm:$0xf] }
 0x224   :  { %3571 = vpow2.f32 %v2775_v10  ;;  %v3467_v10 = vld [vmem:[%s5216_s1 + $0xec] sm:$0xf0]  ;;  %1556 = vmatpush.bf16.msra.mxu1 %v3013_v31  ;;  %v2928_v31 = vld [vmem:[%s5216_s1 + $0x20] sm:$0xf] }
 0x225   :  { %v3025_v12 = vor.u32 %v3467_v10, %v3024_v9  ;;  %v2968_v10 = vld [vmem:[%s5216_s1 + $0x68] sm:$0xf] }
 0x226   :  { %v2969_v15 = vor.u32 %v3452_v11, %v2968_v10 }
 0x227   :  { %v3568_v26 = vpop.eup %3567  ;;  %1542 = vmatpush.bf16.msra.mxu0 %v3025_v12  ;;  %v3450_v12 = vld [vmem:[%s5216_s1 + $0x6c] sm:$0xf] }
 0x228   :  { %v949_v30 = vadd.f32 1.0, %v3568_v26  ;;  %v3016_v26 = vld [vmem:[%s5216_s1 + $0xc8] sm:$0xf]  ;;  %v2973_v20 = vor.u32 %v3450_v12, %v2970_v16 }
 0x229   :  { %v3570_v32 = vpop.eup %3569 }
 0x22a   :  { %v3572_v33 = vpop.eup %3571  ;;  %3573 = vrcp.f32 %v949_v30  ;;  %v971_v34 = vadd.f32 1.0, %v3570_v32  ;;  %v961_v42 = vand.u32 2147483648, %v949_v30  ;;  %v959_v46 = vand.u32 2147483647, %v949_v30 }
 0x22b   :  { %v995_v35 = vadd.f32 1.0, %v3572_v33  ;;  %vm955_vm15 = vweird.f32 %v949_v30  ;;  %v3017_v32 = vor.u32 %v3464_v27, %v3016_v26  ;;  %v3462_v33 = vld [vmem:[%s5216_s1 + $0xcc] sm:$0xf]  ;;  %1543 = vmatpush.bf16.msra.mxu0 %v3009_v24  ;;  %v2954_v27 = vld [vmem:[%s5216_s1 + $0x58] sm:$0xf0] }
 0x22c   :  { %3575 = vrcp.f32 %v971_v34  ;;  %v983_v47 = vand.u32 2147483648, %v971_v34  ;;  %v981_v50 = vand.u32 2147483647, %v971_v34  ;;  %v962_v51 = vor.u32 1.1754944e-38, %v961_v42  ;;  %v3460_v42 = vld [vmem:[%s5216_s1 + $0xb4] sm:$0xf0] }
 0x22d   :  { %3577 = vrcp.f32 %v995_v35  ;;  %vm960_vm5 = vcmp.eq.f32.partialorder %v959_v46, 8.507059e+37  ;;  %vm977_vm6 = vweird.f32 %v971_v34  ;;  %v1007_v2 = vand.u32 2147483648, %v995_v35  ;;  %1569 = vmatpush.bf16.msra.mxu2 %v3017_v32  ;;  %v3002_v46 = vld [vmem:[%s5216_s1 + $0xb8] sm:$0xf0]  ;;  %v3446_v26 = vld [vmem:[%s5216_s1 + $0x4c] sm:$0xf] }
 0x22e   :  { %3579 = vtanh.f32 %v987_v38  ;;  %v984_v56 = vor.u32 1.1754944e-38, %v983_v47  ;;  %vm982_vm8 = vcmp.eq.f32.partialorder %v981_v50, 8.507059e+37  ;;  %vm1001_vm10 = vweird.f32 %v995_v35  ;;  %v3457_v38 = vld [vmem:[%s5216_s1 + $0xa4] sm:$0xf]  ;;  %v2976_v47 = vld [vmem:[%s5216_s1 + $0x80] sm:$0xf] }
 0x22f   :  { %v1005_v3 = vand.u32 2147483647, %v995_v35  ;;  %v1008_v5 = vor.u32 1.1754944e-38, %v1007_v2  ;;  %v3453_v50 = vld [vmem:[%s5216_s1 + $0x84] sm:$0xf] }
 0x230   :  { %v3574_v36 = vpop.eup %3573  ;;  %v3443_v32 = vld [vmem:[%s5216_s1 + $0x2c] sm:$0xf0] }
 0x231   :  { %v951_v37 = vmul.f32 %v3574_v36, %v949_v30  ;;  %vm956_vm14 = vweird.f32 %v3574_v36  ;;  %vm1006_vm12 = vcmp.eq.f32.partialorder %v1005_v3, 8.507059e+37 }
 0x232   :  { %v3576_v58 = vpop.eup %3575  ;;  %vm957_vm4 = vmor %vm955_vm15, %vm956_vm14 }
 0x233   :  { %v3578_v39 = vpop.eup %3577  ;;  %v952_v40 = vsub.f32 1.0, %v951_v37  ;;  %v973_v41 = vmul.f32 %v3576_v58, %v971_v34  ;;  %vm978_vm3 = vweird.f32 %v3576_v58  ;;  %v3018_v34 = vld [vmem:[%s5216_s1 + $0xd8] sm:$0xf0]  ;;  %v2992_v37 = vld [vmem:[%s5216_s1 + $0xa0] sm:$0xf] }
 0x234   :  { %v997_v43 = vmul.f32 %v3578_v39, %v995_v35  ;;  %vm979_vm7 = vmor %vm977_vm6, %vm978_vm3  ;;  %v3580_v59 = vpop.eup %3579  ;;  %vm1002_vm9 = vweird.f32 %v3578_v39 }
 0x235   :  { %v974_v44 = vsub.f32 1.0, %v973_v41  ;;  %v953_v45 = vmul.f32 %v3574_v36, %v952_v40  ;;  %vm1003_vm11 = vmor %vm1001_vm10, %vm1002_vm9  ;;  %v2994_v40 = vld [vmem:[%s5216_s1 + $0xb0] sm:$0xf0]  ;;  %v3000_v41 = vld [vmem:[%s5216_s1 + $0xa8] sm:$0xf] }
 0x236   :  { %v998_v52 = vsub.f32 1.0, %v997_v43  ;;  %v2997_v43 = vor.u32 %v3457_v38, %v2994_v40  ;;  %v2930_v40 = vld [vmem:[%s5216_s1 + $0x30] sm:$0xf0] }
 0x237   :  { %v954_v48 = vadd.f32 %v3574_v36, %v953_v45  ;;  %v975_v49 = vmul.f32 %v3576_v58, %v974_v44  ;;  %v3001_v44 = vor.u32 %v3460_v42, %v3000_v41  ;;  %v3458_v45 = vld [vmem:[%s5216_s1 + $0xac] sm:$0xf]  ;;  %v2936_v41 = vld [vmem:[%s5216_s1 + $0x28] sm:$0xf]  ;;  %v3444_v42 = vld [vmem:[%s5216_s1 + $0x34] sm:$0xf0] }
 0x238   :  { %v999_v61 = vmul.f32 %v3578_v39, %v998_v52  ;;  %1557 = vmatpush.bf16.msra.mxu1 %v2997_v43 }
 0x239   :  { %v958_v53 = vsel %vm957_vm4, %v3574_v36, %v954_v48  ;;  %v976_v54 = vadd.f32 %v3576_v58, %v975_v49  ;;  %v3021_v36 = vor.u32 %v3462_v33, %v3018_v34  ;;  %v3005_v48 = vor.u32 %v3458_v45, %v3002_v46  ;;  %v3455_v49 = vld [vmem:[%s5216_s1 + $0x8c] sm:$0xf0]  ;;  %1570 = vmatpush.bf16.msra.mxu2 %v3001_v44  ;;  %v3442_v45 = vld [vmem:[%s5216_s1 + $0x2c] sm:$0xf] }
 0x23a   :  { %v963_v55 = vsel %vm960_vm5, %v962_v51, %v958_v53  ;;  %v1000_v1 = vadd.f32 %v3578_v39, %v999_v61  ;;  %v2978_v51 = vld [vmem:[%s5216_s1 + $0x90] sm:$0xf0]  ;;  %v2977_v52 = vor.u32 %v3455_v49, %v2976_v47  ;;  %v2929_v46 = vor.u32 %v3443_v32, %v2928_v31  ;;  %v2938_v47 = vld [vmem:[%s5216_s1 + $0x38] sm:$0xf0] }
 0x23b   :  { %v980_v57 = vsel %vm979_vm7, %v3576_v58, %v976_v54  ;;  %v1012_v63 = vmul.f32 %v3580_v59, %v963_v55  ;;  %v3459_v58 = vld [vmem:[%s5216_s1 + $0xac] sm:$0xf0]  ;;  %1582 = vmatpush.bf16.msra.mxu3 %v3021_v36  ;;  %v2981_v53 = vor.u32 %v3453_v50, %v2978_v51  ;;  %v2984_v54 = vld [vmem:[%s5216_s1 + $0x88] sm:$0xf]  ;;  %v3456_v55 = vld [vmem:[%s5216_s1 + $0x94] sm:$0xf0]  ;;  %v2953_v36 = vor.u32 %v3448_v25, %v2952_v23 }
 0x23c   :  { %v985_v60 = vsel %vm982_vm8, %v984_v56, %v980_v57  ;;  %v1004_v4 = vsel %vm1003_vm11, %v3578_v39, %v1000_v1  ;;  %v2993_v39 = vor.u32 %v3459_v58, %v2992_v37  ;;  %v3454_v56 = vld [vmem:[%s5216_s1 + $0x8c] sm:$0xf]  ;;  %v2985_v61 = vor.u32 %v3456_v55, %v2984_v54  ;;  %v3451_v1 = vld [vmem:[%s5216_s1 + $0x6c] sm:$0xf0]  ;;  %v3441_v37 = vld [vmem:[%s5216_s1 + $0x24] sm:$0xf] }
 0x23d   :  { %v1011_v62 = vmul.f32 %v985_v60, %v4349_v29  ;;  %v1009_v7 = vsel %vm1006_vm12, %v1008_v5, %v1004_v4  ;;  %v2905_v60 = vld [vmem:[%s5215_s0 + $0x18] sm:$0xff]  ;;  %1558 = vmatpush.bf16.msra.mxu1 %v2981_v53  ;;  %v2937_v49 = vor.u32 %v3444_v42, %v2936_v41  ;;  %v2912_v50 = vld [vmem:[%s5216_s1] sm:$0xf]  ;;  %v3439_v51 = vld [vmem:[%s5216_s1 + $0xc] sm:$0xf0]  ;;  %v2941_v53 = vor.u32 %v3442_v45, %v2938_v47 }
 0x23e   :  { %1544 = vmatpush.bf16.msra.mxu0 %v2993_v39  ;;  %1571 = vmatpush.bf16.msra.mxu2 %v2985_v61  ;;  %v2957_v39 = vor.u32 %v3446_v26, %v2954_v27  ;;  %v2914_v54 = vld [vmem:[%s5216_s1 + $0x10] sm:$0xf0]  ;;  %v2920_v55 = vld [vmem:[%s5216_s1 + $0x8] sm:$0xf]  ;;  %v3497_v45 = vld [vmem:[%s5216_s1 + $0xe4] sm:$0xf] }
 0x23f   :  { %v4560_v0 = vadd.f32 %v1012_v63, %v1011_v62  ;;  %1583 = vmatpush.bf16.msra.mxu3 %v3005_v48  ;;  %v2986_v62 = vld [vmem:[%s5216_s1 + $0x98] sm:$0xf0]  ;;  %v2960_v63 = vld [vmem:[%s5216_s1 + $0x60] sm:$0xf]  ;;  %v2933_v48 = vor.u32 %v3441_v37, %v2930_v40  ;;  %v3159_v47 = vld [vmem:[%s5216_s1 + $0xf0] sm:$0xf0] }
 0x240   :  { %v2961_v9 = vor.u32 %v3451_v1, %v2960_v63 }
 0x241   :  { %3581 = vtanh.f32 %v4560_v0 }
 0x242   :  { %1545 = vmatpush.bf16.msra.mxu0 %v2977_v52  ;;  %1572 = vmatpush.bf16.msra.mxu2 %v2969_v15  ;;  %v3437_v52 = vld [vmem:[%s5216_s1 + $0x4] sm:$0xf] }
 0x246   :  { %1546 = vmatpush.bf16.msra.mxu0 %v2961_v9  ;;  %1573 = vmatpush.bf16.msra.mxu2 %v2953_v36 }
 0x247   :  { %v3582_v6 = vpop.eup %3581 }
 0x248   :  { %v1015_v8 = vmul.f32 %v3582_v6, %v1009_v7  ;;  %v2989_v6 = vor.u32 %v3454_v56, %v2986_v62  ;;  %v3449_v7 = vld [vmem:[%s5216_s1 + $0x64] sm:$0xf]  ;;  %v3440_v56 = vld [vmem:[%s5216_s1 + $0x14] sm:$0xf0]  ;;  %v2917_v62 = vor.u32 %v3437_v52, %v2914_v54  ;;  %v3498_v52 = vld [vmem:[%s5216_s1 + $0xec] sm:$0xf] }
 0x249   :  { %v2921_v63 = vor.u32 %v3440_v56, %v2920_v55  ;;  %v3141_v55 = vld [vmem:[%s5216_s1 + $0xc0] sm:$0xf]  ;;  %v3495_v56 = vld [vmem:[%s5216_s1 + $0xcc] sm:$0xf0] }
 0x24a   :  { %2776 = vst [vmem:[%s5219_s4 + $0x4] sm:$0x3] %v1015_v8  ;;  %v1018_v29 = vpack.c.bf16 %v1015_v8, %v1015_v8  ;;  %v2962_v8 = vld [vmem:[%s5216_s1 + $0x70] sm:$0xf0]  ;;  %1584 = vmatpush.bf16.msra.mxu3 %v2989_v6  ;;  %1574 = vmatpush.bf16.msra.mxu2 %v2937_v49  ;;  %v3500_v49 = vld [vmem:[%s5216_s1 + $0xf4] sm:$0xf0] }
 0x24b   :  { %v2965_v14 = vor.u32 %v3449_v7, %v2962_v8 }
 0x24c   :  { %1219 = vmatmul.bf16.vlgmr.msrb.gmra.mxu0 %v1018_v29  ;;  %1232 = vmatmul.bf16.vlgmr.msrb.gmra.mxu1 %v1018_v29 }
 0x24d   :  { %1245 = vmatmul.bf16.vlgmr.msrb.gmra.mxu2 %v1018_v29  ;;  %1258 = vmatmul.bf16.vlgmr.msrb.gmra.mxu3 %v1018_v29 }
 0x24e   :  { %1559 = vmatpush.bf16.msra.mxu1 %v2965_v14  ;;  %1585 = vmatpush.bf16.msra.mxu3 %v2973_v20 }
 0x24f   :  { %1575 = vmatpush.bf16.msra.mxu2 %v2921_v63 }
 0x252   :  { %1586 = vmatpush.bf16.msra.mxu3 %v2957_v39 }
 0x256   :  { %1587 = vmatpush.bf16.msra.mxu3 %v2941_v53  ;;  %v3167_v53 = vld [vmem:[%s5216_s1 + $0xf8] sm:$0xf0] }
 0x257   :  { %v3170_v54 = vor.u32 %v3498_v52, %v3167_v53  ;;  %v3479_v52 = vld [vmem:[%s5216_s1 + $0x4c] sm:$0xf0] }
 0x2c9   :  { %v1220_v28 = vpop.f32.mrf.mxu0  ;;  %v1233_v30 = vpop.f32.mrf.mxu1 }
 0x2ca   :  { %v1269_v35 = vrot.slane %v1233_v30, 6  ;;  %v2949_v30 = vor.u32 %v3445_v21, %v2946_v22 }
 0x2cc   :  { %v1272_v29 = vsel %vm277_vm0, %v1220_v28, %v1269_v35  ;;  %v2945_v28 = vor.u32 %v3447_v18, %v2944_v17  ;;  %1560 = vmatpush.bf16.msra.mxu1 %v2949_v30 }
 0x2ce   :  { %1547 = vmatpush.bf16.msra.mxu0 %v2945_v28 }
 0x2d0   :  { %v1246_v57 = vpop.f32.mrf.mxu2  ;;  %v1259_v59 = vpop.f32.mrf.mxu3  ;;  %1561 = vmatpush.bf16.msra.mxu1 %v2933_v48  ;;  %v3165_v48 = vld [vmem:[%s5216_s1 + $0xe8] sm:$0xf] }
 0x2d1   :  { %v1270_v2 = vrot.slane %v1246_v57, 4  ;;  %v1271_v3 = vrot.slane %v1259_v59, 2  ;;  %v1222_v4 = vpop.f32.mrf.mxu0  ;;  %v1235_v5 = vpop.f32.mrf.mxu1  ;;  %v3438_v57 = vld [vmem:[%s5216_s1 + $0xc] sm:$0xf]  ;;  %v2922_v59 = vld [vmem:[%s5216_s1 + $0x18] sm:$0xf0] }
 0x2d2   :  { %1548 = vmatpush.bf16.msra.mxu0 %v2929_v46 }
 0x2d3   :  { %v1273_v13 = vsel %vm279_vm1, %v1270_v2, %v1271_v3  ;;  %v2925_v2 = vor.u32 %v3438_v57, %v2922_v59  ;;  %v3493_v57 = vld [vmem:[%s5216_s1 + $0xc4] sm:$0xf]  ;;  %v3142_v59 = vor.u32 %v3495_v56, %v3141_v55  ;;  %v3079_v56 = vld [vmem:[%s5216_s1 + $0x50] sm:$0xf0] }
 0x2d4   :  { %v1274_v19 = vsel %vm281_vm2, %v1272_v29, %v1273_v13  ;;  %1562 = vmatpush.bf16.msra.mxu1 %v2917_v62  ;;  %v3496_v62 = vld [vmem:[%s5216_s1 + $0xd4] sm:$0xf0]  ;;  %v3477_v55 = vld [vmem:[%s5216_s1 + $0x44] sm:$0xf] }
 0x2d5   :  { %v4707_v24 = vadd.f32 %v2905_v60, %v1274_v19  ;;  %v2913_v60 = vor.u32 %v3439_v51, %v2912_v50  ;;  %1588 = vmatpush.bf16.msra.mxu3 %v2925_v2  ;;  %v3162_v50 = vor.u32 %v3497_v45, %v3159_v47  ;;  %v3166_v51 = vor.u32 %v3500_v49, %v3165_v48  ;;  %v3484_v45 = vld [vmem:[%s5216_s1 + $0x74] sm:$0xf0] }
 0x2d7   :  { %v2906_v33 = vmul.f32 -1.442695, %v4707_v24  ;;  %v1297_v34 = vrot.slane %v4707_v24, 2  ;;  %v1321_v35 = vrot.slane %v4707_v24, 6  ;;  %1549 = vmatpush.bf16.msra.mxu0 %v2913_v60  ;;  %v1318_v9 = vrot.slane %v4707_v24, 4  ;;  %1899 = vmatpush.bf16.msrb.mxu2 %v3166_v51 }
 0x2d8   :  { %v1248_v58 = vpop.f32.mrf.mxu2  ;;  %v1261_v38 = vpop.f32.mrf.mxu3  ;;  %1886 = vmatpush.bf16.msrb.mxu1 %v3162_v50  ;;  %v3143_v60 = vld [vmem:[%s5216_s1 + $0xd0] sm:$0xf0]  ;;  %v3103_v50 = vld [vmem:[%s5216_s1 + $0x78] sm:$0xf0]  ;;  %v3077_v51 = vld [vmem:[%s5216_s1 + $0x40] sm:$0xf] }
 0x2d9   :  { %3583 = vpow2.f32 %v2906_v33  ;;  %v2907_v43 = vmul.f32 -1.442695, %v1297_v34  ;;  %v2908_v44 = vmul.f32 -1.442695, %v1321_v35  ;;  %1912 = vmatpush.bf16.msrb.mxu3 %v3170_v54  ;;  %v3146_v2 = vor.u32 %v3493_v57, %v3143_v60  ;;  %v3085_v57 = vld [vmem:[%s5216_s1 + $0x48] sm:$0xf] }
 0x2da   :  { %v3480_v60 = vld [vmem:[%s5216_s1 + $0x54] sm:$0xf0] }
 0x2db   :  { %3585 = vpow2.f32 %v2907_v43  ;;  %v3157_v43 = vld [vmem:[%s5216_s1 + $0xe0] sm:$0xf] }
 0x2dc   :  { %3587 = vpow2.f32 %v2908_v44  ;;  %v3499_v44 = vld [vmem:[%s5216_s1 + $0xec] sm:$0xf0]  ;;  %1887 = vmatpush.bf16.msrb.mxu1 %v3146_v2  ;;  %v3061_v2 = vld [vmem:[%s5216_s1 + $0x20] sm:$0xf] }
 0x2dd   :  { %v3158_v46 = vor.u32 %v3499_v44, %v3157_v43  ;;  %v3101_v44 = vld [vmem:[%s5216_s1 + $0x68] sm:$0xf] }
 0x2de   :  { %v3102_v49 = vor.u32 %v3484_v45, %v3101_v44 }
 0x2df   :  { %v3584_v61 = vpop.eup %3583  ;;  %1873 = vmatpush.bf16.msrb.mxu0 %v3158_v46  ;;  %v3482_v46 = vld [vmem:[%s5216_s1 + $0x6c] sm:$0xf] }
 0x2e0   :  { %v1280_v1 = vadd.f32 1.0, %v3584_v61  ;;  %v3149_v61 = vld [vmem:[%s5216_s1 + $0xc8] sm:$0xf]  ;;  %v3106_v54 = vor.u32 %v3482_v46, %v3103_v50 }
 0x2e1   :  { %v3586_v3 = vpop.eup %3585 }
 0x2e2   :  { %v3588_v4 = vpop.eup %3587  ;;  %3589 = vrcp.f32 %v1280_v1  ;;  %v1302_v5 = vadd.f32 1.0, %v3586_v3  ;;  %v1292_v13 = vand.u32 2147483648, %v1280_v1  ;;  %v1290_v17 = vand.u32 2147483647, %v1280_v1 }
 0x2e3   :  { %v1326_v6 = vadd.f32 1.0, %v3588_v4  ;;  %vm1286_vm14 = vweird.f32 %v1280_v1  ;;  %v3150_v3 = vor.u32 %v3496_v62, %v3149_v61  ;;  %v3494_v4 = vld [vmem:[%s5216_s1 + $0xcc] sm:$0xf]  ;;  %1874 = vmatpush.bf16.msrb.mxu0 %v3142_v59  ;;  %v3087_v62 = vld [vmem:[%s5216_s1 + $0x58] sm:$0xf0] }
 0x2e4   :  { %3591 = vrcp.f32 %v1302_v5  ;;  %v1314_v18 = vand.u32 2147483648, %v1302_v5  ;;  %v1312_v21 = vand.u32 2147483647, %v1302_v5  ;;  %v1293_v22 = vor.u32 1.1754944e-38, %v1292_v13  ;;  %v3492_v13 = vld [vmem:[%s5216_s1 + $0xb4] sm:$0xf0] }
 0x2e5   :  { %3593 = vrcp.f32 %v1326_v6  ;;  %vm1291_vm4 = vcmp.eq.f32.partialorder %v1290_v17, 8.507059e+37  ;;  %vm1308_vm5 = vweird.f32 %v1302_v5  ;;  %v1338_v37 = vand.u32 2147483648, %v1326_v6  ;;  %1900 = vmatpush.bf16.msrb.mxu2 %v3150_v3  ;;  %v3135_v17 = vld [vmem:[%s5216_s1 + $0xb8] sm:$0xf0]  ;;  %v3478_v61 = vld [vmem:[%s5216_s1 + $0x4c] sm:$0xf] }
 0x2e6   :  { %3595 = vtanh.f32 %v1318_v9  ;;  %v1315_v27 = vor.u32 1.1754944e-38, %v1314_v18  ;;  %vm1313_vm7 = vcmp.eq.f32.partialorder %v1312_v21, 8.507059e+37  ;;  %vm1332_vm9 = vweird.f32 %v1326_v6  ;;  %v3489_v9 = vld [vmem:[%s5216_s1 + $0xa4] sm:$0xf]  ;;  %v3109_v18 = vld [vmem:[%s5216_s1 + $0x80] sm:$0xf] }
 0x2e7   :  { %v1336_v58 = vand.u32 2147483647, %v1326_v6  ;;  %v1339_v39 = vor.u32 1.1754944e-38, %v1338_v37  ;;  %v3485_v21 = vld [vmem:[%s5216_s1 + $0x84] sm:$0xf] }
 0x2e8   :  { %v3590_v7 = vpop.eup %3589  ;;  %v3475_v3 = vld [vmem:[%s5216_s1 + $0x2c] sm:$0xf0] }
 0x2e9   :  { %v1282_v8 = vmul.f32 %v3590_v7, %v1280_v1  ;;  %vm1287_vm13 = vweird.f32 %v3590_v7  ;;  %vm1337_vm11 = vcmp.eq.f32.partialorder %v1336_v58, 8.507059e+37 }
 0x2ea   :  { %v3592_v29 = vpop.eup %3591  ;;  %vm1288_vm3 = vmor %vm1286_vm14, %vm1287_vm13 }
 0x2eb   :  { %v3594_v10 = vpop.eup %3593  ;;  %v1283_v11 = vsub.f32 1.0, %v1282_v8  ;;  %v1304_v12 = vmul.f32 %v3592_v29, %v1302_v5  ;;  %vm1309_vm15 = vweird.f32 %v3592_v29  ;;  %v3151_v5 = vld [vmem:[%s5216_s1 + $0xd8] sm:$0xf0]  ;;  %v3125_v8 = vld [vmem:[%s5216_s1 + $0xa0] sm:$0xf] }
 0x2ec   :  { %v1328_v14 = vmul.f32 %v3594_v10, %v1326_v6  ;;  %vm1310_vm6 = vmor %vm1308_vm5, %vm1309_vm15  ;;  %v3596_v30 = vpop.eup %3595  ;;  %vm1333_vm8 = vweird.f32 %v3594_v10 }
 0x2ed   :  { %v1305_v15 = vsub.f32 1.0, %v1304_v12  ;;  %v1284_v16 = vmul.f32 %v3590_v7, %v1283_v11  ;;  %vm1334_vm10 = vmor %vm1332_vm9, %vm1333_vm8  ;;  %v3127_v11 = vld [vmem:[%s5216_s1 + $0xb0] sm:$0xf0]  ;;  %v3133_v12 = vld [vmem:[%s5216_s1 + $0xa8] sm:$0xf] }
 0x2ee   :  { %v1329_v23 = vsub.f32 1.0, %v1328_v14  ;;  %v3130_v14 = vor.u32 %v3489_v9, %v3127_v11  ;;  %v3063_v11 = vld [vmem:[%s5216_s1 + $0x30] sm:$0xf0] }
 0x2ef   :  { %v1285_v19 = vadd.f32 %v3590_v7, %v1284_v16  ;;  %v1306_v20 = vmul.f32 %v3592_v29, %v1305_v15  ;;  %v3134_v15 = vor.u32 %v3492_v13, %v3133_v12  ;;  %v3490_v16 = vld [vmem:[%s5216_s1 + $0xac] sm:$0xf]  ;;  %v3069_v12 = vld [vmem:[%s5216_s1 + $0x28] sm:$0xf]  ;;  %v3476_v13 = vld [vmem:[%s5216_s1 + $0x34] sm:$0xf0] }
 0x2f0   :  { %v1330_v32 = vmul.f32 %v3594_v10, %v1329_v23  ;;  %1888 = vmatpush.bf16.msrb.mxu1 %v3130_v14 }
 0x2f1   :  { %v1289_v24 = vsel %vm1288_vm3, %v3590_v7, %v1285_v19  ;;  %v1307_v25 = vadd.f32 %v3592_v29, %v1306_v20  ;;  %v3154_v7 = vor.u32 %v3494_v4, %v3151_v5  ;;  %v3138_v19 = vor.u32 %v3490_v16, %v3135_v17  ;;  %v3487_v20 = vld [vmem:[%s5216_s1 + $0x8c] sm:$0xf0]  ;;  %1901 = vmatpush.bf16.msrb.mxu2 %v3134_v15  ;;  %v3474_v16 = vld [vmem:[%s5216_s1 + $0x2c] sm:$0xf] }
 0x2f2   :  { %v1294_v26 = vsel %vm1291_vm4, %v1293_v22, %v1289_v24  ;;  %v1331_v36 = vadd.f32 %v3594_v10, %v1330_v32  ;;  %v3111_v22 = vld [vmem:[%s5216_s1 + $0x90] sm:$0xf0]  ;;  %v3110_v23 = vor.u32 %v3487_v20, %v3109_v18  ;;  %v3062_v17 = vor.u32 %v3475_v3, %v3061_v2  ;;  %v3071_v18 = vld [vmem:[%s5216_s1 + $0x38] sm:$0xf0] }
 0x2f3   :  { %v1311_v28 = vsel %vm1310_vm6, %v3592_v29, %v1307_v25  ;;  %v1343_v34 = vmul.f32 %v3596_v30, %v1294_v26  ;;  %v3491_v29 = vld [vmem:[%s5216_s1 + $0xac] sm:$0xf0]  ;;  %1913 = vmatpush.bf16.msrb.mxu3 %v3154_v7  ;;  %v3114_v24 = vor.u32 %v3485_v21, %v3111_v22  ;;  %v3117_v25 = vld [vmem:[%s5216_s1 + $0x88] sm:$0xf]  ;;  %v3488_v26 = vld [vmem:[%s5216_s1 + $0x94] sm:$0xf0]  ;;  %v3086_v7 = vor.u32 %v3480_v60, %v3085_v57 }
 0x2f4   :  { %v1316_v31 = vsel %vm1313_vm7, %v1315_v27, %v1311_v28  ;;  %v1335_v38 = vsel %vm1334_vm10, %v3594_v10, %v1331_v36  ;;  %v3126_v10 = vor.u32 %v3491_v29, %v3125_v8  ;;  %v3486_v27 = vld [vmem:[%s5216_s1 + $0x8c] sm:$0xf]  ;;  %v3118_v32 = vor.u32 %v3488_v26, %v3117_v25  ;;  %v3483_v36 = vld [vmem:[%s5216_s1 + $0x6c] sm:$0xf0]  ;;  %v3473_v8 = vld [vmem:[%s5216_s1 + $0x24] sm:$0xf] }
 0x2f5   :  { %v1342_v33 = vmul.f32 %v1316_v31, %v4560_v0  ;;  %v1340_v41 = vsel %vm1337_vm11, %v1339_v39, %v1335_v38  ;;  %v3038_v31 = vld [vmem:[%s5215_s0 + $0x20] sm:$0xff]  ;;  %1889 = vmatpush.bf16.msrb.mxu1 %v3114_v24  ;;  %v3070_v20 = vor.u32 %v3476_v13, %v3069_v12  ;;  %v3471_v22 = vld [vmem:[%s5216_s1 + $0xc] sm:$0xf0]  ;;  %v3074_v24 = vor.u32 %v3474_v16, %v3071_v18  ;;  %v3047_v25 = vld [vmem:[%s5216_s1 + $0x10] sm:$0xf0] }
 0x2f6   :  { %1875 = vmatpush.bf16.msrb.mxu0 %v3126_v10  ;;  %1902 = vmatpush.bf16.msrb.mxu2 %v3118_v32  ;;  %v3090_v10 = vor.u32 %v3478_v61, %v3087_v62  ;;  %v3045_v21 = vld [vmem:[%s5216_s1] sm:$0xf]  ;;  %v3053_v26 = vld [vmem:[%s5216_s1 + $0x8] sm:$0xf]  ;;  %v3529_v16 = vld [vmem:[%s5216_s1 + $0xe4] sm:$0xf] }
 0x2f7   :  { %v4771_v35 = vadd.f32 %v1343_v34, %v1342_v33  ;;  %1914 = vmatpush.bf16.msrb.mxu3 %v3138_v19  ;;  %v3119_v33 = vld [vmem:[%s5216_s1 + $0x98] sm:$0xf0]  ;;  %v3093_v34 = vld [vmem:[%s5216_s1 + $0x60] sm:$0xf]  ;;  %v3066_v19 = vor.u32 %v3473_v8, %v3063_v11  ;;  %v3292_v18 = vld [vmem:[%s5216_s1 + $0xf0] sm:$0xf0] }
 0x2f8   :  { %v3094_v43 = vor.u32 %v3483_v36, %v3093_v34 }
 0x2f9   :  { %3597 = vtanh.f32 %v4771_v35 }
 0x2fa   :  { %1876 = vmatpush.bf16.msrb.mxu0 %v3110_v23  ;;  %1903 = vmatpush.bf16.msrb.mxu2 %v3102_v49  ;;  %v3469_v23 = vld [vmem:[%s5216_s1 + $0x4] sm:$0xf] }
 0x2fe   :  { %1877 = vmatpush.bf16.msrb.mxu0 %v3094_v43  ;;  %1904 = vmatpush.bf16.msrb.mxu2 %v3086_v7 }
 0x2ff   :  { %v3598_v40 = vpop.eup %3597 }
 0x300   :  { %v1346_v42 = vmul.f32 %v3598_v40, %v1340_v41  ;;  %v3122_v40 = vor.u32 %v3486_v27, %v3119_v33  ;;  %v3481_v41 = vld [vmem:[%s5216_s1 + $0x64] sm:$0xf]  ;;  %v3472_v27 = vld [vmem:[%s5216_s1 + $0x14] sm:$0xf0]  ;;  %v3050_v33 = vor.u32 %v3469_v23, %v3047_v25  ;;  %v3530_v23 = vld [vmem:[%s5216_s1 + $0xec] sm:$0xf] }
 0x301   :  { %v3054_v34 = vor.u32 %v3472_v27, %v3053_v26  ;;  %v3274_v26 = vld [vmem:[%s5216_s1 + $0xc0] sm:$0xf]  ;;  %v3527_v27 = vld [vmem:[%s5216_s1 + $0xcc] sm:$0xf0] }
 0x302   :  { %2909 = vst [vmem:[%s5219_s4 + $0x6] sm:$0x3] %v1346_v42  ;;  %v1349_v0 = vpack.c.bf16 %v1346_v42, %v1346_v42  ;;  %v3095_v42 = vld [vmem:[%s5216_s1 + $0x70] sm:$0xf0]  ;;  %1915 = vmatpush.bf16.msrb.mxu3 %v3122_v40  ;;  %1905 = vmatpush.bf16.msrb.mxu2 %v3070_v20  ;;  %v3532_v20 = vld [vmem:[%s5216_s1 + $0xf4] sm:$0xf0] }
 0x303   :  { %v3098_v48 = vor.u32 %v3481_v41, %v3095_v42 }
 0x304   :  { %1550 = vmatmul.bf16.vlgmr.msra.gmra.mxu0 %v1349_v0  ;;  %1563 = vmatmul.bf16.vlgmr.msra.gmra.mxu1 %v1349_v0 }
 0x305   :  { %1576 = vmatmul.bf16.vlgmr.msra.gmra.mxu2 %v1349_v0  ;;  %1589 = vmatmul.bf16.vlgmr.msra.gmra.mxu3 %v1349_v0 }
 0x306   :  { %1890 = vmatpush.bf16.msrb.mxu1 %v3098_v48  ;;  %1916 = vmatpush.bf16.msrb.mxu3 %v3106_v54 }
 0x307   :  { %1906 = vmatpush.bf16.msrb.mxu2 %v3054_v34 }
 0x30a   :  { %1917 = vmatpush.bf16.msrb.mxu3 %v3090_v10 }
 0x30e   :  { %1918 = vmatpush.bf16.msrb.mxu3 %v3074_v24  ;;  %v3300_v24 = vld [vmem:[%s5216_s1 + $0xf8] sm:$0xf0] }
 0x30f   :  { %v3303_v25 = vor.u32 %v3530_v23, %v3300_v24  ;;  %v3511_v23 = vld [vmem:[%s5216_s1 + $0x4c] sm:$0xf0] }
 0x381   :  { %v1551_v63 = vpop.f32.mrf.mxu0  ;;  %v1564_v1 = vpop.f32.mrf.mxu1 }
 0x382   :  { %v1600_v6 = vrot.slane %v1564_v1, 6  ;;  %v3082_v1 = vor.u32 %v3477_v55, %v3079_v56 }
 0x384   :  { %v1603_v0 = vsel %vm277_vm0, %v1551_v63, %v1600_v6  ;;  %v3078_v63 = vor.u32 %v3479_v52, %v3077_v51  ;;  %1891 = vmatpush.bf16.msrb.mxu1 %v3082_v1 }
 0x386   :  { %1878 = vmatpush.bf16.msrb.mxu0 %v3078_v63 }
 0x388   :  { %v1577_v28 = vpop.f32.mrf.mxu2  ;;  %v1590_v30 = vpop.f32.mrf.mxu3  ;;  %1892 = vmatpush.bf16.msrb.mxu1 %v3066_v19  ;;  %v3298_v19 = vld [vmem:[%s5216_s1 + $0xe8] sm:$0xf] }
 0x389   :  { %v1601_v37 = vrot.slane %v1577_v28, 4  ;;  %v1602_v58 = vrot.slane %v1590_v30, 2  ;;  %v1553_v38 = vpop.f32.mrf.mxu0  ;;  %v1566_v39 = vpop.f32.mrf.mxu1  ;;  %v3470_v28 = vld [vmem:[%s5216_s1 + $0xc] sm:$0xf]  ;;  %v3055_v30 = vld [vmem:[%s5216_s1 + $0x18] sm:$0xf0] }
 0x38a   :  { %1879 = vmatpush.bf16.msrb.mxu0 %v3062_v17 }
 0x38b   :  { %v1604_v47 = vsel %vm279_vm1, %v1601_v37, %v1602_v58  ;;  %v3058_v37 = vor.u32 %v3470_v28, %v3055_v30  ;;  %v3525_v28 = vld [vmem:[%s5216_s1 + $0xc4] sm:$0xf]  ;;  %v3275_v30 = vor.u32 %v3527_v27, %v3274_v26  ;;  %v3212_v27 = vld [vmem:[%s5216_s1 + $0x50] sm:$0xf0] }
 0x38c   :  { %v1605_v53 = vsel %vm281_vm2, %v1603_v0, %v1604_v47  ;;  %1893 = vmatpush.bf16.msrb.mxu1 %v3050_v33  ;;  %v3528_v33 = vld [vmem:[%s5216_s1 + $0xd4] sm:$0xf0]  ;;  %v3509_v26 = vld [vmem:[%s5216_s1 + $0x44] sm:$0xf] }
 0x38d   :  { %v4918_v59 = vadd.f32 %v3038_v31, %v1605_v53  ;;  %v3046_v31 = vor.u32 %v3471_v22, %v3045_v21  ;;  %1919 = vmatpush.bf16.msrb.mxu3 %v3058_v37  ;;  %v3295_v21 = vor.u32 %v3529_v16, %v3292_v18  ;;  %v3299_v22 = vor.u32 %v3532_v20, %v3298_v19  ;;  %v3516_v16 = vld [vmem:[%s5216_s1 + $0x74] sm:$0xf0] }
 0x38f   :  { %v3039_v4 = vmul.f32 -1.442695, %v4918_v59  ;;  %v1628_v5 = vrot.slane %v4918_v59, 2  ;;  %v1652_v6 = vrot.slane %v4918_v59, 6  ;;  %1880 = vmatpush.bf16.msrb.mxu0 %v3046_v31  ;;  %v1649_v43 = vrot.slane %v4918_v59, 4  ;;  %2230 = vmatpush.bf16.msra.mxu2 %v3299_v22 }
 0x390   :  { %v1579_v29 = vpop.f32.mrf.mxu2  ;;  %v1592_v9 = vpop.f32.mrf.mxu3  ;;  %2217 = vmatpush.bf16.msra.mxu1 %v3295_v21  ;;  %v3276_v31 = vld [vmem:[%s5216_s1 + $0xd0] sm:$0xf0]  ;;  %v3236_v21 = vld [vmem:[%s5216_s1 + $0x78] sm:$0xf0]  ;;  %v3210_v22 = vld [vmem:[%s5216_s1 + $0x40] sm:$0xf] }
 0x391   :  { %3599 = vpow2.f32 %v3039_v4  ;;  %v3040_v14 = vmul.f32 -1.442695, %v1628_v5  ;;  %v3041_v15 = vmul.f32 -1.442695, %v1652_v6  ;;  %2243 = vmatpush.bf16.msra.mxu3 %v3303_v25  ;;  %v3279_v37 = vor.u32 %v3525_v28, %v3276_v31  ;;  %v3218_v28 = vld [vmem:[%s5216_s1 + $0x48] sm:$0xf] }
 0x392   :  { %v3512_v31 = vld [vmem:[%s5216_s1 + $0x54] sm:$0xf0] }
 0x393   :  { %3601 = vpow2.f32 %v3040_v14  ;;  %v3290_v14 = vld [vmem:[%s5216_s1 + $0xe0] sm:$0xf] }
 0x394   :  { %3603 = vpow2.f32 %v3041_v15  ;;  %v3531_v15 = vld [vmem:[%s5216_s1 + $0xec] sm:$0xf0]  ;;  %2218 = vmatpush.bf16.msra.mxu1 %v3279_v37  ;;  %v3194_v37 = vld [vmem:[%s5216_s1 + $0x20] sm:$0xf] }
 0x395   :  { %v3291_v17 = vor.u32 %v3531_v15, %v3290_v14  ;;  %v3234_v15 = vld [vmem:[%s5216_s1 + $0x68] sm:$0xf] }
 0x396   :  { %v3235_v20 = vor.u32 %v3516_v16, %v3234_v15 }
 0x397   :  { %v3600_v32 = vpop.eup %3599  ;;  %2204 = vmatpush.bf16.msra.mxu0 %v3291_v17  ;;  %v3514_v17 = vld [vmem:[%s5216_s1 + $0x6c] sm:$0xf] }
 0x398   :  { %v1611_v36 = vadd.f32 1.0, %v3600_v32  ;;  %v3282_v32 = vld [vmem:[%s5216_s1 + $0xc8] sm:$0xf]  ;;  %v3239_v25 = vor.u32 %v3514_v17, %v3236_v21 }
 0x399   :  { %v3602_v58 = vpop.eup %3601 }
 0x39a   :  { %v3604_v38 = vpop.eup %3603  ;;  %3605 = vrcp.f32 %v1611_v36  ;;  %v1633_v39 = vadd.f32 1.0, %v3602_v58  ;;  %v1623_v47 = vand.u32 2147483648, %v1611_v36  ;;  %v1621_v51 = vand.u32 2147483647, %v1611_v36 }
 0x39b   :  { %v1657_v40 = vadd.f32 1.0, %v3604_v38  ;;  %vm1617_vm13 = vweird.f32 %v1611_v36  ;;  %v3283_v58 = vor.u32 %v3528_v33, %v3282_v32  ;;  %v3526_v38 = vld [vmem:[%s5216_s1 + $0xcc] sm:$0xf]  ;;  %2205 = vmatpush.bf16.msra.mxu0 %v3275_v30  ;;  %v3220_v33 = vld [vmem:[%s5216_s1 + $0x58] sm:$0xf0] }
 0x39c   :  { %3607 = vrcp.f32 %v1633_v39  ;;  %v1645_v52 = vand.u32 2147483648, %v1633_v39  ;;  %v1643_v55 = vand.u32 2147483647, %v1633_v39  ;;  %v1624_v56 = vor.u32 1.1754944e-38, %v1623_v47  ;;  %v3524_v47 = vld [vmem:[%s5216_s1 + $0xb4] sm:$0xf0] }
 0x39d   :  { %3609 = vrcp.f32 %v1657_v40  ;;  %vm1622_vm3 = vcmp.eq.f32.partialorder %v1621_v51, 8.507059e+37  ;;  %vm1639_vm4 = vweird.f32 %v1633_v39  ;;  %v1669_v8 = vand.u32 2147483648, %v1657_v40  ;;  %2231 = vmatpush.bf16.msra.mxu2 %v3283_v58  ;;  %v3268_v51 = vld [vmem:[%s5216_s1 + $0xb8] sm:$0xf0]  ;;  %v3510_v32 = vld [vmem:[%s5216_s1 + $0x4c] sm:$0xf] }
 0x39e   :  { %3611 = vtanh.f32 %v1649_v43  ;;  %v1646_v62 = vor.u32 1.1754944e-38, %v1645_v52  ;;  %vm1644_vm6 = vcmp.eq.f32.partialorder %v1643_v55, 8.507059e+37  ;;  %vm1663_vm8 = vweird.f32 %v1657_v40  ;;  %v3521_v43 = vld [vmem:[%s5216_s1 + $0xa4] sm:$0xf]  ;;  %v3242_v52 = vld [vmem:[%s5216_s1 + $0x80] sm:$0xf] }
 0x39f   :  { %v1667_v29 = vand.u32 2147483647, %v1657_v40  ;;  %v1670_v10 = vor.u32 1.1754944e-38, %v1669_v8  ;;  %v3517_v55 = vld [vmem:[%s5216_s1 + $0x84] sm:$0xf] }
 0x3a0   :  { %v3606_v41 = vpop.eup %3605  ;;  %v3507_v58 = vld [vmem:[%s5216_s1 + $0x2c] sm:$0xf0] }
 0x3a1   :  { %v1613_v42 = vmul.f32 %v3606_v41, %v1611_v36  ;;  %vm1618_vm12 = vweird.f32 %v3606_v41  ;;  %vm1668_vm10 = vcmp.eq.f32.partialorder %v1667_v29, 8.507059e+37 }
 0x3a2   :  { %v3608_v0 = vpop.eup %3607  ;;  %vm1619_vm15 = vmor %vm1617_vm13, %vm1618_vm12 }
 0x3a3   :  { %v3610_v44 = vpop.eup %3609  ;;  %v1614_v45 = vsub.f32 1.0, %v1613_v42  ;;  %v1635_v46 = vmul.f32 %v3608_v0, %v1633_v39  ;;  %vm1640_vm14 = vweird.f32 %v3608_v0  ;;  %v3284_v39 = vld [vmem:[%s5216_s1 + $0xd8] sm:$0xf0]  ;;  %v3258_v42 = vld [vmem:[%s5216_s1 + $0xa0] sm:$0xf] }
 0x3a4   :  { %v1659_v48 = vmul.f32 %v3610_v44, %v1657_v40  ;;  %vm1641_vm5 = vmor %vm1639_vm4, %vm1640_vm14  ;;  %v3612_v1 = vpop.eup %3611  ;;  %vm1664_vm7 = vweird.f32 %v3610_v44 }
 0x3a5   :  { %v1636_v49 = vsub.f32 1.0, %v1635_v46  ;;  %v1615_v50 = vmul.f32 %v3606_v41, %v1614_v45  ;;  %vm1665_vm9 = vmor %vm1663_vm8, %vm1664_vm7  ;;  %v3260_v45 = vld [vmem:[%s5216_s1 + $0xb0] sm:$0xf0]  ;;  %v3266_v46 = vld [vmem:[%s5216_s1 + $0xa8] sm:$0xf] }
 0x3a6   :  { %v1660_v57 = vsub.f32 1.0, %v1659_v48  ;;  %v3263_v48 = vor.u32 %v3521_v43, %v3260_v45  ;;  %v3196_v45 = vld [vmem:[%s5216_s1 + $0x30] sm:$0xf0] }
 0x3a7   :  { %v1616_v53 = vadd.f32 %v3606_v41, %v1615_v50  ;;  %v1637_v54 = vmul.f32 %v3608_v0, %v1636_v49  ;;  %v3267_v49 = vor.u32 %v3524_v47, %v3266_v46  ;;  %v3522_v50 = vld [vmem:[%s5216_s1 + $0xac] sm:$0xf]  ;;  %v3202_v46 = vld [vmem:[%s5216_s1 + $0x28] sm:$0xf]  ;;  %v3508_v47 = vld [vmem:[%s5216_s1 + $0x34] sm:$0xf0] }
 0x3a8   :  { %v1661_v3 = vmul.f32 %v3610_v44, %v1660_v57  ;;  %2219 = vmatpush.bf16.msra.mxu1 %v3263_v48 }
 0x3a9   :  { %v1620_v59 = vsel %vm1619_vm15, %v3606_v41, %v1616_v53  ;;  %v1638_v60 = vadd.f32 %v3608_v0, %v1637_v54  ;;  %v3287_v41 = vor.u32 %v3526_v38, %v3284_v39  ;;  %v3271_v53 = vor.u32 %v3522_v50, %v3268_v51  ;;  %v3519_v54 = vld [vmem:[%s5216_s1 + $0x8c] sm:$0xf0]  ;;  %2232 = vmatpush.bf16.msra.mxu2 %v3267_v49  ;;  %v3506_v50 = vld [vmem:[%s5216_s1 + $0x2c] sm:$0xf] }
 0x3aa   :  { %v1625_v61 = vsel %vm1622_vm3, %v1624_v56, %v1620_v59  ;;  %v1662_v7 = vadd.f32 %v3610_v44, %v1661_v3  ;;  %v3244_v56 = vld [vmem:[%s5216_s1 + $0x90] sm:$0xf0]  ;;  %v3243_v57 = vor.u32 %v3519_v54, %v3242_v52  ;;  %v3195_v51 = vor.u32 %v3507_v58, %v3194_v37  ;;  %v3204_v52 = vld [vmem:[%s5216_s1 + $0x38] sm:$0xf0] }
 0x3ab   :  { %v1642_v63 = vsel %vm1641_vm5, %v3608_v0, %v1638_v60  ;;  %v1674_v5 = vmul.f32 %v3612_v1, %v1625_v61  ;;  %v3523_v0 = vld [vmem:[%s5216_s1 + $0xac] sm:$0xf0]  ;;  %2244 = vmatpush.bf16.msra.mxu3 %v3287_v41  ;;  %v3247_v59 = vor.u32 %v3517_v55, %v3244_v56  ;;  %v3250_v60 = vld [vmem:[%s5216_s1 + $0x88] sm:$0xf]  ;;  %v3520_v61 = vld [vmem:[%s5216_s1 + $0x94] sm:$0xf0]  ;;  %v3219_v41 = vor.u32 %v3512_v31, %v3218_v28 }
 0x3ac   :  { %v1647_v2 = vsel %vm1644_vm6, %v1646_v62, %v1642_v63  ;;  %v1666_v9 = vsel %vm1665_vm9, %v3610_v44, %v1662_v7  ;;  %v3259_v44 = vor.u32 %v3523_v0, %v3258_v42  ;;  %v3518_v62 = vld [vmem:[%s5216_s1 + $0x8c] sm:$0xf]  ;;  %v3251_v3 = vor.u32 %v3520_v61, %v3250_v60  ;;  %v3515_v7 = vld [vmem:[%s5216_s1 + $0x6c] sm:$0xf0]  ;;  %v3505_v42 = vld [vmem:[%s5216_s1 + $0x24] sm:$0xf] }
 0x3ad   :  { %v1673_v4 = vmul.f32 %v1647_v2, %v4771_v35  ;;  %v1671_v12 = vsel %vm1668_vm10, %v1670_v10, %v1666_v9  ;;  %v3171_v2 = vld [vmem:[%s5215_s0 + $0x28] sm:$0xff]  ;;  %2220 = vmatpush.bf16.msra.mxu1 %v3247_v59  ;;  %v3203_v54 = vor.u32 %v3508_v47, %v3202_v46  ;;  %v3178_v55 = vld [vmem:[%s5216_s1] sm:$0xf]  ;;  %v3503_v56 = vld [vmem:[%s5216_s1 + $0xc] sm:$0xf0]  ;;  %v3207_v59 = vor.u32 %v3506_v50, %v3204_v52 }
 0x3ae   :  { %2206 = vmatpush.bf16.msra.mxu0 %v3259_v44  ;;  %2233 = vmatpush.bf16.msra.mxu2 %v3251_v3  ;;  %v3223_v44 = vor.u32 %v3510_v32, %v3220_v33  ;;  %v3180_v60 = vld [vmem:[%s5216_s1 + $0x10] sm:$0xf0]  ;;  %v3186_v61 = vld [vmem:[%s5216_s1 + $0x8] sm:$0xf] }
 0x3af   :  { %v4982_v6 = vadd.f32 %v1674_v5, %v1673_v4  ;;  %2245 = vmatpush.bf16.msra.mxu3 %v3271_v53  ;;  %v3252_v4 = vld [vmem:[%s5216_s1 + $0x98] sm:$0xf0]  ;;  %v3226_v5 = vld [vmem:[%s5216_s1 + $0x60] sm:$0xf]  ;;  %v3199_v53 = vor.u32 %v3505_v42, %v3196_v45 }
 0x3b0   :  { %v3227_v14 = vor.u32 %v3515_v7, %v3226_v5 }
 0x3b1   :  { %3613 = vtanh.f32 %v4982_v6 }
 0x3b2   :  { %2207 = vmatpush.bf16.msra.mxu0 %v3243_v57  ;;  %2234 = vmatpush.bf16.msra.mxu2 %v3235_v20  ;;  %v3501_v57 = vld [vmem:[%s5216_s1 + $0x4] sm:$0xf] }
 0x3b6   :  { %2208 = vmatpush.bf16.msra.mxu0 %v3227_v14  ;;  %2235 = vmatpush.bf16.msra.mxu2 %v3219_v41 }
 0x3b7   :  { %v3614_v11 = vpop.eup %3613 }
 0x3b8   :  { %v1677_v13 = vmul.f32 %v3614_v11, %v1671_v12  ;;  %v3255_v11 = vor.u32 %v3518_v62, %v3252_v4  ;;  %v3513_v12 = vld [vmem:[%s5216_s1 + $0x64] sm:$0xf]  ;;  %v3504_v62 = vld [vmem:[%s5216_s1 + $0x14] sm:$0xf0]  ;;  %v3183_v4 = vor.u32 %v3501_v57, %v3180_v60  ;;  %v3304_v57 = vld [vmem:[%s5215_s0 + $0x30] sm:$0xff]  ;;  %s3699_s0 = smov [#allocation4]  }
 0x3b9   :  { %v3187_v5 = vor.u32 %v3504_v62, %v3186_v61  ;;  %s2362_s25 = sshll.u32 %s3699_s0, 4  ;;  %s2363_s25 = int_to_ptr.vmem [resolvable:$true] %s2362_s25 }
 0x3ba   :  { %3042 = vst [vmem:[%s5219_s4 + $0x8] sm:$0x3] %v1677_v13  ;;  %v1680_v35 = vpack.c.bf16 %v1677_v13, %v1677_v13  ;;  %v3228_v13 = vld [vmem:[%s5216_s1 + $0x70] sm:$0xf0]  ;;  %2246 = vmatpush.bf16.msra.mxu3 %v3255_v11  ;;  %2236 = vmatpush.bf16.msra.mxu2 %v3203_v54 }
 0x3bb   :  { %v3231_v19 = vor.u32 %v3513_v12, %v3228_v13 }
 0x3bc   :  { %1881 = vmatmul.bf16.vlgmr.msrb.gmra.mxu0 %v1680_v35  ;;  %1894 = vmatmul.bf16.vlgmr.msrb.gmra.mxu1 %v1680_v35 }
 0x3bd   :  { %1907 = vmatmul.bf16.vlgmr.msrb.gmra.mxu2 %v1680_v35  ;;  %1920 = vmatmul.bf16.vlgmr.msrb.gmra.mxu3 %v1680_v35 }
 0x3be   :  { %2221 = vmatpush.bf16.msra.mxu1 %v3231_v19  ;;  %2247 = vmatpush.bf16.msra.mxu3 %v3239_v25 }
 0x3bf   :  { %2237 = vmatpush.bf16.msra.mxu2 %v3187_v5 }
 0x3c2   :  { %2248 = vmatpush.bf16.msra.mxu3 %v3223_v44 }
 0x3c6   :  { %2249 = vmatpush.bf16.msra.mxu3 %v3207_v59 }
 0x439   :  { %v1882_v34 = vpop.f32.mrf.mxu0  ;;  %v1895_v36 = vpop.f32.mrf.mxu1 }
 0x43a   :  { %v1931_v40 = vrot.slane %v1895_v36, 6  ;;  %v3215_v36 = vor.u32 %v3509_v26, %v3212_v27 }
 0x43c   :  { %v1934_v35 = vsel %vm277_vm0, %v1882_v34, %v1931_v40  ;;  %v3211_v34 = vor.u32 %v3511_v23, %v3210_v22  ;;  %2222 = vmatpush.bf16.msra.mxu1 %v3215_v36 }
 0x43e   :  { %2209 = vmatpush.bf16.msra.mxu0 %v3211_v34 }
 0x440   :  { %v1908_v63 = vpop.f32.mrf.mxu2  ;;  %v1921_v1 = vpop.f32.mrf.mxu3  ;;  %2223 = vmatpush.bf16.msra.mxu1 %v3199_v53 }
 0x441   :  { %v1932_v8 = vrot.slane %v1908_v63, 4  ;;  %v1933_v29 = vrot.slane %v1921_v1, 2  ;;  %v1884_v9 = vpop.f32.mrf.mxu0  ;;  %v1897_v10 = vpop.f32.mrf.mxu1  ;;  %v3502_v63 = vld [vmem:[%s5216_s1 + $0xc] sm:$0xf]  ;;  %v3188_v1 = vld [vmem:[%s5216_s1 + $0x18] sm:$0xf0] }
 0x442   :  { %2210 = vmatpush.bf16.msra.mxu0 %v3195_v51 }
 0x443   :  { %v1935_v18 = vsel %vm279_vm1, %v1932_v8, %v1933_v29  ;;  %v3191_v8 = vor.u32 %v3502_v63, %v3188_v1 }
 0x444   :  { %v1936_v24 = vsel %vm281_vm2, %v1934_v35, %v1935_v18  ;;  %2224 = vmatpush.bf16.msra.mxu1 %v3183_v4 }
 0x445   :  { %v5129_v30 = vadd.f32 %v3171_v2, %v1936_v24  ;;  %v3179_v2 = vor.u32 %v3503_v56, %v3178_v55  ;;  %2250 = vmatpush.bf16.msra.mxu3 %v3191_v8 }
 0x447   :  { %v3172_v38 = vmul.f32 -1.442695, %v5129_v30  ;;  %v1959_v39 = vrot.slane %v5129_v30, 2  ;;  %v1983_v40 = vrot.slane %v5129_v30, 6  ;;  %2211 = vmatpush.bf16.msra.mxu0 %v3179_v2  ;;  %v1980_v14 = vrot.slane %v5129_v30, 4 }
 0x448   :  { %v1910_v0 = vpop.f32.mrf.mxu2  ;;  %v1923_v43 = vpop.f32.mrf.mxu3 }
 0x449   :  { %3615 = vpow2.f32 %v3172_v38  ;;  %v3173_v48 = vmul.f32 -1.442695, %v1959_v39  ;;  %v3174_v49 = vmul.f32 -1.442695, %v1983_v40 }
 0x44b   :  { %3617 = vpow2.f32 %v3173_v48 }
 0x44c   :  { %3619 = vpow2.f32 %v3174_v49 }
 0x44f   :  { %v3616_v3 = vpop.eup %3615 }
 0x450   :  { %v1942_v7 = vadd.f32 1.0, %v3616_v3 }
 0x451   :  { %v3618_v29 = vpop.eup %3617 }
 0x452   :  { %v3620_v9 = vpop.eup %3619  ;;  %3621 = vrcp.f32 %v1942_v7  ;;  %v1964_v10 = vadd.f32 1.0, %v3618_v29  ;;  %v1954_v18 = vand.u32 2147483648, %v1942_v7  ;;  %v1952_v22 = vand.u32 2147483647, %v1942_v7 }
 0x453   :  { %v1988_v11 = vadd.f32 1.0, %v3620_v9  ;;  %vm1948_vm12 = vweird.f32 %v1942_v7 }
 0x454   :  { %3623 = vrcp.f32 %v1964_v10  ;;  %v1976_v23 = vand.u32 2147483648, %v1964_v10  ;;  %v1974_v26 = vand.u32 2147483647, %v1964_v10  ;;  %v1955_v27 = vor.u32 1.1754944e-38, %v1954_v18 }
 0x455   :  { %3625 = vrcp.f32 %v1988_v11  ;;  %vm1953_vm15 = vcmp.eq.f32.partialorder %v1952_v22, 8.507059e+37  ;;  %vm1970_vm3 = vweird.f32 %v1964_v10  ;;  %v2000_v42 = vand.u32 2147483648, %v1988_v11 }
 0x456   :  { %3627 = vtanh.f32 %v1980_v14  ;;  %v1977_v33 = vor.u32 1.1754944e-38, %v1976_v23  ;;  %vm1975_vm5 = vcmp.eq.f32.partialorder %v1974_v26, 8.507059e+37  ;;  %vm1994_vm7 = vweird.f32 %v1988_v11 }
 0x457   :  { %v1998_v0 = vand.u32 2147483647, %v1988_v11  ;;  %v2001_v44 = vor.u32 1.1754944e-38, %v2000_v42 }
 0x458   :  { %v3622_v12 = vpop.eup %3621 }
 0x459   :  { %v1944_v13 = vmul.f32 %v3622_v12, %v1942_v7  ;;  %vm1949_vm11 = vweird.f32 %v3622_v12  ;;  %vm1999_vm9 = vcmp.eq.f32.partialorder %v1998_v0, 8.507059e+37 }
 0x45a   :  { %v3624_v35 = vpop.eup %3623  ;;  %vm1950_vm14 = vmor %vm1948_vm12, %vm1949_vm11 }
 0x45b   :  { %v3626_v15 = vpop.eup %3625  ;;  %v1945_v16 = vsub.f32 1.0, %v1944_v13  ;;  %v1966_v17 = vmul.f32 %v3624_v35, %v1964_v10  ;;  %vm1971_vm13 = vweird.f32 %v3624_v35 }
 0x45c   :  { %v1990_v19 = vmul.f32 %v3626_v15, %v1988_v11  ;;  %vm1972_vm4 = vmor %vm1970_vm3, %vm1971_vm13  ;;  %v3628_v36 = vpop.eup %3627  ;;  %vm1995_vm6 = vweird.f32 %v3626_v15 }
 0x45d   :  { %v1967_v20 = vsub.f32 1.0, %v1966_v17  ;;  %v1946_v21 = vmul.f32 %v3622_v12, %v1945_v16  ;;  %vm1996_vm8 = vmor %vm1994_vm7, %vm1995_vm6 }
 0x45e   :  { %v1991_v28 = vsub.f32 1.0, %v1990_v19 }
 0x45f   :  { %v1947_v24 = vadd.f32 %v3622_v12, %v1946_v21  ;;  %v1968_v25 = vmul.f32 %v3624_v35, %v1967_v20 }
 0x460   :  { %v1992_v58 = vmul.f32 %v3626_v15, %v1991_v28 }
 0x461   :  { %v1951_v30 = vsel %vm1950_vm14, %v3622_v12, %v1947_v24  ;;  %v1969_v31 = vadd.f32 %v3624_v35, %v1968_v25 }
 0x462   :  { %v1956_v32 = vsel %vm1953_vm15, %v1955_v27, %v1951_v30  ;;  %v1993_v41 = vadd.f32 %v3626_v15, %v1992_v58 }
 0x463   :  { %v1973_v34 = vsel %vm1972_vm4, %v3624_v35, %v1969_v31  ;;  %v2005_v39 = vmul.f32 %v3628_v36, %v1956_v32 }
 0x464   :  { %v1978_v37 = vsel %vm1975_vm5, %v1977_v33, %v1973_v34  ;;  %v1997_v43 = vsel %vm1996_vm8, %v3626_v15, %v1993_v41 }
 0x465   :  { %v2004_v38 = vmul.f32 %v1978_v37, %v4982_v6  ;;  %v2002_v46 = vsel %vm1999_vm9, %v2001_v44, %v1997_v43 }
 0x467   :  { %v5193_v40 = vadd.f32 %v2005_v39, %v2004_v38 }
 0x469   :  { %3629 = vtanh.f32 %v5193_v40 }
 0x46f   :  { %v3630_v45 = vpop.eup %3629 }
 0x470   :  { %v2008_v47 = vmul.f32 %v3630_v45, %v2002_v46 }
 0x472   :  { %3175 = vst [vmem:[%s5219_s4 + $0xa] sm:$0x3] %v2008_v47  ;;  %v2011_v6 = vpack.c.bf16 %v2008_v47, %v2008_v47 }
 0x474   :  { %2212 = vmatmul.bf16.vlgmr.msra.gmra.mxu0 %v2011_v6  ;;  %2225 = vmatmul.bf16.vlgmr.msra.gmra.mxu1 %v2011_v6 }
 0x475   :  { %2238 = vmatmul.bf16.vlgmr.msra.gmra.mxu2 %v2011_v6  ;;  %2251 = vmatmul.bf16.vlgmr.msra.gmra.mxu3 %v2011_v6 }
 0x4f1   :  { %v2213_v48 = vpop.f32.mrf.mxu0  ;;  %v2226_v49 = vpop.f32.mrf.mxu1 }
 0x4f2   :  { %v2262_v50 = vrot.slane %v2226_v49, 6 }
 0x4f4   :  { %v2265_v59 = vsel %vm277_vm0, %v2213_v48, %v2262_v50 }
 0x4f8   :  { %v2239_v51 = vpop.f32.mrf.mxu2  ;;  %v2252_v52 = vpop.f32.mrf.mxu3 }
 0x4f9   :  { %v2263_v53 = vrot.slane %v2239_v51, 4  ;;  %v2264_v54 = vrot.slane %v2252_v52, 2  ;;  %v2215_v55 = vpop.f32.mrf.mxu0  ;;  %v2228_v56 = vpop.f32.mrf.mxu1 }
 0x4fb   :  { %v2266_v60 = vsel %vm279_vm1, %v2263_v53, %v2264_v54 }
 0x4fc   :  { %v2267_v61 = vsel %vm281_vm2, %v2265_v59, %v2266_v60 }
 0x4fd   :  { %v2269_v62 = vadd.f32 %v3304_v57, %v2267_v61 }
 0x4ff   :  { %v3305_v63 = vmul.f32 -1.442695, %v2269_v62  ;;  %v2290_v1 = vrot.slane %v2269_v62, 2  ;;  %v2314_v2 = vrot.slane %v2269_v62, 6  ;;  %v2311_v15 = vrot.slane %v2269_v62, 4 }
 0x500   :  { %v2241_v3 = vpop.f32.mrf.mxu2  ;;  %v2254_v4 = vpop.f32.mrf.mxu3 }
 0x501   :  { %3631 = vpow2.f32 %v3305_v63  ;;  %v3306_v5 = vmul.f32 -1.442695, %v2290_v1  ;;  %v3307_v7 = vmul.f32 -1.442695, %v2314_v2 }
 0x503   :  { %3633 = vpow2.f32 %v3306_v5 }
 0x504   :  { %3635 = vpow2.f32 %v3307_v7 }
 0x507   :  { %v3632_v8 = vpop.eup %3631 }
 0x508   :  { %v2273_v29 = vadd.f32 1.0, %v3632_v8 }
 0x509   :  { %v3634_v9 = vpop.eup %3633 }
 0x50a   :  { %v3636_v10 = vpop.eup %3635  ;;  %3637 = vrcp.f32 %v2273_v29  ;;  %v2295_v11 = vadd.f32 1.0, %v3634_v9  ;;  %v2285_v19 = vand.u32 2147483648, %v2273_v29  ;;  %v2283_v22 = vand.u32 2147483647, %v2273_v29 }
 0x50b   :  { %v2319_v12 = vadd.f32 1.0, %v3636_v10  ;;  %vm2279_vm1 = vweird.f32 %v2273_v29 }
 0x50c   :  { %3639 = vrcp.f32 %v2295_v11  ;;  %v2307_v24 = vand.u32 2147483648, %v2295_v11  ;;  %v2305_v27 = vand.u32 2147483647, %v2295_v11  ;;  %v2286_v28 = vor.u32 1.1754944e-38, %v2285_v19 }
 0x50d   :  { %3641 = vrcp.f32 %v2319_v12  ;;  %vm2284_vm11 = vcmp.eq.f32.partialorder %v2283_v22, 8.507059e+37  ;;  %vm2301_vm12 = vweird.f32 %v2295_v11  ;;  %v2331_v43 = vand.u32 2147483648, %v2319_v12 }
 0x50e   :  { %3643 = vtanh.f32 %v2311_v15  ;;  %v2308_v34 = vor.u32 1.1754944e-38, %v2307_v24  ;;  %vm2306_vm14 = vcmp.eq.f32.partialorder %v2305_v27, 8.507059e+37  ;;  %vm2325_vm3 = vweird.f32 %v2319_v12 }
 0x50f   :  { %v2329_v44 = vand.u32 2147483647, %v2319_v12  ;;  %v2332_v46 = vor.u32 1.1754944e-38, %v2331_v43 }
 0x510   :  { %v3638_v13 = vpop.eup %3637 }
 0x511   :  { %v2275_v35 = vmul.f32 %v3638_v13, %v2273_v29  ;;  %vm2280_vm0 = vweird.f32 %v3638_v13  ;;  %vm2330_vm5 = vcmp.eq.f32.partialorder %v2329_v44, 8.507059e+37 }
 0x512   :  { %v3640_v14 = vpop.eup %3639  ;;  %vm2281_vm10 = vmor %vm2279_vm1, %vm2280_vm0 }
 0x513   :  { %v3642_v16 = vpop.eup %3641  ;;  %v2276_v17 = vsub.f32 1.0, %v2275_v35  ;;  %v2297_v18 = vmul.f32 %v3640_v14, %v2295_v11  ;;  %vm2302_vm2 = vweird.f32 %v3640_v14 }
 0x514   :  { %v2321_v20 = vmul.f32 %v3642_v16, %v2319_v12  ;;  %vm2303_vm13 = vmor %vm2301_vm12, %vm2302_vm2  ;;  %v3644_v37 = vpop.eup %3643  ;;  %vm2326_vm15 = vweird.f32 %v3642_v16 }
 0x515   :  { %v2277_v21 = vmul.f32 %v3638_v13, %v2276_v17  ;;  %v2298_v23 = vsub.f32 1.0, %v2297_v18  ;;  %vm2327_vm4 = vmor %vm2325_vm3, %vm2326_vm15 }
 0x516   :  { %v2322_v30 = vsub.f32 1.0, %v2321_v20 }
 0x517   :  { %v2278_v25 = vadd.f32 %v3638_v13, %v2277_v21  ;;  %v2299_v26 = vmul.f32 %v3640_v14, %v2298_v23 }
 0x518   :  { %v2323_v38 = vmul.f32 %v3642_v16, %v2322_v30 }
 0x519   :  { %v2282_v31 = vsel %vm2281_vm10, %v3638_v13, %v2278_v25  ;;  %v2300_v32 = vadd.f32 %v3640_v14, %v2299_v26 }
 0x51a   :  { %v2287_v33 = vsel %vm2284_vm11, %v2286_v28, %v2282_v31  ;;  %v2324_v0 = vadd.f32 %v3642_v16, %v2323_v38 }
 0x51b   :  { %v2304_v36 = vsel %vm2303_vm13, %v3640_v14, %v2300_v32  ;;  %v2336_v41 = vmul.f32 %v3644_v37, %v2287_v33 }
 0x51c   :  { %v2309_v58 = vsel %vm2306_vm14, %v2308_v34, %v2304_v36  ;;  %v2328_v45 = vsel %vm2327_vm4, %v3642_v16, %v2324_v0 }
 0x51d   :  { %v2335_v39 = vmul.f32 %v2309_v58, %v5193_v40  ;;  %v2333_v47 = vsel %vm2330_vm5, %v2332_v46, %v2328_v45 }
 0x51f   :  { %v2337_v42 = vadd.f32 %v2336_v41, %v2335_v39 }
 0x521   :  { %3645 = vtanh.f32 %v2337_v42  ;;  %2343 = vst [vmem:[#allocation4] sm:$0x3] %v2337_v42 }
 0x522   :  { %2367 = dma.vmem_to_hbm [thread:$0]  %s2363_s25, 32, %s2365_s28, [#allocation5]  }
 0x527   :  { %v3646_v40 = vpop.eup %3645 }
 0x528   :  { %v2339_v6 = vmul.f32 %v3646_v40, %v2333_v47 }
 0x52a   :  { %3308 = vst [vmem:[%s5219_s4 + $0xc] sm:$0x3] %v2339_v6 }
 0x52b   :  { %2342 = vst [vmem:[#allocation2] sm:$0x3] %v2339_v6 }
 0x52c   :  { %2356 = dma.vmem_to_hbm [thread:$0]  %s2352_s6, 32, %s2354_s8, [#allocation3]  }
 0x52d   :  { %3695 = dma.done.wait [#allocation3], 32  }
 0x52e   :  { %3696 = vsyncadd [#allocation3], 4294967264 }
 0x52f   :  { %3697 = dma.done.wait [#allocation5], 32  }
 0x530   :  { %3698 = vsyncadd [#allocation5], 4294967264 }
 0x531   :  { %2378 = vsyncpa [#allocation3], 1 }
 0x532   :  { %2379 = vsyncpa [#allocation5], 1 }

// kernel: seq2seq_forward.6
= control target key start
LH: loop header
LB: loop body
LE: loop exit
PB: predicated region body
PF: predicated region fallthrough
CT: control target
= control target key end

     0   :  { %s5875_s0 = inlined_call_operand.vmem [shape: f32[8,2,512], index: 0, kind: input, shape index: {}]   ;;  %s5876_s1 = inlined_call_operand.vmem [shape: bf16[128,512], index: 1, kind: input, shape index: {}]   ;;  %s5877_s2 = inlined_call_operand.vmem [shape: f32[2,128], index: 2, kind: input, shape index: {}, may-alias: {2,3}]   ;;  %s5878_s3 = inlined_call_operand.vmem [shape: f32[2,128], index: 3, kind: input, shape index: {}, may-alias: {2,3}]   ;;  %s5879_s4 = inlined_call_operand.hbm [shape: f32[8,2,128], index: 4, kind: output, shape index: {0}]   ;;  %s5880_s5 = inlined_call_operand.vmem [shape: f32[2,128], index: 5, kind: output, shape index: {1}]   ;;  %s5881_s6 = inlined_call_operand.vmem [shape: f32[2,128], index: 6, kind: output, shape index: {2}]  }
   0x1   :  { %v2814_v0 = vld [vmem:[%s5876_s1 + $0xe0] sm:$0xf]  ;;  %v3785_v1 = vld [vmem:[%s5876_s1 + $0xec] sm:$0xf0]  ;;  %v3783_v2 = vld [vmem:[%s5876_s1 + $0xe4] sm:$0xf] }
   0x2   :  { %v2815_v3 = vor.u32 %v3785_v1, %v2814_v0  ;;  %v2816_v4 = vld [vmem:[%s5876_s1 + $0xf0] sm:$0xf0]  ;;  %v2822_v5 = vld [vmem:[%s5876_s1 + $0xe8] sm:$0xf]  ;;  %v3786_v6 = vld [vmem:[%s5876_s1 + $0xf4] sm:$0xf0] }
   0x3   :  { %v2819_v7 = vor.u32 %v3783_v2, %v2816_v4  ;;  %v2823_v8 = vor.u32 %v3786_v6, %v2822_v5  ;;  %v3784_v9 = vld [vmem:[%s5876_s1 + $0xec] sm:$0xf]  ;;  %v2824_v10 = vld [vmem:[%s5876_s1 + $0xf8] sm:$0xf0]  ;;  %v2798_v11 = vld [vmem:[%s5876_s1 + $0xc0] sm:$0xf] }
   0x4   :  { %216 = vmatpush.bf16.msra.mxu0 %v2815_v3  ;;  %v2827_v12 = vor.u32 %v3784_v9, %v2824_v10  ;;  %v3781_v13 = vld [vmem:[%s5876_s1 + $0xcc] sm:$0xf0]  ;;  %v3779_v14 = vld [vmem:[%s5876_s1 + $0xc4] sm:$0xf]  ;;  %v2800_v15 = vld [vmem:[%s5876_s1 + $0xd0] sm:$0xf0] }
   0x5   :  { %229 = vmatpush.bf16.msra.mxu1 %v2819_v7  ;;  %242 = vmatpush.bf16.msra.mxu2 %v2823_v8  ;;  %v2799_v16 = vor.u32 %v3781_v13, %v2798_v11  ;;  %v2803_v17 = vor.u32 %v3779_v14, %v2800_v15  ;;  %v2806_v18 = vld [vmem:[%s5876_s1 + $0xc8] sm:$0xf]  ;;  %v3782_v19 = vld [vmem:[%s5876_s1 + $0xd4] sm:$0xf0]  ;;  %v3780_v20 = vld [vmem:[%s5876_s1 + $0xcc] sm:$0xf] }
   0x6   :  { %255 = vmatpush.bf16.msra.mxu3 %v2827_v12  ;;  %v2807_v21 = vor.u32 %v3782_v19, %v2806_v18  ;;  %v2808_v22 = vld [vmem:[%s5876_s1 + $0xd8] sm:$0xf0]  ;;  %v2782_v23 = vld [vmem:[%s5876_s1 + $0xa0] sm:$0xf]  ;;  %v3777_v24 = vld [vmem:[%s5876_s1 + $0xac] sm:$0xf0] }
   0x7   :  { %v2811_v25 = vor.u32 %v3780_v20, %v2808_v22  ;;  %v3775_v26 = vld [vmem:[%s5876_s1 + $0xa4] sm:$0xf]  ;;  %v2784_v27 = vld [vmem:[%s5876_s1 + $0xb0] sm:$0xf0]  ;;  %v2790_v28 = vld [vmem:[%s5876_s1 + $0xa8] sm:$0xf]  ;;  %v2783_v29 = vor.u32 %v3777_v24, %v2782_v23 }
   0x8   :  { %217 = vmatpush.bf16.msra.mxu0 %v2799_v16  ;;  %v3778_v30 = vld [vmem:[%s5876_s1 + $0xb4] sm:$0xf0]  ;;  %v3776_v31 = vld [vmem:[%s5876_s1 + $0xac] sm:$0xf]  ;;  %v2792_v32 = vld [vmem:[%s5876_s1 + $0xb8] sm:$0xf0]  ;;  %v2787_v33 = vor.u32 %v3775_v26, %v2784_v27 }
   0x9   :  { %230 = vmatpush.bf16.msra.mxu1 %v2803_v17  ;;  %243 = vmatpush.bf16.msra.mxu2 %v2807_v21  ;;  %v2791_v34 = vor.u32 %v3778_v30, %v2790_v28  ;;  %v2766_v35 = vld [vmem:[%s5876_s1 + $0x80] sm:$0xf]  ;;  %v3773_v36 = vld [vmem:[%s5876_s1 + $0x8c] sm:$0xf0]  ;;  %v3771_v37 = vld [vmem:[%s5876_s1 + $0x84] sm:$0xf]  ;;  %v2795_v38 = vor.u32 %v3776_v31, %v2792_v32 }
   0xa   :  { %256 = vmatpush.bf16.msra.mxu3 %v2811_v25  ;;  %v2768_v39 = vld [vmem:[%s5876_s1 + $0x90] sm:$0xf0]  ;;  %v2774_v40 = vld [vmem:[%s5876_s1 + $0x88] sm:$0xf]  ;;  %v3774_v41 = vld [vmem:[%s5876_s1 + $0x94] sm:$0xf0]  ;;  %v2767_v44 = vor.u32 %v3773_v36, %v2766_v35 }
   0xb   :  { %v3772_v42 = vld [vmem:[%s5876_s1 + $0x8c] sm:$0xf]  ;;  %v2776_v43 = vld [vmem:[%s5876_s1 + $0x98] sm:$0xf0]  ;;  %v2771_v45 = vor.u32 %v3771_v37, %v2768_v39  ;;  %v2775_v46 = vor.u32 %v3774_v41, %v2774_v40  ;;  %v2750_v47 = vld [vmem:[%s5876_s1 + $0x60] sm:$0xf] }
   0xc   :  { %218 = vmatpush.bf16.msra.mxu0 %v2783_v29  ;;  %v3769_v48 = vld [vmem:[%s5876_s1 + $0x6c] sm:$0xf0]  ;;  %v3767_v49 = vld [vmem:[%s5876_s1 + $0x64] sm:$0xf]  ;;  %v2779_v50 = vor.u32 %v3772_v42, %v2776_v43  ;;  %v2752_v51 = vld [vmem:[%s5876_s1 + $0x70] sm:$0xf0] }
   0xd   :  { %231 = vmatpush.bf16.msra.mxu1 %v2787_v33  ;;  %244 = vmatpush.bf16.msra.mxu2 %v2791_v34  ;;  %v2758_v52 = vld [vmem:[%s5876_s1 + $0x68] sm:$0xf]  ;;  %v3770_v53 = vld [vmem:[%s5876_s1 + $0x74] sm:$0xf0]  ;;  %v3768_v54 = vld [vmem:[%s5876_s1 + $0x6c] sm:$0xf]  ;;  %v2751_v56 = vor.u32 %v3769_v48, %v2750_v47  ;;  %v2755_v57 = vor.u32 %v3767_v49, %v2752_v51 }
   0xe   :  { %257 = vmatpush.bf16.msra.mxu3 %v2795_v38  ;;  %v2760_v55 = vld [vmem:[%s5876_s1 + $0x78] sm:$0xf0]  ;;  %v2759_v58 = vor.u32 %v3770_v53, %v2758_v52  ;;  %v2734_v59 = vld [vmem:[%s5876_s1 + $0x40] sm:$0xf]  ;;  %v3765_v60 = vld [vmem:[%s5876_s1 + $0x4c] sm:$0xf0] }
   0xf   :  { %v3763_v61 = vld [vmem:[%s5876_s1 + $0x44] sm:$0xf]  ;;  %v2763_v62 = vor.u32 %v3768_v54, %v2760_v55  ;;  %v2736_v63 = vld [vmem:[%s5876_s1 + $0x50] sm:$0xf0]  ;;  %v2742_v0 = vld [vmem:[%s5876_s1 + $0x48] sm:$0xf]  ;;  %v2735_v4 = vor.u32 %v3765_v60, %v2734_v59 }
  0x10   :  { %219 = vmatpush.bf16.msra.mxu0 %v2767_v44  ;;  %v3766_v1 = vld [vmem:[%s5876_s1 + $0x54] sm:$0xf0]  ;;  %v3764_v2 = vld [vmem:[%s5876_s1 + $0x4c] sm:$0xf]  ;;  %v2744_v3 = vld [vmem:[%s5876_s1 + $0x58] sm:$0xf0]  ;;  %v2739_v6 = vor.u32 %v3763_v61, %v2736_v63 }
  0x11   :  { %232 = vmatpush.bf16.msra.mxu1 %v2771_v45  ;;  %245 = vmatpush.bf16.msra.mxu2 %v2775_v46  ;;  %v2718_v5 = vld [vmem:[%s5876_s1 + $0x20] sm:$0xf]  ;;  %v2743_v7 = vor.u32 %v3766_v1, %v2742_v0  ;;  %v3761_v8 = vld [vmem:[%s5876_s1 + $0x2c] sm:$0xf0]  ;;  %v3759_v9 = vld [vmem:[%s5876_s1 + $0x24] sm:$0xf]  ;;  %v2747_v11 = vor.u32 %v3764_v2, %v2744_v3 }
  0x12   :  { %258 = vmatpush.bf16.msra.mxu3 %v2779_v50  ;;  %v2720_v10 = vld [vmem:[%s5876_s1 + $0x30] sm:$0xf0]  ;;  %v2726_v12 = vld [vmem:[%s5876_s1 + $0x28] sm:$0xf]  ;;  %v3762_v13 = vld [vmem:[%s5876_s1 + $0x34] sm:$0xf0] }
  0x14   :  { %220 = vmatpush.bf16.msra.mxu0 %v2751_v56 }
  0x15   :  { %233 = vmatpush.bf16.msra.mxu1 %v2755_v57  ;;  %246 = vmatpush.bf16.msra.mxu2 %v2759_v58 }
  0x16   :  { %259 = vmatpush.bf16.msra.mxu3 %v2763_v62 }
  0x17   :  { %12 = vsyncpa [#allocation3], 0  ;;  %v3760_v14 = vld [vmem:[%s5876_s1 + $0x2c] sm:$0xf]  ;;  %v2728_v15 = vld [vmem:[%s5876_s1 + $0x38] sm:$0xf0]  ;;  %v2719_v16 = vor.u32 %v3761_v8, %v2718_v5  ;;  %v2723_v17 = vor.u32 %v3759_v9, %v2720_v10  ;;  %v2727_v18 = vor.u32 %v3762_v13, %v2726_v12 }
  0x18   :  { %221 = vmatpush.bf16.msra.mxu0 %v2735_v4  ;;  %v2702_v19 = vld [vmem:[%s5876_s1] sm:$0xf]  ;;  %v3757_v20 = vld [vmem:[%s5876_s1 + $0xc] sm:$0xf0]  ;;  %v3755_v21 = vld [vmem:[%s5876_s1 + $0x4] sm:$0xf]  ;;  %v2731_v22 = vor.u32 %v3760_v14, %v2728_v15 }
  0x19   :  { %234 = vmatpush.bf16.msra.mxu1 %v2739_v6  ;;  %247 = vmatpush.bf16.msra.mxu2 %v2743_v7  ;;  %v2704_v23 = vld [vmem:[%s5876_s1 + $0x10] sm:$0xf0]  ;;  %v2710_v24 = vld [vmem:[%s5876_s1 + $0x8] sm:$0xf]  ;;  %v3758_v25 = vld [vmem:[%s5876_s1 + $0x14] sm:$0xf0]  ;;  %v2703_v28 = vor.u32 %v3757_v20, %v2702_v19 }
  0x1a   :  { %260 = vmatpush.bf16.msra.mxu3 %v2747_v11  ;;  %v3756_v26 = vld [vmem:[%s5876_s1 + $0xc] sm:$0xf]  ;;  %v2712_v27 = vld [vmem:[%s5876_s1 + $0x18] sm:$0xf0]  ;;  %v21_v29 = vld [vmem:[%s5877_s2] sm:$0x3]  ;;  %v2707_v30 = vor.u32 %v3755_v21, %v2704_v23  ;;  %v2711_v31 = vor.u32 %v3758_v25, %v2710_v24 }
  0x1b   :  { %v2715_v32 = vor.u32 %v3756_v26, %v2712_v27  ;;  %v23_v33 = vpack.c.bf16 %v21_v29, %v21_v29  ;;  %v2945_v34 = vld [vmem:[%s5876_s1 + $0xe0] sm:$0xf]  ;;  %v3817_v35 = vld [vmem:[%s5876_s1 + $0xec] sm:$0xf0]  ;;  %v3815_v36 = vld [vmem:[%s5876_s1 + $0xe4] sm:$0xf] }
  0x1c   :  { %222 = vmatpush.bf16.msra.mxu0 %v2719_v16  ;;  %v2946_v37 = vor.u32 %v3817_v35, %v2945_v34  ;;  %v2947_v38 = vld [vmem:[%s5876_s1 + $0xf0] sm:$0xf0]  ;;  %v2953_v39 = vld [vmem:[%s5876_s1 + $0xe8] sm:$0xf]  ;;  %v3818_v40 = vld [vmem:[%s5876_s1 + $0xf4] sm:$0xf0] }
  0x1d   :  { %235 = vmatpush.bf16.msra.mxu1 %v2723_v17  ;;  %248 = vmatpush.bf16.msra.mxu2 %v2727_v18  ;;  %v2950_v41 = vor.u32 %v3815_v36, %v2947_v38  ;;  %v2954_v42 = vor.u32 %v3818_v40, %v2953_v39  ;;  %v3816_v43 = vld [vmem:[%s5876_s1 + $0xec] sm:$0xf]  ;;  %v2955_v44 = vld [vmem:[%s5876_s1 + $0xf8] sm:$0xf0]  ;;  %v2929_v46 = vld [vmem:[%s5876_s1 + $0xc0] sm:$0xf] }
  0x1e   :  { %261 = vmatpush.bf16.msra.mxu3 %v2731_v22  ;;  %v2958_v45 = vor.u32 %v3816_v43, %v2955_v44  ;;  %v3813_v47 = vld [vmem:[%s5876_s1 + $0xcc] sm:$0xf0]  ;;  %v3811_v48 = vld [vmem:[%s5876_s1 + $0xc4] sm:$0xf]  ;;  %v2931_v51 = vld [vmem:[%s5876_s1 + $0xd0] sm:$0xf0] }
  0x1f   :  { %v2930_v50 = vor.u32 %v3813_v47, %v2929_v46  ;;  %v2937_v52 = vld [vmem:[%s5876_s1 + $0xc8] sm:$0xf]  ;;  %v3814_v53 = vld [vmem:[%s5876_s1 + $0xd4] sm:$0xf0]  ;;  %v2934_v55 = vor.u32 %v3811_v48, %v2931_v51  ;;  %v3812_v57 = vld [vmem:[%s5876_s1 + $0xcc] sm:$0xf] }
  0x20   :  { %223 = vmatpush.bf16.msra.mxu0 %v2703_v28  ;;  %v2938_v56 = vor.u32 %v3814_v53, %v2937_v52  ;;  %v2939_v58 = vld [vmem:[%s5876_s1 + $0xd8] sm:$0xf0]  ;;  %vm276_vm0 = vcmask 1041408   ;;  %v2913_v61 = vld [vmem:[%s5876_s1 + $0xa0] sm:$0xf]  ;;  %vm278_vm1 = vcmask 1045508  }
  0x21   :  { %236 = vmatpush.bf16.msra.mxu1 %v2707_v30  ;;  %249 = vmatpush.bf16.msra.mxu2 %v2711_v31  ;;  %v2942_v60 = vor.u32 %v3812_v57, %v2939_v58  ;;  %v3809_v62 = vld [vmem:[%s5876_s1 + $0xac] sm:$0xf0]  ;;  %v3807_v63 = vld [vmem:[%s5876_s1 + $0xa4] sm:$0xf]  ;;  %v2915_v1 = vld [vmem:[%s5876_s1 + $0xb0] sm:$0xf0] }
  0x22   :  { %262 = vmatpush.bf16.msra.mxu3 %v2715_v32  ;;  %v2914_v0 = vor.u32 %v3809_v62, %v2913_v61  ;;  %v2921_v2 = vld [vmem:[%s5876_s1 + $0xa8] sm:$0xf]  ;;  %v3810_v3 = vld [vmem:[%s5876_s1 + $0xb4] sm:$0xf0]  ;;  %v2918_v4 = vor.u32 %v3807_v63, %v2915_v1  ;;  %v3808_v6 = vld [vmem:[%s5876_s1 + $0xac] sm:$0xf] }
  0x23   :  { %224 = vmatmul.bf16.vlgmr.msra.gmra.mxu0 %v23_v33  ;;  %v2922_v5 = vor.u32 %v3810_v3, %v2921_v2  ;;  %v2923_v7 = vld [vmem:[%s5876_s1 + $0xb8] sm:$0xf0]  ;;  %v2897_v8 = vld [vmem:[%s5876_s1 + $0x80] sm:$0xf]  ;;  %v3805_v10 = vld [vmem:[%s5876_s1 + $0x8c] sm:$0xf0] }
  0x24   :  { %237 = vmatmul.bf16.vlgmr.msra.gmra.mxu1 %v23_v33  ;;  %250 = vmatmul.bf16.vlgmr.msra.gmra.mxu2 %v23_v33  ;;  %v2926_v9 = vor.u32 %v3808_v6, %v2923_v7  ;;  %v3803_v11 = vld [vmem:[%s5876_s1 + $0x84] sm:$0xf]  ;;  %v2899_v12 = vld [vmem:[%s5876_s1 + $0x90] sm:$0xf0]  ;;  %v2898_v14 = vor.u32 %v3805_v10, %v2897_v8  ;;  %v2905_v16 = vld [vmem:[%s5876_s1 + $0x88] sm:$0xf] }
  0x25   :  { %263 = vmatmul.bf16.vlgmr.msra.gmra.mxu3 %v23_v33  ;;  %548 = vmatpush.bf16.msrb.mxu0 %v2946_v37  ;;  %v2902_v15 = vor.u32 %v3803_v11, %v2899_v12  ;;  %v3806_v17 = vld [vmem:[%s5876_s1 + $0x94] sm:$0xf0]  ;;  %v3804_v18 = vld [vmem:[%s5876_s1 + $0x8c] sm:$0xf]  ;;  %v268_v21 = vld [vmem:[%s5875_s0] sm:$0xff]  ;;  %vm280_vm2 = vcmask 1043456  }
  0x26   :  { %561 = vmatpush.bf16.msrb.mxu1 %v2950_v41  ;;  %574 = vmatpush.bf16.msrb.mxu2 %v2954_v42  ;;  %v2906_v23 = vor.u32 %v3806_v17, %v2905_v16  ;;  %v2907_v24 = vld [vmem:[%s5876_s1 + $0x98] sm:$0xf0]  ;;  %v2881_v25 = vld [vmem:[%s5876_s1 + $0x60] sm:$0xf]  ;;  %v3801_v30 = vld [vmem:[%s5876_s1 + $0x6c] sm:$0xf0] }
  0x27   :  { %587 = vmatpush.bf16.msrb.mxu3 %v2958_v45  ;;  %v2910_v29 = vor.u32 %v3804_v18, %v2907_v24  ;;  %v3799_v31 = vld [vmem:[%s5876_s1 + $0x64] sm:$0xf]  ;;  %v2882_v32 = vor.u32 %v3801_v30, %v2881_v25  ;;  %v2883_v33 = vld [vmem:[%s5876_s1 + $0x70] sm:$0xf0]  ;;  %v2889_v34 = vld [vmem:[%s5876_s1 + $0x68] sm:$0xf] }
  0x28   :  { %v3802_v35 = vld [vmem:[%s5876_s1 + $0x74] sm:$0xf0]  ;;  %v2886_v37 = vor.u32 %v3799_v31, %v2883_v33  ;;  %v3800_v39 = vld [vmem:[%s5876_s1 + $0x6c] sm:$0xf]  ;;  %v2891_v40 = vld [vmem:[%s5876_s1 + $0x78] sm:$0xf0] }
  0x29   :  { %549 = vmatpush.bf16.msrb.mxu0 %v2930_v50  ;;  %v2890_v38 = vor.u32 %v3802_v35, %v2889_v34  ;;  %v2865_v41 = vld [vmem:[%s5876_s1 + $0x40] sm:$0xf]  ;;  %v2894_v43 = vor.u32 %v3800_v39, %v2891_v40  ;;  %v3797_v44 = vld [vmem:[%s5876_s1 + $0x4c] sm:$0xf0]  ;;  %v3795_v45 = vld [vmem:[%s5876_s1 + $0x44] sm:$0xf] }
  0x2a   :  { %562 = vmatpush.bf16.msrb.mxu1 %v2934_v55  ;;  %575 = vmatpush.bf16.msrb.mxu2 %v2938_v56  ;;  %v2867_v46 = vld [vmem:[%s5876_s1 + $0x50] sm:$0xf0]  ;;  %v2873_v48 = vld [vmem:[%s5876_s1 + $0x48] sm:$0xf]  ;;  %v3796_v50 = vld [vmem:[%s5876_s1 + $0x4c] sm:$0xf]  ;;  %v2866_v51 = vor.u32 %v3797_v44, %v2865_v41 }
  0x2b   :  { %588 = vmatpush.bf16.msrb.mxu3 %v2942_v60  ;;  %v2870_v52 = vor.u32 %v3795_v45, %v2867_v46  ;;  %v2875_v53 = vld [vmem:[%s5876_s1 + $0x58] sm:$0xf0]  ;;  %v3793_v60 = vld [vmem:[%s5876_s1 + $0x2c] sm:$0xf0]  ;;  %v3791_v63 = vld [vmem:[%s5876_s1 + $0x24] sm:$0xf] }
  0x2c   :  { %v2878_v62 = vor.u32 %v3796_v50, %v2875_v53  ;;  %v2857_v1 = vld [vmem:[%s5876_s1 + $0x28] sm:$0xf]  ;;  %v3792_v6 = vld [vmem:[%s5876_s1 + $0x2c] sm:$0xf]  ;;  %v2859_v7 = vld [vmem:[%s5876_s1 + $0x38] sm:$0xf0] }
  0x2d   :  { %550 = vmatpush.bf16.msrb.mxu0 %v2914_v0  ;;  %v2851_v0 = vld [vmem:[%s5876_s1 + $0x30] sm:$0xf0]  ;;  %v2833_v10 = vld [vmem:[%s5876_s1] sm:$0xf]  ;;  %v3789_v11 = vld [vmem:[%s5876_s1 + $0xc] sm:$0xf0] }
  0x2e   :  { %563 = vmatpush.bf16.msrb.mxu1 %v2918_v4  ;;  %576 = vmatpush.bf16.msrb.mxu2 %v2922_v5  ;;  %v3794_v4 = vld [vmem:[%s5876_s1 + $0x34] sm:$0xf0]  ;;  %v2854_v8 = vor.u32 %v3791_v63, %v2851_v0  ;;  %v3787_v12 = vld [vmem:[%s5876_s1 + $0x4] sm:$0xf]  ;;  %v3788_v17 = vld [vmem:[%s5876_s1 + $0xc] sm:$0xf] }
  0x2f   :  { %589 = vmatpush.bf16.msrb.mxu3 %v2926_v9  ;;  %v2858_v9 = vor.u32 %v3794_v4, %v2857_v1  ;;  %v3790_v16 = vld [vmem:[%s5876_s1 + $0x14] sm:$0xf0]  ;;  %v2843_v18 = vld [vmem:[%s5876_s1 + $0x18] sm:$0xf0]  ;;  %v3077_v4 = vld [vmem:[%s5876_s1 + $0xe0] sm:$0xf] }
  0x30   :  { %v2846_v24 = vor.u32 %v3788_v17, %v2843_v18  ;;  %v3845_v17 = vld [vmem:[%s5876_s1 + $0xcc] sm:$0xf0]  ;;  %v3843_v18 = vld [vmem:[%s5876_s1 + $0xc4] sm:$0xf]  ;;  %s4168_s14 = smov [#allocation2]   ;;  %s2680_s18 = sshll.u32 %s5879_s4, 4  ;;  %s2681_s18 = int_to_ptr.hbm [resolvable:$true] %s2680_s18 }
  0x31   :  { %551 = vmatpush.bf16.msrb.mxu0 %v2898_v14  ;;  %v2835_v14 = vld [vmem:[%s5876_s1 + $0x10] sm:$0xf0]  ;;  %s2678_s15 = sshll.u32 %s4168_s14, 4  ;;  %s4169_s20 = smov 32   ;;  %s2679_s15 = int_to_ptr.vmem [resolvable:$true] %s2678_s15 }
  0x32   :  { %564 = vmatpush.bf16.msrb.mxu1 %v2902_v15  ;;  %577 = vmatpush.bf16.msrb.mxu2 %v2906_v23  ;;  %v2841_v15 = vld [vmem:[%s5876_s1 + $0x8] sm:$0xf]  ;;  %s4170_s21 = smov 2  }
  0x33   :  { %590 = vmatpush.bf16.msrb.mxu3 %v2910_v29 }
  0x35   :  { %552 = vmatpush.bf16.msrb.mxu0 %v2882_v32 }
  0x36   :  { %565 = vmatpush.bf16.msrb.mxu1 %v2886_v37  ;;  %578 = vmatpush.bf16.msrb.mxu2 %v2890_v38 }
  0x37   :  { %591 = vmatpush.bf16.msrb.mxu3 %v2894_v43 }
  0x39   :  { %553 = vmatpush.bf16.msrb.mxu0 %v2866_v51 }
  0x3a   :  { %566 = vmatpush.bf16.msrb.mxu1 %v2870_v52 }
  0x3b   :  { %592 = vmatpush.bf16.msrb.mxu3 %v2878_v62 }
  0x3e   :  { %567 = vmatpush.bf16.msrb.mxu1 %v2854_v8  ;;  %v3079_v8 = vld [vmem:[%s5876_s1 + $0xf0] sm:$0xf0] }
  0xa0   :  { %v225_v49 = vpop.f32.mrf.mxu0 }
  0xa1   :  { %v238_v54 = vpop.f32.mrf.mxu1 }
  0xa2   :  { %v273_v59 = vrot.slane %v238_v54, 6  ;;  %v2849_v54 = vld [vmem:[%s5876_s1 + $0x20] sm:$0xf] }
  0xa3   :  { %v2850_v5 = vor.u32 %v3793_v60, %v2849_v54 }
  0xa4   :  { %v277_v26 = vsel %vm276_vm0, %v225_v49, %v273_v59  ;;  %v3798_v49 = vld [vmem:[%s5876_s1 + $0x54] sm:$0xf0] }
  0xa5   :  { %v2874_v59 = vor.u32 %v3798_v49, %v2873_v48  ;;  %554 = vmatpush.bf16.msrb.mxu0 %v2850_v5  ;;  %v22_v49 = vld [vmem:[%s5878_s3] sm:$0x3]  ;;  %v3849_v5 = vld [vmem:[%s5876_s1 + $0xec] sm:$0xf0] }
  0xa7   :  { %v251_v13 = vpop.f32.mrf.mxu2  ;;  %579 = vmatpush.bf16.msrb.mxu2 %v2874_v59 }
  0xa8   :  { %v274_v19 = vrot.slane %v251_v13, 4  ;;  %v264_v20 = vpop.f32.mrf.mxu3  ;;  %v227_v22 = vpop.f32.mrf.mxu0  ;;  %v2862_v13 = vor.u32 %v3792_v6, %v2859_v7  ;;  %v3847_v6 = vld [vmem:[%s5876_s1 + $0xe4] sm:$0xf]  ;;  %v3078_v7 = vor.u32 %v3849_v5, %v3077_v4  ;;  %v3021_v5 = vld [vmem:[%s5876_s1 + $0x68] sm:$0xf] }
  0xa9   :  { %v275_v27 = vrot.slane %v264_v20, 2  ;;  %v240_v28 = vpop.f32.mrf.mxu1  ;;  %v2842_v22 = vor.u32 %v3790_v16, %v2841_v15  ;;  %v3061_v16 = vld [vmem:[%s5876_s1 + $0xc0] sm:$0xf] }
  0xaa   :  { %593 = vmatpush.bf16.msrb.mxu3 %v2862_v13  ;;  %v3848_v13 = vld [vmem:[%s5876_s1 + $0xec] sm:$0xf] }
  0xab   :  { %v279_v36 = vsel %vm278_vm1, %v274_v19, %v275_v27  ;;  %v2834_v19 = vor.u32 %v3789_v11, %v2833_v10  ;;  %580 = vmatpush.bf16.msrb.mxu2 %v2858_v9  ;;  %v3085_v9 = vld [vmem:[%s5876_s1 + $0xe8] sm:$0xf]  ;;  %v3850_v10 = vld [vmem:[%s5876_s1 + $0xf4] sm:$0xf0]  ;;  %v3082_v11 = vor.u32 %v3847_v6, %v3079_v8 }
  0xac   :  { %v281_v42 = vsel %vm280_vm2, %v277_v26, %v279_v36  ;;  %v3834_v6 = vld [vmem:[%s5876_s1 + $0x74] sm:$0xf0] }
  0xad   :  { %v4539_v47 = vadd.f32 %v281_v42, %v268_v21  ;;  %v2838_v21 = vor.u32 %v3787_v12, %v2835_v14  ;;  %555 = vmatpush.bf16.msrb.mxu0 %v2834_v19  ;;  %v3086_v12 = vor.u32 %v3850_v10, %v3085_v9  ;;  %v3087_v14 = vld [vmem:[%s5876_s1 + $0xf8] sm:$0xf0]  ;;  %v3062_v19 = vor.u32 %v3845_v17, %v3061_v16  ;;  %v3827_v16 = vld [vmem:[%s5876_s1 + $0x44] sm:$0xf]  ;;  %v2999_v17 = vld [vmem:[%s5876_s1 + $0x50] sm:$0xf0] }
  0xae   :  { %594 = vmatpush.bf16.msrb.mxu3 %v2846_v24  ;;  %v3090_v15 = vor.u32 %v3848_v13, %v3087_v14  ;;  %v3022_v10 = vor.u32 %v3834_v6, %v3021_v5  ;;  %v3829_v13 = vld [vmem:[%s5876_s1 + $0x4c] sm:$0xf0] }
  0xaf   :  { %v2828_v55 = vmul.f32 -1.442695, %v4539_v47  ;;  %v304_v56 = vrot.slane %v4539_v47, 2  ;;  %v328_v57 = vrot.slane %v4539_v47, 6  ;;  %v253_v58 = vpop.f32.mrf.mxu2  ;;  %568 = vmatpush.bf16.msrb.mxu1 %v2838_v21  ;;  %581 = vmatpush.bf16.msrb.mxu2 %v2842_v22  ;;  %v325_v32 = vrot.slane %v4539_v47, 4 }
  0xb0   :  { %v266_v61 = vpop.f32.mrf.mxu3  ;;  %v3069_v21 = vld [vmem:[%s5876_s1 + $0xc8] sm:$0xf]  ;;  %v3846_v22 = vld [vmem:[%s5876_s1 + $0xd4] sm:$0xf0] }
  0xb1   :  { %4014 = vpow2.f32 %v2828_v55  ;;  %v2829_v2 = vmul.f32 -1.442695, %v304_v56  ;;  %v2830_v3 = vmul.f32 -1.442695, %v328_v57  ;;  %879 = vmatpush.bf16.msra.mxu0 %v3078_v7  ;;  %v3832_v7 = vld [vmem:[%s5876_s1 + $0x6c] sm:$0xf] }
  0xb2   :  { %918 = vmatpush.bf16.msra.mxu3 %v3090_v15 }
  0xb3   :  { %4016 = vpow2.f32 %v2829_v2  ;;  %892 = vmatpush.bf16.msra.mxu1 %v3082_v11  ;;  %905 = vmatpush.bf16.msra.mxu2 %v3086_v12  ;;  %v3023_v11 = vld [vmem:[%s5876_s1 + $0x78] sm:$0xf0]  ;;  %v2997_v12 = vld [vmem:[%s5876_s1 + $0x40] sm:$0xf] }
  0xb4   :  { %4018 = vpow2.f32 %v2830_v3  ;;  %v3026_v15 = vor.u32 %v3832_v7, %v3023_v11 }
  0xb5   :  { %880 = vmatpush.bf16.msra.mxu0 %v3062_v19 }
  0xb7   :  { %v4015_v20 = vpop.eup %4014 }
  0xb8   :  { %v287_v23 = vadd.f32 1.0, %v4015_v20  ;;  %v3063_v20 = vld [vmem:[%s5876_s1 + $0xd0] sm:$0xf0] }
  0xb9   :  { %v4017_v25 = vpop.eup %4016 }
  0xba   :  { %v4019_v26 = vpop.eup %4018  ;;  %4020 = vrcp.f32 %v287_v23  ;;  %v309_v27 = vadd.f32 1.0, %v4017_v25  ;;  %v299_v36 = vand.u32 2147483648, %v287_v23  ;;  %v297_v40 = vand.u32 2147483647, %v287_v23 }
  0xbb   :  { %v333_v28 = vadd.f32 1.0, %v4019_v26  ;;  %vm293_vm4 = vweird.f32 %v287_v23  ;;  %v3066_v25 = vor.u32 %v3843_v18, %v3063_v20  ;;  %v3070_v26 = vor.u32 %v3846_v22, %v3069_v21  ;;  %v3005_v18 = vld [vmem:[%s5876_s1 + $0x48] sm:$0xf]  ;;  %v3830_v20 = vld [vmem:[%s5876_s1 + $0x54] sm:$0xf0] }
  0xbc   :  { %4022 = vrcp.f32 %v309_v27  ;;  %v321_v41 = vand.u32 2147483648, %v309_v27  ;;  %v319_v44 = vand.u32 2147483647, %v309_v27  ;;  %v300_v45 = vor.u32 1.1754944e-38, %v299_v36  ;;  %v3053_v36 = vld [vmem:[%s5876_s1 + $0xa8] sm:$0xf] }
  0xbd   :  { %4024 = vrcp.f32 %v333_v28  ;;  %vm298_vm7 = vcmp.eq.f32.partialorder %v297_v40, 8.507059e+37  ;;  %vm315_vm8 = vweird.f32 %v309_v27  ;;  %v345_v60 = vand.u32 2147483648, %v333_v28  ;;  %893 = vmatpush.bf16.msra.mxu1 %v3066_v25  ;;  %906 = vmatpush.bf16.msra.mxu2 %v3070_v26  ;;  %v3840_v40 = vld [vmem:[%s5876_s1 + $0xac] sm:$0xf]  ;;  %v3007_v22 = vld [vmem:[%s5876_s1 + $0x58] sm:$0xf0] }
  0xbe   :  { %4026 = vtanh.f32 %v325_v32  ;;  %v322_v51 = vor.u32 1.1754944e-38, %v321_v41  ;;  %vm320_vm10 = vcmp.eq.f32.partialorder %v319_v44, 8.507059e+37  ;;  %vm339_vm12 = vweird.f32 %v333_v28  ;;  %v3841_v32 = vld [vmem:[%s5876_s1 + $0xac] sm:$0xf0]  ;;  %v3055_v41 = vld [vmem:[%s5876_s1 + $0xb8] sm:$0xf0] }
  0xbf   :  { %v343_v61 = vand.u32 2147483647, %v333_v28  ;;  %v346_v63 = vor.u32 1.1754944e-38, %v345_v60  ;;  %v3837_v44 = vld [vmem:[%s5876_s1 + $0x8c] sm:$0xf0] }
  0xc0   :  { %v4021_v29 = vpop.eup %4020  ;;  %v3828_v21 = vld [vmem:[%s5876_s1 + $0x4c] sm:$0xf]  ;;  %v2981_v25 = vld [vmem:[%s5876_s1 + $0x20] sm:$0xf]  ;;  %v3825_v26 = vld [vmem:[%s5876_s1 + $0x2c] sm:$0xf0] }
  0xc1   :  { %v289_v30 = vmul.f32 %v4021_v29, %v287_v23  ;;  %vm294_vm3 = vweird.f32 %v4021_v29  ;;  %vm344_vm14 = vcmp.eq.f32.partialorder %v343_v61, 8.507059e+37 }
  0xc2   :  { %v4023_v31 = vpop.eup %4022  ;;  %vm295_vm6 = vmor %vm293_vm4, %vm294_vm3 }
  0xc3   :  { %v4025_v33 = vpop.eup %4024  ;;  %v290_v34 = vsub.f32 1.0, %v289_v30  ;;  %v311_v35 = vmul.f32 %v4023_v31, %v309_v27  ;;  %vm316_vm5 = vweird.f32 %v4023_v31  ;;  %v3844_v27 = vld [vmem:[%s5876_s1 + $0xcc] sm:$0xf] }
  0xc4   :  { %v335_v37 = vmul.f32 %v4025_v33, %v333_v28  ;;  %vm317_vm9 = vmor %vm315_vm8, %vm316_vm5  ;;  %v4027_v53 = vpop.eup %4026  ;;  %vm340_vm11 = vweird.f32 %v4025_v33  ;;  %v3071_v28 = vld [vmem:[%s5876_s1 + $0xd8] sm:$0xf0] }
  0xc5   :  { %v312_v38 = vsub.f32 1.0, %v311_v35  ;;  %v291_v39 = vmul.f32 %v4021_v29, %v290_v34  ;;  %vm341_vm13 = vmor %vm339_vm12, %vm340_vm11  ;;  %v3074_v30 = vor.u32 %v3844_v27, %v3071_v28  ;;  %v3047_v35 = vld [vmem:[%s5876_s1 + $0xb0] sm:$0xf0] }
  0xc6   :  { %v336_v46 = vsub.f32 1.0, %v335_v37  ;;  %v3842_v37 = vld [vmem:[%s5876_s1 + $0xb4] sm:$0xf0] }
  0xc7   :  { %v292_v42 = vadd.f32 %v4021_v29, %v291_v39  ;;  %v313_v43 = vmul.f32 %v4023_v31, %v312_v38  ;;  %919 = vmatpush.bf16.msra.mxu3 %v3074_v30  ;;  %v3054_v39 = vor.u32 %v3842_v37, %v3053_v36  ;;  %v3006_v30 = vor.u32 %v3830_v20, %v3005_v18  ;;  %v2989_v36 = vld [vmem:[%s5876_s1 + $0x28] sm:$0xf]  ;;  %v3826_v37 = vld [vmem:[%s5876_s1 + $0x34] sm:$0xf0] }
  0xc8   :  { %v337_v55 = vmul.f32 %v4025_v33, %v336_v46  ;;  %v3031_v46 = vld [vmem:[%s5876_s1 + $0x90] sm:$0xf0] }
  0xc9   :  { %v296_v47 = vsel %vm295_vm6, %v4021_v29, %v292_v42  ;;  %v314_v48 = vadd.f32 %v4023_v31, %v313_v43  ;;  %v3029_v42 = vld [vmem:[%s5876_s1 + $0x80] sm:$0xf]  ;;  %v3058_v43 = vor.u32 %v3840_v40, %v3055_v41  ;;  %907 = vmatpush.bf16.msra.mxu2 %v3054_v39  ;;  %v3824_v40 = vld [vmem:[%s5876_s1 + $0x2c] sm:$0xf]  ;;  %v2982_v41 = vor.u32 %v3825_v26, %v2981_v25 }
  0xca   :  { %v301_v50 = vsel %vm298_vm7, %v300_v45, %v296_v47  ;;  %v338_v59 = vadd.f32 %v4025_v33, %v337_v55  ;;  %v3835_v45 = vld [vmem:[%s5876_s1 + $0x84] sm:$0xf]  ;;  %v3030_v47 = vor.u32 %v3837_v44, %v3029_v42  ;;  %v2991_v42 = vld [vmem:[%s5876_s1 + $0x38] sm:$0xf0]  ;;  %v2990_v44 = vor.u32 %v3826_v37, %v2989_v36 }
  0xcb   :  { %v318_v52 = vsel %vm317_vm9, %v4023_v31, %v314_v48  ;;  %v350_v57 = vmul.f32 %v4027_v53, %v301_v50  ;;  %v3045_v31 = vld [vmem:[%s5876_s1 + $0xa0] sm:$0xf]  ;;  %v3034_v48 = vor.u32 %v3835_v45, %v3031_v46  ;;  %v3838_v50 = vld [vmem:[%s5876_s1 + $0x94] sm:$0xf0]  ;;  %920 = vmatpush.bf16.msra.mxu3 %v3058_v43  ;;  %v3821_v46 = vld [vmem:[%s5876_s1 + $0xc] sm:$0xf0] }
  0xcc   :  { %v323_v54 = vsel %vm320_vm10, %v322_v51, %v318_v52  ;;  %v342_v62 = vsel %vm341_vm13, %v4025_v33, %v338_v59  ;;  %v3839_v33 = vld [vmem:[%s5876_s1 + $0xa4] sm:$0xf]  ;;  %v3046_v34 = vor.u32 %v3841_v32, %v3045_v31  ;;  %v3836_v51 = vld [vmem:[%s5876_s1 + $0x8c] sm:$0xf]  ;;  %v3833_v59 = vld [vmem:[%s5876_s1 + $0x6c] sm:$0xf0] }
  0xcd   :  { %v349_v56 = vmul.f32 %v323_v54, %v22_v49  ;;  %v347_v1 = vsel %vm344_vm14, %v346_v63, %v342_v62  ;;  %v3050_v38 = vor.u32 %v3839_v33, %v3047_v35  ;;  %v3037_v49 = vld [vmem:[%s5876_s1 + $0x88] sm:$0xf]  ;;  %v3823_v31 = vld [vmem:[%s5876_s1 + $0x24] sm:$0xf]  ;;  %v2983_v35 = vld [vmem:[%s5876_s1 + $0x30] sm:$0xf0] }
  0xce   :  { %881 = vmatpush.bf16.msra.mxu0 %v3046_v34  ;;  %v2959_v54 = vld [vmem:[%s5875_s0 + $0x8] sm:$0xff]  ;;  %v3038_v55 = vor.u32 %v3838_v50, %v3037_v49  ;;  %v3010_v34 = vor.u32 %v3828_v21, %v3007_v22  ;;  %v2986_v43 = vor.u32 %v3823_v31, %v2983_v35  ;;  %v2965_v45 = vld [vmem:[%s5876_s1] sm:$0xf]  ;;  %v2967_v49 = vld [vmem:[%s5876_s1 + $0x10] sm:$0xf0] }
  0xcf   :  { %v4608_v58 = vadd.f32 %v350_v57, %v349_v56  ;;  %894 = vmatpush.bf16.msra.mxu1 %v3050_v38  ;;  %v3039_v56 = vld [vmem:[%s5876_s1 + $0x98] sm:$0xf0]  ;;  %v3013_v57 = vld [vmem:[%s5876_s1 + $0x60] sm:$0xf]  ;;  %v2973_v50 = vld [vmem:[%s5876_s1 + $0x8] sm:$0xf] }
  0xd0   :  { %v3014_v4 = vor.u32 %v3833_v59, %v3013_v57  ;;  %908 = vmatpush.bf16.msra.mxu2 %v3038_v55 }
  0xd1   :  { %4028 = vtanh.f32 %v4608_v58 }
  0xd2   :  { %882 = vmatpush.bf16.msra.mxu0 %v3030_v47  ;;  %v3819_v47 = vld [vmem:[%s5876_s1 + $0x4] sm:$0xf] }
  0xd3   :  { %895 = vmatpush.bf16.msra.mxu1 %v3034_v48  ;;  %v2994_v48 = vor.u32 %v3824_v40, %v2991_v42  ;;  %v3879_v40 = vld [vmem:[%s5876_s1 + $0xe4] sm:$0xf]  ;;  %v3211_v42 = vld [vmem:[%s5876_s1 + $0xf0] sm:$0xf0] }
  0xd4   :  { %909 = vmatpush.bf16.msra.mxu2 %v3022_v10 }
  0xd6   :  { %883 = vmatpush.bf16.msra.mxu0 %v3014_v4 }
  0xd7   :  { %v4029_v0 = vpop.eup %4028 }
  0xd8   :  { %v353_v2 = vmul.f32 %v4029_v0, %v347_v1  ;;  %v3042_v0 = vor.u32 %v3836_v51, %v3039_v56  ;;  %v3831_v1 = vld [vmem:[%s5876_s1 + $0x64] sm:$0xf]  ;;  %910 = vmatpush.bf16.msra.mxu2 %v3006_v30  ;;  %v3822_v51 = vld [vmem:[%s5876_s1 + $0x14] sm:$0xf0]  ;;  %v2970_v56 = vor.u32 %v3819_v47, %v2967_v49  ;;  %v3880_v47 = vld [vmem:[%s5876_s1 + $0xec] sm:$0xf] }
  0xd9   :  { %v2974_v57 = vor.u32 %v3822_v51, %v2973_v50  ;;  %v3193_v50 = vld [vmem:[%s5876_s1 + $0xc0] sm:$0xf]  ;;  %v3877_v51 = vld [vmem:[%s5876_s1 + $0xcc] sm:$0xf0] }
  0xda   :  { %354 = vst [vmem:[#allocation2] sm:$0x3] %v353_v2  ;;  %v355_v3 = vpack.c.bf16 %v353_v2, %v353_v2  ;;  %v3015_v2 = vld [vmem:[%s5876_s1 + $0x70] sm:$0xf0]  ;;  %921 = vmatpush.bf16.msra.mxu3 %v3042_v0 }
  0xdb   :  { %v3018_v9 = vor.u32 %v3831_v1, %v3015_v2 }
  0xdc   :  { %556 = vmatmul.bf16.vlgmr.msrb.gmra.mxu0 %v355_v3  ;;  %569 = vmatmul.bf16.vlgmr.msrb.gmra.mxu1 %v355_v3 }
  0xdd   :  { %582 = vmatmul.bf16.vlgmr.msrb.gmra.mxu2 %v355_v3  ;;  %595 = vmatmul.bf16.vlgmr.msrb.gmra.mxu3 %v355_v3 }
  0xde   :  { %896 = vmatpush.bf16.msra.mxu1 %v3018_v9  ;;  %922 = vmatpush.bf16.msra.mxu3 %v3026_v15 }
  0xdf   :  { %911 = vmatpush.bf16.msra.mxu2 %v2990_v44  ;;  %v3882_v44 = vld [vmem:[%s5876_s1 + $0xf4] sm:$0xf0] }
  0xe2   :  { %923 = vmatpush.bf16.msra.mxu3 %v3010_v34 }
  0xe3   :  { %912 = vmatpush.bf16.msra.mxu2 %v2974_v57 }
  0xe6   :  { %924 = vmatpush.bf16.msra.mxu3 %v2994_v48  ;;  %v3219_v48 = vld [vmem:[%s5876_s1 + $0xf8] sm:$0xf0] }
  0xe7   :  { %v3222_v49 = vor.u32 %v3880_v47, %v3219_v48  ;;  %v3861_v47 = vld [vmem:[%s5876_s1 + $0x4c] sm:$0xf0] }
 0x159   :  { %v557_v23 = vpop.f32.mrf.mxu0  ;;  %v570_v24 = vpop.f32.mrf.mxu1 }
 0x15a   :  { %v606_v29 = vrot.slane %v570_v24, 6  ;;  %v3002_v24 = vor.u32 %v3827_v16, %v2999_v17 }
 0x15c   :  { %v609_v3 = vsel %vm276_vm0, %v557_v23, %v606_v29  ;;  %v2998_v23 = vor.u32 %v3829_v13, %v2997_v12  ;;  %897 = vmatpush.bf16.msra.mxu1 %v3002_v24 }
 0x15e   :  { %884 = vmatpush.bf16.msra.mxu0 %v2998_v23 }
 0x160   :  { %v583_v52 = vpop.f32.mrf.mxu2  ;;  %v596_v53 = vpop.f32.mrf.mxu3  ;;  %898 = vmatpush.bf16.msra.mxu1 %v2986_v43  ;;  %v3217_v43 = vld [vmem:[%s5876_s1 + $0xe8] sm:$0xf] }
 0x161   :  { %v607_v60 = vrot.slane %v583_v52, 4  ;;  %v608_v61 = vrot.slane %v596_v53, 2  ;;  %v559_v62 = vpop.f32.mrf.mxu0  ;;  %v572_v63 = vpop.f32.mrf.mxu1  ;;  %v3820_v52 = vld [vmem:[%s5876_s1 + $0xc] sm:$0xf]  ;;  %v2975_v53 = vld [vmem:[%s5876_s1 + $0x18] sm:$0xf0] }
 0x162   :  { %885 = vmatpush.bf16.msra.mxu0 %v2982_v41 }
 0x163   :  { %v610_v8 = vsel %vm278_vm1, %v607_v60, %v608_v61  ;;  %v2978_v60 = vor.u32 %v3820_v52, %v2975_v53  ;;  %v3875_v52 = vld [vmem:[%s5876_s1 + $0xc4] sm:$0xf]  ;;  %v3194_v53 = vor.u32 %v3877_v51, %v3193_v50  ;;  %v3131_v51 = vld [vmem:[%s5876_s1 + $0x50] sm:$0xf0] }
 0x164   :  { %v611_v14 = vsel %vm280_vm2, %v609_v3, %v610_v8  ;;  %899 = vmatpush.bf16.msra.mxu1 %v2970_v56  ;;  %v3878_v56 = vld [vmem:[%s5876_s1 + $0xd4] sm:$0xf0]  ;;  %v3859_v50 = vld [vmem:[%s5876_s1 + $0x44] sm:$0xf] }
 0x165   :  { %v4752_v19 = vadd.f32 %v2959_v54, %v611_v14  ;;  %v2966_v54 = vor.u32 %v3821_v46, %v2965_v45  ;;  %925 = vmatpush.bf16.msra.mxu3 %v2978_v60  ;;  %v3214_v45 = vor.u32 %v3879_v40, %v3211_v42  ;;  %v3218_v46 = vor.u32 %v3882_v44, %v3217_v43  ;;  %v3866_v40 = vld [vmem:[%s5876_s1 + $0x74] sm:$0xf0] }
 0x167   :  { %v2960_v27 = vmul.f32 -1.442695, %v4752_v19  ;;  %v634_v28 = vrot.slane %v4752_v19, 2  ;;  %v658_v29 = vrot.slane %v4752_v19, 6  ;;  %886 = vmatpush.bf16.msra.mxu0 %v2966_v54  ;;  %v655_v4 = vrot.slane %v4752_v19, 4  ;;  %1236 = vmatpush.bf16.msrb.mxu2 %v3218_v46 }
 0x168   :  { %v585_v32 = vpop.f32.mrf.mxu2  ;;  %v598_v33 = vpop.f32.mrf.mxu3  ;;  %1223 = vmatpush.bf16.msrb.mxu1 %v3214_v45  ;;  %v3195_v54 = vld [vmem:[%s5876_s1 + $0xd0] sm:$0xf0]  ;;  %v3155_v45 = vld [vmem:[%s5876_s1 + $0x78] sm:$0xf0]  ;;  %v3129_v46 = vld [vmem:[%s5876_s1 + $0x40] sm:$0xf] }
 0x169   :  { %4030 = vpow2.f32 %v2960_v27  ;;  %v2961_v38 = vmul.f32 -1.442695, %v634_v28  ;;  %v2962_v39 = vmul.f32 -1.442695, %v658_v29  ;;  %1249 = vmatpush.bf16.msrb.mxu3 %v3222_v49  ;;  %v3198_v60 = vor.u32 %v3875_v52, %v3195_v54  ;;  %v3137_v52 = vld [vmem:[%s5876_s1 + $0x48] sm:$0xf] }
 0x16a   :  { %v3862_v54 = vld [vmem:[%s5876_s1 + $0x54] sm:$0xf0] }
 0x16b   :  { %4032 = vpow2.f32 %v2961_v38 }
 0x16c   :  { %4034 = vpow2.f32 %v2962_v39  ;;  %v3881_v39 = vld [vmem:[%s5876_s1 + $0xec] sm:$0xf0]  ;;  %1224 = vmatpush.bf16.msrb.mxu1 %v3198_v60  ;;  %v3113_v60 = vld [vmem:[%s5876_s1 + $0x20] sm:$0xf] }
 0x16f   :  { %v4031_v55 = vpop.eup %4030 }
 0x170   :  { %v617_v59 = vadd.f32 1.0, %v4031_v55  ;;  %v3201_v55 = vld [vmem:[%s5876_s1 + $0xc8] sm:$0xf] }
 0x171   :  { %v4033_v61 = vpop.eup %4032 }
 0x172   :  { %v4035_v62 = vpop.eup %4034  ;;  %4036 = vrcp.f32 %v617_v59  ;;  %v639_v63 = vadd.f32 1.0, %v4033_v61  ;;  %v629_v8 = vand.u32 2147483648, %v617_v59  ;;  %v627_v12 = vand.u32 2147483647, %v617_v59 }
 0x173   :  { %v663_v0 = vadd.f32 1.0, %v4035_v62  ;;  %vm623_vm3 = vweird.f32 %v617_v59  ;;  %v3202_v61 = vor.u32 %v3878_v56, %v3201_v55  ;;  %v3876_v62 = vld [vmem:[%s5876_s1 + $0xcc] sm:$0xf]  ;;  %v3139_v56 = vld [vmem:[%s5876_s1 + $0x58] sm:$0xf0] }
 0x174   :  { %4038 = vrcp.f32 %v639_v63  ;;  %v651_v13 = vand.u32 2147483648, %v639_v63  ;;  %v649_v16 = vand.u32 2147483647, %v639_v63  ;;  %v630_v17 = vor.u32 1.1754944e-38, %v629_v8  ;;  %v3874_v8 = vld [vmem:[%s5876_s1 + $0xb4] sm:$0xf0] }
 0x175   :  { %4040 = vrcp.f32 %v663_v0  ;;  %vm628_vm6 = vcmp.eq.f32.partialorder %v627_v12, 8.507059e+37  ;;  %vm645_vm7 = vweird.f32 %v639_v63  ;;  %v675_v31 = vand.u32 2147483648, %v663_v0  ;;  %1237 = vmatpush.bf16.msrb.mxu2 %v3202_v61  ;;  %v3187_v12 = vld [vmem:[%s5876_s1 + $0xb8] sm:$0xf0]  ;;  %v3860_v55 = vld [vmem:[%s5876_s1 + $0x4c] sm:$0xf] }
 0x176   :  { %4042 = vtanh.f32 %v655_v4  ;;  %v652_v22 = vor.u32 1.1754944e-38, %v651_v13  ;;  %vm650_vm9 = vcmp.eq.f32.partialorder %v649_v16, 8.507059e+37  ;;  %vm669_vm11 = vweird.f32 %v663_v0  ;;  %v3871_v4 = vld [vmem:[%s5876_s1 + $0xa4] sm:$0xf]  ;;  %v3161_v13 = vld [vmem:[%s5876_s1 + $0x80] sm:$0xf] }
 0x177   :  { %v673_v32 = vand.u32 2147483647, %v663_v0  ;;  %v676_v34 = vor.u32 1.1754944e-38, %v675_v31  ;;  %v3867_v16 = vld [vmem:[%s5876_s1 + $0x84] sm:$0xf] }
 0x178   :  { %v4037_v1 = vpop.eup %4036  ;;  %v3857_v61 = vld [vmem:[%s5876_s1 + $0x2c] sm:$0xf0] }
 0x179   :  { %v619_v2 = vmul.f32 %v4037_v1, %v617_v59  ;;  %vm624_vm15 = vweird.f32 %v4037_v1  ;;  %vm674_vm13 = vcmp.eq.f32.partialorder %v673_v32, 8.507059e+37 }
 0x17a   :  { %v4039_v3 = vpop.eup %4038  ;;  %vm625_vm5 = vmor %vm623_vm3, %vm624_vm15 }
 0x17b   :  { %v4041_v5 = vpop.eup %4040  ;;  %v620_v6 = vsub.f32 1.0, %v619_v2  ;;  %v641_v7 = vmul.f32 %v4039_v3, %v639_v63  ;;  %vm646_vm4 = vweird.f32 %v4039_v3  ;;  %v3203_v63 = vld [vmem:[%s5876_s1 + $0xd8] sm:$0xf0]  ;;  %v3177_v2 = vld [vmem:[%s5876_s1 + $0xa0] sm:$0xf] }
 0x17c   :  { %v665_v9 = vmul.f32 %v4041_v5, %v663_v0  ;;  %vm647_vm8 = vmor %vm645_vm7, %vm646_vm4  ;;  %v4043_v24 = vpop.eup %4042  ;;  %vm670_vm10 = vweird.f32 %v4041_v5 }
 0x17d   :  { %v642_v10 = vsub.f32 1.0, %v641_v7  ;;  %v621_v11 = vmul.f32 %v4037_v1, %v620_v6  ;;  %vm671_vm12 = vmor %vm669_vm11, %vm670_vm10  ;;  %v3179_v6 = vld [vmem:[%s5876_s1 + $0xb0] sm:$0xf0]  ;;  %v3185_v7 = vld [vmem:[%s5876_s1 + $0xa8] sm:$0xf] }
 0x17e   :  { %v666_v18 = vsub.f32 1.0, %v665_v9  ;;  %v3182_v9 = vor.u32 %v3871_v4, %v3179_v6  ;;  %v3115_v6 = vld [vmem:[%s5876_s1 + $0x30] sm:$0xf0] }
 0x17f   :  { %v622_v14 = vadd.f32 %v4037_v1, %v621_v11  ;;  %v643_v15 = vmul.f32 %v4039_v3, %v642_v10  ;;  %v3186_v10 = vor.u32 %v3874_v8, %v3185_v7  ;;  %v3872_v11 = vld [vmem:[%s5876_s1 + $0xac] sm:$0xf]  ;;  %v3121_v7 = vld [vmem:[%s5876_s1 + $0x28] sm:$0xf]  ;;  %v3858_v8 = vld [vmem:[%s5876_s1 + $0x34] sm:$0xf0] }
 0x180   :  { %v667_v26 = vmul.f32 %v4041_v5, %v666_v18  ;;  %1225 = vmatpush.bf16.msrb.mxu1 %v3182_v9 }
 0x181   :  { %v626_v19 = vsel %vm625_vm5, %v4037_v1, %v622_v14  ;;  %v644_v20 = vadd.f32 %v4039_v3, %v643_v15  ;;  %v3206_v1 = vor.u32 %v3876_v62, %v3203_v63  ;;  %v3190_v14 = vor.u32 %v3872_v11, %v3187_v12  ;;  %v3869_v15 = vld [vmem:[%s5876_s1 + $0x8c] sm:$0xf0]  ;;  %1238 = vmatpush.bf16.msrb.mxu2 %v3186_v10  ;;  %v3856_v11 = vld [vmem:[%s5876_s1 + $0x2c] sm:$0xf] }
 0x182   :  { %v631_v21 = vsel %vm628_vm6, %v630_v17, %v626_v19  ;;  %v668_v30 = vadd.f32 %v4041_v5, %v667_v26  ;;  %v3163_v17 = vld [vmem:[%s5876_s1 + $0x90] sm:$0xf0]  ;;  %v3162_v18 = vor.u32 %v3869_v15, %v3161_v13  ;;  %v3114_v12 = vor.u32 %v3857_v61, %v3113_v60  ;;  %v3123_v13 = vld [vmem:[%s5876_s1 + $0x38] sm:$0xf0] }
 0x183   :  { %v648_v23 = vsel %vm647_vm8, %v4039_v3, %v644_v20  ;;  %v680_v28 = vmul.f32 %v4043_v24, %v631_v21  ;;  %v3873_v3 = vld [vmem:[%s5876_s1 + $0xac] sm:$0xf0]  ;;  %1250 = vmatpush.bf16.msrb.mxu3 %v3206_v1  ;;  %v3166_v19 = vor.u32 %v3867_v16, %v3163_v17  ;;  %v3169_v20 = vld [vmem:[%s5876_s1 + $0x88] sm:$0xf]  ;;  %v3870_v21 = vld [vmem:[%s5876_s1 + $0x94] sm:$0xf0]  ;;  %v3138_v1 = vor.u32 %v3862_v54, %v3137_v52 }
 0x184   :  { %v653_v25 = vsel %vm650_vm9, %v652_v22, %v648_v23  ;;  %v672_v33 = vsel %vm671_vm12, %v4041_v5, %v668_v30  ;;  %v3178_v5 = vor.u32 %v3873_v3, %v3177_v2  ;;  %v3868_v22 = vld [vmem:[%s5876_s1 + $0x8c] sm:$0xf]  ;;  %v3170_v26 = vor.u32 %v3870_v21, %v3169_v20  ;;  %v3865_v30 = vld [vmem:[%s5876_s1 + $0x6c] sm:$0xf0]  ;;  %v3855_v2 = vld [vmem:[%s5876_s1 + $0x24] sm:$0xf] }
 0x185   :  { %v679_v27 = vmul.f32 %v653_v25, %v4608_v58  ;;  %v677_v36 = vsel %vm674_vm13, %v676_v34, %v672_v33  ;;  %v3209_v58 = vld [vmem:[%s5876_s1 + $0xe0] sm:$0xf]  ;;  %v3091_v25 = vld [vmem:[%s5875_s0 + $0x10] sm:$0xff]  ;;  %1226 = vmatpush.bf16.msrb.mxu1 %v3166_v19  ;;  %v3122_v15 = vor.u32 %v3858_v8, %v3121_v7  ;;  %v3126_v19 = vor.u32 %v3856_v11, %v3123_v13  ;;  %v3105_v21 = vld [vmem:[%s5876_s1 + $0x8] sm:$0xf] }
 0x186   :  { %v3210_v41 = vor.u32 %v3881_v39, %v3209_v58  ;;  %v3153_v39 = vld [vmem:[%s5876_s1 + $0x68] sm:$0xf]  ;;  %1239 = vmatpush.bf16.msrb.mxu2 %v3170_v26  ;;  %v3097_v16 = vld [vmem:[%s5876_s1] sm:$0xf]  ;;  %v3853_v17 = vld [vmem:[%s5876_s1 + $0xc] sm:$0xf0] }
 0x187   :  { %v4816_v29 = vadd.f32 %v680_v28, %v679_v27  ;;  %1251 = vmatpush.bf16.msrb.mxu3 %v3190_v14  ;;  %v3171_v27 = vld [vmem:[%s5876_s1 + $0x98] sm:$0xf0]  ;;  %v3145_v28 = vld [vmem:[%s5876_s1 + $0x60] sm:$0xf]  ;;  %v3154_v44 = vor.u32 %v3866_v40, %v3153_v39  ;;  %v3118_v14 = vor.u32 %v3855_v2, %v3115_v6  ;;  %v3099_v20 = vld [vmem:[%s5876_s1 + $0x10] sm:$0xf0] }
 0x188   :  { %1210 = vmatpush.bf16.msrb.mxu0 %v3210_v41  ;;  %v3146_v58 = vor.u32 %v3865_v30, %v3145_v28  ;;  %v3864_v41 = vld [vmem:[%s5876_s1 + $0x6c] sm:$0xf]  ;;  %v3911_v11 = vld [vmem:[%s5876_s1 + $0xe4] sm:$0xf]  ;;  %v3343_v13 = vld [vmem:[%s5876_s1 + $0xf0] sm:$0xf0] }
 0x189   :  { %4044 = vtanh.f32 %v4816_v29  ;;  %v3158_v49 = vor.u32 %v3864_v41, %v3155_v45 }
 0x18a   :  { %1240 = vmatpush.bf16.msrb.mxu2 %v3154_v44 }
 0x18c   :  { %1211 = vmatpush.bf16.msrb.mxu0 %v3194_v53 }
 0x18e   :  { %1241 = vmatpush.bf16.msrb.mxu2 %v3138_v1 }
 0x18f   :  { %v4045_v35 = vpop.eup %4044 }
 0x190   :  { %v683_v37 = vmul.f32 %v4045_v35, %v677_v36  ;;  %1212 = vmatpush.bf16.msrb.mxu0 %v3178_v5  ;;  %v3174_v35 = vor.u32 %v3868_v22, %v3171_v27  ;;  %v3863_v36 = vld [vmem:[%s5876_s1 + $0x64] sm:$0xf]  ;;  %v3142_v5 = vor.u32 %v3860_v55, %v3139_v56  ;;  %v3854_v22 = vld [vmem:[%s5876_s1 + $0x14] sm:$0xf0] }
 0x191   :  { %v3106_v28 = vor.u32 %v3854_v22, %v3105_v21  ;;  %v3325_v21 = vld [vmem:[%s5876_s1 + $0xc0] sm:$0xf]  ;;  %v3909_v22 = vld [vmem:[%s5876_s1 + $0xcc] sm:$0xf0] }
 0x192   :  { %685 = vst [vmem:[#allocation2 + $0x2] sm:$0x3] %v683_v37  ;;  %v686_v38 = vpack.c.bf16 %v683_v37, %v683_v37  ;;  %v3147_v37 = vld [vmem:[%s5876_s1 + $0x70] sm:$0xf0]  ;;  %1252 = vmatpush.bf16.msrb.mxu3 %v3174_v35  ;;  %1242 = vmatpush.bf16.msrb.mxu2 %v3122_v15  ;;  %v3914_v15 = vld [vmem:[%s5876_s1 + $0xf4] sm:$0xf0] }
 0x193   :  { %v3150_v43 = vor.u32 %v3863_v36, %v3147_v37 }
 0x194   :  { %887 = vmatmul.bf16.vlgmr.msra.gmra.mxu0 %v686_v38  ;;  %900 = vmatmul.bf16.vlgmr.msra.gmra.mxu1 %v686_v38 }
 0x195   :  { %913 = vmatmul.bf16.vlgmr.msra.gmra.mxu2 %v686_v38  ;;  %926 = vmatmul.bf16.vlgmr.msra.gmra.mxu3 %v686_v38 }
 0x196   :  { %1213 = vmatpush.bf16.msrb.mxu0 %v3162_v18  ;;  %1227 = vmatpush.bf16.msrb.mxu1 %v3150_v43  ;;  %v3851_v18 = vld [vmem:[%s5876_s1 + $0x4] sm:$0xf] }
 0x197   :  { %1253 = vmatpush.bf16.msrb.mxu3 %v3158_v49  ;;  %v3102_v27 = vor.u32 %v3851_v18, %v3099_v20  ;;  %1243 = vmatpush.bf16.msrb.mxu2 %v3106_v28  ;;  %v3912_v18 = vld [vmem:[%s5876_s1 + $0xec] sm:$0xf] }
 0x19a   :  { %1214 = vmatpush.bf16.msrb.mxu0 %v3146_v58 }
 0x19b   :  { %1254 = vmatpush.bf16.msrb.mxu3 %v3142_v5 }
 0x19f   :  { %1255 = vmatpush.bf16.msrb.mxu3 %v3126_v19  ;;  %v3351_v19 = vld [vmem:[%s5876_s1 + $0xf8] sm:$0xf0] }
 0x1a0   :  { %v3354_v20 = vor.u32 %v3912_v18, %v3351_v19  ;;  %v3893_v18 = vld [vmem:[%s5876_s1 + $0x4c] sm:$0xf0] }
 0x211   :  { %v888_v57 = vpop.f32.mrf.mxu0  ;;  %v901_v59 = vpop.f32.mrf.mxu1 }
 0x212   :  { %v937_v0 = vrot.slane %v901_v59, 6  ;;  %v3134_v59 = vor.u32 %v3859_v50, %v3131_v51 }
 0x214   :  { %v940_v38 = vsel %vm276_vm0, %v888_v57, %v937_v0  ;;  %v3130_v57 = vor.u32 %v3861_v47, %v3129_v46  ;;  %1228 = vmatpush.bf16.msrb.mxu1 %v3134_v59 }
 0x216   :  { %1215 = vmatpush.bf16.msrb.mxu0 %v3130_v57 }
 0x218   :  { %v914_v23 = vpop.f32.mrf.mxu2  ;;  %v927_v24 = vpop.f32.mrf.mxu3  ;;  %1229 = vmatpush.bf16.msrb.mxu1 %v3118_v14  ;;  %v3349_v14 = vld [vmem:[%s5876_s1 + $0xe8] sm:$0xf] }
 0x219   :  { %v938_v31 = vrot.slane %v914_v23, 4  ;;  %v939_v32 = vrot.slane %v927_v24, 2  ;;  %v890_v33 = vpop.f32.mrf.mxu0  ;;  %v903_v34 = vpop.f32.mrf.mxu1  ;;  %v3852_v23 = vld [vmem:[%s5876_s1 + $0xc] sm:$0xf]  ;;  %v3107_v24 = vld [vmem:[%s5876_s1 + $0x18] sm:$0xf0] }
 0x21a   :  { %1216 = vmatpush.bf16.msrb.mxu0 %v3114_v12 }
 0x21b   :  { %v941_v42 = vsel %vm278_vm1, %v938_v31, %v939_v32  ;;  %v3110_v31 = vor.u32 %v3852_v23, %v3107_v24  ;;  %v3907_v23 = vld [vmem:[%s5876_s1 + $0xc4] sm:$0xf]  ;;  %v3326_v24 = vor.u32 %v3909_v22, %v3325_v21  ;;  %v3263_v22 = vld [vmem:[%s5876_s1 + $0x50] sm:$0xf0] }
 0x21c   :  { %v942_v48 = vsel %vm280_vm2, %v940_v38, %v941_v42  ;;  %1230 = vmatpush.bf16.msrb.mxu1 %v3102_v27  ;;  %v3910_v27 = vld [vmem:[%s5876_s1 + $0xd4] sm:$0xf0]  ;;  %v3891_v21 = vld [vmem:[%s5876_s1 + $0x44] sm:$0xf] }
 0x21d   :  { %v4960_v53 = vadd.f32 %v3091_v25, %v942_v48  ;;  %v3098_v25 = vor.u32 %v3853_v17, %v3097_v16  ;;  %1256 = vmatpush.bf16.msrb.mxu3 %v3110_v31  ;;  %v3346_v16 = vor.u32 %v3911_v11, %v3343_v13  ;;  %v3350_v17 = vor.u32 %v3914_v15, %v3349_v14  ;;  %v3898_v11 = vld [vmem:[%s5876_s1 + $0x74] sm:$0xf0] }
 0x21f   :  { %v3092_v62 = vmul.f32 -1.442695, %v4960_v53  ;;  %v965_v63 = vrot.slane %v4960_v53, 2  ;;  %v989_v0 = vrot.slane %v4960_v53, 6  ;;  %1217 = vmatpush.bf16.msrb.mxu0 %v3098_v25  ;;  %v986_v58 = vrot.slane %v4960_v53, 4  ;;  %1567 = vmatpush.bf16.msra.mxu2 %v3350_v17 }
 0x220   :  { %v916_v3 = vpop.f32.mrf.mxu2  ;;  %v929_v4 = vpop.f32.mrf.mxu3  ;;  %1554 = vmatpush.bf16.msra.mxu1 %v3346_v16  ;;  %v3327_v25 = vld [vmem:[%s5876_s1 + $0xd0] sm:$0xf0]  ;;  %v3287_v16 = vld [vmem:[%s5876_s1 + $0x78] sm:$0xf0]  ;;  %v3261_v17 = vld [vmem:[%s5876_s1 + $0x40] sm:$0xf] }
 0x221   :  { %4046 = vpow2.f32 %v3092_v62  ;;  %v3093_v9 = vmul.f32 -1.442695, %v965_v63  ;;  %v3094_v10 = vmul.f32 -1.442695, %v989_v0  ;;  %1580 = vmatpush.bf16.msra.mxu3 %v3354_v20  ;;  %v3330_v31 = vor.u32 %v3907_v23, %v3327_v25  ;;  %v3269_v23 = vld [vmem:[%s5876_s1 + $0x48] sm:$0xf] }
 0x222   :  { %v3894_v25 = vld [vmem:[%s5876_s1 + $0x54] sm:$0xf0] }
 0x223   :  { %4048 = vpow2.f32 %v3093_v9 }
 0x224   :  { %4050 = vpow2.f32 %v3094_v10  ;;  %v3913_v10 = vld [vmem:[%s5876_s1 + $0xec] sm:$0xf0]  ;;  %1555 = vmatpush.bf16.msra.mxu1 %v3330_v31  ;;  %v3245_v31 = vld [vmem:[%s5876_s1 + $0x20] sm:$0xf] }
 0x227   :  { %v4047_v26 = vpop.eup %4046 }
 0x228   :  { %v948_v30 = vadd.f32 1.0, %v4047_v26  ;;  %v3333_v26 = vld [vmem:[%s5876_s1 + $0xc8] sm:$0xf] }
 0x229   :  { %v4049_v32 = vpop.eup %4048 }
 0x22a   :  { %v4051_v33 = vpop.eup %4050  ;;  %4052 = vrcp.f32 %v948_v30  ;;  %v970_v34 = vadd.f32 1.0, %v4049_v32  ;;  %v960_v42 = vand.u32 2147483648, %v948_v30  ;;  %v958_v46 = vand.u32 2147483647, %v948_v30 }
 0x22b   :  { %v994_v35 = vadd.f32 1.0, %v4051_v33  ;;  %vm954_vm15 = vweird.f32 %v948_v30  ;;  %v3334_v32 = vor.u32 %v3910_v27, %v3333_v26  ;;  %v3908_v33 = vld [vmem:[%s5876_s1 + $0xcc] sm:$0xf]  ;;  %v3271_v27 = vld [vmem:[%s5876_s1 + $0x58] sm:$0xf0] }
 0x22c   :  { %4054 = vrcp.f32 %v970_v34  ;;  %v982_v47 = vand.u32 2147483648, %v970_v34  ;;  %v980_v50 = vand.u32 2147483647, %v970_v34  ;;  %v961_v51 = vor.u32 1.1754944e-38, %v960_v42  ;;  %v3906_v42 = vld [vmem:[%s5876_s1 + $0xb4] sm:$0xf0] }
 0x22d   :  { %4056 = vrcp.f32 %v994_v35  ;;  %vm959_vm5 = vcmp.eq.f32.partialorder %v958_v46, 8.507059e+37  ;;  %vm976_vm6 = vweird.f32 %v970_v34  ;;  %v1006_v2 = vand.u32 2147483648, %v994_v35  ;;  %1568 = vmatpush.bf16.msra.mxu2 %v3334_v32  ;;  %v3319_v46 = vld [vmem:[%s5876_s1 + $0xb8] sm:$0xf0]  ;;  %v3892_v26 = vld [vmem:[%s5876_s1 + $0x4c] sm:$0xf] }
 0x22e   :  { %4058 = vtanh.f32 %v986_v58  ;;  %v983_v56 = vor.u32 1.1754944e-38, %v982_v47  ;;  %vm981_vm8 = vcmp.eq.f32.partialorder %v980_v50, 8.507059e+37  ;;  %vm1000_vm10 = vweird.f32 %v994_v35  ;;  %v3903_v58 = vld [vmem:[%s5876_s1 + $0xa4] sm:$0xf]  ;;  %v3293_v47 = vld [vmem:[%s5876_s1 + $0x80] sm:$0xf] }
 0x22f   :  { %v1004_v3 = vand.u32 2147483647, %v994_v35  ;;  %v1007_v5 = vor.u32 1.1754944e-38, %v1006_v2  ;;  %v3899_v50 = vld [vmem:[%s5876_s1 + $0x84] sm:$0xf] }
 0x230   :  { %v4053_v36 = vpop.eup %4052  ;;  %v3889_v32 = vld [vmem:[%s5876_s1 + $0x2c] sm:$0xf0] }
 0x231   :  { %v950_v37 = vmul.f32 %v4053_v36, %v948_v30  ;;  %vm955_vm14 = vweird.f32 %v4053_v36  ;;  %vm1005_vm12 = vcmp.eq.f32.partialorder %v1004_v3, 8.507059e+37 }
 0x232   :  { %v4055_v38 = vpop.eup %4054  ;;  %vm956_vm4 = vmor %vm954_vm15, %vm955_vm14 }
 0x233   :  { %v4057_v39 = vpop.eup %4056  ;;  %v951_v40 = vsub.f32 1.0, %v950_v37  ;;  %v972_v41 = vmul.f32 %v4055_v38, %v970_v34  ;;  %vm977_vm3 = vweird.f32 %v4055_v38  ;;  %v3335_v34 = vld [vmem:[%s5876_s1 + $0xd8] sm:$0xf0]  ;;  %v3309_v37 = vld [vmem:[%s5876_s1 + $0xa0] sm:$0xf] }
 0x234   :  { %v996_v43 = vmul.f32 %v4057_v39, %v994_v35  ;;  %vm978_vm7 = vmor %vm976_vm6, %vm977_vm3  ;;  %v4059_v59 = vpop.eup %4058  ;;  %vm1001_vm9 = vweird.f32 %v4057_v39 }
 0x235   :  { %v973_v44 = vsub.f32 1.0, %v972_v41  ;;  %v952_v45 = vmul.f32 %v4053_v36, %v951_v40  ;;  %vm1002_vm11 = vmor %vm1000_vm10, %vm1001_vm9  ;;  %v3311_v40 = vld [vmem:[%s5876_s1 + $0xb0] sm:$0xf0]  ;;  %v3317_v41 = vld [vmem:[%s5876_s1 + $0xa8] sm:$0xf] }
 0x236   :  { %v997_v52 = vsub.f32 1.0, %v996_v43  ;;  %v3314_v43 = vor.u32 %v3903_v58, %v3311_v40  ;;  %v3247_v40 = vld [vmem:[%s5876_s1 + $0x30] sm:$0xf0] }
 0x237   :  { %v953_v48 = vadd.f32 %v4053_v36, %v952_v45  ;;  %v974_v49 = vmul.f32 %v4055_v38, %v973_v44  ;;  %v3318_v44 = vor.u32 %v3906_v42, %v3317_v41  ;;  %v3904_v45 = vld [vmem:[%s5876_s1 + $0xac] sm:$0xf]  ;;  %v3253_v41 = vld [vmem:[%s5876_s1 + $0x28] sm:$0xf]  ;;  %v3890_v42 = vld [vmem:[%s5876_s1 + $0x34] sm:$0xf0] }
 0x238   :  { %v998_v61 = vmul.f32 %v4057_v39, %v997_v52  ;;  %1556 = vmatpush.bf16.msra.mxu1 %v3314_v43 }
 0x239   :  { %v957_v53 = vsel %vm956_vm4, %v4053_v36, %v953_v48  ;;  %v975_v54 = vadd.f32 %v4055_v38, %v974_v49  ;;  %v3338_v36 = vor.u32 %v3908_v33, %v3335_v34  ;;  %v3322_v48 = vor.u32 %v3904_v45, %v3319_v46  ;;  %v3901_v49 = vld [vmem:[%s5876_s1 + $0x8c] sm:$0xf0]  ;;  %1569 = vmatpush.bf16.msra.mxu2 %v3318_v44  ;;  %v3888_v45 = vld [vmem:[%s5876_s1 + $0x2c] sm:$0xf] }
 0x23a   :  { %v962_v55 = vsel %vm959_vm5, %v961_v51, %v957_v53  ;;  %v999_v1 = vadd.f32 %v4057_v39, %v998_v61  ;;  %v3295_v51 = vld [vmem:[%s5876_s1 + $0x90] sm:$0xf0]  ;;  %v3294_v52 = vor.u32 %v3901_v49, %v3293_v47  ;;  %v3246_v46 = vor.u32 %v3889_v32, %v3245_v31  ;;  %v3255_v47 = vld [vmem:[%s5876_s1 + $0x38] sm:$0xf0] }
 0x23b   :  { %v979_v57 = vsel %vm978_vm7, %v4055_v38, %v975_v54  ;;  %v1011_v63 = vmul.f32 %v4059_v59, %v962_v55  ;;  %v3905_v38 = vld [vmem:[%s5876_s1 + $0xac] sm:$0xf0]  ;;  %1581 = vmatpush.bf16.msra.mxu3 %v3338_v36  ;;  %v3298_v53 = vor.u32 %v3899_v50, %v3295_v51  ;;  %v3301_v54 = vld [vmem:[%s5876_s1 + $0x88] sm:$0xf]  ;;  %v3902_v55 = vld [vmem:[%s5876_s1 + $0x94] sm:$0xf0]  ;;  %v3270_v36 = vor.u32 %v3894_v25, %v3269_v23 }
 0x23c   :  { %v984_v60 = vsel %vm981_vm8, %v983_v56, %v979_v57  ;;  %v1003_v4 = vsel %vm1002_vm11, %v4057_v39, %v999_v1  ;;  %v3310_v39 = vor.u32 %v3905_v38, %v3309_v37  ;;  %v3900_v56 = vld [vmem:[%s5876_s1 + $0x8c] sm:$0xf]  ;;  %v3302_v61 = vor.u32 %v3902_v55, %v3301_v54  ;;  %v3897_v1 = vld [vmem:[%s5876_s1 + $0x6c] sm:$0xf0]  ;;  %v3887_v37 = vld [vmem:[%s5876_s1 + $0x24] sm:$0xf] }
 0x23d   :  { %v1010_v62 = vmul.f32 %v984_v60, %v4816_v29  ;;  %v1008_v7 = vsel %vm1005_vm12, %v1007_v5, %v1003_v4  ;;  %v3341_v29 = vld [vmem:[%s5876_s1 + $0xe0] sm:$0xf]  ;;  %v3223_v60 = vld [vmem:[%s5875_s0 + $0x18] sm:$0xff]  ;;  %1557 = vmatpush.bf16.msra.mxu1 %v3298_v53  ;;  %v3254_v49 = vor.u32 %v3890_v42, %v3253_v41  ;;  %v3885_v51 = vld [vmem:[%s5876_s1 + $0xc] sm:$0xf0]  ;;  %v3258_v53 = vor.u32 %v3888_v45, %v3255_v47 }
 0x23e   :  { %v3342_v12 = vor.u32 %v3913_v10, %v3341_v29  ;;  %v3285_v10 = vld [vmem:[%s5876_s1 + $0x68] sm:$0xf]  ;;  %1570 = vmatpush.bf16.msra.mxu2 %v3302_v61  ;;  %v3229_v50 = vld [vmem:[%s5876_s1] sm:$0xf]  ;;  %v3231_v54 = vld [vmem:[%s5876_s1 + $0x10] sm:$0xf0] }
 0x23f   :  { %v5024_v0 = vadd.f32 %v1011_v63, %v1010_v62  ;;  %1582 = vmatpush.bf16.msra.mxu3 %v3322_v48  ;;  %v3303_v62 = vld [vmem:[%s5876_s1 + $0x98] sm:$0xf0]  ;;  %v3277_v63 = vld [vmem:[%s5876_s1 + $0x60] sm:$0xf]  ;;  %v3286_v15 = vor.u32 %v3898_v11, %v3285_v10  ;;  %v3250_v48 = vor.u32 %v3887_v37, %v3247_v40  ;;  %v3237_v55 = vld [vmem:[%s5876_s1 + $0x8] sm:$0xf] }
 0x240   :  { %1541 = vmatpush.bf16.msra.mxu0 %v3342_v12  ;;  %v3278_v29 = vor.u32 %v3897_v1, %v3277_v63  ;;  %v3896_v12 = vld [vmem:[%s5876_s1 + $0x6c] sm:$0xf]  ;;  %v3943_v45 = vld [vmem:[%s5876_s1 + $0xe4] sm:$0xf]  ;;  %v3475_v47 = vld [vmem:[%s5876_s1 + $0xf0] sm:$0xf0] }
 0x241   :  { %4060 = vtanh.f32 %v5024_v0  ;;  %v3290_v20 = vor.u32 %v3896_v12, %v3287_v16 }
 0x242   :  { %1571 = vmatpush.bf16.msra.mxu2 %v3286_v15 }
 0x244   :  { %1542 = vmatpush.bf16.msra.mxu0 %v3326_v24 }
 0x246   :  { %1572 = vmatpush.bf16.msra.mxu2 %v3270_v36 }
 0x247   :  { %v4061_v6 = vpop.eup %4060 }
 0x248   :  { %v1014_v8 = vmul.f32 %v4061_v6, %v1008_v7  ;;  %1543 = vmatpush.bf16.msra.mxu0 %v3310_v39  ;;  %v3306_v6 = vor.u32 %v3900_v56, %v3303_v62  ;;  %v3895_v7 = vld [vmem:[%s5876_s1 + $0x64] sm:$0xf]  ;;  %v3274_v39 = vor.u32 %v3892_v26, %v3271_v27  ;;  %v3886_v56 = vld [vmem:[%s5876_s1 + $0x14] sm:$0xf0] }
 0x249   :  { %v3238_v63 = vor.u32 %v3886_v56, %v3237_v55  ;;  %v3457_v55 = vld [vmem:[%s5876_s1 + $0xc0] sm:$0xf]  ;;  %v3941_v56 = vld [vmem:[%s5876_s1 + $0xcc] sm:$0xf0] }
 0x24a   :  { %1016 = vst [vmem:[#allocation2 + $0x4] sm:$0x3] %v1014_v8  ;;  %v1017_v9 = vpack.c.bf16 %v1014_v8, %v1014_v8  ;;  %v3279_v8 = vld [vmem:[%s5876_s1 + $0x70] sm:$0xf0]  ;;  %1583 = vmatpush.bf16.msra.mxu3 %v3306_v6  ;;  %1573 = vmatpush.bf16.msra.mxu2 %v3254_v49  ;;  %v3946_v49 = vld [vmem:[%s5876_s1 + $0xf4] sm:$0xf0] }
 0x24b   :  { %v3282_v14 = vor.u32 %v3895_v7, %v3279_v8 }
 0x24c   :  { %1218 = vmatmul.bf16.vlgmr.msrb.gmra.mxu0 %v1017_v9  ;;  %1231 = vmatmul.bf16.vlgmr.msrb.gmra.mxu1 %v1017_v9 }
 0x24d   :  { %1244 = vmatmul.bf16.vlgmr.msrb.gmra.mxu2 %v1017_v9  ;;  %1257 = vmatmul.bf16.vlgmr.msrb.gmra.mxu3 %v1017_v9 }
 0x24e   :  { %1544 = vmatpush.bf16.msra.mxu0 %v3294_v52  ;;  %1558 = vmatpush.bf16.msra.mxu1 %v3282_v14  ;;  %v3883_v52 = vld [vmem:[%s5876_s1 + $0x4] sm:$0xf] }
 0x24f   :  { %1584 = vmatpush.bf16.msra.mxu3 %v3290_v20  ;;  %v3234_v62 = vor.u32 %v3883_v52, %v3231_v54  ;;  %1574 = vmatpush.bf16.msra.mxu2 %v3238_v63  ;;  %v3944_v52 = vld [vmem:[%s5876_s1 + $0xec] sm:$0xf] }
 0x252   :  { %1545 = vmatpush.bf16.msra.mxu0 %v3278_v29 }
 0x253   :  { %1585 = vmatpush.bf16.msra.mxu3 %v3274_v39 }
 0x257   :  { %1586 = vmatpush.bf16.msra.mxu3 %v3258_v53  ;;  %v3483_v53 = vld [vmem:[%s5876_s1 + $0xf8] sm:$0xf0] }
 0x258   :  { %v3486_v54 = vor.u32 %v3944_v52, %v3483_v53  ;;  %v3925_v52 = vld [vmem:[%s5876_s1 + $0x4c] sm:$0xf0] }
 0x2c9   :  { %v1219_v28 = vpop.f32.mrf.mxu0  ;;  %v1232_v30 = vpop.f32.mrf.mxu1 }
 0x2ca   :  { %v1268_v35 = vrot.slane %v1232_v30, 6  ;;  %v3266_v30 = vor.u32 %v3891_v21, %v3263_v22 }
 0x2cc   :  { %v1271_v9 = vsel %vm276_vm0, %v1219_v28, %v1268_v35  ;;  %v3262_v28 = vor.u32 %v3893_v18, %v3261_v17  ;;  %1559 = vmatpush.bf16.msra.mxu1 %v3266_v30 }
 0x2ce   :  { %1546 = vmatpush.bf16.msra.mxu0 %v3262_v28 }
 0x2d0   :  { %v1245_v57 = vpop.f32.mrf.mxu2  ;;  %v1258_v59 = vpop.f32.mrf.mxu3  ;;  %1560 = vmatpush.bf16.msra.mxu1 %v3250_v48  ;;  %v3481_v48 = vld [vmem:[%s5876_s1 + $0xe8] sm:$0xf] }
 0x2d1   :  { %v1269_v2 = vrot.slane %v1245_v57, 4  ;;  %v1270_v3 = vrot.slane %v1258_v59, 2  ;;  %v1221_v4 = vpop.f32.mrf.mxu0  ;;  %v1234_v5 = vpop.f32.mrf.mxu1  ;;  %v3884_v57 = vld [vmem:[%s5876_s1 + $0xc] sm:$0xf]  ;;  %v3239_v59 = vld [vmem:[%s5876_s1 + $0x18] sm:$0xf0] }
 0x2d2   :  { %1547 = vmatpush.bf16.msra.mxu0 %v3246_v46 }
 0x2d3   :  { %v1272_v13 = vsel %vm278_vm1, %v1269_v2, %v1270_v3  ;;  %v3242_v2 = vor.u32 %v3884_v57, %v3239_v59  ;;  %v3939_v57 = vld [vmem:[%s5876_s1 + $0xc4] sm:$0xf]  ;;  %v3458_v59 = vor.u32 %v3941_v56, %v3457_v55  ;;  %v3395_v56 = vld [vmem:[%s5876_s1 + $0x50] sm:$0xf0] }
 0x2d4   :  { %v1273_v19 = vsel %vm280_vm2, %v1271_v9, %v1272_v13  ;;  %1561 = vmatpush.bf16.msra.mxu1 %v3234_v62  ;;  %v3942_v62 = vld [vmem:[%s5876_s1 + $0xd4] sm:$0xf0]  ;;  %v3923_v55 = vld [vmem:[%s5876_s1 + $0x44] sm:$0xf] }
 0x2d5   :  { %v5168_v24 = vadd.f32 %v3223_v60, %v1273_v19  ;;  %v3230_v60 = vor.u32 %v3885_v51, %v3229_v50  ;;  %1587 = vmatpush.bf16.msra.mxu3 %v3242_v2  ;;  %v3478_v50 = vor.u32 %v3943_v45, %v3475_v47  ;;  %v3482_v51 = vor.u32 %v3946_v49, %v3481_v48  ;;  %v3930_v45 = vld [vmem:[%s5876_s1 + $0x74] sm:$0xf0] }
 0x2d7   :  { %v3224_v33 = vmul.f32 -1.442695, %v5168_v24  ;;  %v1296_v34 = vrot.slane %v5168_v24, 2  ;;  %v1320_v35 = vrot.slane %v5168_v24, 6  ;;  %1548 = vmatpush.bf16.msra.mxu0 %v3230_v60  ;;  %v1317_v29 = vrot.slane %v5168_v24, 4  ;;  %1898 = vmatpush.bf16.msrb.mxu2 %v3482_v51 }
 0x2d8   :  { %v1247_v38 = vpop.f32.mrf.mxu2  ;;  %v1260_v58 = vpop.f32.mrf.mxu3  ;;  %1885 = vmatpush.bf16.msrb.mxu1 %v3478_v50  ;;  %v3459_v60 = vld [vmem:[%s5876_s1 + $0xd0] sm:$0xf0]  ;;  %v3419_v50 = vld [vmem:[%s5876_s1 + $0x78] sm:$0xf0]  ;;  %v3393_v51 = vld [vmem:[%s5876_s1 + $0x40] sm:$0xf] }
 0x2d9   :  { %4062 = vpow2.f32 %v3224_v33  ;;  %v3225_v43 = vmul.f32 -1.442695, %v1296_v34  ;;  %v3226_v44 = vmul.f32 -1.442695, %v1320_v35  ;;  %1911 = vmatpush.bf16.msrb.mxu3 %v3486_v54  ;;  %v3462_v2 = vor.u32 %v3939_v57, %v3459_v60  ;;  %v3401_v57 = vld [vmem:[%s5876_s1 + $0x48] sm:$0xf] }
 0x2da   :  { %v3926_v60 = vld [vmem:[%s5876_s1 + $0x54] sm:$0xf0] }
 0x2db   :  { %4064 = vpow2.f32 %v3225_v43 }
 0x2dc   :  { %4066 = vpow2.f32 %v3226_v44  ;;  %v3945_v44 = vld [vmem:[%s5876_s1 + $0xec] sm:$0xf0]  ;;  %1886 = vmatpush.bf16.msrb.mxu1 %v3462_v2  ;;  %v3377_v2 = vld [vmem:[%s5876_s1 + $0x20] sm:$0xf] }
 0x2df   :  { %v4063_v61 = vpop.eup %4062 }
 0x2e0   :  { %v1279_v1 = vadd.f32 1.0, %v4063_v61  ;;  %v3465_v61 = vld [vmem:[%s5876_s1 + $0xc8] sm:$0xf] }
 0x2e1   :  { %v4065_v3 = vpop.eup %4064 }
 0x2e2   :  { %v4067_v4 = vpop.eup %4066  ;;  %4068 = vrcp.f32 %v1279_v1  ;;  %v1301_v5 = vadd.f32 1.0, %v4065_v3  ;;  %v1291_v13 = vand.u32 2147483648, %v1279_v1  ;;  %v1289_v17 = vand.u32 2147483647, %v1279_v1 }
 0x2e3   :  { %v1325_v6 = vadd.f32 1.0, %v4067_v4  ;;  %vm1285_vm14 = vweird.f32 %v1279_v1  ;;  %v3466_v3 = vor.u32 %v3942_v62, %v3465_v61  ;;  %v3940_v4 = vld [vmem:[%s5876_s1 + $0xcc] sm:$0xf]  ;;  %v3403_v62 = vld [vmem:[%s5876_s1 + $0x58] sm:$0xf0] }
 0x2e4   :  { %4070 = vrcp.f32 %v1301_v5  ;;  %v1313_v18 = vand.u32 2147483648, %v1301_v5  ;;  %v1311_v21 = vand.u32 2147483647, %v1301_v5  ;;  %v1292_v22 = vor.u32 1.1754944e-38, %v1291_v13  ;;  %v3938_v13 = vld [vmem:[%s5876_s1 + $0xb4] sm:$0xf0] }
 0x2e5   :  { %4072 = vrcp.f32 %v1325_v6  ;;  %vm1290_vm4 = vcmp.eq.f32.partialorder %v1289_v17, 8.507059e+37  ;;  %vm1307_vm5 = vweird.f32 %v1301_v5  ;;  %v1337_v37 = vand.u32 2147483648, %v1325_v6  ;;  %1899 = vmatpush.bf16.msrb.mxu2 %v3466_v3  ;;  %v3451_v17 = vld [vmem:[%s5876_s1 + $0xb8] sm:$0xf0]  ;;  %v3924_v61 = vld [vmem:[%s5876_s1 + $0x4c] sm:$0xf] }
 0x2e6   :  { %4074 = vtanh.f32 %v1317_v29  ;;  %v1314_v27 = vor.u32 1.1754944e-38, %v1313_v18  ;;  %vm1312_vm7 = vcmp.eq.f32.partialorder %v1311_v21, 8.507059e+37  ;;  %vm1331_vm9 = vweird.f32 %v1325_v6  ;;  %v3935_v29 = vld [vmem:[%s5876_s1 + $0xa4] sm:$0xf]  ;;  %v3425_v18 = vld [vmem:[%s5876_s1 + $0x80] sm:$0xf] }
 0x2e7   :  { %v1335_v38 = vand.u32 2147483647, %v1325_v6  ;;  %v1338_v39 = vor.u32 1.1754944e-38, %v1337_v37  ;;  %v3931_v21 = vld [vmem:[%s5876_s1 + $0x84] sm:$0xf] }
 0x2e8   :  { %v4069_v7 = vpop.eup %4068  ;;  %v3921_v3 = vld [vmem:[%s5876_s1 + $0x2c] sm:$0xf0] }
 0x2e9   :  { %v1281_v8 = vmul.f32 %v4069_v7, %v1279_v1  ;;  %vm1286_vm13 = vweird.f32 %v4069_v7  ;;  %vm1336_vm11 = vcmp.eq.f32.partialorder %v1335_v38, 8.507059e+37 }
 0x2ea   :  { %v4071_v9 = vpop.eup %4070  ;;  %vm1287_vm3 = vmor %vm1285_vm14, %vm1286_vm13 }
 0x2eb   :  { %v4073_v10 = vpop.eup %4072  ;;  %v1282_v11 = vsub.f32 1.0, %v1281_v8  ;;  %v1303_v12 = vmul.f32 %v4071_v9, %v1301_v5  ;;  %vm1308_vm15 = vweird.f32 %v4071_v9  ;;  %v3467_v5 = vld [vmem:[%s5876_s1 + $0xd8] sm:$0xf0]  ;;  %v3441_v8 = vld [vmem:[%s5876_s1 + $0xa0] sm:$0xf] }
 0x2ec   :  { %v1327_v14 = vmul.f32 %v4073_v10, %v1325_v6  ;;  %vm1309_vm6 = vmor %vm1307_vm5, %vm1308_vm15  ;;  %v4075_v30 = vpop.eup %4074  ;;  %vm1332_vm8 = vweird.f32 %v4073_v10 }
 0x2ed   :  { %v1304_v15 = vsub.f32 1.0, %v1303_v12  ;;  %v1283_v16 = vmul.f32 %v4069_v7, %v1282_v11  ;;  %vm1333_vm10 = vmor %vm1331_vm9, %vm1332_vm8  ;;  %v3443_v11 = vld [vmem:[%s5876_s1 + $0xb0] sm:$0xf0]  ;;  %v3449_v12 = vld [vmem:[%s5876_s1 + $0xa8] sm:$0xf] }
 0x2ee   :  { %v1328_v23 = vsub.f32 1.0, %v1327_v14  ;;  %v3446_v14 = vor.u32 %v3935_v29, %v3443_v11  ;;  %v3379_v11 = vld [vmem:[%s5876_s1 + $0x30] sm:$0xf0] }
 0x2ef   :  { %v1284_v19 = vadd.f32 %v4069_v7, %v1283_v16  ;;  %v1305_v20 = vmul.f32 %v4071_v9, %v1304_v15  ;;  %v3450_v15 = vor.u32 %v3938_v13, %v3449_v12  ;;  %v3936_v16 = vld [vmem:[%s5876_s1 + $0xac] sm:$0xf]  ;;  %v3385_v12 = vld [vmem:[%s5876_s1 + $0x28] sm:$0xf]  ;;  %v3922_v13 = vld [vmem:[%s5876_s1 + $0x34] sm:$0xf0] }
 0x2f0   :  { %v1329_v32 = vmul.f32 %v4073_v10, %v1328_v23  ;;  %1887 = vmatpush.bf16.msrb.mxu1 %v3446_v14 }
 0x2f1   :  { %v1288_v24 = vsel %vm1287_vm3, %v4069_v7, %v1284_v19  ;;  %v1306_v25 = vadd.f32 %v4071_v9, %v1305_v20  ;;  %v3470_v7 = vor.u32 %v3940_v4, %v3467_v5  ;;  %v3454_v19 = vor.u32 %v3936_v16, %v3451_v17  ;;  %v3933_v20 = vld [vmem:[%s5876_s1 + $0x8c] sm:$0xf0]  ;;  %1900 = vmatpush.bf16.msrb.mxu2 %v3450_v15  ;;  %v3920_v16 = vld [vmem:[%s5876_s1 + $0x2c] sm:$0xf] }
 0x2f2   :  { %v1293_v26 = vsel %vm1290_vm4, %v1292_v22, %v1288_v24  ;;  %v1330_v36 = vadd.f32 %v4073_v10, %v1329_v32  ;;  %v3427_v22 = vld [vmem:[%s5876_s1 + $0x90] sm:$0xf0]  ;;  %v3426_v23 = vor.u32 %v3933_v20, %v3425_v18  ;;  %v3378_v17 = vor.u32 %v3921_v3, %v3377_v2  ;;  %v3387_v18 = vld [vmem:[%s5876_s1 + $0x38] sm:$0xf0] }
 0x2f3   :  { %v1310_v28 = vsel %vm1309_vm6, %v4071_v9, %v1306_v25  ;;  %v1342_v34 = vmul.f32 %v4075_v30, %v1293_v26  ;;  %v3937_v9 = vld [vmem:[%s5876_s1 + $0xac] sm:$0xf0]  ;;  %1912 = vmatpush.bf16.msrb.mxu3 %v3470_v7  ;;  %v3430_v24 = vor.u32 %v3931_v21, %v3427_v22  ;;  %v3433_v25 = vld [vmem:[%s5876_s1 + $0x88] sm:$0xf]  ;;  %v3934_v26 = vld [vmem:[%s5876_s1 + $0x94] sm:$0xf0]  ;;  %v3402_v7 = vor.u32 %v3926_v60, %v3401_v57 }
 0x2f4   :  { %v1315_v31 = vsel %vm1312_vm7, %v1314_v27, %v1310_v28  ;;  %v1334_v58 = vsel %vm1333_vm10, %v4073_v10, %v1330_v36  ;;  %v3442_v10 = vor.u32 %v3937_v9, %v3441_v8  ;;  %v3932_v27 = vld [vmem:[%s5876_s1 + $0x8c] sm:$0xf]  ;;  %v3434_v32 = vor.u32 %v3934_v26, %v3433_v25  ;;  %v3929_v36 = vld [vmem:[%s5876_s1 + $0x6c] sm:$0xf0]  ;;  %v3919_v8 = vld [vmem:[%s5876_s1 + $0x24] sm:$0xf] }
 0x2f5   :  { %v1341_v33 = vmul.f32 %v1315_v31, %v5024_v0  ;;  %v1339_v41 = vsel %vm1336_vm11, %v1338_v39, %v1334_v58  ;;  %v3473_v0 = vld [vmem:[%s5876_s1 + $0xe0] sm:$0xf]  ;;  %1888 = vmatpush.bf16.msrb.mxu1 %v3430_v24  ;;  %v3386_v20 = vor.u32 %v3922_v13, %v3385_v12  ;;  %v3917_v22 = vld [vmem:[%s5876_s1 + $0xc] sm:$0xf0]  ;;  %v3390_v24 = vor.u32 %v3920_v16, %v3387_v18  ;;  %v3363_v25 = vld [vmem:[%s5876_s1 + $0x10] sm:$0xf0] }
 0x2f6   :  { %v3474_v46 = vor.u32 %v3945_v44, %v3473_v0  ;;  %v3355_v31 = vld [vmem:[%s5875_s0 + $0x20] sm:$0xff]  ;;  %v3417_v44 = vld [vmem:[%s5876_s1 + $0x68] sm:$0xf]  ;;  %1901 = vmatpush.bf16.msrb.mxu2 %v3434_v32  ;;  %v3607_v18 = vld [vmem:[%s5876_s1 + $0xf0] sm:$0xf0] }
 0x2f7   :  { %v5232_v35 = vadd.f32 %v1342_v34, %v1341_v33  ;;  %1913 = vmatpush.bf16.msrb.mxu3 %v3454_v19  ;;  %v3435_v33 = vld [vmem:[%s5876_s1 + $0x98] sm:$0xf0]  ;;  %v3409_v34 = vld [vmem:[%s5876_s1 + $0x60] sm:$0xf]  ;;  %v3418_v49 = vor.u32 %v3930_v45, %v3417_v44  ;;  %v3382_v19 = vor.u32 %v3919_v8, %v3379_v11  ;;  %v3369_v26 = vld [vmem:[%s5876_s1 + $0x8] sm:$0xf] }
 0x2f8   :  { %1872 = vmatpush.bf16.msrb.mxu0 %v3474_v46  ;;  %v3410_v0 = vor.u32 %v3929_v36, %v3409_v34  ;;  %v3928_v46 = vld [vmem:[%s5876_s1 + $0x6c] sm:$0xf]  ;;  %v3361_v21 = vld [vmem:[%s5876_s1] sm:$0xf]  ;;  %v3975_v16 = vld [vmem:[%s5876_s1 + $0xe4] sm:$0xf] }
 0x2f9   :  { %4076 = vtanh.f32 %v5232_v35  ;;  %v3422_v54 = vor.u32 %v3928_v46, %v3419_v50 }
 0x2fa   :  { %1902 = vmatpush.bf16.msrb.mxu2 %v3418_v49 }
 0x2fc   :  { %1873 = vmatpush.bf16.msrb.mxu0 %v3458_v59 }
 0x2fe   :  { %1903 = vmatpush.bf16.msrb.mxu2 %v3402_v7 }
 0x2ff   :  { %v4077_v40 = vpop.eup %4076 }
 0x300   :  { %v1345_v42 = vmul.f32 %v4077_v40, %v1339_v41  ;;  %1874 = vmatpush.bf16.msrb.mxu0 %v3442_v10  ;;  %v3438_v40 = vor.u32 %v3932_v27, %v3435_v33  ;;  %v3927_v41 = vld [vmem:[%s5876_s1 + $0x64] sm:$0xf]  ;;  %v3406_v10 = vor.u32 %v3924_v61, %v3403_v62  ;;  %v3918_v27 = vld [vmem:[%s5876_s1 + $0x14] sm:$0xf0] }
 0x301   :  { %v3370_v34 = vor.u32 %v3918_v27, %v3369_v26  ;;  %v3589_v26 = vld [vmem:[%s5876_s1 + $0xc0] sm:$0xf]  ;;  %v3973_v27 = vld [vmem:[%s5876_s1 + $0xcc] sm:$0xf0] }
 0x302   :  { %1347 = vst [vmem:[#allocation2 + $0x6] sm:$0x3] %v1345_v42  ;;  %v1348_v43 = vpack.c.bf16 %v1345_v42, %v1345_v42  ;;  %v3411_v42 = vld [vmem:[%s5876_s1 + $0x70] sm:$0xf0]  ;;  %1914 = vmatpush.bf16.msrb.mxu3 %v3438_v40  ;;  %1904 = vmatpush.bf16.msrb.mxu2 %v3386_v20  ;;  %v3978_v20 = vld [vmem:[%s5876_s1 + $0xf4] sm:$0xf0] }
 0x303   :  { %v3414_v48 = vor.u32 %v3927_v41, %v3411_v42 }
 0x304   :  { %1549 = vmatmul.bf16.vlgmr.msra.gmra.mxu0 %v1348_v43  ;;  %1562 = vmatmul.bf16.vlgmr.msra.gmra.mxu1 %v1348_v43 }
 0x305   :  { %1575 = vmatmul.bf16.vlgmr.msra.gmra.mxu2 %v1348_v43  ;;  %1588 = vmatmul.bf16.vlgmr.msra.gmra.mxu3 %v1348_v43 }
 0x306   :  { %1875 = vmatpush.bf16.msrb.mxu0 %v3426_v23  ;;  %1889 = vmatpush.bf16.msrb.mxu1 %v3414_v48  ;;  %v3915_v23 = vld [vmem:[%s5876_s1 + $0x4] sm:$0xf] }
 0x307   :  { %1915 = vmatpush.bf16.msrb.mxu3 %v3422_v54  ;;  %v3366_v33 = vor.u32 %v3915_v23, %v3363_v25  ;;  %1905 = vmatpush.bf16.msrb.mxu2 %v3370_v34  ;;  %v3976_v23 = vld [vmem:[%s5876_s1 + $0xec] sm:$0xf] }
 0x30a   :  { %1876 = vmatpush.bf16.msrb.mxu0 %v3410_v0 }
 0x30b   :  { %1916 = vmatpush.bf16.msrb.mxu3 %v3406_v10 }
 0x30f   :  { %1917 = vmatpush.bf16.msrb.mxu3 %v3390_v24  ;;  %v3615_v24 = vld [vmem:[%s5876_s1 + $0xf8] sm:$0xf0] }
 0x310   :  { %v3618_v25 = vor.u32 %v3976_v23, %v3615_v24  ;;  %v3957_v23 = vld [vmem:[%s5876_s1 + $0x4c] sm:$0xf0] }
 0x381   :  { %v1550_v63 = vpop.f32.mrf.mxu0  ;;  %v1563_v1 = vpop.f32.mrf.mxu1 }
 0x382   :  { %v1599_v6 = vrot.slane %v1563_v1, 6  ;;  %v3398_v1 = vor.u32 %v3923_v55, %v3395_v56 }
 0x384   :  { %v1602_v43 = vsel %vm276_vm0, %v1550_v63, %v1599_v6  ;;  %v3394_v63 = vor.u32 %v3925_v52, %v3393_v51  ;;  %1890 = vmatpush.bf16.msrb.mxu1 %v3398_v1 }
 0x386   :  { %1877 = vmatpush.bf16.msrb.mxu0 %v3394_v63 }
 0x388   :  { %v1576_v28 = vpop.f32.mrf.mxu2  ;;  %v1589_v30 = vpop.f32.mrf.mxu3  ;;  %1891 = vmatpush.bf16.msrb.mxu1 %v3382_v19  ;;  %v3613_v19 = vld [vmem:[%s5876_s1 + $0xe8] sm:$0xf] }
 0x389   :  { %v1600_v37 = vrot.slane %v1576_v28, 4  ;;  %v1601_v38 = vrot.slane %v1589_v30, 2  ;;  %v1552_v58 = vpop.f32.mrf.mxu0  ;;  %v1565_v39 = vpop.f32.mrf.mxu1  ;;  %v3916_v28 = vld [vmem:[%s5876_s1 + $0xc] sm:$0xf]  ;;  %v3371_v30 = vld [vmem:[%s5876_s1 + $0x18] sm:$0xf0] }
 0x38a   :  { %1878 = vmatpush.bf16.msrb.mxu0 %v3378_v17 }
 0x38b   :  { %v1603_v47 = vsel %vm278_vm1, %v1600_v37, %v1601_v38  ;;  %v3374_v37 = vor.u32 %v3916_v28, %v3371_v30  ;;  %v3971_v28 = vld [vmem:[%s5876_s1 + $0xc4] sm:$0xf]  ;;  %v3590_v30 = vor.u32 %v3973_v27, %v3589_v26  ;;  %v3527_v27 = vld [vmem:[%s5876_s1 + $0x50] sm:$0xf0] }
 0x38c   :  { %v1604_v53 = vsel %vm280_vm2, %v1602_v43, %v1603_v47  ;;  %1892 = vmatpush.bf16.msrb.mxu1 %v3366_v33  ;;  %v3974_v33 = vld [vmem:[%s5876_s1 + $0xd4] sm:$0xf0]  ;;  %v3955_v26 = vld [vmem:[%s5876_s1 + $0x44] sm:$0xf] }
 0x38d   :  { %v5376_v59 = vadd.f32 %v3355_v31, %v1604_v53  ;;  %v3362_v31 = vor.u32 %v3917_v22, %v3361_v21  ;;  %1918 = vmatpush.bf16.msrb.mxu3 %v3374_v37  ;;  %v3610_v21 = vor.u32 %v3975_v16, %v3607_v18  ;;  %v3614_v22 = vor.u32 %v3978_v20, %v3613_v19  ;;  %v3962_v16 = vld [vmem:[%s5876_s1 + $0x74] sm:$0xf0] }
 0x38f   :  { %v3356_v4 = vmul.f32 -1.442695, %v5376_v59  ;;  %v1627_v5 = vrot.slane %v5376_v59, 2  ;;  %v1651_v6 = vrot.slane %v5376_v59, 6  ;;  %1879 = vmatpush.bf16.msrb.mxu0 %v3362_v31  ;;  %v1648_v0 = vrot.slane %v5376_v59, 4  ;;  %2229 = vmatpush.bf16.msra.mxu2 %v3614_v22 }
 0x390   :  { %v1578_v9 = vpop.f32.mrf.mxu2  ;;  %v1591_v29 = vpop.f32.mrf.mxu3  ;;  %2216 = vmatpush.bf16.msra.mxu1 %v3610_v21  ;;  %v3591_v31 = vld [vmem:[%s5876_s1 + $0xd0] sm:$0xf0]  ;;  %v3551_v21 = vld [vmem:[%s5876_s1 + $0x78] sm:$0xf0]  ;;  %v3525_v22 = vld [vmem:[%s5876_s1 + $0x40] sm:$0xf] }
 0x391   :  { %4078 = vpow2.f32 %v3356_v4  ;;  %v3357_v14 = vmul.f32 -1.442695, %v1627_v5  ;;  %v3358_v15 = vmul.f32 -1.442695, %v1651_v6  ;;  %2242 = vmatpush.bf16.msra.mxu3 %v3618_v25  ;;  %v3594_v37 = vor.u32 %v3971_v28, %v3591_v31  ;;  %v3533_v28 = vld [vmem:[%s5876_s1 + $0x48] sm:$0xf] }
 0x392   :  { %v3958_v31 = vld [vmem:[%s5876_s1 + $0x54] sm:$0xf0] }
 0x393   :  { %4080 = vpow2.f32 %v3357_v14 }
 0x394   :  { %4082 = vpow2.f32 %v3358_v15  ;;  %v3977_v15 = vld [vmem:[%s5876_s1 + $0xec] sm:$0xf0]  ;;  %2217 = vmatpush.bf16.msra.mxu1 %v3594_v37  ;;  %v3509_v37 = vld [vmem:[%s5876_s1 + $0x20] sm:$0xf] }
 0x397   :  { %v4079_v32 = vpop.eup %4078 }
 0x398   :  { %v1610_v36 = vadd.f32 1.0, %v4079_v32  ;;  %v3597_v32 = vld [vmem:[%s5876_s1 + $0xc8] sm:$0xf] }
 0x399   :  { %v4081_v38 = vpop.eup %4080 }
 0x39a   :  { %v4083_v58 = vpop.eup %4082  ;;  %4084 = vrcp.f32 %v1610_v36  ;;  %v1632_v39 = vadd.f32 1.0, %v4081_v38  ;;  %v1622_v47 = vand.u32 2147483648, %v1610_v36  ;;  %v1620_v51 = vand.u32 2147483647, %v1610_v36 }
 0x39b   :  { %v1656_v40 = vadd.f32 1.0, %v4083_v58  ;;  %vm1616_vm13 = vweird.f32 %v1610_v36  ;;  %v3598_v38 = vor.u32 %v3974_v33, %v3597_v32  ;;  %v3972_v58 = vld [vmem:[%s5876_s1 + $0xcc] sm:$0xf]  ;;  %v3535_v33 = vld [vmem:[%s5876_s1 + $0x58] sm:$0xf0] }
 0x39c   :  { %4086 = vrcp.f32 %v1632_v39  ;;  %v1644_v52 = vand.u32 2147483648, %v1632_v39  ;;  %v1642_v55 = vand.u32 2147483647, %v1632_v39  ;;  %v1623_v56 = vor.u32 1.1754944e-38, %v1622_v47  ;;  %v3970_v47 = vld [vmem:[%s5876_s1 + $0xb4] sm:$0xf0] }
 0x39d   :  { %4088 = vrcp.f32 %v1656_v40  ;;  %vm1621_vm3 = vcmp.eq.f32.partialorder %v1620_v51, 8.507059e+37  ;;  %vm1638_vm4 = vweird.f32 %v1632_v39  ;;  %v1668_v8 = vand.u32 2147483648, %v1656_v40  ;;  %2230 = vmatpush.bf16.msra.mxu2 %v3598_v38  ;;  %v3583_v51 = vld [vmem:[%s5876_s1 + $0xb8] sm:$0xf0]  ;;  %v3956_v32 = vld [vmem:[%s5876_s1 + $0x4c] sm:$0xf] }
 0x39e   :  { %4090 = vtanh.f32 %v1648_v0  ;;  %v1645_v62 = vor.u32 1.1754944e-38, %v1644_v52  ;;  %vm1643_vm6 = vcmp.eq.f32.partialorder %v1642_v55, 8.507059e+37  ;;  %vm1662_vm8 = vweird.f32 %v1656_v40  ;;  %v3967_v0 = vld [vmem:[%s5876_s1 + $0xa4] sm:$0xf]  ;;  %v3557_v52 = vld [vmem:[%s5876_s1 + $0x80] sm:$0xf] }
 0x39f   :  { %v1666_v9 = vand.u32 2147483647, %v1656_v40  ;;  %v1669_v10 = vor.u32 1.1754944e-38, %v1668_v8  ;;  %v3963_v55 = vld [vmem:[%s5876_s1 + $0x84] sm:$0xf] }
 0x3a0   :  { %v4085_v41 = vpop.eup %4084  ;;  %v3953_v38 = vld [vmem:[%s5876_s1 + $0x2c] sm:$0xf0] }
 0x3a1   :  { %v1612_v42 = vmul.f32 %v4085_v41, %v1610_v36  ;;  %vm1617_vm12 = vweird.f32 %v4085_v41  ;;  %vm1667_vm10 = vcmp.eq.f32.partialorder %v1666_v9, 8.507059e+37 }
 0x3a2   :  { %v4087_v43 = vpop.eup %4086  ;;  %vm1618_vm15 = vmor %vm1616_vm13, %vm1617_vm12 }
 0x3a3   :  { %v4089_v44 = vpop.eup %4088  ;;  %v1613_v45 = vsub.f32 1.0, %v1612_v42  ;;  %v1634_v46 = vmul.f32 %v4087_v43, %v1632_v39  ;;  %vm1639_vm14 = vweird.f32 %v4087_v43  ;;  %v3599_v39 = vld [vmem:[%s5876_s1 + $0xd8] sm:$0xf0]  ;;  %v3573_v42 = vld [vmem:[%s5876_s1 + $0xa0] sm:$0xf] }
 0x3a4   :  { %v1658_v48 = vmul.f32 %v4089_v44, %v1656_v40  ;;  %vm1640_vm5 = vmor %vm1638_vm4, %vm1639_vm14  ;;  %v4091_v1 = vpop.eup %4090  ;;  %vm1663_vm7 = vweird.f32 %v4089_v44 }
 0x3a5   :  { %v1635_v49 = vsub.f32 1.0, %v1634_v46  ;;  %v1614_v50 = vmul.f32 %v4085_v41, %v1613_v45  ;;  %vm1664_vm9 = vmor %vm1662_vm8, %vm1663_vm7  ;;  %v3575_v45 = vld [vmem:[%s5876_s1 + $0xb0] sm:$0xf0]  ;;  %v3581_v46 = vld [vmem:[%s5876_s1 + $0xa8] sm:$0xf] }
 0x3a6   :  { %v1659_v57 = vsub.f32 1.0, %v1658_v48  ;;  %v3578_v48 = vor.u32 %v3967_v0, %v3575_v45  ;;  %v3511_v45 = vld [vmem:[%s5876_s1 + $0x30] sm:$0xf0] }
 0x3a7   :  { %v1615_v53 = vadd.f32 %v4085_v41, %v1614_v50  ;;  %v1636_v54 = vmul.f32 %v4087_v43, %v1635_v49  ;;  %v3582_v49 = vor.u32 %v3970_v47, %v3581_v46  ;;  %v3968_v50 = vld [vmem:[%s5876_s1 + $0xac] sm:$0xf]  ;;  %v3517_v46 = vld [vmem:[%s5876_s1 + $0x28] sm:$0xf]  ;;  %v3954_v47 = vld [vmem:[%s5876_s1 + $0x34] sm:$0xf0] }
 0x3a8   :  { %v1660_v3 = vmul.f32 %v4089_v44, %v1659_v57  ;;  %2218 = vmatpush.bf16.msra.mxu1 %v3578_v48 }
 0x3a9   :  { %v1619_v59 = vsel %vm1618_vm15, %v4085_v41, %v1615_v53  ;;  %v1637_v60 = vadd.f32 %v4087_v43, %v1636_v54  ;;  %v3602_v41 = vor.u32 %v3972_v58, %v3599_v39  ;;  %v3586_v53 = vor.u32 %v3968_v50, %v3583_v51  ;;  %v3965_v54 = vld [vmem:[%s5876_s1 + $0x8c] sm:$0xf0]  ;;  %2231 = vmatpush.bf16.msra.mxu2 %v3582_v49  ;;  %v3952_v50 = vld [vmem:[%s5876_s1 + $0x2c] sm:$0xf] }
 0x3aa   :  { %v1624_v61 = vsel %vm1621_vm3, %v1623_v56, %v1619_v59  ;;  %v1661_v7 = vadd.f32 %v4089_v44, %v1660_v3  ;;  %v3559_v56 = vld [vmem:[%s5876_s1 + $0x90] sm:$0xf0]  ;;  %v3558_v57 = vor.u32 %v3965_v54, %v3557_v52  ;;  %v3510_v51 = vor.u32 %v3953_v38, %v3509_v37  ;;  %v3519_v52 = vld [vmem:[%s5876_s1 + $0x38] sm:$0xf0] }
 0x3ab   :  { %v1641_v63 = vsel %vm1640_vm5, %v4087_v43, %v1637_v60  ;;  %v1673_v5 = vmul.f32 %v4091_v1, %v1624_v61  ;;  %v3969_v43 = vld [vmem:[%s5876_s1 + $0xac] sm:$0xf0]  ;;  %2243 = vmatpush.bf16.msra.mxu3 %v3602_v41  ;;  %v3562_v59 = vor.u32 %v3963_v55, %v3559_v56  ;;  %v3565_v60 = vld [vmem:[%s5876_s1 + $0x88] sm:$0xf]  ;;  %v3966_v61 = vld [vmem:[%s5876_s1 + $0x94] sm:$0xf0]  ;;  %v3534_v41 = vor.u32 %v3958_v31, %v3533_v28 }
 0x3ac   :  { %v1646_v2 = vsel %vm1643_vm6, %v1645_v62, %v1641_v63  ;;  %v1665_v29 = vsel %vm1664_vm9, %v4089_v44, %v1661_v7  ;;  %v3574_v44 = vor.u32 %v3969_v43, %v3573_v42  ;;  %v3964_v62 = vld [vmem:[%s5876_s1 + $0x8c] sm:$0xf]  ;;  %v3566_v3 = vor.u32 %v3966_v61, %v3565_v60  ;;  %v3961_v7 = vld [vmem:[%s5876_s1 + $0x6c] sm:$0xf0]  ;;  %v3951_v42 = vld [vmem:[%s5876_s1 + $0x24] sm:$0xf] }
 0x3ad   :  { %v1672_v4 = vmul.f32 %v1646_v2, %v5232_v35  ;;  %v1670_v12 = vsel %vm1667_vm10, %v1669_v10, %v1665_v29  ;;  %v3605_v35 = vld [vmem:[%s5876_s1 + $0xe0] sm:$0xf]  ;;  %v3487_v2 = vld [vmem:[%s5875_s0 + $0x28] sm:$0xff]  ;;  %2219 = vmatpush.bf16.msra.mxu1 %v3562_v59  ;;  %v3518_v54 = vor.u32 %v3954_v47, %v3517_v46  ;;  %v3949_v56 = vld [vmem:[%s5876_s1 + $0xc] sm:$0xf0]  ;;  %v3522_v59 = vor.u32 %v3952_v50, %v3519_v52 }
 0x3ae   :  { %v3606_v17 = vor.u32 %v3977_v15, %v3605_v35  ;;  %v3549_v15 = vld [vmem:[%s5876_s1 + $0x68] sm:$0xf]  ;;  %2232 = vmatpush.bf16.msra.mxu2 %v3566_v3  ;;  %v3493_v55 = vld [vmem:[%s5876_s1] sm:$0xf]  ;;  %v3495_v60 = vld [vmem:[%s5876_s1 + $0x10] sm:$0xf0] }
 0x3af   :  { %v5440_v6 = vadd.f32 %v1673_v5, %v1672_v4  ;;  %2244 = vmatpush.bf16.msra.mxu3 %v3586_v53  ;;  %v3567_v4 = vld [vmem:[%s5876_s1 + $0x98] sm:$0xf0]  ;;  %v3541_v5 = vld [vmem:[%s5876_s1 + $0x60] sm:$0xf]  ;;  %v3550_v20 = vor.u32 %v3962_v16, %v3549_v15  ;;  %v3514_v53 = vor.u32 %v3951_v42, %v3511_v45  ;;  %v3501_v61 = vld [vmem:[%s5876_s1 + $0x8] sm:$0xf] }
 0x3b0   :  { %2203 = vmatpush.bf16.msra.mxu0 %v3606_v17  ;;  %v3542_v35 = vor.u32 %v3961_v7, %v3541_v5  ;;  %v3960_v17 = vld [vmem:[%s5876_s1 + $0x6c] sm:$0xf]  ;;  %v4007_v50 = vld [vmem:[%s5876_s1 + $0xe4] sm:$0xf]  ;;  %v3739_v52 = vld [vmem:[%s5876_s1 + $0xf0] sm:$0xf0] }
 0x3b1   :  { %4092 = vtanh.f32 %v5440_v6  ;;  %v3554_v25 = vor.u32 %v3960_v17, %v3551_v21 }
 0x3b2   :  { %2233 = vmatpush.bf16.msra.mxu2 %v3550_v20 }
 0x3b4   :  { %2204 = vmatpush.bf16.msra.mxu0 %v3590_v30 }
 0x3b6   :  { %2234 = vmatpush.bf16.msra.mxu2 %v3534_v41 }
 0x3b7   :  { %v4093_v11 = vpop.eup %4092 }
 0x3b8   :  { %v1676_v13 = vmul.f32 %v4093_v11, %v1670_v12  ;;  %2205 = vmatpush.bf16.msra.mxu0 %v3574_v44  ;;  %v3570_v11 = vor.u32 %v3964_v62, %v3567_v4  ;;  %v3959_v12 = vld [vmem:[%s5876_s1 + $0x64] sm:$0xf]  ;;  %v3538_v44 = vor.u32 %v3956_v32, %v3535_v33  ;;  %v3950_v62 = vld [vmem:[%s5876_s1 + $0x14] sm:$0xf0] }
 0x3b9   :  { %v3502_v5 = vor.u32 %v3950_v62, %v3501_v61  ;;  %v3721_v61 = vld [vmem:[%s5876_s1 + $0xc0] sm:$0xf]  ;;  %v4005_v62 = vld [vmem:[%s5876_s1 + $0xcc] sm:$0xf0] }
 0x3ba   :  { %1678 = vst [vmem:[#allocation2 + $0x8] sm:$0x3] %v1676_v13  ;;  %v1679_v14 = vpack.c.bf16 %v1676_v13, %v1676_v13  ;;  %v3543_v13 = vld [vmem:[%s5876_s1 + $0x70] sm:$0xf0]  ;;  %2245 = vmatpush.bf16.msra.mxu3 %v3570_v11  ;;  %2235 = vmatpush.bf16.msra.mxu2 %v3518_v54  ;;  %v4010_v54 = vld [vmem:[%s5876_s1 + $0xf4] sm:$0xf0] }
 0x3bb   :  { %v3546_v19 = vor.u32 %v3959_v12, %v3543_v13 }
 0x3bc   :  { %1880 = vmatmul.bf16.vlgmr.msrb.gmra.mxu0 %v1679_v14  ;;  %1893 = vmatmul.bf16.vlgmr.msrb.gmra.mxu1 %v1679_v14 }
 0x3bd   :  { %1906 = vmatmul.bf16.vlgmr.msrb.gmra.mxu2 %v1679_v14  ;;  %1919 = vmatmul.bf16.vlgmr.msrb.gmra.mxu3 %v1679_v14 }
 0x3be   :  { %2206 = vmatpush.bf16.msra.mxu0 %v3558_v57  ;;  %2220 = vmatpush.bf16.msra.mxu1 %v3546_v19  ;;  %v3947_v57 = vld [vmem:[%s5876_s1 + $0x4] sm:$0xf] }
 0x3bf   :  { %2246 = vmatpush.bf16.msra.mxu3 %v3554_v25  ;;  %v3498_v4 = vor.u32 %v3947_v57, %v3495_v60  ;;  %2236 = vmatpush.bf16.msra.mxu2 %v3502_v5  ;;  %v4008_v57 = vld [vmem:[%s5876_s1 + $0xec] sm:$0xf] }
 0x3c2   :  { %2207 = vmatpush.bf16.msra.mxu0 %v3542_v35 }
 0x3c3   :  { %2247 = vmatpush.bf16.msra.mxu3 %v3538_v44 }
 0x3c7   :  { %2248 = vmatpush.bf16.msra.mxu3 %v3522_v59  ;;  %v3747_v59 = vld [vmem:[%s5876_s1 + $0xf8] sm:$0xf0] }
 0x3c8   :  { %v3750_v60 = vor.u32 %v4008_v57, %v3747_v59  ;;  %v3989_v57 = vld [vmem:[%s5876_s1 + $0x4c] sm:$0xf0] }
 0x439   :  { %v1881_v34 = vpop.f32.mrf.mxu0  ;;  %v1894_v36 = vpop.f32.mrf.mxu1 }
 0x43a   :  { %v1930_v40 = vrot.slane %v1894_v36, 6  ;;  %v3530_v36 = vor.u32 %v3955_v26, %v3527_v27 }
 0x43c   :  { %v1933_v14 = vsel %vm276_vm0, %v1881_v34, %v1930_v40  ;;  %v3526_v34 = vor.u32 %v3957_v23, %v3525_v22  ;;  %2221 = vmatpush.bf16.msra.mxu1 %v3530_v36 }
 0x43e   :  { %2208 = vmatpush.bf16.msra.mxu0 %v3526_v34 }
 0x440   :  { %v1907_v63 = vpop.f32.mrf.mxu2  ;;  %v1920_v1 = vpop.f32.mrf.mxu3  ;;  %2222 = vmatpush.bf16.msra.mxu1 %v3514_v53  ;;  %v3745_v53 = vld [vmem:[%s5876_s1 + $0xe8] sm:$0xf] }
 0x441   :  { %v1931_v8 = vrot.slane %v1907_v63, 4  ;;  %v1932_v9 = vrot.slane %v1920_v1, 2  ;;  %v1883_v29 = vpop.f32.mrf.mxu0  ;;  %v1896_v10 = vpop.f32.mrf.mxu1  ;;  %v3948_v63 = vld [vmem:[%s5876_s1 + $0xc] sm:$0xf]  ;;  %v3503_v1 = vld [vmem:[%s5876_s1 + $0x18] sm:$0xf0] }
 0x442   :  { %2209 = vmatpush.bf16.msra.mxu0 %v3510_v51 }
 0x443   :  { %v1934_v18 = vsel %vm278_vm1, %v1931_v8, %v1932_v9  ;;  %v3506_v8 = vor.u32 %v3948_v63, %v3503_v1  ;;  %v4003_v63 = vld [vmem:[%s5876_s1 + $0xc4] sm:$0xf]  ;;  %v3722_v1 = vor.u32 %v4005_v62, %v3721_v61  ;;  %v3659_v62 = vld [vmem:[%s5876_s1 + $0x50] sm:$0xf0] }
 0x444   :  { %v1935_v24 = vsel %vm280_vm2, %v1933_v14, %v1934_v18  ;;  %2223 = vmatpush.bf16.msra.mxu1 %v3498_v4  ;;  %v4006_v4 = vld [vmem:[%s5876_s1 + $0xd4] sm:$0xf0]  ;;  %v3987_v61 = vld [vmem:[%s5876_s1 + $0x44] sm:$0xf] }
 0x445   :  { %v5584_v30 = vadd.f32 %v3487_v2, %v1935_v24  ;;  %v3494_v2 = vor.u32 %v3949_v56, %v3493_v55  ;;  %2249 = vmatpush.bf16.msra.mxu3 %v3506_v8  ;;  %v3742_v55 = vor.u32 %v4007_v50, %v3739_v52  ;;  %v3746_v56 = vor.u32 %v4010_v54, %v3745_v53  ;;  %v3994_v50 = vld [vmem:[%s5876_s1 + $0x74] sm:$0xf0] }
 0x447   :  { %v3488_v58 = vmul.f32 -1.442695, %v5584_v30  ;;  %v1958_v39 = vrot.slane %v5584_v30, 2  ;;  %v1982_v40 = vrot.slane %v5584_v30, 6  ;;  %2210 = vmatpush.bf16.msra.mxu0 %v3494_v2  ;;  %v1979_v35 = vrot.slane %v5584_v30, 4  ;;  %2560 = vmatpush.bf16.msrb.mxu2 %v3746_v56 }
 0x448   :  { %v1909_v43 = vpop.f32.mrf.mxu2  ;;  %v1922_v0 = vpop.f32.mrf.mxu3  ;;  %2547 = vmatpush.bf16.msrb.mxu1 %v3742_v55  ;;  %v3723_v2 = vld [vmem:[%s5876_s1 + $0xd0] sm:$0xf0]  ;;  %v3683_v55 = vld [vmem:[%s5876_s1 + $0x78] sm:$0xf0]  ;;  %v3657_v56 = vld [vmem:[%s5876_s1 + $0x40] sm:$0xf] }
 0x449   :  { %4094 = vpow2.f32 %v3488_v58  ;;  %v3489_v48 = vmul.f32 -1.442695, %v1958_v39  ;;  %v3490_v49 = vmul.f32 -1.442695, %v1982_v40  ;;  %2573 = vmatpush.bf16.msrb.mxu3 %v3750_v60  ;;  %v3726_v8 = vor.u32 %v4003_v63, %v3723_v2  ;;  %v3665_v63 = vld [vmem:[%s5876_s1 + $0x48] sm:$0xf] }
 0x44a   :  { %v3990_v2 = vld [vmem:[%s5876_s1 + $0x54] sm:$0xf0] }
 0x44b   :  { %4096 = vpow2.f32 %v3489_v48 }
 0x44c   :  { %4098 = vpow2.f32 %v3490_v49  ;;  %v4009_v49 = vld [vmem:[%s5876_s1 + $0xec] sm:$0xf0]  ;;  %2548 = vmatpush.bf16.msrb.mxu1 %v3726_v8  ;;  %v3641_v8 = vld [vmem:[%s5876_s1 + $0x20] sm:$0xf] }
 0x44f   :  { %v4095_v3 = vpop.eup %4094 }
 0x450   :  { %v1941_v7 = vadd.f32 1.0, %v4095_v3  ;;  %v3729_v3 = vld [vmem:[%s5876_s1 + $0xc8] sm:$0xf] }
 0x451   :  { %v4097_v9 = vpop.eup %4096 }
 0x452   :  { %v4099_v29 = vpop.eup %4098  ;;  %4100 = vrcp.f32 %v1941_v7  ;;  %v1963_v10 = vadd.f32 1.0, %v4097_v9  ;;  %v1953_v18 = vand.u32 2147483648, %v1941_v7  ;;  %v1951_v22 = vand.u32 2147483647, %v1941_v7 }
 0x453   :  { %v1987_v11 = vadd.f32 1.0, %v4099_v29  ;;  %vm1947_vm12 = vweird.f32 %v1941_v7  ;;  %v3730_v9 = vor.u32 %v4006_v4, %v3729_v3  ;;  %v4004_v29 = vld [vmem:[%s5876_s1 + $0xcc] sm:$0xf]  ;;  %v3667_v4 = vld [vmem:[%s5876_s1 + $0x58] sm:$0xf0] }
 0x454   :  { %4102 = vrcp.f32 %v1963_v10  ;;  %v1975_v23 = vand.u32 2147483648, %v1963_v10  ;;  %v1973_v26 = vand.u32 2147483647, %v1963_v10  ;;  %v1954_v27 = vor.u32 1.1754944e-38, %v1953_v18  ;;  %v4002_v18 = vld [vmem:[%s5876_s1 + $0xb4] sm:$0xf0] }
 0x455   :  { %4104 = vrcp.f32 %v1987_v11  ;;  %vm1952_vm15 = vcmp.eq.f32.partialorder %v1951_v22, 8.507059e+37  ;;  %vm1969_vm3 = vweird.f32 %v1963_v10  ;;  %v1999_v42 = vand.u32 2147483648, %v1987_v11  ;;  %2561 = vmatpush.bf16.msrb.mxu2 %v3730_v9  ;;  %v3715_v22 = vld [vmem:[%s5876_s1 + $0xb8] sm:$0xf0]  ;;  %v3988_v3 = vld [vmem:[%s5876_s1 + $0x4c] sm:$0xf] }
 0x456   :  { %4106 = vtanh.f32 %v1979_v35  ;;  %v1976_v33 = vor.u32 1.1754944e-38, %v1975_v23  ;;  %vm1974_vm5 = vcmp.eq.f32.partialorder %v1973_v26, 8.507059e+37  ;;  %vm1993_vm7 = vweird.f32 %v1987_v11  ;;  %v3999_v35 = vld [vmem:[%s5876_s1 + $0xa4] sm:$0xf]  ;;  %v3689_v23 = vld [vmem:[%s5876_s1 + $0x80] sm:$0xf] }
 0x457   :  { %v1997_v43 = vand.u32 2147483647, %v1987_v11  ;;  %v2000_v44 = vor.u32 1.1754944e-38, %v1999_v42  ;;  %v3995_v26 = vld [vmem:[%s5876_s1 + $0x84] sm:$0xf] }
 0x458   :  { %v4101_v12 = vpop.eup %4100  ;;  %v3985_v9 = vld [vmem:[%s5876_s1 + $0x2c] sm:$0xf0] }
 0x459   :  { %v1943_v13 = vmul.f32 %v4101_v12, %v1941_v7  ;;  %vm1948_vm11 = vweird.f32 %v4101_v12  ;;  %vm1998_vm9 = vcmp.eq.f32.partialorder %v1997_v43, 8.507059e+37 }
 0x45a   :  { %v4103_v14 = vpop.eup %4102  ;;  %vm1949_vm14 = vmor %vm1947_vm12, %vm1948_vm11 }
 0x45b   :  { %v4105_v15 = vpop.eup %4104  ;;  %v1944_v16 = vsub.f32 1.0, %v1943_v13  ;;  %v1965_v17 = vmul.f32 %v4103_v14, %v1963_v10  ;;  %vm1970_vm13 = vweird.f32 %v4103_v14  ;;  %v3731_v10 = vld [vmem:[%s5876_s1 + $0xd8] sm:$0xf0]  ;;  %v3705_v13 = vld [vmem:[%s5876_s1 + $0xa0] sm:$0xf] }
 0x45c   :  { %v1989_v19 = vmul.f32 %v4105_v15, %v1987_v11  ;;  %vm1971_vm4 = vmor %vm1969_vm3, %vm1970_vm13  ;;  %v4107_v36 = vpop.eup %4106  ;;  %vm1994_vm6 = vweird.f32 %v4105_v15 }
 0x45d   :  { %v1966_v20 = vsub.f32 1.0, %v1965_v17  ;;  %v1945_v21 = vmul.f32 %v4101_v12, %v1944_v16  ;;  %vm1995_vm8 = vmor %vm1993_vm7, %vm1994_vm6  ;;  %v3707_v16 = vld [vmem:[%s5876_s1 + $0xb0] sm:$0xf0]  ;;  %v3713_v17 = vld [vmem:[%s5876_s1 + $0xa8] sm:$0xf] }
 0x45e   :  { %v1990_v28 = vsub.f32 1.0, %v1989_v19  ;;  %v3710_v19 = vor.u32 %v3999_v35, %v3707_v16  ;;  %v3643_v16 = vld [vmem:[%s5876_s1 + $0x30] sm:$0xf0] }
 0x45f   :  { %v1946_v24 = vadd.f32 %v4101_v12, %v1945_v21  ;;  %v1967_v25 = vmul.f32 %v4103_v14, %v1966_v20  ;;  %v3714_v20 = vor.u32 %v4002_v18, %v3713_v17  ;;  %v4000_v21 = vld [vmem:[%s5876_s1 + $0xac] sm:$0xf]  ;;  %v3649_v17 = vld [vmem:[%s5876_s1 + $0x28] sm:$0xf]  ;;  %v3986_v18 = vld [vmem:[%s5876_s1 + $0x34] sm:$0xf0] }
 0x460   :  { %v1991_v38 = vmul.f32 %v4105_v15, %v1990_v28  ;;  %2549 = vmatpush.bf16.msrb.mxu1 %v3710_v19 }
 0x461   :  { %v1950_v30 = vsel %vm1949_vm14, %v4101_v12, %v1946_v24  ;;  %v1968_v31 = vadd.f32 %v4103_v14, %v1967_v25  ;;  %v3734_v12 = vor.u32 %v4004_v29, %v3731_v10  ;;  %v3718_v24 = vor.u32 %v4000_v21, %v3715_v22  ;;  %v3997_v25 = vld [vmem:[%s5876_s1 + $0x8c] sm:$0xf0]  ;;  %2562 = vmatpush.bf16.msrb.mxu2 %v3714_v20  ;;  %v3984_v21 = vld [vmem:[%s5876_s1 + $0x2c] sm:$0xf] }
 0x462   :  { %v1955_v32 = vsel %vm1952_vm15, %v1954_v27, %v1950_v30  ;;  %v1992_v41 = vadd.f32 %v4105_v15, %v1991_v38  ;;  %v3691_v27 = vld [vmem:[%s5876_s1 + $0x90] sm:$0xf0]  ;;  %v3690_v28 = vor.u32 %v3997_v25, %v3689_v23  ;;  %v3642_v22 = vor.u32 %v3985_v9, %v3641_v8  ;;  %v3651_v23 = vld [vmem:[%s5876_s1 + $0x38] sm:$0xf0] }
 0x463   :  { %v1972_v34 = vsel %vm1971_vm4, %v4103_v14, %v1968_v31  ;;  %v2004_v39 = vmul.f32 %v4107_v36, %v1955_v32  ;;  %v4001_v14 = vld [vmem:[%s5876_s1 + $0xac] sm:$0xf0]  ;;  %2574 = vmatpush.bf16.msrb.mxu3 %v3734_v12  ;;  %v3694_v30 = vor.u32 %v3995_v26, %v3691_v27  ;;  %v3697_v31 = vld [vmem:[%s5876_s1 + $0x88] sm:$0xf]  ;;  %v3998_v32 = vld [vmem:[%s5876_s1 + $0x94] sm:$0xf0]  ;;  %v3666_v12 = vor.u32 %v3990_v2, %v3665_v63 }
 0x464   :  { %v1977_v37 = vsel %vm1974_vm5, %v1976_v33, %v1972_v34  ;;  %v1996_v0 = vsel %vm1995_vm8, %v4105_v15, %v1992_v41  ;;  %v3706_v15 = vor.u32 %v4001_v14, %v3705_v13  ;;  %v3996_v33 = vld [vmem:[%s5876_s1 + $0x8c] sm:$0xf]  ;;  %v3698_v38 = vor.u32 %v3998_v32, %v3697_v31  ;;  %v3993_v41 = vld [vmem:[%s5876_s1 + $0x6c] sm:$0xf0]  ;;  %v3983_v13 = vld [vmem:[%s5876_s1 + $0x24] sm:$0xf] }
 0x465   :  { %v2003_v58 = vmul.f32 %v1977_v37, %v5440_v6  ;;  %v2001_v46 = vsel %vm1998_vm9, %v2000_v44, %v1996_v0  ;;  %v3737_v6 = vld [vmem:[%s5876_s1 + $0xe0] sm:$0xf]  ;;  %v3619_v37 = vld [vmem:[%s5875_s0 + $0x30] sm:$0xff]  ;;  %2550 = vmatpush.bf16.msrb.mxu1 %v3694_v30  ;;  %v3650_v25 = vor.u32 %v3986_v18, %v3649_v17  ;;  %v3654_v30 = vor.u32 %v3984_v21, %v3651_v23  ;;  %v3633_v32 = vld [vmem:[%s5876_s1 + $0x8] sm:$0xf] }
 0x466   :  { %v3738_v51 = vor.u32 %v4009_v49, %v3737_v6  ;;  %v3681_v49 = vld [vmem:[%s5876_s1 + $0x68] sm:$0xf]  ;;  %2563 = vmatpush.bf16.msrb.mxu2 %v3698_v38  ;;  %v3625_v26 = vld [vmem:[%s5876_s1] sm:$0xf]  ;;  %v3981_v27 = vld [vmem:[%s5876_s1 + $0xc] sm:$0xf0] }
 0x467   :  { %v5648_v40 = vadd.f32 %v2004_v39, %v2003_v58  ;;  %2575 = vmatpush.bf16.msrb.mxu3 %v3718_v24  ;;  %v3699_v58 = vld [vmem:[%s5876_s1 + $0x98] sm:$0xf0]  ;;  %v3673_v39 = vld [vmem:[%s5876_s1 + $0x60] sm:$0xf]  ;;  %v3682_v54 = vor.u32 %v3994_v50, %v3681_v49  ;;  %v3646_v24 = vor.u32 %v3983_v13, %v3643_v16  ;;  %v3627_v31 = vld [vmem:[%s5876_s1 + $0x10] sm:$0xf0] }
 0x468   :  { %2534 = vmatpush.bf16.msrb.mxu0 %v3738_v51  ;;  %v3674_v6 = vor.u32 %v3993_v41, %v3673_v39  ;;  %v3992_v51 = vld [vmem:[%s5876_s1 + $0x6c] sm:$0xf] }
 0x469   :  { %4108 = vtanh.f32 %v5648_v40  ;;  %v3686_v60 = vor.u32 %v3992_v51, %v3683_v55 }
 0x46a   :  { %2564 = vmatpush.bf16.msrb.mxu2 %v3682_v54 }
 0x46c   :  { %2535 = vmatpush.bf16.msrb.mxu0 %v3722_v1 }
 0x46e   :  { %2565 = vmatpush.bf16.msrb.mxu2 %v3666_v12 }
 0x46f   :  { %v4109_v45 = vpop.eup %4108 }
 0x470   :  { %v2007_v47 = vmul.f32 %v4109_v45, %v2001_v46  ;;  %2536 = vmatpush.bf16.msrb.mxu0 %v3706_v15  ;;  %v3702_v45 = vor.u32 %v3996_v33, %v3699_v58  ;;  %v3991_v46 = vld [vmem:[%s5876_s1 + $0x64] sm:$0xf]  ;;  %v3670_v15 = vor.u32 %v3988_v3, %v3667_v4  ;;  %v3982_v33 = vld [vmem:[%s5876_s1 + $0x14] sm:$0xf0] }
 0x471   :  { %v3634_v39 = vor.u32 %v3982_v33, %v3633_v32 }
 0x472   :  { %2009 = vst [vmem:[#allocation2 + $0xa] sm:$0x3] %v2007_v47  ;;  %v2010_v48 = vpack.c.bf16 %v2007_v47, %v2007_v47  ;;  %v3675_v47 = vld [vmem:[%s5876_s1 + $0x70] sm:$0xf0]  ;;  %2576 = vmatpush.bf16.msrb.mxu3 %v3702_v45  ;;  %2566 = vmatpush.bf16.msrb.mxu2 %v3650_v25 }
 0x473   :  { %v3678_v53 = vor.u32 %v3991_v46, %v3675_v47 }
 0x474   :  { %2211 = vmatmul.bf16.vlgmr.msra.gmra.mxu0 %v2010_v48  ;;  %2224 = vmatmul.bf16.vlgmr.msra.gmra.mxu1 %v2010_v48 }
 0x475   :  { %2237 = vmatmul.bf16.vlgmr.msra.gmra.mxu2 %v2010_v48  ;;  %2250 = vmatmul.bf16.vlgmr.msra.gmra.mxu3 %v2010_v48 }
 0x476   :  { %2537 = vmatpush.bf16.msrb.mxu0 %v3690_v28  ;;  %2551 = vmatpush.bf16.msrb.mxu1 %v3678_v53  ;;  %v3979_v28 = vld [vmem:[%s5876_s1 + $0x4] sm:$0xf] }
 0x477   :  { %2577 = vmatpush.bf16.msrb.mxu3 %v3686_v60  ;;  %v3630_v58 = vor.u32 %v3979_v28, %v3627_v31  ;;  %2567 = vmatpush.bf16.msrb.mxu2 %v3634_v39  ;;  %v3751_v28 = vld [vmem:[%s5875_s0 + $0x38] sm:$0xff] }
 0x47a   :  { %2538 = vmatpush.bf16.msrb.mxu0 %v3674_v6 }
 0x47b   :  { %2578 = vmatpush.bf16.msrb.mxu3 %v3670_v15 }
 0x47f   :  { %2579 = vmatpush.bf16.msrb.mxu3 %v3654_v30 }
 0x4f1   :  { %v2212_v5 = vpop.f32.mrf.mxu0  ;;  %v2225_v7 = vpop.f32.mrf.mxu1 }
 0x4f2   :  { %v2261_v11 = vrot.slane %v2225_v7, 6  ;;  %v3662_v7 = vor.u32 %v3987_v61, %v3659_v62 }
 0x4f4   :  { %v2264_v48 = vsel %vm276_vm0, %v2212_v5, %v2261_v11  ;;  %v3658_v5 = vor.u32 %v3989_v57, %v3657_v56  ;;  %2552 = vmatpush.bf16.msrb.mxu1 %v3662_v7 }
 0x4f6   :  { %2539 = vmatpush.bf16.msrb.mxu0 %v3658_v5 }
 0x4f8   :  { %v2238_v34 = vpop.f32.mrf.mxu2  ;;  %v2251_v36 = vpop.f32.mrf.mxu3  ;;  %2553 = vmatpush.bf16.msrb.mxu1 %v3646_v24 }
 0x4f9   :  { %v2262_v42 = vrot.slane %v2238_v34, 4  ;;  %v2263_v43 = vrot.slane %v2251_v36, 2  ;;  %v2214_v0 = vpop.f32.mrf.mxu0  ;;  %v2227_v44 = vpop.f32.mrf.mxu1  ;;  %v3980_v34 = vld [vmem:[%s5876_s1 + $0xc] sm:$0xf]  ;;  %v3635_v36 = vld [vmem:[%s5876_s1 + $0x18] sm:$0xf0] }
 0x4fa   :  { %2540 = vmatpush.bf16.msrb.mxu0 %v3642_v22 }
 0x4fb   :  { %v2265_v52 = vsel %vm278_vm1, %v2262_v42, %v2263_v43  ;;  %v3638_v42 = vor.u32 %v3980_v34, %v3635_v36 }
 0x4fc   :  { %v2266_v59 = vsel %vm280_vm2, %v2264_v48, %v2265_v52  ;;  %2554 = vmatpush.bf16.msrb.mxu1 %v3630_v58 }
 0x4fd   :  { %v5792_v1 = vadd.f32 %v3619_v37, %v2266_v59  ;;  %v3626_v37 = vor.u32 %v3981_v27, %v3625_v26  ;;  %2580 = vmatpush.bf16.msrb.mxu3 %v3638_v42 }
 0x4ff   :  { %v3620_v29 = vmul.f32 -1.442695, %v5792_v1  ;;  %v2289_v10 = vrot.slane %v5792_v1, 2  ;;  %v2313_v11 = vrot.slane %v5792_v1, 6  ;;  %2541 = vmatpush.bf16.msrb.mxu0 %v3626_v37  ;;  %v2310_v6 = vrot.slane %v5792_v1, 4 }
 0x500   :  { %v2240_v14 = vpop.f32.mrf.mxu2  ;;  %v2253_v35 = vpop.f32.mrf.mxu3 }
 0x501   :  { %4110 = vpow2.f32 %v3620_v29  ;;  %v3621_v19 = vmul.f32 -1.442695, %v2289_v10  ;;  %v3622_v20 = vmul.f32 -1.442695, %v2313_v11 }
 0x503   :  { %4112 = vpow2.f32 %v3621_v19 }
 0x504   :  { %4114 = vpow2.f32 %v3622_v20 }
 0x507   :  { %v4111_v38 = vpop.eup %4110 }
 0x508   :  { %v2272_v41 = vadd.f32 1.0, %v4111_v38 }
 0x509   :  { %v4113_v43 = vpop.eup %4112 }
 0x50a   :  { %v4115_v0 = vpop.eup %4114  ;;  %4116 = vrcp.f32 %v2272_v41  ;;  %v2294_v44 = vadd.f32 1.0, %v4113_v43  ;;  %v2284_v52 = vand.u32 2147483648, %v2272_v41  ;;  %v2282_v56 = vand.u32 2147483647, %v2272_v41 }
 0x50b   :  { %v2318_v45 = vadd.f32 1.0, %v4115_v0  ;;  %vm2278_vm11 = vweird.f32 %v2272_v41 }
 0x50c   :  { %4118 = vrcp.f32 %v2294_v44  ;;  %v2306_v57 = vand.u32 2147483648, %v2294_v44  ;;  %v2304_v61 = vand.u32 2147483647, %v2294_v44  ;;  %v2285_v62 = vor.u32 1.1754944e-38, %v2284_v52 }
 0x50d   :  { %4120 = vrcp.f32 %v2318_v45  ;;  %vm2283_vm14 = vcmp.eq.f32.partialorder %v2282_v56, 8.507059e+37  ;;  %vm2300_vm15 = vweird.f32 %v2294_v44  ;;  %v2330_v13 = vand.u32 2147483648, %v2318_v45 }
 0x50e   :  { %4122 = vtanh.f32 %v2310_v6  ;;  %v2307_v4 = vor.u32 1.1754944e-38, %v2306_v57  ;;  %vm2305_vm4 = vcmp.eq.f32.partialorder %v2304_v61, 8.507059e+37  ;;  %vm2324_vm6 = vweird.f32 %v2318_v45 }
 0x50f   :  { %v2328_v14 = vand.u32 2147483647, %v2318_v45  ;;  %v2331_v15 = vor.u32 1.1754944e-38, %v2330_v13 }
 0x510   :  { %v4117_v46 = vpop.eup %4116 }
 0x511   :  { %v2274_v47 = vmul.f32 %v4117_v46, %v2272_v41  ;;  %vm2279_vm10 = vweird.f32 %v4117_v46  ;;  %vm2329_vm8 = vcmp.eq.f32.partialorder %v2328_v14, 8.507059e+37 }
 0x512   :  { %v4119_v48 = vpop.eup %4118  ;;  %vm2280_vm13 = vmor %vm2278_vm11, %vm2279_vm10 }
 0x513   :  { %v4121_v49 = vpop.eup %4120  ;;  %v2275_v50 = vsub.f32 1.0, %v2274_v47  ;;  %v2296_v51 = vmul.f32 %v4119_v48, %v2294_v44  ;;  %vm2301_vm12 = vweird.f32 %v4119_v48 }
 0x514   :  { %v2320_v53 = vmul.f32 %v4121_v49, %v2318_v45  ;;  %vm2302_vm3 = vmor %vm2300_vm15, %vm2301_vm12  ;;  %v4123_v7 = vpop.eup %4122  ;;  %vm2325_vm5 = vweird.f32 %v4121_v49 }
 0x515   :  { %v2297_v54 = vsub.f32 1.0, %v2296_v51  ;;  %v2276_v55 = vmul.f32 %v4117_v46, %v2275_v50  ;;  %vm2326_vm7 = vmor %vm2324_vm6, %vm2325_vm5 }
 0x516   :  { %v2321_v63 = vsub.f32 1.0, %v2320_v53 }
 0x517   :  { %v2277_v59 = vadd.f32 %v4117_v46, %v2276_v55  ;;  %v2298_v60 = vmul.f32 %v4119_v48, %v2297_v54 }
 0x518   :  { %v2322_v9 = vmul.f32 %v4121_v49, %v2321_v63 }
 0x519   :  { %v2281_v1 = vsel %vm2280_vm13, %v4117_v46, %v2277_v59  ;;  %v2299_v2 = vadd.f32 %v4119_v48, %v2298_v60 }
 0x51a   :  { %v2286_v3 = vsel %vm2283_vm14, %v2285_v62, %v2281_v1  ;;  %v2323_v12 = vadd.f32 %v4121_v49, %v2322_v9 }
 0x51b   :  { %v2303_v5 = vsel %vm2302_vm3, %v4119_v48, %v2299_v2  ;;  %v2335_v10 = vmul.f32 %v4123_v7, %v2286_v3 }
 0x51c   :  { %v2308_v8 = vsel %vm2305_vm4, %v2307_v4, %v2303_v5  ;;  %v2327_v35 = vsel %vm2326_vm7, %v4121_v49, %v2323_v12 }
 0x51d   :  { %v2334_v29 = vmul.f32 %v2308_v8, %v5648_v40  ;;  %v2332_v17 = vsel %vm2329_vm8, %v2331_v15, %v2327_v35 }
 0x51f   :  { %v5856_v11 = vadd.f32 %v2335_v10, %v2334_v29 }
 0x521   :  { %4124 = vtanh.f32 %v5856_v11 }
 0x527   :  { %v4125_v16 = vpop.eup %4124 }
 0x528   :  { %v2338_v18 = vmul.f32 %v4125_v16, %v2332_v17 }
 0x52a   :  { %2340 = vst [vmem:[#allocation2 + $0xc] sm:$0x3] %v2338_v18  ;;  %v2341_v19 = vpack.c.bf16 %v2338_v18, %v2338_v18 }
 0x52c   :  { %2542 = vmatmul.bf16.vlgmr.msrb.gmra.mxu0 %v2341_v19  ;;  %2555 = vmatmul.bf16.vlgmr.msrb.gmra.mxu1 %v2341_v19 }
 0x52d   :  { %2568 = vmatmul.bf16.vlgmr.msrb.gmra.mxu2 %v2341_v19  ;;  %2581 = vmatmul.bf16.vlgmr.msrb.gmra.mxu3 %v2341_v19 }
 0x5a9   :  { %v2543_v40 = vpop.f32.mrf.mxu0  ;;  %v2556_v20 = vpop.f32.mrf.mxu1 }
 0x5aa   :  { %v2592_v21 = vrot.slane %v2556_v20, 6 }
 0x5ac   :  { %v2595_v30 = vsel %vm276_vm0, %v2543_v40, %v2592_v21 }
 0x5b0   :  { %v2569_v22 = vpop.f32.mrf.mxu2  ;;  %v2582_v23 = vpop.f32.mrf.mxu3 }
 0x5b1   :  { %v2593_v24 = vrot.slane %v2569_v22, 4  ;;  %v2594_v25 = vrot.slane %v2582_v23, 2  ;;  %v2545_v26 = vpop.f32.mrf.mxu0  ;;  %v2558_v27 = vpop.f32.mrf.mxu1 }
 0x5b3   :  { %v2596_v31 = vsel %vm278_vm1, %v2593_v24, %v2594_v25 }
 0x5b4   :  { %v2597_v32 = vsel %vm280_vm2, %v2595_v30, %v2596_v31 }
 0x5b5   :  { %v2599_v33 = vadd.f32 %v3751_v28, %v2597_v32 }
 0x5b7   :  { %v3752_v34 = vmul.f32 -1.442695, %v2599_v33  ;;  %v2620_v36 = vrot.slane %v2599_v33, 2  ;;  %v2644_v37 = vrot.slane %v2599_v33, 6  ;;  %v2641_v50 = vrot.slane %v2599_v33, 4 }
 0x5b8   :  { %v2571_v38 = vpop.f32.mrf.mxu2  ;;  %v2584_v58 = vpop.f32.mrf.mxu3 }
 0x5b9   :  { %4126 = vpow2.f32 %v3752_v34  ;;  %v3753_v39 = vmul.f32 -1.442695, %v2620_v36  ;;  %v3754_v41 = vmul.f32 -1.442695, %v2644_v37 }
 0x5bb   :  { %4128 = vpow2.f32 %v3753_v39 }
 0x5bc   :  { %4130 = vpow2.f32 %v3754_v41 }
 0x5bf   :  { %v4127_v42 = vpop.eup %4126 }
 0x5c0   :  { %v2603_v43 = vadd.f32 1.0, %v4127_v42 }
 0x5c1   :  { %v4129_v0 = vpop.eup %4128 }
 0x5c2   :  { %v4131_v44 = vpop.eup %4130  ;;  %4132 = vrcp.f32 %v2603_v43  ;;  %v2625_v45 = vadd.f32 1.0, %v4129_v0  ;;  %v2615_v54 = vand.u32 2147483648, %v2603_v43  ;;  %v2613_v56 = vand.u32 2147483647, %v2603_v43 }
 0x5c3   :  { %v2649_v46 = vadd.f32 1.0, %v4131_v44  ;;  %vm2609_vm1 = vweird.f32 %v2603_v43 }
 0x5c4   :  { %4134 = vrcp.f32 %v2625_v45  ;;  %v2637_v60 = vand.u32 2147483648, %v2625_v45  ;;  %v2635_v62 = vand.u32 2147483647, %v2625_v45  ;;  %v2616_v1 = vor.u32 1.1754944e-38, %v2615_v54 }
 0x5c5   :  { %4136 = vrcp.f32 %v2649_v46  ;;  %vm2614_vm10 = vcmp.eq.f32.partialorder %v2613_v56, 8.507059e+37  ;;  %vm2631_vm11 = vweird.f32 %v2625_v45  ;;  %v2661_v35 = vand.u32 2147483648, %v2649_v46 }
 0x5c6   :  { %4138 = vtanh.f32 %v2641_v50  ;;  %v2638_v5 = vor.u32 1.1754944e-38, %v2637_v60  ;;  %vm2636_vm13 = vcmp.eq.f32.partialorder %v2635_v62, 8.507059e+37  ;;  %vm2655_vm15 = vweird.f32 %v2649_v46 }
 0x5c7   :  { %v2659_v15 = vand.u32 2147483647, %v2649_v46  ;;  %v2662_v17 = vor.u32 1.1754944e-38, %v2661_v35 }
 0x5c8   :  { %v4133_v47 = vpop.eup %4132 }
 0x5c9   :  { %v2605_v48 = vmul.f32 %v4133_v47, %v2603_v43  ;;  %vm2610_vm0 = vweird.f32 %v4133_v47  ;;  %vm2660_vm4 = vcmp.eq.f32.partialorder %v2659_v15, 8.507059e+37 }
 0x5ca   :  { %v4135_v6 = vpop.eup %4134  ;;  %vm2611_vm2 = vmor %vm2609_vm1, %vm2610_vm0 }
 0x5cb   :  { %v2606_v49 = vsub.f32 1.0, %v2605_v48  ;;  %v4137_v51 = vpop.eup %4136  ;;  %v2627_v52 = vmul.f32 %v4135_v6, %v2625_v45  ;;  %vm2632_vm9 = vweird.f32 %v4135_v6 }
 0x5cc   :  { %v2651_v55 = vmul.f32 %v4137_v51, %v2649_v46  ;;  %vm2633_vm12 = vmor %vm2631_vm11, %vm2632_vm9  ;;  %v4139_v8 = vpop.eup %4138  ;;  %vm2656_vm14 = vweird.f32 %v4137_v51 }
 0x5cd   :  { %v2607_v53 = vmul.f32 %v4133_v47, %v2606_v49  ;;  %v2628_v57 = vsub.f32 1.0, %v2627_v52  ;;  %vm2657_vm3 = vmor %vm2655_vm15, %vm2656_vm14 }
 0x5ce   :  { %v2652_v2 = vsub.f32 1.0, %v2651_v55 }
 0x5cf   :  { %v2608_v59 = vadd.f32 %v4133_v47, %v2607_v53  ;;  %v2629_v61 = vmul.f32 %v4135_v6, %v2628_v57 }
 0x5d0   :  { %v2653_v29 = vmul.f32 %v4137_v51, %v2652_v2 }
 0x5d1   :  { %v2612_v63 = vsel %vm2611_vm2, %v4133_v47, %v2608_v59  ;;  %v2630_v3 = vadd.f32 %v4135_v6, %v2629_v61 }
 0x5d2   :  { %v2617_v4 = vsel %vm2614_vm10, %v2616_v1, %v2612_v63  ;;  %v2654_v14 = vadd.f32 %v4137_v51, %v2653_v29 }
 0x5d3   :  { %v2634_v7 = vsel %vm2633_vm12, %v4135_v6, %v2630_v3  ;;  %v2666_v12 = vmul.f32 %v4139_v8, %v2617_v4 }
 0x5d4   :  { %v2639_v9 = vsel %vm2636_vm13, %v2638_v5, %v2634_v7  ;;  %v2658_v16 = vsel %vm2657_vm3, %v4137_v51, %v2654_v14 }
 0x5d5   :  { %v2665_v10 = vmul.f32 %v2639_v9, %v5856_v11  ;;  %v2663_v18 = vsel %vm2660_vm4, %v2662_v17, %v2658_v16 }
 0x5d7   :  { %v2667_v13 = vadd.f32 %v2666_v12, %v2665_v10 }
 0x5d9   :  { %4140 = vtanh.f32 %v2667_v13  ;;  %2673 = vst [vmem:[%s5881_s6] sm:$0x3] %v2667_v13 }
 0x5df   :  { %v4141_v11 = vpop.eup %4140 }
 0x5e0   :  { %v2669_v19 = vmul.f32 %v4141_v11, %v2663_v18 }
 0x5e2   :  { %2671 = vst [vmem:[#allocation2 + $0xe] sm:$0x3] %v2669_v19 }
 0x5e3   :  { %2672 = vst [vmem:[%s5880_s5] sm:$0x3] %v2669_v19 }
 0x5e4   :  { %2686 = dma.vmem_to_hbm [thread:$0]  %s2679_s15, 256, %s2681_s18, [#allocation3], %s4169_s20, %s4169_s20, %s4170_s21  }
 0x5e5   :  { %4166 = dma.done.wait [#allocation3], 256  }
 0x5e6   :  { %4167 = vsyncadd [#allocation3], 4294967040 }
 0x5e7   :  { %2699 = vsyncpa [#allocation3], 1 }

// kernel: seq2seq_forward.9
= control target key start
LH: loop header
LB: loop body
LE: loop exit
PB: predicated region body
PF: predicated region fallthrough
CT: control target
= control target key end

     0   :  { %v155_v3 = vmov 0   ;;  %v87_v22 = vlaneseq  ;;  %vm62_vm0 = vcmask 326656   ;;  %vm120_vm4 = vcmask 7168   ;;  %s256_s1 = inlined_call_operand.vmem [shape: f32[128,40], index: 1, kind: input, shape index: {}]   ;;  %s257_s3 = inlined_call_operand.vmem [shape: s32[16,1], index: 3, kind: input, shape index: {}]   ;;  %s258_s2 = inlined_call_operand.vmem [shape: f32[1,40], index: 2, kind: input, shape index: {}]   ;;  %s259_s0 = inlined_call_operand.vmem [shape: f32[16,128], index: 0, kind: input, shape index: {}]   ;;  %s260_s4 = inlined_call_operand.vmem [shape: f32[16,1], index: 4, kind: output, shape index: {}]  }
   0x1   :  { %v34_v0 = vld [vmem:[%s256_s1 + $0x78] sm:$0xff]  ;;  %v33_v1 = vld [vmem:[%s256_s1 + $0x70] sm:$0xff]  ;;  %v32_v2 = vld [vmem:[%s256_s1 + $0x68] sm:$0xff]  ;;  %144 = vset.pattern.permute.xlu1 %v155_v3  ;;  %145 = vset.pattern.permute.xlu0 %v155_v3 }
   0x2   :  { %127 = vmatpush.msra.mxu1 %v34_v0  ;;  %39 = vmatpush.msra.mxu0 %v34_v0  ;;  %v31_v4 = vld [vmem:[%s256_s1 + $0x60] sm:$0xff]  ;;  %v30_v5 = vld [vmem:[%s256_s1 + $0x58] sm:$0xff]  ;;  %v90_v6 = vld [vmem:[%s257_s3 + $0x8] sm:$0xff]  ;;  %v88_v25 = vand.u32 127, %v87_v22  ;;  %v108_v47 = vshrl.u32 %v87_v22, 7 }
   0x3   :  { %v29_v7 = vld [vmem:[%s256_s1 + $0x50] sm:$0xff]  ;;  %95 = vperm.xlu1 %144, %v90_v6   ;;  %v28_v8 = vld [vmem:[%s256_s1 + $0x48] sm:$0xff]  ;;  %v27_v9 = vld [vmem:[%s256_s1 + $0x40] sm:$0xff] }
   0x4   :  { %128 = vmatpush.msra.mxu1 %v33_v1  ;;  %40 = vmatpush.msra.mxu0 %v33_v1  ;;  %v89_v10 = vld [vmem:[%s257_s3] sm:$0xff]  ;;  %v26_v11 = vld [vmem:[%s256_s1 + $0x38] sm:$0xff]  ;;  %v25_v12 = vld [vmem:[%s256_s1 + $0x30] sm:$0xff]  ;;  %v109_v49 = vadd.s32 8, %v108_v47 }
   0x5   :  { %v24_v13 = vld [vmem:[%s256_s1 + $0x28] sm:$0xff]  ;;  %v23_v14 = vld [vmem:[%s256_s1 + $0x20] sm:$0xff]  ;;  %v22_v15 = vld [vmem:[%s256_s1 + $0x18] sm:$0xff] }
   0x6   :  { %129 = vmatpush.msra.mxu1 %v32_v2  ;;  %41 = vmatpush.msra.mxu0 %v32_v2  ;;  %v21_v16 = vld [vmem:[%s256_s1 + $0x10] sm:$0xff]  ;;  %v20_v17 = vld [vmem:[%s256_s1 + $0x8] sm:$0xff]  ;;  %v19_v18 = vld [vmem:[%s256_s1] sm:$0xff]  ;;  %vm115_vm3 = vcmp.lt.s32.totalorder %v109_v49, 14 }
   0x7   :  { %v18_v19 = vld [vmem:[%s259_s0 + $0x8] sm:$0xff]  ;;  %v17_v20 = vld [vmem:[%s259_s0] sm:$0xff] }
   0x8   :  { %130 = vmatpush.msra.mxu1 %v31_v4  ;;  %42 = vmatpush.msra.mxu0 %v31_v4  ;;  %v146_v23 = vld [vmem:[%s258_s2] ss:$0 sm:$0xff] }
   0xa   :  { %131 = vmatpush.msra.mxu1 %v30_v5  ;;  %43 = vmatpush.msra.mxu0 %v30_v5 }
   0xb   :  { %92 = vperm.xlu1 %144, %v89_v10  }
   0xc   :  { %132 = vmatpush.msra.mxu1 %v29_v7  ;;  %44 = vmatpush.msra.mxu0 %v29_v7 }
   0xe   :  { %133 = vmatpush.msra.mxu1 %v28_v8  ;;  %45 = vmatpush.msra.mxu0 %v28_v8 }
  0x10   :  { %134 = vmatpush.msra.mxu1 %v27_v9  ;;  %46 = vmatpush.msra.mxu0 %v27_v9 }
  0x12   :  { %135 = vmatpush.msra.mxu1 %v26_v11  ;;  %47 = vmatpush.msra.mxu0 %v26_v11 }
  0x14   :  { %136 = vmatpush.msra.mxu1 %v25_v12  ;;  %48 = vmatpush.msra.mxu0 %v25_v12 }
  0x16   :  { %137 = vmatpush.msra.mxu1 %v24_v13  ;;  %49 = vmatpush.msra.mxu0 %v24_v13 }
  0x18   :  { %138 = vmatpush.msra.mxu1 %v23_v14  ;;  %50 = vmatpush.msra.mxu0 %v23_v14 }
  0x1a   :  { %139 = vmatpush.msra.mxu1 %v22_v15  ;;  %51 = vmatpush.msra.mxu0 %v22_v15 }
  0x1c   :  { %140 = vmatpush.msra.mxu1 %v21_v16  ;;  %52 = vmatpush.msra.mxu0 %v21_v16 }
  0x1e   :  { %141 = vmatpush.msra.mxu1 %v20_v17  ;;  %53 = vmatpush.msra.mxu0 %v20_v17 }
  0x20   :  { %142 = vmatpush.msra.mxu1 %v19_v18  ;;  %54 = vmatpush.msra.mxu0 %v19_v18 }
  0x21   :  { %58 = vmatmul.f32.vlgmr.msra.gmra.mxu1 %v18_v19  ;;  %55 = vmatmul.f32.vlgmr.msra.gmra.mxu0 %v17_v20 }
  0x75   :  { %v96_v21 = vpop.permute.xlu1 %95 }
  0x76   :  { %vm98_vm2 = vcmp.eq.s32.totalorder %v88_v25, %v96_v21 }
  0x7d   :  { %v93_v24 = vpop.permute.xlu1 %92 }
  0x7e   :  { %vm97_vm1 = vcmp.eq.s32.totalorder %v88_v25, %v93_v24 }
  0x9e   :  { %v59_v26 = vpop.f32.mrf.mxu1  ;;  %v56_v27 = vpop.f32.mrf.mxu0 }
  0x9f   :  { %v60_v28 = vadd.f32 %v146_v23, %v59_v26  ;;  %v57_v29 = vadd.f32 %v146_v23, %v56_v27 }
  0xa1   :  { %v66_v30 = vsel %vm62_vm0, %v60_v28, -inf  ;;  %v99_v31 = vsel %vm97_vm1, %v57_v29, 0.0  ;;  %v63_v33 = vsel %vm62_vm0, %v57_v29, -inf  ;;  %v100_v34 = vsel %vm98_vm2, %v60_v28, 0.0 }
  0xa2   :  { %67 = vmax.xlane.f32.xlu0 %v66_v30  ;;  %v101_v32 = vsel %vm62_vm0, %v99_v31, 0.0  ;;  %v104_v35 = vsel %vm62_vm0, %v100_v34, 0.0 }
  0xa3   :  { %102 = vadd.xlane.f32.xlu1 %v101_v32 }
  0xaa   :  { %64 = vmax.xlane.f32.xlu0 %v63_v33 }
  0xb2   :  { %105 = vadd.xlane.f32.xlu0 %v104_v35 }
 0x115   :  { %v68_v36 = vpop.xlane.xlu0 %67 }
 0x116   :  { %v70_v37 = vsub.f32 %v60_v28, %v68_v36  ;;  %v103_v59 = vpop.xlane.xlu1 %102 }
 0x118   :  { %v73_v38 = vmul.f32 1.442695, %v70_v37 }
 0x11a   :  { %147 = vpow2.f32 %v73_v38 }
 0x11d   :  { %v65_v39 = vpop.xlane.xlu0 %64 }
 0x11e   :  { %v69_v40 = vsub.f32 %v57_v29, %v65_v39 }
 0x120   :  { %v148_v41 = vpop.eup %147  ;;  %v71_v42 = vmul.f32 1.442695, %v69_v40 }
 0x121   :  { %v78_v43 = vsel %vm62_vm0, %v148_v41, 0.0 }
 0x122   :  { %149 = vpow2.f32 %v71_v42  ;;  %79 = vadd.xlane.f32.xlu2 %v78_v43 }
 0x125   :  { %v106_v53 = vpop.xlane.xlu0 %105 }
 0x128   :  { %v150_v44 = vpop.eup %149 }
 0x129   :  { %v75_v45 = vsel %vm62_vm0, %v150_v44, 0.0 }
 0x12a   :  { %76 = vadd.xlane.f32.xlu2 %v75_v45 }
 0x195   :  { %v80_v46 = vpop.xlane.xlu2 %79 }
 0x196   :  { %151 = vlog2.f32 %v80_v46 }
 0x19c   :  { %v152_v48 = vpop.eup %151 }
 0x19d   :  { %v84_v50 = vmul.f32 0.6931472, %v152_v48  ;;  %v77_v51 = vpop.xlane.xlu2 %76 }
 0x19e   :  { %153 = vlog2.f32 %v77_v51 }
 0x19f   :  { %v86_v52 = vadd.f32 %v84_v50, %v68_v36 }
 0x1a1   :  { %v117_v54 = vsub.f32 %v86_v52, %v106_v53 }
 0x1a3   :  { %v119_v55 = vsel %vm115_vm3, %v117_v54, 0.0 }
 0x1a4   :  { %v154_v56 = vpop.eup %153  ;;  %122 = vst.msk [vmem:[%s260_s4 + $0x8] sm:$0xff] %vm120_vm4, %v119_v55 }
 0x1a5   :  { %v82_v57 = vmul.f32 0.6931472, %v154_v56 }
 0x1a7   :  { %v85_v58 = vadd.f32 %v82_v57, %v65_v39 }
 0x1a9   :  { %v116_v60 = vsub.f32 %v85_v58, %v103_v59 }
 0x1ab   :  { %121 = vst.msk [vmem:[%s260_s4] sm:$0xff] %vm120_vm4, %v116_v60 }

</bundles_post_ra>
